<compile_context>
chip_gen: v5e
topology: v5e:2x2
jax: 0.10.0
libtpu: 0.0.40
codegen_flags: <defaults>
</compile_context>

<pallas_src>
import functools

import jax
import jax.numpy as jnp
from jax.experimental import pallas as pl
from jax.experimental.pallas import tpu as pltpu


def _round_up(x, m):
    return (x + m - 1) // m * m


# ---------------------------------------------------------------------------
# Kernel 1: fused im2col-GEMM conv + folded-BN affine + optional ReLU.
# Used for conv1to3.  Batch is collapsed into the GEMM M dimension.
# ---------------------------------------------------------------------------
def _gemm_bn_act_kernel(xs_ref, w_ref, sc_ref, bi_ref, o_ref, *, relu):
    """xs_ref: (tm, Kp) bf16; w_ref: (Kp, Coutp) bf16; sc/bi: (1, Coutp) f32."""
    acc = jnp.dot(xs_ref[...], w_ref[...], preferred_element_type=jnp.float32)
    out = acc * sc_ref[...] + bi_ref[...]
    if relu:
        out = jnp.maximum(out, 0.0)
    o_ref[...] = out.astype(o_ref.dtype)


def _extract_patches(xp, kh_sz, kw_sz, stride, hout, wout):
    """im2col (XLA glue): (N, Hp, Wp, Cin) -> (N, Hout*Wout, KH*KW*Cin)."""
    n, _, _, cin = xp.shape
    pats = []
    for kh in range(kh_sz):
        for kw in range(kw_sz):
            p = jax.lax.slice(
                xp,
                (0, kh, kw, 0),
                (n,
                 kh + stride * (hout - 1) + 1,
                 kw + stride * (wout - 1) + 1,
                 cin),
                (1, stride, stride, 1),
            )
            pats.append(p.reshape(n, hout * wout, cin))
    return jnp.concatenate(pats, axis=-1)


def conv2d_bn_act(x, w, scale, bias, *, stride, relu):
    """Conv2d(padding=K//2) + folded BN + optional ReLU via one GEMM kernel.

    x: (N, H, W, Cin) -> (N, Hout, Wout, Cout) bfloat16.
    """
    n, h, wdim, cin = x.shape
    kh, kw, _, cout = w.shape
    ph, pw = kh // 2, kw // 2
    hout = (h + 2 * ph - kh) // stride + 1
    wout = (wdim + 2 * pw - kw) // stride + 1
    m = n * hout * wout                      # batch folded into GEMM M
    k = kh * kw * cin
    kp = _round_up(k, 128)                   # lane-dense contraction dim
    coutp = _round_up(cout, 128)             # lane-dense output dim

    xp = jnp.pad(x, ((0, 0), (ph, ph), (pw, pw), (0, 0)))
    xs = _extract_patches(xp, kh, kw, stride, hout, wout).reshape(m, k)
    xs = jnp.pad(xs, ((0, 0), (0, kp - k))).astype(jnp.bfloat16)

    wr = jnp.pad(w.reshape(k, cout),
                 ((0, kp - k), (0, coutp - cout))).astype(jnp.bfloat16)
    sc = jnp.pad(scale, (0, coutp - cout)).reshape(1, coutp).astype(jnp.float32)
    bi = jnp.pad(bias, (0, coutp - cout)).reshape(1, coutp).astype(jnp.float32)

    tm = 256 if m % 256 == 0 else m          # M tile (parallel axis for megacore)
    assert m % tm == 0
    grid = (m // tm,)

    out = pl.pallas_call(
        functools.partial(_gemm_bn_act_kernel, relu=relu),
        out_shape=jax.ShapeDtypeStruct((m, coutp), jnp.bfloat16),
        grid=grid,
        in_specs=[
            pl.BlockSpec((tm, kp), lambda i: (i, 0)),
            pl.BlockSpec((kp, coutp), lambda i: (0, 0)),
            pl.BlockSpec((1, coutp), lambda i: (0, 0)),
            pl.BlockSpec((1, coutp), lambda i: (0, 0)),
        ],
        out_specs=pl.BlockSpec((tm, coutp), lambda i: (i, 0)),
        compiler_params=pltpu.CompilerParams(
            dimension_semantics=("parallel",),
            vmem_limit_bytes=16 * 1024 * 1024,
        ),
    )(xs, wr, sc, bi)

    out = out.reshape(n, hout, wout, coutp)
    if coutp != cout:
        out = out[:, :, :, :cout]
    return out


# ---------------------------------------------------------------------------
# Kernel 2: fully fused conv4to14 block.
# Grid = (batch "parallel", 10 repeats "arbitrary").  The activation stays in a
# VMEM scratch carry (zero-padded, spatially flattened) across all 20 convs;
# each 3x3 conv = 9 shifted-row bf16 GEMMs accumulated in f32, then folded-BN
# affine (+ReLU for the first conv of the pair) and a border-zeroing mask.
# ---------------------------------------------------------------------------
def _block_kernel(x_ref, wa_ref, wb_ref, sa_ref, ba_ref, sb_ref, bb_ref,
                  mask_ref, o_ref, carry_ref,
                  *, rows, rows_c, base, wpad, n_rep):
    r = pl.program_id(1)

    @pl.when(r == 0)
    def _init():
        # Zero the whole padded carry, then drop this batch's padded activation
        # into rows [base, base+rows).
        carry_ref[...] = jnp.zeros_like(carry_ref)
        carry_ref[pl.ds(base, rows), :] = x_ref[0].astype(carry_ref.dtype)

    mask = mask_ref[...]                       # (rows_c, C): 1 on interior, 0 on border

    def conv3x3(w_ref, sc_ref, bi_ref, relu):
        cout = w_ref.shape[-1]
        acc = jnp.zeros((rows_c, cout), jnp.float32)
        t = 0
        for dh in range(3):
            for dw in range(3):
                delta = (dh - 1) * wpad + (dw - 1)          # static row offset
                xs = carry_ref[pl.ds(base + delta, rows_c), :].astype(jnp.bfloat16)
                acc = acc + jnp.dot(xs, w_ref[t],
                                    preferred_element_type=jnp.float32)
                t += 1
        out = acc * sc_ref[...] + bi_ref[...]
        if relu:
            out = jnp.maximum(out, 0.0)
        out = out * mask                                     # keep zero-pad border
        carry_ref[pl.ds(base, rows_c), :] = out.astype(carry_ref.dtype)

    conv3x3(wa_ref, sa_ref, ba_ref, relu=True)    # Conv+BN+ReLU (shared weights)
    conv3x3(wb_ref, sb_ref, bb_ref, relu=False)   # Conv+BN

    @pl.when(r == n_rep - 1)
    def _final():
        o_ref[0] = carry_ref[pl.ds(base, rows), :].astype(o_ref.dtype)


def conv_block_x10(x_nhwc, pa, pb, *, n_rep=10):
    n, h, w, c = x_nhwc.shape
    cout = pa["w"].shape[-1]
    assert cout == c
    hp, wp = h + 2, w + 2
    rows = hp * wp                               # padded spatial rows per batch
    rows_c = _round_up(rows, 8)                  # compute extent (sublane friendly)
    base = _round_up(wp + 1, 8)                  # >= wp+1 so tap slice starts >= 0
    buf_rows = _round_up(base + rows_c + wp + 1, 8)

    # Zero-pad spatially, flatten (hp, wp) -> rows; one slab per batch element.
    xflat = jnp.pad(x_nhwc.astype(jnp.float32),
                    ((0, 0), (1, 1), (1, 1), (0, 0))).reshape(n, rows, c)

    wa9 = pa["w"].reshape(9, c, cout).astype(jnp.bfloat16)
    wb9 = pb["w"].reshape(9, c, cout).astype(jnp.bfloat16)
    sa = pa["scale"].reshape(1, cout).astype(jnp.float32)
    ba = pa["bias"].reshape(1, cout).astype(jnp.float32)
    sb = pb["scale"].reshape(1, cout).astype(jnp.float32)
    bb = pb["bias"].reshape(1, cout).astype(jnp.float32)

    # Interior mask (1 where the row is a real output position, 0 on the border),
    # padded to rows_c compute rows.
    hh = jnp.arange(hp).reshape(hp, 1, 1)
    ww = jnp.arange(wp).reshape(1, wp, 1)
    interior = (hh >= 1) & (hh <= h) & (ww >= 1) & (ww <= w)
    mask = jnp.broadcast_to(interior, (hp, wp, cout)).astype(jnp.float32)
    mask = jnp.pad(mask.reshape(rows, cout), ((0, rows_c - rows), (0, 0)))

    kernel = functools.partial(_block_kernel, rows=rows, rows_c=rows_c,
                               base=base, wpad=wp, n_rep=n_rep)
    out = pl.pallas_call(
        kernel,
        out_shape=jax.ShapeDtypeStruct((n, rows, c), jnp.float32),
        grid=(n, n_rep),
        in_specs=[
            pl.BlockSpec((1, rows, c), lambda b, r: (b, 0, 0)),     # activation
            pl.BlockSpec((9, c, cout), lambda b, r: (0, 0, 0)),     # shared W_a
            pl.BlockSpec((9, c, cout), lambda b, r: (0, 0, 0)),     # shared W_b
            pl.BlockSpec((1, cout), lambda b, r: (0, 0)),           # scale_a
            pl.BlockSpec((1, cout), lambda b, r: (0, 0)),           # bias_a
            pl.BlockSpec((1, cout), lambda b, r: (0, 0)),           # scale_b
            pl.BlockSpec((1, cout), lambda b, r: (0, 0)),           # bias_b
            pl.BlockSpec((rows_c, cout), lambda b, r: (0, 0)),      # interior mask
        ],
        out_specs=pl.BlockSpec((1, rows, c), lambda b, r: (b, 0, 0)),
        scratch_shapes=[pltpu.VMEM((buf_rows, c), jnp.float32)],    # activation carry
        compiler_params=pltpu.CompilerParams(
            dimension_semantics=("parallel", "arbitrary"),
            vmem_limit_bytes=16 * 1024 * 1024,
        ),
    )(xflat, wa9, wb9, sa, ba, sb, bb, mask)

    return out.reshape(n, hp, wp, c)[:, 1:1 + h, 1:1 + w, :]


# ---------------------------------------------------------------------------
# Deterministic parameter initialization (Conv bias + BN folded to scale/bias)
# ---------------------------------------------------------------------------
def _init_conv_bn(key, kh, kw, cin, cout):
    k1, k2, k3, k4, k5, k6 = jax.random.split(key, 6)
    fan_in = kh * kw * cin
    w = jax.random.normal(k1, (kh, kw, cin, cout), jnp.float32) * jnp.sqrt(2.0 / fan_in)
    b = 0.05 * jax.random.normal(k2, (cout,), jnp.float32)
    gamma = 1.0 + 0.1 * jax.random.normal(k3, (cout,), jnp.float32)
    beta = 0.1 * jax.random.normal(k4, (cout,), jnp.float32)
    running_mean = 0.1 * jax.random.normal(k5, (cout,), jnp.float32)
    running_var = 1.0 + 0.1 * jax.random.uniform(k6, (cout,), jnp.float32)
    eps = 1e-5
    scale = gamma / jnp.sqrt(running_var + eps)
    bias = beta + scale * (b - running_mean)
    return {"w": w, "scale": scale, "bias": bias}


def init_branch_conv_params(key, input_nc):
    k1, k2, k3, k4, k5 = jax.random.split(key, 5)
    return {
        "c1": _init_conv_bn(k1, 7, 7, input_nc, 64),
        "c2": _init_conv_bn(k2, 3, 3, 64, 128),
        "c3": _init_conv_bn(k3, 3, 3, 128, 256),
        # shared across all 10 repeats (PyTorch module aliasing)
        "blk_a": _init_conv_bn(k4, 3, 3, 256, 256),
        "blk_b": _init_conv_bn(k5, 3, 3, 256, 256),
    }


# ---------------------------------------------------------------------------
# branch_conv forward (NCHW in / NCHW out, like the PyTorch module)
# ---------------------------------------------------------------------------
def branch_conv_forward(x_nchw, params):
    x = jnp.transpose(x_nchw, (0, 2, 3, 1)).astype(jnp.float32)   # NCHW -> NHWC

    # conv1to3
    p = params["c1"]
    x = conv2d_bn_act(x, p["w"], p["scale"], p["bias"], stride=1, relu=True)
    p = params["c2"]
    x = conv2d_bn_act(x, p["w"], p["scale"], p["bias"], stride=2, relu=True)
    p = params["c3"]
    x = conv2d_bn_act(x, p["w"], p["scale"], p["bias"], stride=2, relu=True)

    # conv4to14: [Conv, BN, ReLU, Conv, BN] x 10, shared params, one fused kernel
    x = conv_block_x10(x, params["blk_a"], params["blk_b"], n_rep=10)

    return jnp.transpose(x, (0, 3, 1, 2))                         # NHWC -> NCHW


# ---------------------------------------------------------------------------
# Pure-JAX reference (for numerical verification)
# ---------------------------------------------------------------------------
def _ref_conv_bn_act(x, w, scale, bias, *, stride, relu):
    kh, kw = w.shape[0], w.shape[1]
    out = jax.lax.conv_general_dilated(
        x, w, window_strides=(stride, stride),
        padding=((kh // 2, kh // 2), (kw // 2, kw // 2)),
        dimension_numbers=("NHWC", "HWIO", "NHWC"),
        precision=jax.lax.Precision.HIGHEST)
    out = out * scale + bias
    return jnp.maximum(out, 0.0) if relu else out


def branch_conv_reference(x_nchw, params):
    x = jnp.transpose(x_nchw, (0, 2, 3, 1)).astype(jnp.float32)
    p = params["c1"]
    x = _ref_conv_bn_act(x, p["w"], p["scale"], p["bias"], stride=1, relu=True)
    p = params["c2"]
    x = _ref_conv_bn_act(x, p["w"], p["scale"], p["bias"], stride=2, relu=True)
    p = params["c3"]
    x = _ref_conv_bn_act(x, p["w"], p["scale"], p["bias"], stride=2, relu=True)
    pa, pb = params["blk_a"], params["blk_b"]
    for _ in range(10):
        x = _ref_conv_bn_act(x, pa["w"], pa["scale"], pa["bias"], stride=1, relu=True)
        x = _ref_conv_bn_act(x, pb["w"], pb["scale"], pb["bias"], stride=1, relu=False)
    return jnp.transpose(x, (0, 3, 1, 2))


if __name__ == "__main__":
    key = jax.random.PRNGKey(0)
    kx, kp = jax.random.split(key)
    input_nc = 4
    # PyTorch-style NCHW input
    x = jax.random.normal(kx, (2, input_nc, 16, 16), jnp.float32)
    params = init_branch_conv_params(kp, input_nc)

    fwd = jax.jit(branch_conv_forward)
    y = fwd(x, params)
    jax.block_until_ready(y)

    assert y.shape == (2, 256, 4, 4), y.shape
    assert bool(jnp.all(jnp.isfinite(y)))

    y_ref = branch_conv_reference(x, params)
    rel_err = jnp.max(jnp.abs(y - y_ref)) / (jnp.max(jnp.abs(y_ref)) + 1e-6)
    assert float(rel_err) < 5e-2, float(rel_err)

    print("KERNEL_OK")
</pallas_src>

<mosaic_0001>
module attributes {stable_mosaic.version = 11 : i64} {
  func.func @_gemm_bn_act_kernel(%arg0: i32, %arg1: memref<256x256xbf16, #tpu.memory_space<vmem>>, %arg2: memref<256x128xbf16, #tpu.memory_space<vmem>>, %arg3: memref<1x128xf32, #tpu.memory_space<vmem>>, %arg4: memref<1x128xf32, #tpu.memory_space<vmem>>, %arg5: memref<256x128xbf16, #tpu.memory_space<vmem>>) attributes {dimension_semantics = [#tpu.dimension_semantics<parallel>], iteration_bounds = array<i64: 2>, scalar_prefetch = 0 : i64, scratch_operands = 0 : i64, tpu.core_type = #tpu.core_type<tc>, window_params = [{transform_indices = @transform_0, window_bounds = array<i64: 256, 256>}, {pipeline_mode = #tpu.pipeline_mode<synchronous>, transform_indices = @transform_1, window_bounds = array<i64: 256, 128>}, {pipeline_mode = #tpu.pipeline_mode<synchronous>, transform_indices = @transform_2, window_bounds = array<i64: 1, 128>}, {pipeline_mode = #tpu.pipeline_mode<synchronous>, transform_indices = @transform_3, window_bounds = array<i64: 1, 128>}, {transform_indices = @transform_4, window_bounds = array<i64: 256, 128>}]} {
    %c0 = arith.constant 0 : index
    %c0_0 = arith.constant 0 : index
    %0 = vector.load %arg1[%c0, %c0_0] : memref<256x256xbf16, #tpu.memory_space<vmem>>, vector<256x256xbf16>
    %c0_1 = arith.constant 0 : index
    %c0_2 = arith.constant 0 : index
    %1 = vector.load %arg2[%c0_1, %c0_2] : memref<256x128xbf16, #tpu.memory_space<vmem>>, vector<256x128xbf16>
    %cst = arith.constant dense<0.000000e+00> : vector<256x128xf32>
    %2 = tpu.matmul %0, %1, %cst {dimension_numbers = #tpu.dot_dimension_numbers<[1], [0], [0], [1], [0, 0, 1, 1], [], []>} : vector<256x256xbf16>, vector<256x128xbf16>, vector<256x128xf32> -> vector<256x128xf32>
    %c0_3 = arith.constant 0 : index
    %c0_4 = arith.constant 0 : index
    %3 = vector.load %arg3[%c0_3, %c0_4] : memref<1x128xf32, #tpu.memory_space<vmem>>, vector<1x128xf32>
    %4 = vector.broadcast %3 : vector<1x128xf32> to vector<256x128xf32>
    %5 = arith.mulf %2, %4 : vector<256x128xf32>
    %c0_5 = arith.constant 0 : index
    %c0_6 = arith.constant 0 : index
    %6 = vector.load %arg4[%c0_5, %c0_6] : memref<1x128xf32, #tpu.memory_space<vmem>>, vector<1x128xf32>
    %7 = vector.broadcast %6 : vector<1x128xf32> to vector<256x128xf32>
    %8 = arith.addf %5, %7 : vector<256x128xf32>
    %cst_7 = arith.constant 0.000000e+00 : f32
    %9 = vector.broadcast %cst_7 : f32 to vector<256x128xf32>
    %10 = arith.maximumf %8, %9 : vector<256x128xf32>
    %11 = arith.truncf %10 : vector<256x128xf32> to vector<256x128xbf16>
    %c0_8 = arith.constant 0 : index
    %c0_9 = arith.constant 0 : index
    %12 = vector.load %arg5[%c0_8, %c0_9] : memref<256x128xbf16, #tpu.memory_space<vmem>>, vector<256x128xbf16>
    tpu.vector_store %arg5[%c0_8, %c0_9], %11 {strides = array<i32>} : memref<256x128xbf16, #tpu.memory_space<vmem>>, vector<256x128xbf16>,
    return
  }
  func.func @transform_0(%arg0: i32) -> (i32, i32) {
    %c0_i32 = arith.constant 0 : i32
    %c0_i32_0 = arith.constant 0 : i32
    return %arg0, %c0_i32 : i32, i32
  }
  func.func @transform_1(%arg0: i32) -> (i32, i32) {
    %c0_i32 = arith.constant 0 : i32
    %c0_i32_0 = arith.constant 0 : i32
    %c0_i32_1 = arith.constant 0 : i32
    return %c0_i32, %c0_i32_0 : i32, i32
  }
  func.func @transform_2(%arg0: i32) -> (i32, i32) {
    %c0_i32 = arith.constant 0 : i32
    %c0_i32_0 = arith.constant 0 : i32
    %c0_i32_1 = arith.constant 0 : i32
    return %c0_i32, %c0_i32_0 : i32, i32
  }
  func.func @transform_3(%arg0: i32) -> (i32, i32) {
    %c0_i32 = arith.constant 0 : i32
    %c0_i32_0 = arith.constant 0 : i32
    %c0_i32_1 = arith.constant 0 : i32
    return %c0_i32, %c0_i32_0 : i32, i32
  }
  func.func @transform_4(%arg0: i32) -> (i32, i32) {
    %c0_i32 = arith.constant 0 : i32
    %c0_i32_0 = arith.constant 0 : i32
    return %arg0, %c0_i32 : i32, i32
  }
}

module attributes {stable_mosaic.version = 11 : i64} {
  func.func @_gemm_bn_act_kernel(%arg0: i32, %arg1: memref<128x640xbf16, #tpu.memory_space<vmem>>, %arg2: memref<640x128xbf16, #tpu.memory_space<vmem>>, %arg3: memref<1x128xf32, #tpu.memory_space<vmem>>, %arg4: memref<1x128xf32, #tpu.memory_space<vmem>>, %arg5: memref<128x128xbf16, #tpu.memory_space<vmem>>) attributes {dimension_semantics = [#tpu.dimension_semantics<parallel>], iteration_bounds = array<i64: 1>, scalar_prefetch = 0 : i64, scratch_operands = 0 : i64, tpu.core_type = #tpu.core_type<tc>, window_params = [{transform_indices = @transform_0, window_bounds = array<i64: 128, 640>}, {pipeline_mode = #tpu.pipeline_mode<synchronous>, transform_indices = @transform_1, window_bounds = array<i64: 640, 128>}, {pipeline_mode = #tpu.pipeline_mode<synchronous>, transform_indices = @transform_2, window_bounds = array<i64: 1, 128>}, {pipeline_mode = #tpu.pipeline_mode<synchronous>, transform_indices = @transform_3, window_bounds = array<i64: 1, 128>}, {transform_indices = @transform_4, window_bounds = array<i64: 128, 128>}]} {
    %c0 = arith.constant 0 : index
    %c0_0 = arith.constant 0 : index
    %0 = vector.load %arg1[%c0, %c0_0] : memref<128x640xbf16, #tpu.memory_space<vmem>>, vector<128x640xbf16>
    %c0_1 = arith.constant 0 : index
    %c0_2 = arith.constant 0 : index
    %1 = vector.load %arg2[%c0_1, %c0_2] : memref<640x128xbf16, #tpu.memory_space<vmem>>, vector<640x128xbf16>
    %cst = arith.constant dense<0.000000e+00> : vector<128x128xf32>
    %2 = tpu.matmul %0, %1, %cst {dimension_numbers = #tpu.dot_dimension_numbers<[1], [0], [0], [1], [0, 0, 1, 1], [], []>} : vector<128x640xbf16>, vector<640x128xbf16>, vector<128x128xf32> -> vector<128x128xf32>
    %c0_3 = arith.constant 0 : index
    %c0_4 = arith.constant 0 : index
    %3 = vector.load %arg3[%c0_3, %c0_4] : memref<1x128xf32, #tpu.memory_space<vmem>>, vector<1x128xf32>
    %4 = vector.broadcast %3 : vector<1x128xf32> to vector<128x128xf32>
    %5 = arith.mulf %2, %4 : vector<128x128xf32>
    %c0_5 = arith.constant 0 : index
    %c0_6 = arith.constant 0 : index
    %6 = vector.load %arg4[%c0_5, %c0_6] : memref<1x128xf32, #tpu.memory_space<vmem>>, vector<1x128xf32>
    %7 = vector.broadcast %6 : vector<1x128xf32> to vector<128x128xf32>
    %8 = arith.addf %5, %7 : vector<128x128xf32>
    %cst_7 = arith.constant 0.000000e+00 : f32
    %9 = vector.broadcast %cst_7 : f32 to vector<128x128xf32>
    %10 = arith.maximumf %8, %9 : vector<128x128xf32>
    %11 = arith.truncf %10 : vector<128x128xf32> to vector<128x128xbf16>
    %c0_8 = arith.constant 0 : index
    %c0_9 = arith.constant 0 : index
    %12 = vector.load %arg5[%c0_8, %c0_9] : memref<128x128xbf16, #tpu.memory_space<vmem>>, vector<128x128xbf16>
    tpu.vector_store %arg5[%c0_8, %c0_9], %11 {strides = array<i32>} : memref<128x128xbf16, #tpu.memory_space<vmem>>, vector<128x128xbf16>,
    return
  }
  func.func @transform_0(%arg0: i32) -> (i32, i32) {
    %c0_i32 = arith.constant 0 : i32
    %c0_i32_0 = arith.constant 0 : i32
    return %arg0, %c0_i32 : i32, i32
  }
  func.func @transform_1(%arg0: i32) -> (i32, i32) {
    %c0_i32 = arith.constant 0 : i32
    %c0_i32_0 = arith.constant 0 : i32
    %c0_i32_1 = arith.constant 0 : i32
    return %c0_i32, %c0_i32_0 : i32, i32
  }
  func.func @transform_2(%arg0: i32) -> (i32, i32) {
    %c0_i32 = arith.constant 0 : i32
    %c0_i32_0 = arith.constant 0 : i32
    %c0_i32_1 = arith.constant 0 : i32
    return %c0_i32, %c0_i32_0 : i32, i32
  }
  func.func @transform_3(%arg0: i32) -> (i32, i32) {
    %c0_i32 = arith.constant 0 : i32
    %c0_i32_0 = arith.constant 0 : i32
    %c0_i32_1 = arith.constant 0 : i32
    return %c0_i32, %c0_i32_0 : i32, i32
  }
  func.func @transform_4(%arg0: i32) -> (i32, i32) {
    %c0_i32 = arith.constant 0 : i32
    %c0_i32_0 = arith.constant 0 : i32
    return %arg0, %c0_i32 : i32, i32
  }
}

module attributes {stable_mosaic.version = 11 : i64} {
  func.func @_gemm_bn_act_kernel(%arg0: i32, %arg1: memref<32x1152xbf16, #tpu.memory_space<vmem>>, %arg2: memref<1152x256xbf16, #tpu.memory_space<vmem>>, %arg3: memref<1x256xf32, #tpu.memory_space<vmem>>, %arg4: memref<1x256xf32, #tpu.memory_space<vmem>>, %arg5: memref<32x256xbf16, #tpu.memory_space<vmem>>) attributes {dimension_semantics = [#tpu.dimension_semantics<parallel>], iteration_bounds = array<i64: 1>, scalar_prefetch = 0 : i64, scratch_operands = 0 : i64, tpu.core_type = #tpu.core_type<tc>, window_params = [{transform_indices = @transform_0, window_bounds = array<i64: 32, 1152>}, {pipeline_mode = #tpu.pipeline_mode<synchronous>, transform_indices = @transform_1, window_bounds = array<i64: 1152, 256>}, {pipeline_mode = #tpu.pipeline_mode<synchronous>, transform_indices = @transform_2, window_bounds = array<i64: 1, 256>}, {pipeline_mode = #tpu.pipeline_mode<synchronous>, transform_indices = @transform_3, window_bounds = array<i64: 1, 256>}, {transform_indices = @transform_4, window_bounds = array<i64: 32, 256>}]} {
    %c0 = arith.constant 0 : index
    %c0_0 = arith.constant 0 : index
    %0 = vector.load %arg1[%c0, %c0_0] : memref<32x1152xbf16, #tpu.memory_space<vmem>>, vector<32x1152xbf16>
    %c0_1 = arith.constant 0 : index
    %c0_2 = arith.constant 0 : index
    %1 = vector.load %arg2[%c0_1, %c0_2] : memref<1152x256xbf16, #tpu.memory_space<vmem>>, vector<1152x256xbf16>
    %cst = arith.constant dense<0.000000e+00> : vector<32x256xf32>
    %2 = tpu.matmul %0, %1, %cst {dimension_numbers = #tpu.dot_dimension_numbers<[1], [0], [0], [1], [0, 0, 1, 1], [], []>} : vector<32x1152xbf16>, vector<1152x256xbf16>, vector<32x256xf32> -> vector<32x256xf32>
    %c0_3 = arith.constant 0 : index
    %c0_4 = arith.constant 0 : index
    %3 = vector.load %arg3[%c0_3, %c0_4] : memref<1x256xf32, #tpu.memory_space<vmem>>, vector<1x256xf32>
    %4 = vector.broadcast %3 : vector<1x256xf32> to vector<32x256xf32>
    %5 = arith.mulf %2, %4 : vector<32x256xf32>
    %c0_5 = arith.constant 0 : index
    %c0_6 = arith.constant 0 : index
    %6 = vector.load %arg4[%c0_5, %c0_6] : memref<1x256xf32, #tpu.memory_space<vmem>>, vector<1x256xf32>
    %7 = vector.broadcast %6 : vector<1x256xf32> to vector<32x256xf32>
    %8 = arith.addf %5, %7 : vector<32x256xf32>
    %cst_7 = arith.constant 0.000000e+00 : f32
    %9 = vector.broadcast %cst_7 : f32 to vector<32x256xf32>
    %10 = arith.maximumf %8, %9 : vector<32x256xf32>
    %11 = arith.truncf %10 : vector<32x256xf32> to vector<32x256xbf16>
    %c0_8 = arith.constant 0 : index
    %c0_9 = arith.constant 0 : index
    %12 = vector.load %arg5[%c0_8, %c0_9] : memref<32x256xbf16, #tpu.memory_space<vmem>>, vector<32x256xbf16>
    tpu.vector_store %arg5[%c0_8, %c0_9], %11 {strides = array<i32>} : memref<32x256xbf16, #tpu.memory_space<vmem>>, vector<32x256xbf16>,
    return
  }
  func.func @transform_0(%arg0: i32) -> (i32, i32) {
    %c0_i32 = arith.constant 0 : i32
    %c0_i32_0 = arith.constant 0 : i32
    return %arg0, %c0_i32 : i32, i32
  }
  func.func @transform_1(%arg0: i32) -> (i32, i32) {
    %c0_i32 = arith.constant 0 : i32
    %c0_i32_0 = arith.constant 0 : i32
    %c0_i32_1 = arith.constant 0 : i32
    return %c0_i32, %c0_i32_0 : i32, i32
  }
  func.func @transform_2(%arg0: i32) -> (i32, i32) {
    %c0_i32 = arith.constant 0 : i32
    %c0_i32_0 = arith.constant 0 : i32
    %c0_i32_1 = arith.constant 0 : i32
    return %c0_i32, %c0_i32_0 : i32, i32
  }
  func.func @transform_3(%arg0: i32) -> (i32, i32) {
    %c0_i32 = arith.constant 0 : i32
    %c0_i32_0 = arith.constant 0 : i32
    %c0_i32_1 = arith.constant 0 : i32
    return %c0_i32, %c0_i32_0 : i32, i32
  }
  func.func @transform_4(%arg0: i32) -> (i32, i32) {
    %c0_i32 = arith.constant 0 : i32
    %c0_i32_0 = arith.constant 0 : i32
    return %arg0, %c0_i32 : i32, i32
  }
}

module attributes {stable_mosaic.version = 11 : i64} {
  func.func @_block_kernel(%arg0: i32, %arg1: i32, %arg2: memref<1x36x256xf32, #tpu.memory_space<vmem>>, %arg3: memref<9x256x256xbf16, #tpu.memory_space<vmem>>, %arg4: memref<9x256x256xbf16, #tpu.memory_space<vmem>>, %arg5: memref<1x256xf32, #tpu.memory_space<vmem>>, %arg6: memref<1x256xf32, #tpu.memory_space<vmem>>, %arg7: memref<1x256xf32, #tpu.memory_space<vmem>>, %arg8: memref<1x256xf32, #tpu.memory_space<vmem>>, %arg9: memref<40x256xf32, #tpu.memory_space<vmem>>, %arg10: memref<1x36x256xf32, #tpu.memory_space<vmem>>, %arg11: memref<56x256xf32, #tpu.memory_space<vmem>>) attributes {dimension_semantics = [#tpu.dimension_semantics<parallel>, #tpu.dimension_semantics<arbitrary>], iteration_bounds = array<i64: 2, 10>, scalar_prefetch = 0 : i64, scratch_operands = 1 : i64, tpu.core_type = #tpu.core_type<tc>, window_params = [{transform_indices = @transform_0, window_bounds = array<i64: 1, 36, 256>}, {pipeline_mode = #tpu.pipeline_mode<synchronous>, transform_indices = @transform_1, window_bounds = array<i64: 9, 256, 256>}, {pipeline_mode = #tpu.pipeline_mode<synchronous>, transform_indices = @transform_2, window_bounds = array<i64: 9, 256, 256>}, {pipeline_mode = #tpu.pipeline_mode<synchronous>, transform_indices = @transform_3, window_bounds = array<i64: 1, 256>}, {pipeline_mode = #tpu.pipeline_mode<synchronous>, transform_indices = @transform_4, window_bounds = array<i64: 1, 256>}, {pipeline_mode = #tpu.pipeline_mode<synchronous>, transform_indices = @transform_5, window_bounds = array<i64: 1, 256>}, {pipeline_mode = #tpu.pipeline_mode<synchronous>, transform_indices = @transform_6, window_bounds = array<i64: 1, 256>}, {pipeline_mode = #tpu.pipeline_mode<synchronous>, transform_indices = @transform_7, window_bounds = array<i64: 40, 256>}, {transform_indices = @transform_8, window_bounds = array<i64: 1, 36, 256>}]} {
    %c0_i32 = arith.constant 0 : i32
    %0 = arith.cmpi eq, %arg1, %c0_i32 : i32
    %1 = arith.extui %0 : i1 to i32
    %c0_i32_0 = arith.constant 0 : i32
    %2 = arith.cmpi ne, %1, %c0_i32_0 : i32
    scf.if %2 {
      %cst_113 = arith.constant 0.000000e+00 : f32
      %135 = vector.broadcast %cst_113 : f32 to vector<56x256xf32>
      %c0_114 = arith.constant 0 : index
      %c0_115 = arith.constant 0 : index
      %136 = vector.load %arg11[%c0_114, %c0_115] : memref<56x256xf32, #tpu.memory_space<vmem>>, vector<56x256xf32>
      tpu.vector_store %arg11[%c0_114, %c0_115], %135 {strides = array<i32>} : memref<56x256xf32, #tpu.memory_space<vmem>>, vector<56x256xf32>,
      %c0_116 = arith.constant 0 : index
      %c0_117 = arith.constant 0 : index
      %c0_118 = arith.constant 0 : index
      %137 = vector.load %arg2[%c0_116, %c0_117, %c0_118] : memref<1x36x256xf32, #tpu.memory_space<vmem>>, vector<1x36x256xf32>
      %138 = vector.shape_cast %137 : vector<1x36x256xf32> to vector<36x256xf32>
      %c8_119 = arith.constant 8 : index
      %c0_120 = arith.constant 0 : index
      %139 = vector.load %arg11[%c8_119, %c0_120] : memref<56x256xf32, #tpu.memory_space<vmem>>, vector<36x256xf32>
      tpu.vector_store %arg11[%c8_119, %c0_120], %138 {strides = array<i32>} : memref<56x256xf32, #tpu.memory_space<vmem>>, vector<36x256xf32>,
    } else {
    }
    %c0 = arith.constant 0 : index
    %c0_1 = arith.constant 0 : index
    %3 = vector.load %arg9[%c0, %c0_1] : memref<40x256xf32, #tpu.memory_space<vmem>>, vector<40x256xf32>
    %cst = arith.constant 0.000000e+00 : f32
    %4 = vector.broadcast %cst : f32 to vector<40x256xf32>
    %c1 = arith.constant 1 : index
    %c0_2 = arith.constant 0 : index
    %5 = vector.load %arg11[%c1, %c0_2] : memref<56x256xf32, #tpu.memory_space<vmem>>, vector<40x256xf32>
    %6 = arith.truncf %5 : vector<40x256xf32> to vector<40x256xbf16>
    %c0_3 = arith.constant 0 : index
    %c0_4 = arith.constant 0 : index
    %c0_5 = arith.constant 0 : index
    %7 = vector.load %arg3[%c0_3, %c0_4, %c0_5] : memref<9x256x256xbf16, #tpu.memory_space<vmem>>, vector<1x256x256xbf16>
    %8 = vector.shape_cast %7 : vector<1x256x256xbf16> to vector<256x256xbf16>
    %cst_6 = arith.constant dense<0.000000e+00> : vector<40x256xf32>
    %9 = tpu.matmul %6, %8, %cst_6 {dimension_numbers = #tpu.dot_dimension_numbers<[1], [0], [0], [1], [0, 0, 1, 1], [], []>} : vector<40x256xbf16>, vector<256x256xbf16>, vector<40x256xf32> -> vector<40x256xf32>
    %10 = arith.addf %4, %9 : vector<40x256xf32>
    %c2 = arith.constant 2 : index
    %c0_7 = arith.constant 0 : index
    %11 = vector.load %arg11[%c2, %c0_7] : memref<56x256xf32, #tpu.memory_space<vmem>>, vector<40x256xf32>
    %12 = arith.truncf %11 : vector<40x256xf32> to vector<40x256xbf16>
    %c1_8 = arith.constant 1 : index
    %c0_9 = arith.constant 0 : index
    %c0_10 = arith.constant 0 : index
    %13 = vector.load %arg3[%c1_8, %c0_9, %c0_10] : memref<9x256x256xbf16, #tpu.memory_space<vmem>>, vector<1x256x256xbf16>
    %14 = vector.shape_cast %13 : vector<1x256x256xbf16> to vector<256x256xbf16>
    %cst_11 = arith.constant dense<0.000000e+00> : vector<40x256xf32>
    %15 = tpu.matmul %12, %14, %cst_11 {dimension_numbers = #tpu.dot_dimension_numbers<[1], [0], [0], [1], [0, 0, 1, 1], [], []>} : vector<40x256xbf16>, vector<256x256xbf16>, vector<40x256xf32> -> vector<40x256xf32>
    %16 = arith.addf %10, %15 : vector<40x256xf32>
    %c3 = arith.constant 3 : index
    %c0_12 = arith.constant 0 : index
    %17 = vector.load %arg11[%c3, %c0_12] : memref<56x256xf32, #tpu.memory_space<vmem>>, vector<40x256xf32>
    %18 = arith.truncf %17 : vector<40x256xf32> to vector<40x256xbf16>
    %c2_13 = arith.constant 2 : index
    %c0_14 = arith.constant 0 : index
    %c0_15 = arith.constant 0 : index
    %19 = vector.load %arg3[%c2_13, %c0_14, %c0_15] : memref<9x256x256xbf16, #tpu.memory_space<vmem>>, vector<1x256x256xbf16>
    %20 = vector.shape_cast %19 : vector<1x256x256xbf16> to vector<256x256xbf16>
    %cst_16 = arith.constant dense<0.000000e+00> : vector<40x256xf32>
    %21 = tpu.matmul %18, %20, %cst_16 {dimension_numbers = #tpu.dot_dimension_numbers<[1], [0], [0], [1], [0, 0, 1, 1], [], []>} : vector<40x256xbf16>, vector<256x256xbf16>, vector<40x256xf32> -> vector<40x256xf32>
    %22 = arith.addf %16, %21 : vector<40x256xf32>
    %c7 = arith.constant 7 : index
    %c0_17 = arith.constant 0 : index
    %23 = vector.load %arg11[%c7, %c0_17] : memref<56x256xf32, #tpu.memory_space<vmem>>, vector<40x256xf32>
    %24 = arith.truncf %23 : vector<40x256xf32> to vector<40x256xbf16>
    %c3_18 = arith.constant 3 : index
    %c0_19 = arith.constant 0 : index
    %c0_20 = arith.constant 0 : index
    %25 = vector.load %arg3[%c3_18, %c0_19, %c0_20] : memref<9x256x256xbf16, #tpu.memory_space<vmem>>, vector<1x256x256xbf16>
    %26 = vector.shape_cast %25 : vector<1x256x256xbf16> to vector<256x256xbf16>
    %cst_21 = arith.constant dense<0.000000e+00> : vector<40x256xf32>
    %27 = tpu.matmul %24, %26, %cst_21 {dimension_numbers = #tpu.dot_dimension_numbers<[1], [0], [0], [1], [0, 0, 1, 1], [], []>} : vector<40x256xbf16>, vector<256x256xbf16>, vector<40x256xf32> -> vector<40x256xf32>
    %28 = arith.addf %22, %27 : vector<40x256xf32>
    %c8 = arith.constant 8 : index
    %c0_22 = arith.constant 0 : index
    %29 = vector.load %arg11[%c8, %c0_22] : memref<56x256xf32, #tpu.memory_space<vmem>>, vector<40x256xf32>
    %30 = arith.truncf %29 : vector<40x256xf32> to vector<40x256xbf16>
    %c4 = arith.constant 4 : index
    %c0_23 = arith.constant 0 : index
    %c0_24 = arith.constant 0 : index
    %31 = vector.load %arg3[%c4, %c0_23, %c0_24] : memref<9x256x256xbf16, #tpu.memory_space<vmem>>, vector<1x256x256xbf16>
    %32 = vector.shape_cast %31 : vector<1x256x256xbf16> to vector<256x256xbf16>
    %cst_25 = arith.constant dense<0.000000e+00> : vector<40x256xf32>
    %33 = tpu.matmul %30, %32, %cst_25 {dimension_numbers = #tpu.dot_dimension_numbers<[1], [0], [0], [1], [0, 0, 1, 1], [], []>} : vector<40x256xbf16>, vector<256x256xbf16>, vector<40x256xf32> -> vector<40x256xf32>
    %34 = arith.addf %28, %33 : vector<40x256xf32>
    %c9 = arith.constant 9 : index
    %c0_26 = arith.constant 0 : index
    %35 = vector.load %arg11[%c9, %c0_26] : memref<56x256xf32, #tpu.memory_space<vmem>>, vector<40x256xf32>
    %36 = arith.truncf %35 : vector<40x256xf32> to vector<40x256xbf16>
    %c5 = arith.constant 5 : index
    %c0_27 = arith.constant 0 : index
    %c0_28 = arith.constant 0 : index
    %37 = vector.load %arg3[%c5, %c0_27, %c0_28] : memref<9x256x256xbf16, #tpu.memory_space<vmem>>, vector<1x256x256xbf16>
    %38 = vector.shape_cast %37 : vector<1x256x256xbf16> to vector<256x256xbf16>
    %cst_29 = arith.constant dense<0.000000e+00> : vector<40x256xf32>
    %39 = tpu.matmul %36, %38, %cst_29 {dimension_numbers = #tpu.dot_dimension_numbers<[1], [0], [0], [1], [0, 0, 1, 1], [], []>} : vector<40x256xbf16>, vector<256x256xbf16>, vector<40x256xf32> -> vector<40x256xf32>
    %40 = arith.addf %34, %39 : vector<40x256xf32>
    %c13 = arith.constant 13 : index
    %c0_30 = arith.constant 0 : index
    %41 = vector.load %arg11[%c13, %c0_30] : memref<56x256xf32, #tpu.memory_space<vmem>>, vector<40x256xf32>
    %42 = arith.truncf %41 : vector<40x256xf32> to vector<40x256xbf16>
    %c6 = arith.constant 6 : index
    %c0_31 = arith.constant 0 : index
    %c0_32 = arith.constant 0 : index
    %43 = vector.load %arg3[%c6, %c0_31, %c0_32] : memref<9x256x256xbf16, #tpu.memory_space<vmem>>, vector<1x256x256xbf16>
    %44 = vector.shape_cast %43 : vector<1x256x256xbf16> to vector<256x256xbf16>
    %cst_33 = arith.constant dense<0.000000e+00> : vector<40x256xf32>
    %45 = tpu.matmul %42, %44, %cst_33 {dimension_numbers = #tpu.dot_dimension_numbers<[1], [0], [0], [1], [0, 0, 1, 1], [], []>} : vector<40x256xbf16>, vector<256x256xbf16>, vector<40x256xf32> -> vector<40x256xf32>
    %46 = arith.addf %40, %45 : vector<40x256xf32>
    %c14 = arith.constant 14 : index
    %c0_34 = arith.constant 0 : index
    %47 = vector.load %arg11[%c14, %c0_34] : memref<56x256xf32, #tpu.memory_space<vmem>>, vector<40x256xf32>
    %48 = arith.truncf %47 : vector<40x256xf32> to vector<40x256xbf16>
    %c7_35 = arith.constant 7 : index
    %c0_36 = arith.constant 0 : index
    %c0_37 = arith.constant 0 : index
    %49 = vector.load %arg3[%c7_35, %c0_36, %c0_37] : memref<9x256x256xbf16, #tpu.memory_space<vmem>>, vector<1x256x256xbf16>
    %50 = vector.shape_cast %49 : vector<1x256x256xbf16> to vector<256x256xbf16>
    %cst_38 = arith.constant dense<0.000000e+00> : vector<40x256xf32>
    %51 = tpu.matmul %48, %50, %cst_38 {dimension_numbers = #tpu.dot_dimension_numbers<[1], [0], [0], [1], [0, 0, 1, 1], [], []>} : vector<40x256xbf16>, vector<256x256xbf16>, vector<40x256xf32> -> vector<40x256xf32>
    %52 = arith.addf %46, %51 : vector<40x256xf32>
    %c15 = arith.constant 15 : index
    %c0_39 = arith.constant 0 : index
    %53 = vector.load %arg11[%c15, %c0_39] : memref<56x256xf32, #tpu.memory_space<vmem>>, vector<40x256xf32>
    %54 = arith.truncf %53 : vector<40x256xf32> to vector<40x256xbf16>
    %c8_40 = arith.constant 8 : index
    %c0_41 = arith.constant 0 : index
    %c0_42 = arith.constant 0 : index
    %55 = vector.load %arg3[%c8_40, %c0_41, %c0_42] : memref<9x256x256xbf16, #tpu.memory_space<vmem>>, vector<1x256x256xbf16>
    %56 = vector.shape_cast %55 : vector<1x256x256xbf16> to vector<256x256xbf16>
    %cst_43 = arith.constant dense<0.000000e+00> : vector<40x256xf32>
    %57 = tpu.matmul %54, %56, %cst_43 {dimension_numbers = #tpu.dot_dimension_numbers<[1], [0], [0], [1], [0, 0, 1, 1], [], []>} : vector<40x256xbf16>, vector<256x256xbf16>, vector<40x256xf32> -> vector<40x256xf32>
    %58 = arith.addf %52, %57 : vector<40x256xf32>
    %c0_44 = arith.constant 0 : index
    %c0_45 = arith.constant 0 : index
    %59 = vector.load %arg5[%c0_44, %c0_45] : memref<1x256xf32, #tpu.memory_space<vmem>>, vector<1x256xf32>
    %60 = vector.broadcast %59 : vector<1x256xf32> to vector<40x256xf32>
    %61 = arith.mulf %58, %60 : vector<40x256xf32>
    %c0_46 = arith.constant 0 : index
    %c0_47 = arith.constant 0 : index
    %62 = vector.load %arg6[%c0_46, %c0_47] : memref<1x256xf32, #tpu.memory_space<vmem>>, vector<1x256xf32>
    %63 = vector.broadcast %62 : vector<1x256xf32> to vector<40x256xf32>
    %64 = arith.addf %61, %63 : vector<40x256xf32>
    %cst_48 = arith.constant 0.000000e+00 : f32
    %65 = vector.broadcast %cst_48 : f32 to vector<40x256xf32>
    %66 = arith.maximumf %64, %65 : vector<40x256xf32>
    %67 = arith.mulf %66, %3 : vector<40x256xf32>
    %c8_49 = arith.constant 8 : index
    %c0_50 = arith.constant 0 : index
    %68 = vector.load %arg11[%c8_49, %c0_50] : memref<56x256xf32, #tpu.memory_space<vmem>>, vector<40x256xf32>
    tpu.vector_store %arg11[%c8_49, %c0_50], %67 {strides = array<i32>} : memref<56x256xf32, #tpu.memory_space<vmem>>, vector<40x256xf32>,
    %cst_51 = arith.constant 0.000000e+00 : f32
    %69 = vector.broadcast %cst_51 : f32 to vector<40x256xf32>
    %c1_52 = arith.constant 1 : index
    %c0_53 = arith.constant 0 : index
    %70 = vector.load %arg11[%c1_52, %c0_53] : memref<56x256xf32, #tpu.memory_space<vmem>>, vector<40x256xf32>
    %71 = arith.truncf %70 : vector<40x256xf32> to vector<40x256xbf16>
    %c0_54 = arith.constant 0 : index
    %c0_55 = arith.constant 0 : index
    %c0_56 = arith.constant 0 : index
    %72 = vector.load %arg4[%c0_54, %c0_55, %c0_56] : memref<9x256x256xbf16, #tpu.memory_space<vmem>>, vector<1x256x256xbf16>
    %73 = vector.shape_cast %72 : vector<1x256x256xbf16> to vector<256x256xbf16>
    %cst_57 = arith.constant dense<0.000000e+00> : vector<40x256xf32>
    %74 = tpu.matmul %71, %73, %cst_57 {dimension_numbers = #tpu.dot_dimension_numbers<[1], [0], [0], [1], [0, 0, 1, 1], [], []>} : vector<40x256xbf16>, vector<256x256xbf16>, vector<40x256xf32> -> vector<40x256xf32>
    %75 = arith.addf %69, %74 : vector<40x256xf32>
    %c2_58 = arith.constant 2 : index
    %c0_59 = arith.constant 0 : index
    %76 = vector.load %arg11[%c2_58, %c0_59] : memref<56x256xf32, #tpu.memory_space<vmem>>, vector<40x256xf32>
    %77 = arith.truncf %76 : vector<40x256xf32> to vector<40x256xbf16>
    %c1_60 = arith.constant 1 : index
    %c0_61 = arith.constant 0 : index
    %c0_62 = arith.constant 0 : index
    %78 = vector.load %arg4[%c1_60, %c0_61, %c0_62] : memref<9x256x256xbf16, #tpu.memory_space<vmem>>, vector<1x256x256xbf16>
    %79 = vector.shape_cast %78 : vector<1x256x256xbf16> to vector<256x256xbf16>
    %cst_63 = arith.constant dense<0.000000e+00> : vector<40x256xf32>
    %80 = tpu.matmul %77, %79, %cst_63 {dimension_numbers = #tpu.dot_dimension_numbers<[1], [0], [0], [1], [0, 0, 1, 1], [], []>} : vector<40x256xbf16>, vector<256x256xbf16>, vector<40x256xf32> -> vector<40x256xf32>
    %81 = arith.addf %75, %80 : vector<40x256xf32>
    %c3_64 = arith.constant 3 : index
    %c0_65 = arith.constant 0 : index
    %82 = vector.load %arg11[%c3_64, %c0_65] : memref<56x256xf32, #tpu.memory_space<vmem>>, vector<40x256xf32>
    %83 = arith.truncf %82 : vector<40x256xf32> to vector<40x256xbf16>
    %c2_66 = arith.constant 2 : index
    %c0_67 = arith.constant 0 : index
    %c0_68 = arith.constant 0 : index
    %84 = vector.load %arg4[%c2_66, %c0_67, %c0_68] : memref<9x256x256xbf16, #tpu.memory_space<vmem>>, vector<1x256x256xbf16>
    %85 = vector.shape_cast %84 : vector<1x256x256xbf16> to vector<256x256xbf16>
    %cst_69 = arith.constant dense<0.000000e+00> : vector<40x256xf32>
    %86 = tpu.matmul %83, %85, %cst_69 {dimension_numbers = #tpu.dot_dimension_numbers<[1], [0], [0], [1], [0, 0, 1, 1], [], []>} : vector<40x256xbf16>, vector<256x256xbf16>, vector<40x256xf32> -> vector<40x256xf32>
    %87 = arith.addf %81, %86 : vector<40x256xf32>
    %c7_70 = arith.constant 7 : index
    %c0_71 = arith.constant 0 : index
    %88 = vector.load %arg11[%c7_70, %c0_71] : memref<56x256xf32, #tpu.memory_space<vmem>>, vector<40x256xf32>
    %89 = arith.truncf %88 : vector<40x256xf32> to vector<40x256xbf16>
    %c3_72 = arith.constant 3 : index
    %c0_73 = arith.constant 0 : index
    %c0_74 = arith.constant 0 : index
    %90 = vector.load %arg4[%c3_72, %c0_73, %c0_74] : memref<9x256x256xbf16, #tpu.memory_space<vmem>>, vector<1x256x256xbf16>
    %91 = vector.shape_cast %90 : vector<1x256x256xbf16> to vector<256x256xbf16>
    %cst_75 = arith.constant dense<0.000000e+00> : vector<40x256xf32>
    %92 = tpu.matmul %89, %91, %cst_75 {dimension_numbers = #tpu.dot_dimension_numbers<[1], [0], [0], [1], [0, 0, 1, 1], [], []>} : vector<40x256xbf16>, vector<256x256xbf16>, vector<40x256xf32> -> vector<40x256xf32>
    %93 = arith.addf %87, %92 : vector<40x256xf32>
    %c8_76 = arith.constant 8 : index
    %c0_77 = arith.constant 0 : index
    %94 = vector.load %arg11[%c8_76, %c0_77] : memref<56x256xf32, #tpu.memory_space<vmem>>, vector<40x256xf32>
    %95 = arith.truncf %94 : vector<40x256xf32> to vector<40x256xbf16>
    %c4_78 = arith.constant 4 : index
    %c0_79 = arith.constant 0 : index
    %c0_80 = arith.constant 0 : index
    %96 = vector.load %arg4[%c4_78, %c0_79, %c0_80] : memref<9x256x256xbf16, #tpu.memory_space<vmem>>, vector<1x256x256xbf16>
    %97 = vector.shape_cast %96 : vector<1x256x256xbf16> to vector<256x256xbf16>
    %cst_81 = arith.constant dense<0.000000e+00> : vector<40x256xf32>
    %98 = tpu.matmul %95, %97, %cst_81 {dimension_numbers = #tpu.dot_dimension_numbers<[1], [0], [0], [1], [0, 0, 1, 1], [], []>} : vector<40x256xbf16>, vector<256x256xbf16>, vector<40x256xf32> -> vector<40x256xf32>
    %99 = arith.addf %93, %98 : vector<40x256xf32>
    %c9_82 = arith.constant 9 : index
    %c0_83 = arith.constant 0 : index
    %100 = vector.load %arg11[%c9_82, %c0_83] : memref<56x256xf32, #tpu.memory_space<vmem>>, vector<40x256xf32>
    %101 = arith.truncf %100 : vector<40x256xf32> to vector<40x256xbf16>
    %c5_84 = arith.constant 5 : index
    %c0_85 = arith.constant 0 : index
    %c0_86 = arith.constant 0 : index
    %102 = vector.load %arg4[%c5_84, %c0_85, %c0_86] : memref<9x256x256xbf16, #tpu.memory_space<vmem>>, vector<1x256x256xbf16>
    %103 = vector.shape_cast %102 : vector<1x256x256xbf16> to vector<256x256xbf16>
    %cst_87 = arith.constant dense<0.000000e+00> : vector<40x256xf32>
    %104 = tpu.matmul %101, %103, %cst_87 {dimension_numbers = #tpu.dot_dimension_numbers<[1], [0], [0], [1], [0, 0, 1, 1], [], []>} : vector<40x256xbf16>, vector<256x256xbf16>, vector<40x256xf32> -> vector<40x256xf32>
    %105 = arith.addf %99, %104 : vector<40x256xf32>
    %c13_88 = arith.constant 13 : index
    %c0_89 = arith.constant 0 : index
    %106 = vector.load %arg11[%c13_88, %c0_89] : memref<56x256xf32, #tpu.memory_space<vmem>>, vector<40x256xf32>
    %107 = arith.truncf %106 : vector<40x256xf32> to vector<40x256xbf16>
    %c6_90 = arith.constant 6 : index
    %c0_91 = arith.constant 0 : index
    %c0_92 = arith.constant 0 : index
    %108 = vector.load %arg4[%c6_90, %c0_91, %c0_92] : memref<9x256x256xbf16, #tpu.memory_space<vmem>>, vector<1x256x256xbf16>
    %109 = vector.shape_cast %108 : vector<1x256x256xbf16> to vector<256x256xbf16>
    %cst_93 = arith.constant dense<0.000000e+00> : vector<40x256xf32>
    %110 = tpu.matmul %107, %109, %cst_93 {dimension_numbers = #tpu.dot_dimension_numbers<[1], [0], [0], [1], [0, 0, 1, 1], [], []>} : vector<40x256xbf16>, vector<256x256xbf16>, vector<40x256xf32> -> vector<40x256xf32>
    %111 = arith.addf %105, %110 : vector<40x256xf32>
    %c14_94 = arith.constant 14 : index
    %c0_95 = arith.constant 0 : index
    %112 = vector.load %arg11[%c14_94, %c0_95] : memref<56x256xf32, #tpu.memory_space<vmem>>, vector<40x256xf32>
    %113 = arith.truncf %112 : vector<40x256xf32> to vector<40x256xbf16>
    %c7_96 = arith.constant 7 : index
    %c0_97 = arith.constant 0 : index
    %c0_98 = arith.constant 0 : index
    %114 = vector.load %arg4[%c7_96, %c0_97, %c0_98] : memref<9x256x256xbf16, #tpu.memory_space<vmem>>, vector<1x256x256xbf16>
    %115 = vector.shape_cast %114 : vector<1x256x256xbf16> to vector<256x256xbf16>
    %cst_99 = arith.constant dense<0.000000e+00> : vector<40x256xf32>
    %116 = tpu.matmul %113, %115, %cst_99 {dimension_numbers = #tpu.dot_dimension_numbers<[1], [0], [0], [1], [0, 0, 1, 1], [], []>} : vector<40x256xbf16>, vector<256x256xbf16>, vector<40x256xf32> -> vector<40x256xf32>
    %117 = arith.addf %111, %116 : vector<40x256xf32>
    %c15_100 = arith.constant 15 : index
    %c0_101 = arith.constant 0 : index
    %118 = vector.load %arg11[%c15_100, %c0_101] : memref<56x256xf32, #tpu.memory_space<vmem>>, vector<40x256xf32>
    %119 = arith.truncf %118 : vector<40x256xf32> to vector<40x256xbf16>
    %c8_102 = arith.constant 8 : index
    %c0_103 = arith.constant 0 : index
    %c0_104 = arith.constant 0 : index
    %120 = vector.load %arg4[%c8_102, %c0_103, %c0_104] : memref<9x256x256xbf16, #tpu.memory_space<vmem>>, vector<1x256x256xbf16>
    %121 = vector.shape_cast %120 : vector<1x256x256xbf16> to vector<256x256xbf16>
    %cst_105 = arith.constant dense<0.000000e+00> : vector<40x256xf32>
    %122 = tpu.matmul %119, %121, %cst_105 {dimension_numbers = #tpu.dot_dimension_numbers<[1], [0], [0], [1], [0, 0, 1, 1], [], []>} : vector<40x256xbf16>, vector<256x256xbf16>, vector<40x256xf32> -> vector<40x256xf32>
    %123 = arith.addf %117, %122 : vector<40x256xf32>
    %c0_106 = arith.constant 0 : index
    %c0_107 = arith.constant 0 : index
    %124 = vector.load %arg7[%c0_106, %c0_107] : memref<1x256xf32, #tpu.memory_space<vmem>>, vector<1x256xf32>
    %125 = vector.broadcast %124 : vector<1x256xf32> to vector<40x256xf32>
    %126 = arith.mulf %123, %125 : vector<40x256xf32>
    %c0_108 = arith.constant 0 : index
    %c0_109 = arith.constant 0 : index
    %127 = vector.load %arg8[%c0_108, %c0_109] : memref<1x256xf32, #tpu.memory_space<vmem>>, vector<1x256xf32>
    %128 = vector.broadcast %127 : vector<1x256xf32> to vector<40x256xf32>
    %129 = arith.addf %126, %128 : vector<40x256xf32>
    %130 = arith.mulf %129, %3 : vector<40x256xf32>
    %c8_110 = arith.constant 8 : index
    %c0_111 = arith.constant 0 : index
    %131 = vector.load %arg11[%c8_110, %c0_111] : memref<56x256xf32, #tpu.memory_space<vmem>>, vector<40x256xf32>
    tpu.vector_store %arg11[%c8_110, %c0_111], %130 {strides = array<i32>} : memref<56x256xf32, #tpu.memory_space<vmem>>, vector<40x256xf32>,
    %c9_i32 = arith.constant 9 : i32
    %132 = arith.cmpi eq, %arg1, %c9_i32 : i32
    %133 = arith.extui %132 : i1 to i32
    %c0_i32_112 = arith.constant 0 : i32
    %134 = arith.cmpi ne, %133, %c0_i32_112 : i32
    scf.if %134 {
      %c8_113 = arith.constant 8 : index
      %c0_114 = arith.constant 0 : index
      %135 = vector.load %arg11[%c8_113, %c0_114] : memref<56x256xf32, #tpu.memory_space<vmem>>, vector<36x256xf32>
      %c0_115 = arith.constant 0 : index
      %c0_116 = arith.constant 0 : index
      %c0_117 = arith.constant 0 : index
      %136 = vector.load %arg10[%c0_115, %c0_116, %c0_117] : memref<1x36x256xf32, #tpu.memory_space<vmem>>, vector<1x36x256xf32>
      %137 = vector.shape_cast %136 : vector<1x36x256xf32> to vector<36x256xf32>
      %138 = vector.shape_cast %135 : vector<36x256xf32> to vector<1x36x256xf32>
      tpu.vector_store %arg10[%c0_115, %c0_116, %c0_117], %138 {strides = array<i32>} : memref<1x36x256xf32, #tpu.memory_space<vmem>>, vector<1x36x256xf32>,
    } else {
    }
    return
  }
  func.func @transform_0(%arg0: i32, %arg1: i32) -> (i32, i32, i32) {
    %c0_i32 = arith.constant 0 : i32
    %c0_i32_0 = arith.constant 0 : i32
    %c0_i32_1 = arith.constant 0 : i32
    return %arg0, %c0_i32, %c0_i32_0 : i32, i32, i32
  }
  func.func @transform_1(%arg0: i32, %arg1: i32) -> (i32, i32, i32) {
    %c0_i32 = arith.constant 0 : i32
    %c0_i32_0 = arith.constant 0 : i32
    %c0_i32_1 = arith.constant 0 : i32
    %c0_i32_2 = arith.constant 0 : i32
    return %c0_i32, %c0_i32_0, %c0_i32_1 : i32, i32, i32
  }
  func.func @transform_2(%arg0: i32, %arg1: i32) -> (i32, i32, i32) {
    %c0_i32 = arith.constant 0 : i32
    %c0_i32_0 = arith.constant 0 : i32
    %c0_i32_1 = arith.constant 0 : i32
    %c0_i32_2 = arith.constant 0 : i32
    return %c0_i32, %c0_i32_0, %c0_i32_1 : i32, i32, i32
  }
  func.func @transform_3(%arg0: i32, %arg1: i32) -> (i32, i32) {
    %c0_i32 = arith.constant 0 : i32
    %c0_i32_0 = arith.constant 0 : i32
    %c0_i32_1 = arith.constant 0 : i32
    return %c0_i32, %c0_i32_0 : i32, i32
  }
  func.func @transform_4(%arg0: i32, %arg1: i32) -> (i32, i32) {
    %c0_i32 = arith.constant 0 : i32
    %c0_i32_0 = arith.constant 0 : i32
    %c0_i32_1 = arith.constant 0 : i32
    return %c0_i32, %c0_i32_0 : i32, i32
  }
  func.func @transform_5(%arg0: i32, %arg1: i32) -> (i32, i32) {
    %c0_i32 = arith.constant 0 : i32
    %c0_i32_0 = arith.constant 0 : i32
    %c0_i32_1 = arith.constant 0 : i32
    return %c0_i32, %c0_i32_0 : i32, i32
  }
  func.func @transform_6(%arg0: i32, %arg1: i32) -> (i32, i32) {
    %c0_i32 = arith.constant 0 : i32
    %c0_i32_0 = arith.constant 0 : i32
    %c0_i32_1 = arith.constant 0 : i32
    return %c0_i32, %c0_i32_0 : i32, i32
  }
  func.func @transform_7(%arg0: i32, %arg1: i32) -> (i32, i32) {
    %c0_i32 = arith.constant 0 : i32
    %c0_i32_0 = arith.constant 0 : i32
    %c0_i32_1 = arith.constant 0 : i32
    return %c0_i32, %c0_i32_0 : i32, i32
  }
  func.func @transform_8(%arg0: i32, %arg1: i32) -> (i32, i32, i32) {
    %c0_i32 = arith.constant 0 : i32
    %c0_i32_0 = arith.constant 0 : i32
    %c0_i32_1 = arith.constant 0 : i32
    return %arg0, %c0_i32, %c0_i32_0 : i32, i32, i32
  }
}

</mosaic_0001>

<bundles_post_ra>
// kernel: branch_conv_forward.4
= control target key start
LH: loop header
LB: loop body
LE: loop exit
PB: predicated region body
PF: predicated region fallthrough
CT: control target
= control target key end

     0   :  { %s1333_s15 = smov 0   ;;  %s1560_s0 = inlined_call_operand.vmem [shape: bf16[512,256], index: 0, kind: input, shape index: {}]   ;;  %s1561_s1 = inlined_call_operand.vmem [shape: bf16[256,128], index: 1, kind: input, shape index: {}]   ;;  %s1562_s2 = inlined_call_operand.vmem [shape: f32[1,128], index: 2, kind: input, shape index: {}]   ;;  %s1563_s3 = inlined_call_operand.vmem [shape: f32[1,128], index: 3, kind: input, shape index: {}]   ;;  %s1564_s4 = inlined_call_operand.vmem [shape: bf16[512,128], index: 4, kind: output, shape index: {}]  }
   0x1 LB: > { %s926_s16 = sadd.s32 4294967295, %s1306_s15   ;;  %p930_p0 = scmp.ge.s32.totalorder %s1306_s15, 1  ;;  %s1306_s15 = sphi %s1333_s15, %s14_s15  }
   0x2   : > { %p164_p1 = scmp.lt.s32.totalorder %s1306_s15, 3 }
   0x4   : > { %p165_p2 = pnand %p930_p0, %p164_p1 }
   0x5   : > { %s931_s29 = sshll.u32 (!%p165_p2), %s926_s16, 5 }
   0x6   : > { %168 = sbr.rel (%p165_p2) target bundleno = 307 (0x133), region = 36  ;;  %p192_p3 = scmp.lt.s32.totalorder (!%p165_p2), %s931_s29, 63 }
   0xb   : > { %v1170_v0 = vld [vmem:[%s1561_s1 + $0x38] sm:$0xff]  ;;  %v1169_v2 = vld [vmem:[%s1561_s1 + $0x30] sm:$0xff]  ;;  %v1168_v4 = vld [vmem:[%s1561_s1 + $0x28] sm:$0xff]  ;;  %s1566_s29 = smov (!%p192_p3, %s931_s29), 63 }
   0xc   : > { %v1178_v1 = vld [vmem:[%s1561_s1 + $0x78] sm:$0xff]  ;;  %524 = vmatpush.bf16.msra.mxu0 %v1170_v0  ;;  %1274 = vmatpush.bf16.msra.mxu2 %v1170_v0  ;;  %v1177_v3 = vld [vmem:[%s1561_s1 + $0x70] sm:$0xff]  ;;  %v1176_v5 = vld [vmem:[%s1561_s1 + $0x68] sm:$0xff]  ;;  %s1130_s17 = sshll.u32 %s1566_s29, 3  ;;  %s935_s8 = sshll.u32 %s1566_s29, 2 }
   0xd   : > { %613 = vmatpush.bf16.msra.mxu1 %v1178_v1  ;;  %1282 = vmatpush.bf16.msra.mxu3 %v1178_v1  ;;  %v1167_v6 = vld [vmem:[%s1561_s1 + $0x20] sm:$0xff]  ;;  %v1166_v8 = vld [vmem:[%s1561_s1 + $0x18] sm:$0xff]  ;;  %v1165_v10 = vld [vmem:[%s1561_s1 + $0x10] sm:$0xff]  ;;  %s1386_s22 = scalar_lea.vmem %s1560_s0, %s1130_s17  ;;  %s1480_s11 = scalar_lea.vmem %s1564_s4, %s935_s8 }
   0xe   : > { %v1175_v7 = vld [vmem:[%s1561_s1 + $0x60] sm:$0xff]  ;;  %v1174_v9 = vld [vmem:[%s1561_s1 + $0x58] sm:$0xff]  ;;  %v1173_v11 = vld [vmem:[%s1561_s1 + $0x50] sm:$0xff] }
   0xf   : > { %v1164_v12 = vld [vmem:[%s1561_s1 + $0x8] sm:$0xff]  ;;  %v1163_v14 = vld [vmem:[%s1561_s1] sm:$0xff]  ;;  %v946_v28 = vld [vmem:[%s1386_s22 + $0x10] sm:$0xf] }
  0x10   : > { %525 = vmatpush.bf16.msra.mxu0 %v1169_v2  ;;  %1275 = vmatpush.bf16.msra.mxu2 %v1169_v2  ;;  %v1172_v13 = vld [vmem:[%s1561_s1 + $0x48] sm:$0xff]  ;;  %v1171_v15 = vld [vmem:[%s1561_s1 + $0x40] sm:$0xff]  ;;  %v1134_v29 = vld [vmem:[%s1386_s22 + $0x14] sm:$0xf0] }
  0x11   : > { %614 = vmatpush.bf16.msra.mxu1 %v1177_v3  ;;  %1283 = vmatpush.bf16.msra.mxu3 %v1177_v3  ;;  %v938_v16 = vld [vmem:[%s1386_s22] sm:$0xf]  ;;  %v1132_v17 = vld [vmem:[%s1386_s22 + $0x4] sm:$0xf0]  ;;  %v1131_v20 = vld [vmem:[%s1386_s22 + $0x4] sm:$0xf]  ;;  %v947_v36 = vor.u32 %v1134_v29, %v946_v28 }
  0x12   : > { %v1002_v18 = vld [vmem:[%s1386_s22 + $0x80] sm:$0xf]  ;;  %v1148_v19 = vld [vmem:[%s1386_s22 + $0x84] sm:$0xf0]  ;;  %v940_v21 = vld [vmem:[%s1386_s22 + $0x8] sm:$0xf0]  ;;  %v939_v24 = vor.u32 %v1132_v17, %v938_v16 }
  0x13   : > { %v1147_v22 = vld [vmem:[%s1386_s22 + $0x84] sm:$0xf]  ;;  %v1004_v23 = vld [vmem:[%s1386_s22 + $0x88] sm:$0xf0]  ;;  %v1003_v25 = vor.u32 %v1148_v19, %v1002_v18  ;;  %v943_v26 = vor.u32 %v1131_v20, %v940_v21  ;;  %v1010_v30 = vld [vmem:[%s1386_s22 + $0x90] sm:$0xf] }
  0x14   : > { %526 = vmatpush.bf16.msra.mxu0 %v1168_v4  ;;  %1276 = vmatpush.bf16.msra.mxu2 %v1168_v4  ;;  %v1007_v27 = vor.u32 %v1147_v22, %v1004_v23  ;;  %v1150_v31 = vld [vmem:[%s1386_s22 + $0x94] sm:$0xf0]  ;;  %v1133_v32 = vld [vmem:[%s1386_s22 + $0x14] sm:$0xf]  ;;  %v948_v33 = vld [vmem:[%s1386_s22 + $0x18] sm:$0xf0] }
  0x15   : > { %615 = vmatpush.bf16.msra.mxu1 %v1176_v5  ;;  %1284 = vmatpush.bf16.msra.mxu3 %v1176_v5  ;;  %v1149_v34 = vld [vmem:[%s1386_s22 + $0x94] sm:$0xf]  ;;  %v1012_v35 = vld [vmem:[%s1386_s22 + $0x98] sm:$0xf0]  ;;  %v1011_v37 = vor.u32 %v1150_v31, %v1010_v30  ;;  %v951_v38 = vor.u32 %v1133_v32, %v948_v33  ;;  %v954_v40 = vld [vmem:[%s1386_s22 + $0x20] sm:$0xf] }
  0x16   : > { %v1015_v39 = vor.u32 %v1149_v34, %v1012_v35  ;;  %v1136_v41 = vld [vmem:[%s1386_s22 + $0x24] sm:$0xf0]  ;;  %v1018_v42 = vld [vmem:[%s1386_s22 + $0xa0] sm:$0xf]  ;;  %v1135_v44 = vld [vmem:[%s1386_s22 + $0x24] sm:$0xf] }
  0x17   : > { %v1152_v43 = vld [vmem:[%s1386_s22 + $0xa4] sm:$0xf0]  ;;  %v956_v45 = vld [vmem:[%s1386_s22 + $0x28] sm:$0xf0]  ;;  %v1151_v46 = vld [vmem:[%s1386_s22 + $0xa4] sm:$0xf]  ;;  %v955_v48 = vor.u32 %v1136_v41, %v954_v40 }
  0x18   : > { %527 = vmatpush.bf16.msra.mxu0 %v1167_v6  ;;  %1277 = vmatpush.bf16.msra.mxu2 %v1167_v6  ;;  %v1020_v47 = vld [vmem:[%s1386_s22 + $0xa8] sm:$0xf0]  ;;  %v1019_v49 = vor.u32 %v1152_v43, %v1018_v42  ;;  %v959_v50 = vor.u32 %v1135_v44, %v956_v45  ;;  %v962_v52 = vld [vmem:[%s1386_s22 + $0x30] sm:$0xf]  ;;  %v1138_v53 = vld [vmem:[%s1386_s22 + $0x34] sm:$0xf0] }
  0x19   : > { %616 = vmatpush.bf16.msra.mxu1 %v1175_v7  ;;  %1285 = vmatpush.bf16.msra.mxu3 %v1175_v7  ;;  %v1023_v51 = vor.u32 %v1151_v46, %v1020_v47  ;;  %v1026_v54 = vld [vmem:[%s1386_s22 + $0xb0] sm:$0xf]  ;;  %v1154_v55 = vld [vmem:[%s1386_s22 + $0xb4] sm:$0xf0]  ;;  %v1137_v56 = vld [vmem:[%s1386_s22 + $0x34] sm:$0xf]  ;;  %v963_v60 = vor.u32 %v1138_v53, %v962_v52 }
  0x1a   : > { %v964_v57 = vld [vmem:[%s1386_s22 + $0x38] sm:$0xf0]  ;;  %v1153_v58 = vld [vmem:[%s1386_s22 + $0xb4] sm:$0xf]  ;;  %v1027_v61 = vor.u32 %v1154_v55, %v1026_v54  ;;  %v970_v0 = vld [vmem:[%s1386_s22 + $0x40] sm:$0xf] }
  0x1b   : > { %v1028_v59 = vld [vmem:[%s1386_s22 + $0xb8] sm:$0xf0]  ;;  %v967_v62 = vor.u32 %v1137_v56, %v964_v57  ;;  %v1140_v1 = vld [vmem:[%s1386_s22 + $0x44] sm:$0xf0]  ;;  %v1034_v2 = vld [vmem:[%s1386_s22 + $0xc0] sm:$0xf] }
  0x1c   : > { %528 = vmatpush.bf16.msra.mxu0 %v1166_v8  ;;  %1278 = vmatpush.bf16.msra.mxu2 %v1166_v8  ;;  %v1031_v63 = vor.u32 %v1153_v58, %v1028_v59  ;;  %v1156_v3 = vld [vmem:[%s1386_s22 + $0xc4] sm:$0xf0]  ;;  %v1139_v4 = vld [vmem:[%s1386_s22 + $0x44] sm:$0xf]  ;;  %v972_v5 = vld [vmem:[%s1386_s22 + $0x48] sm:$0xf0]  ;;  %v971_v8 = vor.u32 %v1140_v1, %v970_v0 }
  0x1d   : > { %617 = vmatpush.bf16.msra.mxu1 %v1174_v9  ;;  %1286 = vmatpush.bf16.msra.mxu3 %v1174_v9  ;;  %v1155_v6 = vld [vmem:[%s1386_s22 + $0xc4] sm:$0xf]  ;;  %v1036_v7 = vld [vmem:[%s1386_s22 + $0xc8] sm:$0xf0]  ;;  %v1035_v9 = vor.u32 %v1156_v3, %v1034_v2  ;;  %v1141_v16 = vld [vmem:[%s1386_s22 + $0x54] sm:$0xf] }
  0x1e   : > { %v980_v17 = vld [vmem:[%s1386_s22 + $0x58] sm:$0xf0]  ;;  %v1157_v18 = vld [vmem:[%s1386_s22 + $0xd4] sm:$0xf]  ;;  %v1143_v28 = vld [vmem:[%s1386_s22 + $0x64] sm:$0xf] }
  0x1f   : > { %v1044_v19 = vld [vmem:[%s1386_s22 + $0xd8] sm:$0xf0]  ;;  %v983_v22 = vor.u32 %v1141_v16, %v980_v17  ;;  %v988_v29 = vld [vmem:[%s1386_s22 + $0x68] sm:$0xf0]  ;;  %v1159_v30 = vld [vmem:[%s1386_s22 + $0xe4] sm:$0xf] }
  0x20   : > { %529 = vmatpush.bf16.msra.mxu0 %v1165_v10  ;;  %1279 = vmatpush.bf16.msra.mxu2 %v1165_v10  ;;  %v975_v10 = vor.u32 %v1139_v4, %v972_v5  ;;  %v1047_v23 = vor.u32 %v1157_v18, %v1044_v19  ;;  %v1052_v31 = vld [vmem:[%s1386_s22 + $0xe8] sm:$0xf0]  ;;  %v991_v34 = vor.u32 %v1143_v28, %v988_v29  ;;  %v1145_v40 = vld [vmem:[%s1386_s22 + $0x74] sm:$0xf]  ;;  %v996_v41 = vld [vmem:[%s1386_s22 + $0x78] sm:$0xf0] }
  0x21   : > { %618 = vmatpush.bf16.msra.mxu1 %v1173_v11  ;;  %1287 = vmatpush.bf16.msra.mxu3 %v1173_v11  ;;  %v1039_v11 = vor.u32 %v1155_v6, %v1036_v7  ;;  %v1055_v35 = vor.u32 %v1159_v30, %v1052_v31  ;;  %v1161_v42 = vld [vmem:[%s1386_s22 + $0xf4] sm:$0xf]  ;;  %v1060_v43 = vld [vmem:[%s1386_s22 + $0xf8] sm:$0xf0]  ;;  %v999_v46 = vor.u32 %v1145_v40, %v996_v41  ;;  %v1470_v55 = vld [vmem:[%s1563_s3] ss:$0 sm:$0xff] }
  0x22   : > { %v1063_v47 = vor.u32 %v1161_v42, %v1060_v43 }
  0x24   : > { %530 = vmatpush.bf16.msra.mxu0 %v1164_v12  ;;  %1280 = vmatpush.bf16.msra.mxu2 %v1164_v12  ;;  %v978_v12 = vld [vmem:[%s1386_s22 + $0x50] sm:$0xf] }
  0x25   : > { %619 = vmatpush.bf16.msra.mxu1 %v1172_v13  ;;  %1288 = vmatpush.bf16.msra.mxu3 %v1172_v13  ;;  %v1142_v13 = vld [vmem:[%s1386_s22 + $0x54] sm:$0xf0] }
  0x26   : > { %v979_v20 = vor.u32 %v1142_v13, %v978_v12 }
  0x28   : > { %531 = vmatpush.bf16.msra.mxu0 %v1163_v14  ;;  %1281 = vmatpush.bf16.msra.mxu2 %v1163_v14  ;;  %v1042_v14 = vld [vmem:[%s1386_s22 + $0xd0] sm:$0xf] }
  0x29   : > { %620 = vmatpush.bf16.msra.mxu1 %v1171_v15  ;;  %1289 = vmatpush.bf16.msra.mxu3 %v1171_v15  ;;  %v1158_v15 = vld [vmem:[%s1386_s22 + $0xd4] sm:$0xf0] }
  0x2a   : > { %v1043_v21 = vor.u32 %v1158_v15, %v1042_v14 }
  0x2b   : > { %532 = vmatmul.bf16.vlgmr.msra.gmra.mxu0 %v939_v24  ;;  %572 = vmatmul.bf16.vlgmr.msra.gmra.mxu2 %v1003_v25  ;;  %v986_v24 = vld [vmem:[%s1386_s22 + $0x60] sm:$0xf]  ;;  %v1144_v25 = vld [vmem:[%s1386_s22 + $0x64] sm:$0xf0] }
  0x2c   : > { %621 = vmatmul.bf16.vlgmr.msra.gmra.mxu1 %v943_v26  ;;  %661 = vmatmul.bf16.vlgmr.msra.gmra.mxu3 %v1007_v27  ;;  %v1050_v26 = vld [vmem:[%s1386_s22 + $0xe0] sm:$0xf]  ;;  %v1160_v27 = vld [vmem:[%s1386_s22 + $0xe4] sm:$0xf0]  ;;  %v987_v32 = vor.u32 %v1144_v25, %v986_v24 }
  0x2d   : > { %v1051_v33 = vor.u32 %v1160_v27, %v1050_v26 }
  0x3b   : > { %537 = vmatmul.bf16.gmra.mxu0 %v947_v36  ;;  %577 = vmatmul.bf16.gmra.mxu2 %v1011_v37  ;;  %v994_v36 = vld [vmem:[%s1386_s22 + $0x70] sm:$0xf]  ;;  %v1146_v37 = vld [vmem:[%s1386_s22 + $0x74] sm:$0xf0] }
  0x3c   : > { %626 = vmatmul.bf16.gmra.mxu1 %v951_v38  ;;  %666 = vmatmul.bf16.gmra.mxu3 %v1015_v39  ;;  %v1058_v38 = vld [vmem:[%s1386_s22 + $0xf0] sm:$0xf]  ;;  %v1162_v39 = vld [vmem:[%s1386_s22 + $0xf4] sm:$0xf0]  ;;  %v995_v44 = vor.u32 %v1146_v37, %v994_v36 }
  0x3d   : > { %v1059_v45 = vor.u32 %v1162_v39, %v1058_v38 }
  0x4b   : > { %542 = vmatmul.bf16.gmra.mxu0 %v955_v48  ;;  %582 = vmatmul.bf16.gmra.mxu2 %v1019_v49 }
  0x4c   : > { %631 = vmatmul.bf16.gmra.mxu1 %v959_v50  ;;  %671 = vmatmul.bf16.gmra.mxu3 %v1023_v51  ;;  %v1464_v51 = vld [vmem:[%s1562_s2] ss:$0 sm:$0xff] }
  0x5b   : > { %547 = vmatmul.bf16.gmra.mxu0 %v963_v60  ;;  %587 = vmatmul.bf16.gmra.mxu2 %v1027_v61 }
  0x5c   : > { %636 = vmatmul.bf16.gmra.mxu1 %v967_v62  ;;  %676 = vmatmul.bf16.gmra.mxu3 %v1031_v63 }
  0x6b   : > { %552 = vmatmul.bf16.gmra.mxu0 %v971_v8  ;;  %592 = vmatmul.bf16.gmra.mxu2 %v1035_v9 }
  0x6c   : > { %641 = vmatmul.bf16.gmra.mxu1 %v975_v10  ;;  %681 = vmatmul.bf16.gmra.mxu3 %v1039_v11 }
  0x7b   : > { %557 = vmatmul.bf16.gmra.mxu0 %v979_v20  ;;  %597 = vmatmul.bf16.gmra.mxu2 %v1043_v21 }
  0x7c   : > { %646 = vmatmul.bf16.gmra.mxu1 %v983_v22  ;;  %686 = vmatmul.bf16.gmra.mxu3 %v1047_v23 }
  0x8b   : > { %562 = vmatmul.bf16.gmra.mxu0 %v987_v32  ;;  %602 = vmatmul.bf16.gmra.mxu2 %v1051_v33 }
  0x8c   : > { %651 = vmatmul.bf16.gmra.mxu1 %v991_v34  ;;  %691 = vmatmul.bf16.gmra.mxu3 %v1055_v35 }
  0x9b   : > { %567 = vmatmul.bf16.gmra.mxu0 %v995_v44  ;;  %607 = vmatmul.bf16.gmra.mxu2 %v1059_v45 }
  0x9c   : > { %656 = vmatmul.bf16.gmra.mxu1 %v999_v46  ;;  %696 = vmatmul.bf16.gmra.mxu3 %v1063_v47 }
  0xa8   : > { %v533_v48 = vpop.f32.mrf.mxu0 }
  0xa9   : > { %v622_v49 = vpop.f32.mrf.mxu1 }
  0xaa   : > { %v623_v50 = vadd.f32 %v622_v49, %v533_v48 }
  0xac   : > { %v706_v54 = vmul.f32 %v1464_v51, %v623_v50 }
  0xae   : > { %v573_v52 = vpop.f32.mrf.mxu2  ;;  %v742_v60 = vadd.f32 %v1470_v55, %v706_v54 }
  0xaf   : > { %v662_v53 = vpop.f32.mrf.mxu3 }
  0xb0   : > { %v535_v56 = vpop.f32.mrf.mxu0  ;;  %v663_v58 = vadd.f32 %v662_v53, %v573_v52  ;;  %v774_v2 = vmax.f32 %v742_v60, 0.0 }
  0xb1   : > { %v624_v57 = vpop.f32.mrf.mxu1 }
  0xb2   : > { %v625_v59 = vadd.f32 %v624_v57, %v535_v56  ;;  %v722_v62 = vmul.f32 %v1464_v51, %v663_v58 }
  0xb4   : > { %v707_v61 = vmul.f32 %v1464_v51, %v625_v59  ;;  %v758_v7 = vadd.f32 %v1470_v55, %v722_v62 }
  0xb6   : > { %v743_v63 = vadd.f32 %v1470_v55, %v707_v61  ;;  %v575_v0 = vpop.f32.mrf.mxu2  ;;  %v790_v12 = vmax.f32 %v758_v7, 0.0 }
  0xb7   : > { %v664_v1 = vpop.f32.mrf.mxu3 }
  0xb8   : > { %v775_v3 = vmax.f32 %v743_v63, 0.0  ;;  %v665_v4 = vadd.f32 %v664_v1, %v575_v0  ;;  %v538_v5 = vpop.f32.mrf.mxu0 }
  0xb9   : > { %v627_v6 = vpop.f32.mrf.mxu1 }
  0xba   : > { %v1182_v8 = vpack.c.bf16 %v775_v3, %v774_v2  ;;  %v723_v9 = vmul.f32 %v1464_v51, %v665_v4  ;;  %v628_v11 = vadd.f32 %v627_v6, %v538_v5 }
  0xbc   : > { %1183 = vst [vmem:[%s1480_s11] sm:$0xff] %v1182_v8   ;;  %v759_v10 = vadd.f32 %v1470_v55, %v723_v9  ;;  %v708_v17 = vmul.f32 %v1464_v51, %v628_v11 }
  0xbe   : > { %v791_v13 = vmax.f32 %v759_v10, 0.0  ;;  %v578_v14 = vpop.f32.mrf.mxu2  ;;  %v744_v22 = vadd.f32 %v1470_v55, %v708_v17 }
  0xbf   : > { %v667_v15 = vpop.f32.mrf.mxu3 }
  0xc0   : > { %v1222_v16 = vpack.c.bf16 %v791_v13, %v790_v12  ;;  %v540_v18 = vpop.f32.mrf.mxu0  ;;  %v668_v20 = vadd.f32 %v667_v15, %v578_v14  ;;  %v776_v28 = vmax.f32 %v744_v22, 0.0 }
  0xc1   : > { %v629_v19 = vpop.f32.mrf.mxu1 }
  0xc2   : > { %1266 = vst [vmem:[%s1480_s11 + $0x40] sm:$0xff] %v1222_v16   ;;  %v630_v21 = vadd.f32 %v629_v19, %v540_v18  ;;  %v724_v24 = vmul.f32 %v1464_v51, %v668_v20 }
  0xc4   : > { %v709_v23 = vmul.f32 %v1464_v51, %v630_v21  ;;  %v760_v33 = vadd.f32 %v1470_v55, %v724_v24 }
  0xc6   : > { %v745_v25 = vadd.f32 %v1470_v55, %v709_v23  ;;  %v580_v26 = vpop.f32.mrf.mxu2  ;;  %v792_v38 = vmax.f32 %v760_v33, 0.0 }
  0xc7   : > { %v669_v27 = vpop.f32.mrf.mxu3 }
  0xc8   : > { %v777_v29 = vmax.f32 %v745_v25, 0.0  ;;  %v670_v30 = vadd.f32 %v669_v27, %v580_v26  ;;  %v543_v31 = vpop.f32.mrf.mxu0 }
  0xc9   : > { %v632_v32 = vpop.f32.mrf.mxu1 }
  0xca   : > { %v1187_v34 = vpack.c.bf16 %v777_v29, %v776_v28  ;;  %v725_v35 = vmul.f32 %v1464_v51, %v670_v30  ;;  %v633_v37 = vadd.f32 %v632_v32, %v543_v31 }
  0xcc   : > { %1259 = vst [vmem:[%s1480_s11 + $0x8] sm:$0xff] %v1187_v34   ;;  %v761_v36 = vadd.f32 %v1470_v55, %v725_v35  ;;  %v710_v43 = vmul.f32 %v1464_v51, %v633_v37 }
  0xce   : > { %v793_v39 = vmax.f32 %v761_v36, 0.0  ;;  %v583_v40 = vpop.f32.mrf.mxu2  ;;  %v746_v48 = vadd.f32 %v1470_v55, %v710_v43 }
  0xcf   : > { %v672_v41 = vpop.f32.mrf.mxu3 }
  0xd0   : > { %v1227_v42 = vpack.c.bf16 %v793_v39, %v792_v38  ;;  %v545_v44 = vpop.f32.mrf.mxu0  ;;  %v673_v46 = vadd.f32 %v672_v41, %v583_v40  ;;  %v778_v56 = vmax.f32 %v746_v48, 0.0 }
  0xd1   : > { %v634_v45 = vpop.f32.mrf.mxu1 }
  0xd2   : > { %1267 = vst [vmem:[%s1480_s11 + $0x48] sm:$0xff] %v1227_v42   ;;  %v635_v47 = vadd.f32 %v634_v45, %v545_v44  ;;  %v726_v50 = vmul.f32 %v1464_v51, %v673_v46 }
  0xd4   : > { %v711_v49 = vmul.f32 %v1464_v51, %v635_v47  ;;  %v762_v61 = vadd.f32 %v1470_v55, %v726_v50 }
  0xd6   : > { %v747_v52 = vadd.f32 %v1470_v55, %v711_v49  ;;  %v585_v53 = vpop.f32.mrf.mxu2  ;;  %v794_v2 = vmax.f32 %v762_v61, 0.0 }
  0xd7   : > { %v674_v54 = vpop.f32.mrf.mxu3 }
  0xd8   : > { %v779_v57 = vmax.f32 %v747_v52, 0.0  ;;  %v675_v58 = vadd.f32 %v674_v54, %v585_v53  ;;  %v548_v59 = vpop.f32.mrf.mxu0 }
  0xd9   : > { %v637_v60 = vpop.f32.mrf.mxu1 }
  0xda   : > { %v1192_v62 = vpack.c.bf16 %v779_v57, %v778_v56  ;;  %v727_v63 = vmul.f32 %v1464_v51, %v675_v58  ;;  %v638_v1 = vadd.f32 %v637_v60, %v548_v59 }
  0xdc   : > { %1260 = vst [vmem:[%s1480_s11 + $0x10] sm:$0xff] %v1192_v62   ;;  %v763_v0 = vadd.f32 %v1470_v55, %v727_v63  ;;  %v712_v7 = vmul.f32 %v1464_v51, %v638_v1 }
  0xde   : > { %v795_v3 = vmax.f32 %v763_v0, 0.0  ;;  %v588_v4 = vpop.f32.mrf.mxu2  ;;  %v748_v12 = vadd.f32 %v1470_v55, %v712_v7 }
  0xdf   : > { %v677_v5 = vpop.f32.mrf.mxu3 }
  0xe0   : > { %v1232_v6 = vpack.c.bf16 %v795_v3, %v794_v2  ;;  %v550_v8 = vpop.f32.mrf.mxu0  ;;  %v678_v10 = vadd.f32 %v677_v5, %v588_v4  ;;  %v780_v18 = vmax.f32 %v748_v12, 0.0 }
  0xe1   : > { %v639_v9 = vpop.f32.mrf.mxu1 }
  0xe2   : > { %1268 = vst [vmem:[%s1480_s11 + $0x50] sm:$0xff] %v1232_v6   ;;  %v640_v11 = vadd.f32 %v639_v9, %v550_v8  ;;  %v728_v14 = vmul.f32 %v1464_v51, %v678_v10 }
  0xe4   : > { %v713_v13 = vmul.f32 %v1464_v51, %v640_v11  ;;  %v764_v23 = vadd.f32 %v1470_v55, %v728_v14 }
  0xe6   : > { %v749_v15 = vadd.f32 %v1470_v55, %v713_v13  ;;  %v590_v16 = vpop.f32.mrf.mxu2  ;;  %v796_v28 = vmax.f32 %v764_v23, 0.0 }
  0xe7   : > { %v679_v17 = vpop.f32.mrf.mxu3 }
  0xe8   : > { %v781_v19 = vmax.f32 %v749_v15, 0.0  ;;  %v680_v20 = vadd.f32 %v679_v17, %v590_v16  ;;  %v553_v21 = vpop.f32.mrf.mxu0 }
  0xe9   : > { %v642_v22 = vpop.f32.mrf.mxu1 }
  0xea   : > { %v1197_v24 = vpack.c.bf16 %v781_v19, %v780_v18  ;;  %v729_v25 = vmul.f32 %v1464_v51, %v680_v20  ;;  %v643_v27 = vadd.f32 %v642_v22, %v553_v21 }
  0xec   : > { %1261 = vst [vmem:[%s1480_s11 + $0x18] sm:$0xff] %v1197_v24   ;;  %v765_v26 = vadd.f32 %v1470_v55, %v729_v25  ;;  %v714_v33 = vmul.f32 %v1464_v51, %v643_v27 }
  0xee   : > { %v797_v29 = vmax.f32 %v765_v26, 0.0  ;;  %v593_v30 = vpop.f32.mrf.mxu2  ;;  %v750_v38 = vadd.f32 %v1470_v55, %v714_v33 }
  0xef   : > { %v682_v31 = vpop.f32.mrf.mxu3 }
  0xf0   : > { %v1237_v32 = vpack.c.bf16 %v797_v29, %v796_v28  ;;  %v555_v34 = vpop.f32.mrf.mxu0  ;;  %v683_v36 = vadd.f32 %v682_v31, %v593_v30  ;;  %v782_v44 = vmax.f32 %v750_v38, 0.0 }
  0xf1   : > { %v644_v35 = vpop.f32.mrf.mxu1 }
  0xf2   : > { %1269 = vst [vmem:[%s1480_s11 + $0x58] sm:$0xff] %v1237_v32   ;;  %v645_v37 = vadd.f32 %v644_v35, %v555_v34  ;;  %v730_v40 = vmul.f32 %v1464_v51, %v683_v36 }
  0xf4   : > { %v715_v39 = vmul.f32 %v1464_v51, %v645_v37  ;;  %v766_v49 = vadd.f32 %v1470_v55, %v730_v40 }
  0xf6   : > { %v751_v41 = vadd.f32 %v1470_v55, %v715_v39  ;;  %v595_v42 = vpop.f32.mrf.mxu2  ;;  %v798_v56 = vmax.f32 %v766_v49, 0.0 }
  0xf7   : > { %v684_v43 = vpop.f32.mrf.mxu3 }
  0xf8   : > { %v783_v45 = vmax.f32 %v751_v41, 0.0  ;;  %v685_v46 = vadd.f32 %v684_v43, %v595_v42  ;;  %v558_v47 = vpop.f32.mrf.mxu0 }
  0xf9   : > { %v647_v48 = vpop.f32.mrf.mxu1 }
  0xfa   : > { %v1202_v50 = vpack.c.bf16 %v783_v45, %v782_v44  ;;  %v731_v52 = vmul.f32 %v1464_v51, %v685_v46  ;;  %v648_v54 = vadd.f32 %v647_v48, %v558_v47 }
  0xfc   : > { %1262 = vst [vmem:[%s1480_s11 + $0x20] sm:$0xff] %v1202_v50   ;;  %v767_v53 = vadd.f32 %v1470_v55, %v731_v52  ;;  %v716_v61 = vmul.f32 %v1464_v51, %v648_v54 }
  0xfe   : > { %v799_v57 = vmax.f32 %v767_v53, 0.0  ;;  %v598_v58 = vpop.f32.mrf.mxu2  ;;  %v752_v2 = vadd.f32 %v1470_v55, %v716_v61 }
  0xff   : > { %v687_v59 = vpop.f32.mrf.mxu3 }
 0x100   : > { %v1242_v60 = vpack.c.bf16 %v799_v57, %v798_v56  ;;  %v560_v62 = vpop.f32.mrf.mxu0  ;;  %v688_v0 = vadd.f32 %v687_v59, %v598_v58  ;;  %v784_v8 = vmax.f32 %v752_v2, 0.0 }
 0x101   : > { %v649_v63 = vpop.f32.mrf.mxu1 }
 0x102   : > { %1270 = vst [vmem:[%s1480_s11 + $0x60] sm:$0xff] %v1242_v60   ;;  %v650_v1 = vadd.f32 %v649_v63, %v560_v62  ;;  %v732_v4 = vmul.f32 %v1464_v51, %v688_v0 }
 0x104   : > { %v717_v3 = vmul.f32 %v1464_v51, %v650_v1  ;;  %v768_v13 = vadd.f32 %v1470_v55, %v732_v4 }
 0x106   : > { %v753_v5 = vadd.f32 %v1470_v55, %v717_v3  ;;  %v600_v6 = vpop.f32.mrf.mxu2  ;;  %v800_v18 = vmax.f32 %v768_v13, 0.0 }
 0x107   : > { %v689_v7 = vpop.f32.mrf.mxu3 }
 0x108   : > { %v785_v9 = vmax.f32 %v753_v5, 0.0  ;;  %v690_v10 = vadd.f32 %v689_v7, %v600_v6  ;;  %v563_v11 = vpop.f32.mrf.mxu0 }
 0x109   : > { %v652_v12 = vpop.f32.mrf.mxu1 }
 0x10a   : > { %v1207_v14 = vpack.c.bf16 %v785_v9, %v784_v8  ;;  %v733_v15 = vmul.f32 %v1464_v51, %v690_v10  ;;  %v653_v17 = vadd.f32 %v652_v12, %v563_v11 }
 0x10c   : > { %1263 = vst [vmem:[%s1480_s11 + $0x28] sm:$0xff] %v1207_v14   ;;  %v769_v16 = vadd.f32 %v1470_v55, %v733_v15  ;;  %v718_v23 = vmul.f32 %v1464_v51, %v653_v17 }
 0x10e   : > { %v801_v19 = vmax.f32 %v769_v16, 0.0  ;;  %v603_v20 = vpop.f32.mrf.mxu2  ;;  %v754_v28 = vadd.f32 %v1470_v55, %v718_v23 }
 0x10f   : > { %v692_v21 = vpop.f32.mrf.mxu3 }
 0x110   : > { %v1247_v22 = vpack.c.bf16 %v801_v19, %v800_v18  ;;  %v565_v24 = vpop.f32.mrf.mxu0  ;;  %v693_v26 = vadd.f32 %v692_v21, %v603_v20  ;;  %v786_v34 = vmax.f32 %v754_v28, 0.0 }
 0x111   : > { %v654_v25 = vpop.f32.mrf.mxu1 }
 0x112   : > { %1271 = vst [vmem:[%s1480_s11 + $0x68] sm:$0xff] %v1247_v22   ;;  %v655_v27 = vadd.f32 %v654_v25, %v565_v24  ;;  %v734_v30 = vmul.f32 %v1464_v51, %v693_v26 }
 0x114   : > { %v719_v29 = vmul.f32 %v1464_v51, %v655_v27  ;;  %v770_v39 = vadd.f32 %v1470_v55, %v734_v30 }
 0x116   : > { %v755_v31 = vadd.f32 %v1470_v55, %v719_v29  ;;  %v605_v32 = vpop.f32.mrf.mxu2  ;;  %v802_v44 = vmax.f32 %v770_v39, 0.0 }
 0x117   : > { %v694_v33 = vpop.f32.mrf.mxu3 }
 0x118   : > { %v787_v35 = vmax.f32 %v755_v31, 0.0  ;;  %v695_v36 = vadd.f32 %v694_v33, %v605_v32  ;;  %v568_v37 = vpop.f32.mrf.mxu0 }
 0x119   : > { %v657_v38 = vpop.f32.mrf.mxu1 }
 0x11a   : > { %v1212_v40 = vpack.c.bf16 %v787_v35, %v786_v34  ;;  %v735_v41 = vmul.f32 %v1464_v51, %v695_v36  ;;  %v658_v43 = vadd.f32 %v657_v38, %v568_v37 }
 0x11c   : > { %1264 = vst [vmem:[%s1480_s11 + $0x30] sm:$0xff] %v1212_v40   ;;  %v771_v42 = vadd.f32 %v1470_v55, %v735_v41  ;;  %v720_v49 = vmul.f32 %v1464_v51, %v658_v43 }
 0x11e   : > { %v803_v45 = vmax.f32 %v771_v42, 0.0  ;;  %v608_v46 = vpop.f32.mrf.mxu2  ;;  %v756_v56 = vadd.f32 %v1470_v55, %v720_v49 }
 0x11f   : > { %v697_v47 = vpop.f32.mrf.mxu3 }
 0x120   : > { %v1252_v48 = vpack.c.bf16 %v803_v45, %v802_v44  ;;  %v570_v50 = vpop.f32.mrf.mxu0  ;;  %v698_v53 = vadd.f32 %v697_v47, %v608_v46  ;;  %v788_v62 = vmax.f32 %v756_v56, 0.0 }
 0x121   : > { %v659_v52 = vpop.f32.mrf.mxu1 }
 0x122   : > { %1272 = vst [vmem:[%s1480_s11 + $0x70] sm:$0xff] %v1252_v48   ;;  %v660_v54 = vadd.f32 %v659_v52, %v570_v50  ;;  %v736_v58 = vmul.f32 %v1464_v51, %v698_v53 }
 0x124   : > { %v721_v57 = vmul.f32 %v1464_v51, %v660_v54  ;;  %v772_v1 = vadd.f32 %v1470_v55, %v736_v58 }
 0x126   : > { %v757_v59 = vadd.f32 %v1470_v55, %v721_v57  ;;  %v610_v60 = vpop.f32.mrf.mxu2  ;;  %v804_v5 = vmax.f32 %v772_v1, 0.0 }
 0x127   : > { %v699_v61 = vpop.f32.mrf.mxu3 }
 0x128   : > { %v789_v63 = vmax.f32 %v757_v59, 0.0  ;;  %v700_v0 = vadd.f32 %v699_v61, %v610_v60 }
 0x12a   : > { %v1217_v2 = vpack.c.bf16 %v789_v63, %v788_v62  ;;  %v737_v3 = vmul.f32 %v1464_v51, %v700_v0 }
 0x12c   : > { %1265 = vst [vmem:[%s1480_s11 + $0x38] sm:$0xff] %v1217_v2   ;;  %v773_v4 = vadd.f32 %v1470_v55, %v737_v3 }
 0x12e   : > { %v805_v6 = vmax.f32 %v773_v4, 0.0 }
 0x130   : > { %v1257_v7 = vpack.c.bf16 %v805_v6, %v804_v5 }
 0x132   : > { %1273 = vst [vmem:[%s1480_s11 + $0x78] sm:$0xff] %v1257_v7  }
 0x133 PF: > { %s14_s15 = sadd.s32 1, %s1306_s15  }
 0x134   : > { %p11_p4 = scmp.ge.s32.totalorder %s14_s15, 4  }
 0x136   :  { %13 = sbr.rel (!%p11_p4) target bundleno = 1 (0x1), region = 66 }

// kernel: branch_conv_forward.5
= control target key start
LH: loop header
LB: loop body
LE: loop exit
PB: predicated region body
PF: predicated region fallthrough
CT: control target
= control target key end

     0   :  { %s1890_s1 = inlined_call_operand.vmem [shape: bf16[640,128], index: 1, kind: input, shape index: {}]   ;;  %s1891_s0 = inlined_call_operand.vmem [shape: bf16[128,640], index: 0, kind: input, shape index: {}]   ;;  %s1892_s2 = inlined_call_operand.vmem [shape: f32[1,128], index: 2, kind: input, shape index: {}]   ;;  %s1893_s3 = inlined_call_operand.vmem [shape: f32[1,128], index: 3, kind: input, shape index: {}]   ;;  %s1894_s4 = inlined_call_operand.vmem [shape: bf16[128,128], index: 4, kind: output, shape index: {}]  }
   0x1   :  { %v1297_v0 = vld [vmem:[%s1890_s1 + $0x38] sm:$0xff]  ;;  %v1296_v1 = vld [vmem:[%s1890_s1 + $0x30] sm:$0xff]  ;;  %v1295_v2 = vld [vmem:[%s1890_s1 + $0x28] sm:$0xff] }
   0x2   :  { %1377 = vmatpush.bf16.msra.mxu1 %v1297_v0  ;;  %1378 = vmatpush.bf16.msra.mxu2 %v1297_v0  ;;  %v1294_v3 = vld [vmem:[%s1890_s1 + $0x20] sm:$0xff]  ;;  %v1293_v4 = vld [vmem:[%s1890_s1 + $0x18] sm:$0xff]  ;;  %v1292_v5 = vld [vmem:[%s1890_s1 + $0x10] sm:$0xff] }
   0x3   :  { %1379 = vmatpush.bf16.msra.mxu3 %v1297_v0  ;;  %593 = vmatpush.bf16.msra.mxu0 %v1297_v0  ;;  %v1291_v6 = vld [vmem:[%s1890_s1 + $0x8] sm:$0xff]  ;;  %v1290_v7 = vld [vmem:[%s1890_s1] sm:$0xff]  ;;  %v972_v8 = vld [vmem:[%s1891_s0 + $0x50] sm:$0xf] }
   0x4   :  { %v1262_v9 = vld [vmem:[%s1891_s0 + $0x60] sm:$0xf0]  ;;  %v1012_v10 = vld [vmem:[%s1891_s0 + $0xa0] sm:$0xf]  ;;  %v1272_v11 = vld [vmem:[%s1891_s0 + $0xb0] sm:$0xf0] }
   0x5   :  { %v1052_v12 = vld [vmem:[%s1891_s0 + $0xf0] sm:$0xf]  ;;  %v1282_v13 = vld [vmem:[%s1891_s0 + $0x100] sm:$0xf0]  ;;  %v932_v14 = vld [vmem:[%s1891_s0] sm:$0xf]  ;;  %v973_v18 = vor.u32 %v1262_v9, %v972_v8  ;;  %v1013_v19 = vor.u32 %v1272_v11, %v1012_v10 }
   0x6   :  { %1380 = vmatpush.bf16.msra.mxu1 %v1296_v1  ;;  %1381 = vmatpush.bf16.msra.mxu2 %v1296_v1  ;;  %v1252_v15 = vld [vmem:[%s1891_s0 + $0x10] sm:$0xf0]  ;;  %v1313_v16 = vld [vmem:[%s1890_s1 + $0xb8] sm:$0xff]  ;;  %v1053_v20 = vor.u32 %v1282_v13, %v1052_v12  ;;  %v1311_v28 = vld [vmem:[%s1890_s1 + $0xa8] sm:$0xff] }
   0x7   :  { %1382 = vmatpush.bf16.msra.mxu3 %v1296_v1  ;;  %594 = vmatpush.bf16.msra.mxu0 %v1296_v1  ;;  %v1305_v17 = vld [vmem:[%s1890_s1 + $0x78] sm:$0xff]  ;;  %v933_v21 = vor.u32 %v1252_v15, %v932_v14  ;;  %v1312_v24 = vld [vmem:[%s1890_s1 + $0xb0] sm:$0xff]  ;;  %v1303_v29 = vld [vmem:[%s1890_s1 + $0x68] sm:$0xff] }
   0x8   :  { %v1321_v22 = vld [vmem:[%s1890_s1 + $0xf8] sm:$0xff]  ;;  %v1304_v25 = vld [vmem:[%s1890_s1 + $0x70] sm:$0xff]  ;;  %v1319_v30 = vld [vmem:[%s1890_s1 + $0xe8] sm:$0xff] }
   0x9   :  { %v1329_v23 = vld [vmem:[%s1890_s1 + $0x138] sm:$0xff]  ;;  %v1320_v26 = vld [vmem:[%s1890_s1 + $0xf0] sm:$0xff]  ;;  %v1327_v31 = vld [vmem:[%s1890_s1 + $0x128] sm:$0xff] }
   0xa   :  { %1383 = vmatpush.bf16.msra.mxu1 %v1295_v2  ;;  %1384 = vmatpush.bf16.msra.mxu2 %v1295_v2  ;;  %v1328_v27 = vld [vmem:[%s1890_s1 + $0x130] sm:$0xff]  ;;  %v1310_v32 = vld [vmem:[%s1890_s1 + $0xa0] sm:$0xff]  ;;  %v992_v36 = vld [vmem:[%s1891_s0 + $0x78] sm:$0xf] }
   0xb   :  { %1385 = vmatpush.bf16.msra.mxu3 %v1295_v2  ;;  %595 = vmatpush.bf16.msra.mxu0 %v1295_v2  ;;  %v1302_v33 = vld [vmem:[%s1890_s1 + $0x60] sm:$0xff]  ;;  %v1267_v37 = vld [vmem:[%s1891_s0 + $0x88] sm:$0xf0]  ;;  %v1032_v38 = vld [vmem:[%s1891_s0 + $0xc8] sm:$0xf] }
   0xc   :  { %v1318_v34 = vld [vmem:[%s1890_s1 + $0xe0] sm:$0xff]  ;;  %v1277_v39 = vld [vmem:[%s1891_s0 + $0xd8] sm:$0xf0]  ;;  %v1072_v40 = vld [vmem:[%s1891_s0 + $0x118] sm:$0xf]  ;;  %v993_v46 = vor.u32 %v1267_v37, %v992_v36 }
   0xd   :  { %v1326_v35 = vld [vmem:[%s1890_s1 + $0x120] sm:$0xff]  ;;  %v1287_v41 = vld [vmem:[%s1891_s0 + $0x128] sm:$0xf0]  ;;  %v952_v42 = vld [vmem:[%s1891_s0 + $0x28] sm:$0xf]  ;;  %v1033_v47 = vor.u32 %v1277_v39, %v1032_v38 }
   0xe   :  { %1386 = vmatpush.bf16.msra.mxu1 %v1294_v3  ;;  %1387 = vmatpush.bf16.msra.mxu2 %v1294_v3  ;;  %v1257_v43 = vld [vmem:[%s1891_s0 + $0x38] sm:$0xf0]  ;;  %v1073_v48 = vor.u32 %v1287_v41, %v1072_v40  ;;  %v1308_v52 = vld [vmem:[%s1890_s1 + $0x90] sm:$0xff]  ;;  %v1307_v56 = vld [vmem:[%s1890_s1 + $0x88] sm:$0xff] }
   0xf   :  { %1388 = vmatpush.bf16.msra.mxu3 %v1294_v3  ;;  %596 = vmatpush.bf16.msra.mxu0 %v1294_v3  ;;  %v1309_v44 = vld [vmem:[%s1890_s1 + $0x98] sm:$0xff]  ;;  %v953_v49 = vor.u32 %v1257_v43, %v952_v42  ;;  %v1300_v53 = vld [vmem:[%s1890_s1 + $0x50] sm:$0xff]  ;;  %v1299_v57 = vld [vmem:[%s1890_s1 + $0x48] sm:$0xff] }
  0x10   :  { %v1301_v45 = vld [vmem:[%s1890_s1 + $0x58] sm:$0xff]  ;;  %v1316_v54 = vld [vmem:[%s1890_s1 + $0xd0] sm:$0xff]  ;;  %v1315_v58 = vld [vmem:[%s1890_s1 + $0xc8] sm:$0xff] }
  0x11   :  { %v1317_v50 = vld [vmem:[%s1890_s1 + $0xd8] sm:$0xff]  ;;  %v1324_v55 = vld [vmem:[%s1890_s1 + $0x110] sm:$0xff]  ;;  %v1323_v59 = vld [vmem:[%s1890_s1 + $0x108] sm:$0xff] }
  0x12   :  { %1389 = vmatpush.bf16.msra.mxu1 %v1293_v4  ;;  %1390 = vmatpush.bf16.msra.mxu2 %v1293_v4  ;;  %v1325_v51 = vld [vmem:[%s1890_s1 + $0x118] sm:$0xff]  ;;  %v1306_v60 = vld [vmem:[%s1890_s1 + $0x80] sm:$0xff]  ;;  %v940_v2 = vld [vmem:[%s1891_s0 + $0x8] sm:$0xf] }
  0x13   :  { %1391 = vmatpush.bf16.msra.mxu3 %v1293_v4  ;;  %597 = vmatpush.bf16.msra.mxu0 %v1293_v4  ;;  %v1298_v61 = vld [vmem:[%s1890_s1 + $0x40] sm:$0xff]  ;;  %v934_v1 = vld [vmem:[%s1891_s0 + $0x14] sm:$0xf0]  ;;  %v1253_v3 = vld [vmem:[%s1891_s0 + $0x18] sm:$0xf0] }
  0x14   :  { %v1314_v62 = vld [vmem:[%s1890_s1 + $0xc0] sm:$0xff]  ;;  %v1251_v4 = vld [vmem:[%s1891_s0 + $0xc] sm:$0xf]  ;;  %v941_v9 = vor.u32 %v1253_v3, %v940_v2  ;;  %v960_v14 = vld [vmem:[%s1891_s0 + $0x30] sm:$0xf] }
  0x15   :  { %v1322_v63 = vld [vmem:[%s1890_s1 + $0x100] sm:$0xff]  ;;  %v1255_v12 = vld [vmem:[%s1891_s0 + $0x2c] sm:$0xf]  ;;  %v1265_v36 = vld [vmem:[%s1891_s0 + $0x7c] sm:$0xf] }
  0x16   :  { %1392 = vmatpush.bf16.msra.mxu1 %v1292_v5  ;;  %1393 = vmatpush.bf16.msra.mxu2 %v1292_v5  ;;  %v1250_v0 = vld [vmem:[%s1891_s0 + $0x4] sm:$0xf]  ;;  %v954_v13 = vld [vmem:[%s1891_s0 + $0x3c] sm:$0xf0]  ;;  %v994_v37 = vld [vmem:[%s1891_s0 + $0x8c] sm:$0xf0] }
  0x17   :  { %1394 = vmatpush.bf16.msra.mxu3 %v1292_v5  ;;  %598 = vmatpush.bf16.msra.mxu0 %v1292_v5  ;;  %v942_v5 = vld [vmem:[%s1891_s0 + $0x1c] sm:$0xf0]  ;;  %v937_v8 = vor.u32 %v1250_v0, %v934_v1  ;;  %v1258_v15 = vld [vmem:[%s1891_s0 + $0x40] sm:$0xf0]  ;;  %v1268_v39 = vld [vmem:[%s1891_s0 + $0x90] sm:$0xf0] }
  0x18   :  { %v945_v10 = vor.u32 %v1251_v4, %v942_v5  ;;  %v1000_v38 = vld [vmem:[%s1891_s0 + $0x80] sm:$0xf]  ;;  %v1266_v40 = vld [vmem:[%s1891_s0 + $0x84] sm:$0xf]  ;;  %v1002_v41 = vld [vmem:[%s1891_s0 + $0x94] sm:$0xf0] }
  0x19   :  { %v1008_v42 = vld [vmem:[%s1891_s0 + $0x88] sm:$0xf]  ;;  %v1269_v43 = vld [vmem:[%s1891_s0 + $0x98] sm:$0xf0]  ;;  %v1276_v0 = vld [vmem:[%s1891_s0 + $0xd4] sm:$0xf] }
  0x1a   :  { %1395 = vmatpush.bf16.msra.mxu1 %v1291_v6  ;;  %1396 = vmatpush.bf16.msra.mxu2 %v1291_v6  ;;  %v1042_v1 = vld [vmem:[%s1891_s0 + $0xe4] sm:$0xf0]  ;;  %v1048_v2 = vld [vmem:[%s1891_s0 + $0xd8] sm:$0xf]  ;;  %v1279_v3 = vld [vmem:[%s1891_s0 + $0xe8] sm:$0xf0] }
  0x1b   :  { %1397 = vmatpush.bf16.msra.mxu3 %v1291_v6  ;;  %599 = vmatpush.bf16.msra.mxu0 %v1291_v6  ;;  %v948_v6 = vld [vmem:[%s1891_s0 + $0x10] sm:$0xf] }
  0x1e   :  { %1398 = vmatpush.bf16.msra.mxu1 %v1290_v7  ;;  %1399 = vmatpush.bf16.msra.mxu2 %v1290_v7 }
  0x1f   :  { %1400 = vmatpush.bf16.msra.mxu3 %v1290_v7  ;;  %600 = vmatpush.bf16.msra.mxu0 %v1290_v7  ;;  %v1254_v7 = vld [vmem:[%s1891_s0 + $0x20] sm:$0xf0] }
  0x20   :  { %v949_v11 = vor.u32 %v1254_v7, %v948_v6  ;;  %v1045_v6 = vor.u32 %v1276_v0, %v1042_v1  ;;  %v1049_v7 = vor.u32 %v1279_v3, %v1048_v2  ;;  %v1821_v1 = vld [vmem:[%s1893_s3] ss:$0 sm:$0xff] }
  0x21   :  { %611 = vmatmul.bf16.vlgmr.msra.gmra.mxu1 %v973_v18  ;;  %621 = vmatmul.bf16.vlgmr.msra.gmra.mxu2 %v1013_v19  ;;  %v968_v18 = vld [vmem:[%s1891_s0 + $0x38] sm:$0xf]  ;;  %v1259_v19 = vld [vmem:[%s1891_s0 + $0x48] sm:$0xf0] }
  0x22   :  { %691 = vmatpush.bf16.msrb.mxu2 %v1313_v16  ;;  %642 = vmatpush.bf16.msrb.mxu1 %v1305_v17  ;;  %v1256_v16 = vld [vmem:[%s1891_s0 + $0x34] sm:$0xf]  ;;  %v962_v17 = vld [vmem:[%s1891_s0 + $0x44] sm:$0xf0] }
  0x23   :  { %631 = vmatmul.bf16.vlgmr.msra.gmra.mxu3 %v1053_v20  ;;  %601 = vmatmul.bf16.vlgmr.msra.gmra.mxu0 %v933_v21  ;;  %v957_v20 = vor.u32 %v1255_v12, %v954_v13  ;;  %v961_v21 = vor.u32 %v1258_v15, %v960_v14  ;;  %v1281_v12 = vld [vmem:[%s1891_s0 + $0xfc] sm:$0xf]  ;;  %v1062_v13 = vld [vmem:[%s1891_s0 + $0x10c] sm:$0xf0]  ;;  %v1068_v14 = vld [vmem:[%s1891_s0 + $0x100] sm:$0xf] }
  0x24   :  { %740 = vmatpush.bf16.msrb.mxu3 %v1321_v22  ;;  %789 = vmatpush.bf16.msrb.mxu0 %v1329_v23  ;;  %v965_v22 = vor.u32 %v1256_v16, %v962_v17  ;;  %v969_v23 = vor.u32 %v1259_v19, %v968_v18  ;;  %v1284_v15 = vld [vmem:[%s1891_s0 + $0x110] sm:$0xf0]  ;;  %v1065_v19 = vor.u32 %v1281_v12, %v1062_v13 }
  0x26   :  { %692 = vmatpush.bf16.msrb.mxu2 %v1312_v24  ;;  %643 = vmatpush.bf16.msrb.mxu1 %v1304_v25  ;;  %v1260_v24 = vld [vmem:[%s1891_s0 + $0x54] sm:$0xf]  ;;  %v974_v25 = vld [vmem:[%s1891_s0 + $0x64] sm:$0xf0] }
  0x28   :  { %741 = vmatpush.bf16.msrb.mxu3 %v1320_v26  ;;  %790 = vmatpush.bf16.msrb.mxu0 %v1328_v27  ;;  %v980_v26 = vld [vmem:[%s1891_s0 + $0x58] sm:$0xf]  ;;  %v1263_v27 = vld [vmem:[%s1891_s0 + $0x68] sm:$0xf0] }
  0x2a   :  { %693 = vmatpush.bf16.msrb.mxu2 %v1311_v28  ;;  %644 = vmatpush.bf16.msrb.mxu1 %v1303_v29  ;;  %v1261_v28 = vld [vmem:[%s1891_s0 + $0x5c] sm:$0xf]  ;;  %v982_v29 = vld [vmem:[%s1891_s0 + $0x6c] sm:$0xf0] }
  0x2c   :  { %742 = vmatpush.bf16.msrb.mxu3 %v1319_v30  ;;  %791 = vmatpush.bf16.msrb.mxu0 %v1327_v31  ;;  %v988_v30 = vld [vmem:[%s1891_s0 + $0x60] sm:$0xf]  ;;  %v1264_v31 = vld [vmem:[%s1891_s0 + $0x70] sm:$0xf0] }
  0x2e   :  { %694 = vmatpush.bf16.msrb.mxu2 %v1310_v32  ;;  %645 = vmatpush.bf16.msrb.mxu1 %v1302_v33  ;;  %v977_v32 = vor.u32 %v1260_v24, %v974_v25  ;;  %v981_v33 = vor.u32 %v1263_v27, %v980_v26  ;;  %v1285_v26 = vld [vmem:[%s1891_s0 + $0x11c] sm:$0xf]  ;;  %v1074_v27 = vld [vmem:[%s1891_s0 + $0x12c] sm:$0xf0] }
  0x30   :  { %743 = vmatpush.bf16.msrb.mxu3 %v1318_v34  ;;  %792 = vmatpush.bf16.msrb.mxu0 %v1326_v35  ;;  %v985_v34 = vor.u32 %v1261_v28, %v982_v29  ;;  %v989_v35 = vor.u32 %v1264_v31, %v988_v30  ;;  %v1080_v28 = vld [vmem:[%s1891_s0 + $0x120] sm:$0xf]  ;;  %v1288_v29 = vld [vmem:[%s1891_s0 + $0x130] sm:$0xf0]  ;;  %v1286_v30 = vld [vmem:[%s1891_s0 + $0x124] sm:$0xf] }
  0x31   :  { %616 = vmatmul.bf16.gmra.mxu1 %v993_v46  ;;  %626 = vmatmul.bf16.gmra.mxu2 %v1033_v47  ;;  %v1005_v46 = vor.u32 %v1266_v40, %v1002_v41  ;;  %v1009_v47 = vor.u32 %v1269_v43, %v1008_v42  ;;  %v1082_v31 = vld [vmem:[%s1891_s0 + $0x134] sm:$0xf0] }
  0x32   :  { %695 = vmatpush.bf16.msrb.mxu2 %v1309_v44  ;;  %646 = vmatpush.bf16.msrb.mxu1 %v1301_v45  ;;  %v997_v44 = vor.u32 %v1265_v36, %v994_v37  ;;  %v1001_v45 = vor.u32 %v1268_v39, %v1000_v38  ;;  %v1077_v36 = vor.u32 %v1285_v26, %v1074_v27 }
  0x33   :  { %636 = vmatmul.bf16.gmra.mxu3 %v1073_v48  ;;  %606 = vmatmul.bf16.gmra.mxu0 %v953_v49  ;;  %v1270_v48 = vld [vmem:[%s1891_s0 + $0xa4] sm:$0xf]  ;;  %v1014_v49 = vld [vmem:[%s1891_s0 + $0xb4] sm:$0xf0]  ;;  %v1081_v37 = vor.u32 %v1288_v29, %v1080_v28  ;;  %v1085_v39 = vor.u32 %v1286_v30, %v1082_v31 }
  0x34   :  { %744 = vmatpush.bf16.msrb.mxu3 %v1317_v50  ;;  %793 = vmatpush.bf16.msrb.mxu0 %v1325_v51  ;;  %v1020_v50 = vld [vmem:[%s1891_s0 + $0xa8] sm:$0xf]  ;;  %v1273_v51 = vld [vmem:[%s1891_s0 + $0xb8] sm:$0xf0] }
  0x36   :  { %696 = vmatpush.bf16.msrb.mxu2 %v1308_v52  ;;  %647 = vmatpush.bf16.msrb.mxu1 %v1300_v53  ;;  %v1271_v52 = vld [vmem:[%s1891_s0 + $0xac] sm:$0xf]  ;;  %v1022_v53 = vld [vmem:[%s1891_s0 + $0xbc] sm:$0xf0] }
  0x38   :  { %745 = vmatpush.bf16.msrb.mxu3 %v1316_v54  ;;  %794 = vmatpush.bf16.msrb.mxu0 %v1324_v55  ;;  %v1028_v54 = vld [vmem:[%s1891_s0 + $0xb0] sm:$0xf]  ;;  %v1274_v55 = vld [vmem:[%s1891_s0 + $0xc0] sm:$0xf0] }
  0x3a   :  { %697 = vmatpush.bf16.msrb.mxu2 %v1307_v56  ;;  %648 = vmatpush.bf16.msrb.mxu1 %v1299_v57  ;;  %v1017_v56 = vor.u32 %v1270_v48, %v1014_v49  ;;  %v1021_v57 = vor.u32 %v1273_v51, %v1020_v50 }
  0x3c   :  { %746 = vmatpush.bf16.msrb.mxu3 %v1315_v58  ;;  %795 = vmatpush.bf16.msrb.mxu0 %v1323_v59  ;;  %v1025_v58 = vor.u32 %v1271_v52, %v1022_v53  ;;  %v1029_v59 = vor.u32 %v1274_v55, %v1028_v54 }
  0x3e   :  { %698 = vmatpush.bf16.msrb.mxu2 %v1306_v60  ;;  %649 = vmatpush.bf16.msrb.mxu1 %v1298_v61  ;;  %v1275_v60 = vld [vmem:[%s1891_s0 + $0xcc] sm:$0xf]  ;;  %v1034_v61 = vld [vmem:[%s1891_s0 + $0xdc] sm:$0xf0] }
  0x3f   :  { %v1037_v4 = vor.u32 %v1275_v60, %v1034_v61 }
  0x40   :  { %747 = vmatpush.bf16.msrb.mxu3 %v1314_v62  ;;  %796 = vmatpush.bf16.msrb.mxu0 %v1322_v63  ;;  %v1040_v62 = vld [vmem:[%s1891_s0 + $0xd0] sm:$0xf]  ;;  %v1278_v63 = vld [vmem:[%s1891_s0 + $0xe0] sm:$0xf0] }
  0x41   :  { %650 = vmatmul.bf16.vlgmr.msrb.gmra.mxu1 %v937_v8  ;;  %699 = vmatmul.bf16.vlgmr.msrb.gmra.mxu2 %v941_v9  ;;  %v1041_v5 = vor.u32 %v1278_v63, %v1040_v62  ;;  %v1280_v8 = vld [vmem:[%s1891_s0 + $0xf4] sm:$0xf]  ;;  %v1054_v9 = vld [vmem:[%s1891_s0 + $0x104] sm:$0xf0] }
  0x42   :  { %v1057_v16 = vor.u32 %v1280_v8, %v1054_v9 }
  0x43   :  { %748 = vmatmul.bf16.vlgmr.msrb.gmra.mxu3 %v945_v10  ;;  %797 = vmatmul.bf16.vlgmr.msrb.gmra.mxu0 %v949_v11  ;;  %v1060_v10 = vld [vmem:[%s1891_s0 + $0xf8] sm:$0xf]  ;;  %v1283_v11 = vld [vmem:[%s1891_s0 + $0x108] sm:$0xf0] }
  0x44   :  { %v1061_v17 = vor.u32 %v1283_v11, %v1060_v10 }
  0x51   :  { %655 = vmatmul.bf16.gmra.mxu1 %v957_v20  ;;  %704 = vmatmul.bf16.gmra.mxu2 %v961_v21  ;;  %v1069_v20 = vor.u32 %v1284_v15, %v1068_v14 }
  0x53   :  { %753 = vmatmul.bf16.gmra.mxu3 %v965_v22  ;;  %802 = vmatmul.bf16.gmra.mxu0 %v969_v23 }
  0x61   :  { %660 = vmatmul.bf16.gmra.mxu1 %v977_v32  ;;  %709 = vmatmul.bf16.gmra.mxu2 %v981_v33  ;;  %v1088_v32 = vld [vmem:[%s1891_s0 + $0x128] sm:$0xf]  ;;  %v1289_v33 = vld [vmem:[%s1891_s0 + $0x138] sm:$0xf0] }
  0x62   :  { %v1089_v40 = vor.u32 %v1289_v33, %v1088_v32 }
  0x63   :  { %758 = vmatmul.bf16.gmra.mxu3 %v985_v34  ;;  %807 = vmatmul.bf16.gmra.mxu0 %v989_v35 }
  0x71   :  { %665 = vmatmul.bf16.gmra.mxu1 %v997_v44  ;;  %714 = vmatmul.bf16.gmra.mxu2 %v1001_v45 }
  0x73   :  { %763 = vmatmul.bf16.gmra.mxu3 %v1005_v46  ;;  %812 = vmatmul.bf16.gmra.mxu0 %v1009_v47 }
  0x81   :  { %670 = vmatmul.bf16.gmra.mxu1 %v1017_v56  ;;  %719 = vmatmul.bf16.gmra.mxu2 %v1021_v57 }
  0x83   :  { %768 = vmatmul.bf16.gmra.mxu3 %v1025_v58  ;;  %817 = vmatmul.bf16.gmra.mxu0 %v1029_v59  ;;  %v1815_v58 = vld [vmem:[%s1892_s2] ss:$0 sm:$0xff] }
  0x91   :  { %675 = vmatmul.bf16.gmra.mxu1 %v1037_v4  ;;  %724 = vmatmul.bf16.gmra.mxu2 %v1041_v5 }
  0x93   :  { %773 = vmatmul.bf16.gmra.mxu3 %v1045_v6  ;;  %822 = vmatmul.bf16.gmra.mxu0 %v1049_v7 }
  0x9e   :  { %v1764_v18 = vpop.f32.mrf.mxu1 }
  0xa0   :  { %v602_v21 = vpop.f32.mrf.mxu0 }
  0xa1   :  { %680 = vmatmul.bf16.gmra.mxu1 %v1057_v16  ;;  %729 = vmatmul.bf16.gmra.mxu2 %v1061_v17 }
  0xa3   :  { %778 = vmatmul.bf16.gmra.mxu3 %v1065_v19  ;;  %827 = vmatmul.bf16.gmra.mxu0 %v1069_v20 }
  0xa4   :  { %v1766_v22 = vpop.f32.mrf.mxu2 }
  0xa6   :  { %v1768_v23 = vpop.f32.mrf.mxu3  ;;  %v1770_v24 = vpop.f32.mrf.mxu1 }
  0xa8   :  { %v604_v25 = vpop.f32.mrf.mxu0 }
  0xac   :  { %v1796_v34 = vpop.f32.mrf.mxu2 }
  0xae   :  { %v1798_v35 = vpop.f32.mrf.mxu3  ;;  %v1800_v38 = vpop.f32.mrf.mxu1 }
  0xb0   :  { %v607_v41 = vpop.f32.mrf.mxu0 }
  0xb1   :  { %685 = vmatmul.bf16.gmra.mxu1 %v1077_v36  ;;  %734 = vmatmul.bf16.gmra.mxu2 %v1081_v37 }
  0xb3   :  { %783 = vmatmul.bf16.gmra.mxu3 %v1085_v39  ;;  %832 = vmatmul.bf16.gmra.mxu0 %v1089_v40 }
  0xb4   :  { %v1802_v42 = vpop.f32.mrf.mxu2 }
  0xb6   :  { %v1804_v43 = vpop.f32.mrf.mxu3  ;;  %v1806_v44 = vpop.f32.mrf.mxu1 }
  0xb8   :  { %v609_v45 = vpop.f32.mrf.mxu0 }
  0xbc   :  { %v1808_v46 = vpop.f32.mrf.mxu2 }
  0xbe   :  { %v1810_v47 = vpop.f32.mrf.mxu3  ;;  %v651_v48 = vpop.f32.mrf.mxu1 }
  0xbf   :  { %v652_v50 = vadd.f32 %v651_v48, %v602_v21 }
  0xc0   :  { %v798_v49 = vpop.f32.mrf.mxu0 }
  0xc4   :  { %v700_v51 = vpop.f32.mrf.mxu2 }
  0xc5   :  { %v701_v52 = vadd.f32 %v700_v51, %v652_v50 }
  0xc6   :  { %v749_v53 = vpop.f32.mrf.mxu3  ;;  %v653_v54 = vpop.f32.mrf.mxu1 }
  0xc7   :  { %v750_v55 = vadd.f32 %v749_v53, %v701_v52  ;;  %v654_v59 = vadd.f32 %v653_v54, %v604_v25 }
  0xc8   :  { %v800_v56 = vpop.f32.mrf.mxu0 }
  0xc9   :  { %v799_v57 = vadd.f32 %v798_v49, %v750_v55 }
  0xcb   :  { %v842_v0 = vmul.f32 %v1815_v58, %v799_v57 }
  0xcc   :  { %v702_v60 = vpop.f32.mrf.mxu2 }
  0xcd   :  { %v703_v61 = vadd.f32 %v702_v60, %v654_v59  ;;  %v862_v5 = vadd.f32 %v1821_v1, %v842_v0 }
  0xce   :  { %v751_v62 = vpop.f32.mrf.mxu3  ;;  %v656_v63 = vpop.f32.mrf.mxu1 }
  0xcf   :  { %v752_v2 = vadd.f32 %v751_v62, %v703_v61  ;;  %v657_v7 = vadd.f32 %v656_v63, %v607_v41  ;;  %v878_v13 = vmax.f32 %v862_v5, 0.0 }
  0xd0   :  { %v803_v3 = vpop.f32.mrf.mxu0 }
  0xd1   :  { %v801_v4 = vadd.f32 %v800_v56, %v752_v2 }
  0xd3   :  { %v843_v6 = vmul.f32 %v1815_v58, %v801_v4 }
  0xd4   :  { %v705_v8 = vpop.f32.mrf.mxu2 }
  0xd5   :  { %v863_v9 = vadd.f32 %v1821_v1, %v843_v6  ;;  %v706_v10 = vadd.f32 %v705_v8, %v657_v7 }
  0xd6   :  { %v754_v11 = vpop.f32.mrf.mxu3  ;;  %v658_v12 = vpop.f32.mrf.mxu1 }
  0xd7   :  { %v879_v14 = vmax.f32 %v863_v9, 0.0  ;;  %v755_v15 = vadd.f32 %v754_v11, %v706_v10  ;;  %v659_v20 = vadd.f32 %v658_v12, %v609_v45 }
  0xd8   :  { %v805_v16 = vpop.f32.mrf.mxu0 }
  0xd9   :  { %v1333_v17 = vpack.c.bf16 %v879_v14, %v878_v13  ;;  %v804_v19 = vadd.f32 %v803_v3, %v755_v15 }
  0xdb   :  { %1334 = vst [vmem:[%s1894_s4] sm:$0xff] %v1333_v17   ;;  %v844_v28 = vmul.f32 %v1815_v58, %v804_v19 }
  0xdc   :  { %v707_v21 = vpop.f32.mrf.mxu2 }
  0xdd   :  { %v708_v25 = vadd.f32 %v707_v21, %v659_v20  ;;  %v864_v32 = vadd.f32 %v1821_v1, %v844_v28 }
  0xde   :  { %v756_v26 = vpop.f32.mrf.mxu3  ;;  %v661_v27 = vpop.f32.mrf.mxu1 }
  0xdf   :  { %v757_v29 = vadd.f32 %v756_v26, %v708_v25  ;;  %v662_v36 = vadd.f32 %v661_v27, %v1764_v18  ;;  %v880_v48 = vmax.f32 %v864_v32, 0.0 }
  0xe0   :  { %v808_v30 = vpop.f32.mrf.mxu0 }
  0xe1   :  { %v806_v31 = vadd.f32 %v805_v16, %v757_v29 }
  0xe3   :  { %v845_v33 = vmul.f32 %v1815_v58, %v806_v31 }
  0xe4   :  { %v710_v37 = vpop.f32.mrf.mxu2 }
  0xe5   :  { %v865_v39 = vadd.f32 %v1821_v1, %v845_v33  ;;  %v711_v40 = vadd.f32 %v710_v37, %v662_v36 }
  0xe6   :  { %v759_v41 = vpop.f32.mrf.mxu3  ;;  %v663_v45 = vpop.f32.mrf.mxu1 }
  0xe7   :  { %v881_v49 = vmax.f32 %v865_v39, 0.0  ;;  %v760_v50 = vadd.f32 %v759_v41, %v711_v40  ;;  %v664_v54 = vadd.f32 %v663_v45, %v1770_v24 }
  0xe8   :  { %v810_v51 = vpop.f32.mrf.mxu0 }
  0xe9   :  { %v1338_v52 = vpack.c.bf16 %v881_v49, %v880_v48  ;;  %v809_v53 = vadd.f32 %v808_v30, %v760_v50 }
  0xeb   :  { %1370 = vst [vmem:[%s1894_s4 + $0x8] sm:$0xff] %v1338_v52   ;;  %v846_v59 = vmul.f32 %v1815_v58, %v809_v53 }
  0xec   :  { %v712_v55 = vpop.f32.mrf.mxu2 }
  0xed   :  { %v713_v18 = vadd.f32 %v712_v55, %v664_v54  ;;  %v866_v63 = vadd.f32 %v1821_v1, %v846_v59 }
  0xee   :  { %v761_v56 = vpop.f32.mrf.mxu3  ;;  %v666_v57 = vpop.f32.mrf.mxu1 }
  0xef   :  { %v762_v60 = vadd.f32 %v761_v56, %v713_v18  ;;  %v667_v2 = vadd.f32 %v666_v57, %v1800_v38  ;;  %v882_v7 = vmax.f32 %v866_v63, 0.0 }
  0xf0   :  { %v813_v61 = vpop.f32.mrf.mxu0 }
  0xf1   :  { %v811_v62 = vadd.f32 %v810_v51, %v762_v60 }
  0xf3   :  { %v847_v0 = vmul.f32 %v1815_v58, %v811_v62 }
  0xf4   :  { %v715_v3 = vpop.f32.mrf.mxu2 }
  0xf5   :  { %v867_v4 = vadd.f32 %v1821_v1, %v847_v0  ;;  %v716_v5 = vadd.f32 %v715_v3, %v667_v2 }
  0xf6   :  { %v764_v24 = vpop.f32.mrf.mxu3  ;;  %v668_v6 = vpop.f32.mrf.mxu1 }
  0xf7   :  { %v883_v8 = vmax.f32 %v867_v4, 0.0  ;;  %v765_v9 = vadd.f32 %v764_v24, %v716_v5  ;;  %v669_v13 = vadd.f32 %v668_v6, %v1806_v44 }
  0xf8   :  { %v815_v10 = vpop.f32.mrf.mxu0 }
  0xf9   :  { %v1343_v11 = vpack.c.bf16 %v883_v8, %v882_v7  ;;  %v814_v12 = vadd.f32 %v813_v61, %v765_v9 }
  0xfb   :  { %1371 = vst [vmem:[%s1894_s4 + $0x10] sm:$0xff] %v1343_v11   ;;  %v848_v17 = vmul.f32 %v1815_v58, %v814_v12 }
  0xfc   :  { %v717_v14 = vpop.f32.mrf.mxu2 }
  0xfd   :  { %v718_v38 = vadd.f32 %v717_v14, %v669_v13  ;;  %v868_v25 = vadd.f32 %v1821_v1, %v848_v17 }
  0xfe   :  { %v766_v15 = vpop.f32.mrf.mxu3  ;;  %v671_v16 = vpop.f32.mrf.mxu1 }
  0xff   :  { %v767_v19 = vadd.f32 %v766_v15, %v718_v38  ;;  %v672_v27 = vadd.f32 %v671_v16, %v1766_v22  ;;  %v884_v32 = vmax.f32 %v868_v25, 0.0 }
 0x100   :  { %v818_v20 = vpop.f32.mrf.mxu0 }
 0x101   :  { %v816_v21 = vadd.f32 %v815_v10, %v767_v19 }
 0x103   :  { %v849_v26 = vmul.f32 %v1815_v58, %v816_v21 }
 0x104   :  { %v720_v28 = vpop.f32.mrf.mxu2 }
 0x105   :  { %v869_v29 = vadd.f32 %v1821_v1, %v849_v26  ;;  %v721_v30 = vadd.f32 %v720_v28, %v672_v27 }
 0x106   :  { %v769_v44 = vpop.f32.mrf.mxu3  ;;  %v673_v31 = vpop.f32.mrf.mxu1 }
 0x107   :  { %v885_v33 = vmax.f32 %v869_v29, 0.0  ;;  %v770_v36 = vadd.f32 %v769_v44, %v721_v30  ;;  %v674_v41 = vadd.f32 %v673_v31, %v1796_v34 }
 0x108   :  { %v820_v37 = vpop.f32.mrf.mxu0 }
 0x109   :  { %v1348_v39 = vpack.c.bf16 %v885_v33, %v884_v32  ;;  %v819_v40 = vadd.f32 %v818_v20, %v770_v36 }
 0x10b   :  { %1372 = vst [vmem:[%s1894_s4 + $0x18] sm:$0xff] %v1348_v39   ;;  %v850_v50 = vmul.f32 %v1815_v58, %v819_v40 }
 0x10c   :  { %v722_v45 = vpop.f32.mrf.mxu2 }
 0x10d   :  { %v723_v22 = vadd.f32 %v722_v45, %v674_v41  ;;  %v870_v54 = vadd.f32 %v1821_v1, %v850_v50 }
 0x10e   :  { %v771_v48 = vpop.f32.mrf.mxu3  ;;  %v676_v49 = vpop.f32.mrf.mxu1 }
 0x10f   :  { %v772_v51 = vadd.f32 %v771_v48, %v723_v22  ;;  %v677_v18 = vadd.f32 %v676_v49, %v1802_v42  ;;  %v886_v61 = vmax.f32 %v870_v54, 0.0 }
 0x110   :  { %v823_v52 = vpop.f32.mrf.mxu0 }
 0x111   :  { %v821_v53 = vadd.f32 %v820_v37, %v772_v51 }
 0x113   :  { %v851_v55 = vmul.f32 %v1815_v58, %v821_v53 }
 0x114   :  { %v725_v56 = vpop.f32.mrf.mxu2 }
 0x115   :  { %v871_v57 = vadd.f32 %v1821_v1, %v851_v55  ;;  %v726_v59 = vadd.f32 %v725_v56, %v677_v18 }
 0x116   :  { %v774_v34 = vpop.f32.mrf.mxu3  ;;  %v678_v60 = vpop.f32.mrf.mxu1 }
 0x117   :  { %v887_v62 = vmax.f32 %v871_v57, 0.0  ;;  %v775_v63 = vadd.f32 %v774_v34, %v726_v59  ;;  %v679_v4 = vadd.f32 %v678_v60, %v1808_v46 }
 0x118   :  { %v825_v0 = vpop.f32.mrf.mxu0 }
 0x119   :  { %v1353_v2 = vpack.c.bf16 %v887_v62, %v886_v61  ;;  %v824_v3 = vadd.f32 %v823_v52, %v775_v63 }
 0x11b   :  { %1373 = vst [vmem:[%s1894_s4 + $0x20] sm:$0xff] %v1353_v2   ;;  %v852_v7 = vmul.f32 %v1815_v58, %v824_v3 }
 0x11c   :  { %v727_v5 = vpop.f32.mrf.mxu2 }
 0x11d   :  { %v728_v42 = vadd.f32 %v727_v5, %v679_v4  ;;  %v872_v11 = vadd.f32 %v1821_v1, %v852_v7 }
 0x11e   :  { %v776_v24 = vpop.f32.mrf.mxu3  ;;  %v681_v6 = vpop.f32.mrf.mxu1 }
 0x11f   :  { %v777_v8 = vadd.f32 %v776_v24, %v728_v42  ;;  %v682_v13 = vadd.f32 %v681_v6, %v1768_v23  ;;  %v888_v17 = vmax.f32 %v872_v11, 0.0 }
 0x120   :  { %v828_v10 = vpop.f32.mrf.mxu0 }
 0x121   :  { %v826_v9 = vadd.f32 %v825_v0, %v777_v8 }
 0x123   :  { %v853_v12 = vmul.f32 %v1815_v58, %v826_v9 }
 0x124   :  { %v730_v14 = vpop.f32.mrf.mxu2 }
 0x125   :  { %v873_v38 = vadd.f32 %v1821_v1, %v853_v12  ;;  %v731_v15 = vadd.f32 %v730_v14, %v682_v13 }
 0x126   :  { %v779_v46 = vpop.f32.mrf.mxu3  ;;  %v683_v16 = vpop.f32.mrf.mxu1 }
 0x127   :  { %v889_v19 = vmax.f32 %v873_v38, 0.0  ;;  %v780_v20 = vadd.f32 %v779_v46, %v731_v15  ;;  %v684_v26 = vadd.f32 %v683_v16, %v1798_v35 }
 0x128   :  { %v830_v27 = vpop.f32.mrf.mxu0 }
 0x129   :  { %v1358_v21 = vpack.c.bf16 %v889_v19, %v888_v17  ;;  %v829_v25 = vadd.f32 %v828_v10, %v780_v20 }
 0x12b   :  { %1374 = vst [vmem:[%s1894_s4 + $0x28] sm:$0xff] %v1358_v21   ;;  %v854_v44 = vmul.f32 %v1815_v58, %v829_v25 }
 0x12c   :  { %v732_v28 = vpop.f32.mrf.mxu2 }
 0x12d   :  { %v733_v23 = vadd.f32 %v732_v28, %v684_v26  ;;  %v874_v33 = vadd.f32 %v1821_v1, %v854_v44 }
 0x12e   :  { %v781_v29 = vpop.f32.mrf.mxu3  ;;  %v686_v30 = vpop.f32.mrf.mxu1 }
 0x12f   :  { %v782_v31 = vadd.f32 %v781_v29, %v733_v23  ;;  %v687_v37 = vadd.f32 %v686_v30, %v1804_v43  ;;  %v890_v22 = vmax.f32 %v874_v33, 0.0 }
 0x130   :  { %v833_v45 = vpop.f32.mrf.mxu0 }
 0x131   :  { %v831_v32 = vadd.f32 %v830_v27, %v782_v31 }
 0x133   :  { %v855_v36 = vmul.f32 %v1815_v58, %v831_v32 }
 0x134   :  { %v735_v39 = vpop.f32.mrf.mxu2 }
 0x135   :  { %v875_v40 = vadd.f32 %v1821_v1, %v855_v36  ;;  %v736_v41 = vadd.f32 %v735_v39, %v687_v37 }
 0x136   :  { %v784_v35 = vpop.f32.mrf.mxu3  ;;  %v688_v50 = vpop.f32.mrf.mxu1 }
 0x137   :  { %v891_v48 = vmax.f32 %v875_v40, 0.0  ;;  %v785_v49 = vadd.f32 %v784_v35, %v736_v41  ;;  %v689_v53 = vadd.f32 %v688_v50, %v1810_v47 }
 0x138   :  { %v835_v57 = vpop.f32.mrf.mxu0 }
 0x139   :  { %v1363_v51 = vpack.c.bf16 %v891_v48, %v890_v22  ;;  %v834_v52 = vadd.f32 %v833_v45, %v785_v49 }
 0x13b   :  { %1375 = vst [vmem:[%s1894_s4 + $0x30] sm:$0xff] %v1363_v51   ;;  %v856_v18 = vmul.f32 %v1815_v58, %v834_v52 }
 0x13c   :  { %v737_v54 = vpop.f32.mrf.mxu2 }
 0x13d   :  { %v738_v43 = vadd.f32 %v737_v54, %v689_v53  ;;  %v876_v34 = vadd.f32 %v1821_v1, %v856_v18 }
 0x13e   :  { %v786_v55 = vpop.f32.mrf.mxu3 }
 0x13f   :  { %v787_v56 = vadd.f32 %v786_v55, %v738_v43  ;;  %v892_v62 = vmax.f32 %v876_v34, 0.0 }
 0x141   :  { %v836_v59 = vadd.f32 %v835_v57, %v787_v56 }
 0x143   :  { %v857_v60 = vmul.f32 %v1815_v58, %v836_v59 }
 0x145   :  { %v877_v61 = vadd.f32 %v1821_v1, %v857_v60 }
 0x147   :  { %v893_v63 = vmax.f32 %v877_v61, 0.0 }
 0x149   :  { %v1368_v0 = vpack.c.bf16 %v893_v63, %v892_v62 }
 0x14b   :  { %1376 = vst [vmem:[%s1894_s4 + $0x38] sm:$0xff] %v1368_v0  }

// kernel: branch_conv_forward.6
= control target key start
LH: loop header
LB: loop body
LE: loop exit
PB: predicated region body
PF: predicated region fallthrough
CT: control target
= control target key end

     0   :  { %s3308_s1 = inlined_call_operand.vmem [shape: bf16[1152,256], index: 1, kind: input, shape index: {}]   ;;  %s3309_s0 = inlined_call_operand.vmem [shape: bf16[32,1152], index: 0, kind: input, shape index: {}]   ;;  %s3310_s2 = inlined_call_operand.vmem [shape: f32[1,256], index: 2, kind: input, shape index: {}]   ;;  %s3311_s3 = inlined_call_operand.vmem [shape: f32[1,256], index: 3, kind: input, shape index: {}]   ;;  %s3312_s4 = inlined_call_operand.vmem [shape: bf16[32,256], index: 4, kind: output, shape index: {}]  }
   0x1   :  { %v1513_v0 = vld [vmem:[%s3308_s1 + $0x70] sm:$0xf]  ;;  %v2064_v1 = vld [vmem:[%s3308_s1 + $0x74] sm:$0xf0]  ;;  %v1505_v11 = vld [vmem:[%s3308_s1 + $0x60] sm:$0xf] }
   0x2   :  { %v1577_v2 = vld [vmem:[%s3308_s1 + $0xf0] sm:$0xf]  ;;  %v1514_v3 = vor.u32 %v2064_v1, %v1513_v0  ;;  %v2080_v4 = vld [vmem:[%s3308_s1 + $0xf4] sm:$0xf0]  ;;  %v2062_v13 = vld [vmem:[%s3308_s1 + $0x64] sm:$0xf0] }
   0x3   :  { %v1641_v5 = vld [vmem:[%s3308_s1 + $0x170] sm:$0xf]  ;;  %v2096_v6 = vld [vmem:[%s3308_s1 + $0x174] sm:$0xf0]  ;;  %v1578_v7 = vor.u32 %v2080_v4, %v1577_v2  ;;  %v1569_v14 = vld [vmem:[%s3308_s1 + $0xe0] sm:$0xf]  ;;  %v1506_v16 = vor.u32 %v2062_v13, %v1505_v11 }
   0x4   :  { %v1642_v8 = vor.u32 %v2096_v6, %v1641_v5  ;;  %v1705_v9 = vld [vmem:[%s3308_s1 + $0x1f0] sm:$0xf]  ;;  %v2112_v10 = vld [vmem:[%s3308_s1 + $0x1f4] sm:$0xf0]  ;;  %993 = vmatpush.bf16.msra.mxu0 %v1514_v3  ;;  %v2078_v15 = vld [vmem:[%s3308_s1 + $0xe4] sm:$0xf0] }
   0x5   :  { %v1706_v12 = vor.u32 %v2112_v10, %v1705_v9  ;;  %1012 = vmatpush.bf16.msra.mxu1 %v1578_v7  ;;  %v1570_v17 = vor.u32 %v2078_v15, %v1569_v14  ;;  %v1633_v18 = vld [vmem:[%s3308_s1 + $0x160] sm:$0xf]  ;;  %v2094_v19 = vld [vmem:[%s3308_s1 + $0x164] sm:$0xf0]  ;;  %v1497_v23 = vld [vmem:[%s3308_s1 + $0x50] sm:$0xf] }
   0x6   :  { %1031 = vmatpush.bf16.msra.mxu2 %v1642_v8  ;;  %v1697_v20 = vld [vmem:[%s3308_s1 + $0x1e0] sm:$0xf]  ;;  %v1634_v21 = vor.u32 %v2094_v19, %v1633_v18  ;;  %v2110_v22 = vld [vmem:[%s3308_s1 + $0x1e4] sm:$0xf0]  ;;  %v2060_v24 = vld [vmem:[%s3308_s1 + $0x54] sm:$0xf0] }
   0x7   :  { %1050 = vmatpush.bf16.msra.mxu3 %v1706_v12  ;;  %v1698_v25 = vor.u32 %v2110_v22, %v1697_v20  ;;  %v1561_v26 = vld [vmem:[%s3308_s1 + $0xd0] sm:$0xf]  ;;  %v2076_v27 = vld [vmem:[%s3308_s1 + $0xd4] sm:$0xf0]  ;;  %v1498_v29 = vor.u32 %v2060_v24, %v1497_v23  ;;  %v1489_v35 = vld [vmem:[%s3308_s1 + $0x40] sm:$0xf] }
   0x8   :  { %v1625_v28 = vld [vmem:[%s3308_s1 + $0x150] sm:$0xf]  ;;  %994 = vmatpush.bf16.msra.mxu0 %v1506_v16  ;;  %v2092_v30 = vld [vmem:[%s3308_s1 + $0x154] sm:$0xf0]  ;;  %v1562_v33 = vor.u32 %v2076_v27, %v1561_v26  ;;  %v2058_v36 = vld [vmem:[%s3308_s1 + $0x44] sm:$0xf0] }
   0x9   :  { %v1689_v31 = vld [vmem:[%s3308_s1 + $0x1d0] sm:$0xf]  ;;  %v2108_v32 = vld [vmem:[%s3308_s1 + $0x1d4] sm:$0xf0]  ;;  %1013 = vmatpush.bf16.msra.mxu1 %v1570_v17  ;;  %v1626_v34 = vor.u32 %v2092_v30, %v1625_v28  ;;  %v1553_v37 = vld [vmem:[%s3308_s1 + $0xc0] sm:$0xf]  ;;  %v1490_v44 = vor.u32 %v2058_v36, %v1489_v35 }
   0xa   :  { %1032 = vmatpush.bf16.msra.mxu2 %v1634_v21  ;;  %v1690_v38 = vor.u32 %v2108_v32, %v1689_v31  ;;  %v2074_v39 = vld [vmem:[%s3308_s1 + $0xc4] sm:$0xf0]  ;;  %v1617_v40 = vld [vmem:[%s3308_s1 + $0x140] sm:$0xf]  ;;  %v1481_v47 = vld [vmem:[%s3308_s1 + $0x30] sm:$0xf] }
   0xb   :  { %1051 = vmatpush.bf16.msra.mxu3 %v1698_v25  ;;  %v2090_v41 = vld [vmem:[%s3308_s1 + $0x144] sm:$0xf0]  ;;  %v1681_v42 = vld [vmem:[%s3308_s1 + $0x1c0] sm:$0xf]  ;;  %v1554_v45 = vor.u32 %v2074_v39, %v1553_v37  ;;  %v2056_v48 = vld [vmem:[%s3308_s1 + $0x34] sm:$0xf0] }
   0xc   :  { %v2106_v43 = vld [vmem:[%s3308_s1 + $0x1c4] sm:$0xf0]  ;;  %995 = vmatpush.bf16.msra.mxu0 %v1498_v29  ;;  %v1618_v46 = vor.u32 %v2090_v41, %v1617_v40  ;;  %v1545_v49 = vld [vmem:[%s3308_s1 + $0xb0] sm:$0xf]  ;;  %v2072_v51 = vld [vmem:[%s3308_s1 + $0xb4] sm:$0xf0]  ;;  %v1482_v56 = vor.u32 %v2056_v48, %v1481_v47 }
   0xd   :  { %1014 = vmatpush.bf16.msra.mxu1 %v1562_v33  ;;  %v1682_v50 = vor.u32 %v2106_v43, %v1681_v42  ;;  %v1609_v52 = vld [vmem:[%s3308_s1 + $0x130] sm:$0xf]  ;;  %v2088_v53 = vld [vmem:[%s3308_s1 + $0x134] sm:$0xf0]  ;;  %v1546_v57 = vor.u32 %v2072_v51, %v1545_v49  ;;  %v1473_v59 = vld [vmem:[%s3308_s1 + $0x20] sm:$0xf] }
   0xe   :  { %1033 = vmatpush.bf16.msra.mxu2 %v1626_v34  ;;  %v1673_v54 = vld [vmem:[%s3308_s1 + $0x1b0] sm:$0xf]  ;;  %v2104_v55 = vld [vmem:[%s3308_s1 + $0x1b4] sm:$0xf0]  ;;  %v1610_v58 = vor.u32 %v2088_v53, %v1609_v52  ;;  %v2054_v60 = vld [vmem:[%s3308_s1 + $0x24] sm:$0xf0] }
   0xf   :  { %1052 = vmatpush.bf16.msra.mxu3 %v1690_v38  ;;  %v1537_v61 = vld [vmem:[%s3308_s1 + $0xa0] sm:$0xf]  ;;  %v1674_v62 = vor.u32 %v2104_v55, %v1673_v54  ;;  %v2070_v63 = vld [vmem:[%s3308_s1 + $0xa4] sm:$0xf0]  ;;  %v1474_v4 = vor.u32 %v2054_v60, %v1473_v59  ;;  %v1465_v7 = vld [vmem:[%s3308_s1 + $0x10] sm:$0xf] }
  0x10   :  { %996 = vmatpush.bf16.msra.mxu0 %v1490_v44  ;;  %v1601_v0 = vld [vmem:[%s3308_s1 + $0x120] sm:$0xf]  ;;  %v2086_v1 = vld [vmem:[%s3308_s1 + $0x124] sm:$0xf0]  ;;  %v1538_v5 = vor.u32 %v2070_v63, %v1537_v61  ;;  %v2052_v8 = vld [vmem:[%s3308_s1 + $0x14] sm:$0xf0] }
  0x11   :  { %1015 = vmatpush.bf16.msra.mxu1 %v1554_v45  ;;  %v1665_v2 = vld [vmem:[%s3308_s1 + $0x1a0] sm:$0xf]  ;;  %v2102_v3 = vld [vmem:[%s3308_s1 + $0x1a4] sm:$0xf0]  ;;  %v1602_v6 = vor.u32 %v2086_v1, %v1601_v0  ;;  %v1529_v9 = vld [vmem:[%s3308_s1 + $0x90] sm:$0xf]  ;;  %v1466_v17 = vor.u32 %v2052_v8, %v1465_v7 }
  0x12   :  { %1034 = vmatpush.bf16.msra.mxu2 %v1618_v46  ;;  %v1666_v10 = vor.u32 %v2102_v3, %v1665_v2  ;;  %v2068_v11 = vld [vmem:[%s3308_s1 + $0x94] sm:$0xf0]  ;;  %v1593_v12 = vld [vmem:[%s3308_s1 + $0x110] sm:$0xf]  ;;  %v1457_v16 = vld [vmem:[%s3308_s1] sm:$0xf] }
  0x13   :  { %1053 = vmatpush.bf16.msra.mxu3 %v1682_v50  ;;  %v2084_v13 = vld [vmem:[%s3308_s1 + $0x114] sm:$0xf0]  ;;  %v1657_v14 = vld [vmem:[%s3308_s1 + $0x190] sm:$0xf]  ;;  %v2050_v18 = vld [vmem:[%s3308_s1 + $0x4] sm:$0xf0]  ;;  %v1530_v21 = vor.u32 %v2068_v11, %v1529_v9 }
  0x14   :  { %997 = vmatpush.bf16.msra.mxu0 %v1482_v56  ;;  %v2100_v15 = vld [vmem:[%s3308_s1 + $0x194] sm:$0xf0]  ;;  %v1521_v19 = vld [vmem:[%s3308_s1 + $0x80] sm:$0xf]  ;;  %v2066_v20 = vld [vmem:[%s3308_s1 + $0x84] sm:$0xf0]  ;;  %v1594_v22 = vor.u32 %v2084_v13, %v1593_v12  ;;  %v1458_v34 = vor.u32 %v2050_v18, %v1457_v16 }
  0x15   :  { %1016 = vmatpush.bf16.msra.mxu1 %v1546_v57  ;;  %v1585_v23 = vld [vmem:[%s3308_s1 + $0x100] sm:$0xf]  ;;  %v2082_v24 = vld [vmem:[%s3308_s1 + $0x104] sm:$0xf0]  ;;  %v1658_v26 = vor.u32 %v2100_v15, %v1657_v14  ;;  %v2035_v29 = vld [vmem:[%s3309_s0 + $0x20] sm:$0xf0]  ;;  %v1522_v38 = vor.u32 %v2066_v20, %v1521_v19 }
  0x16   :  { %1035 = vmatpush.bf16.msra.mxu2 %v1610_v58  ;;  %v1649_v25 = vld [vmem:[%s3308_s1 + $0x180] sm:$0xf]  ;;  %v2098_v27 = vld [vmem:[%s3308_s1 + $0x184] sm:$0xf0]  ;;  %v2031_v30 = vld [vmem:[%s3309_s0 + $0x4] sm:$0xf]  ;;  %v1586_v39 = vor.u32 %v2082_v24, %v1585_v23 }
  0x17   :  { %1054 = vmatpush.bf16.msra.mxu3 %v1674_v62  ;;  %v1385_v28 = vld [vmem:[%s3309_s0] sm:$0xf]  ;;  %v1387_v31 = vld [vmem:[%s3309_s0 + $0x24] sm:$0xf0]  ;;  %v1897_v32 = vld [vmem:[%s3308_s1 + $0x370] sm:$0xf]  ;;  %v1650_v43 = vor.u32 %v2098_v27, %v1649_v25 }
  0x18   :  { %998 = vmatpush.bf16.msra.mxu0 %v1474_v4  ;;  %v2160_v33 = vld [vmem:[%s3308_s1 + $0x374] sm:$0xf0]  ;;  %v1393_v35 = vld [vmem:[%s3309_s0 + $0x8] sm:$0xf]  ;;  %v1833_v36 = vld [vmem:[%s3308_s1 + $0x2f0] sm:$0xf]  ;;  %v2471_v48 = vor.u32 %v2035_v29, %v1385_v28  ;;  %v2482_v53 = vor.u32 %v2031_v30, %v1387_v31 }
  0x19   :  { %1017 = vmatpush.bf16.msra.mxu1 %v1538_v5  ;;  %v2144_v37 = vld [vmem:[%s3308_s1 + $0x2f4] sm:$0xf0]  ;;  %v2036_v40 = vld [vmem:[%s3309_s0 + $0x28] sm:$0xf0]  ;;  %v1395_v42 = vld [vmem:[%s3309_s0 + $0x2c] sm:$0xf0]  ;;  %v1898_v44 = vor.u32 %v2160_v33, %v1897_v32 }
  0x1a   :  { %1036 = vmatpush.bf16.msra.mxu2 %v1602_v6  ;;  %v2032_v41 = vld [vmem:[%s3309_s0 + $0xc] sm:$0xf]  ;;  %v1769_v45 = vld [vmem:[%s3308_s1 + $0x270] sm:$0xf]  ;;  %v2128_v46 = vld [vmem:[%s3308_s1 + $0x274] sm:$0xf0]  ;;  %v1834_v49 = vor.u32 %v2144_v37, %v1833_v36  ;;  %v2484_v54 = vor.u32 %v2036_v40, %v1393_v35 }
  0x1b   :  { %1055 = vmatpush.bf16.msra.mxu3 %v1666_v10  ;;  %v1961_v47 = vld [vmem:[%s3308_s1 + $0x3f0] sm:$0xf]  ;;  %v2176_v50 = vld [vmem:[%s3308_s1 + $0x3f4] sm:$0xf0]  ;;  %v1889_v51 = vld [vmem:[%s3308_s1 + $0x360] sm:$0xf]  ;;  %v2492_v57 = vor.u32 %v2032_v41, %v1395_v42  ;;  %v1770_v58 = vor.u32 %v2128_v46, %v1769_v45 }
  0x1c   :  { %999 = vmatpush.bf16.msra.mxu0 %v1466_v17  ;;  %v2158_v52 = vld [vmem:[%s3308_s1 + $0x364] sm:$0xf0]  ;;  %v1825_v55 = vld [vmem:[%s3308_s1 + $0x2e0] sm:$0xf]  ;;  %v1962_v59 = vor.u32 %v2176_v50, %v1961_v47  ;;  %v1881_v2 = vld [vmem:[%s3308_s1 + $0x350] sm:$0xf] }
  0x1d   :  { %1018 = vmatpush.bf16.msra.mxu1 %v1530_v21  ;;  %v2142_v56 = vld [vmem:[%s3308_s1 + $0x2e4] sm:$0xf0]  ;;  %v1890_v60 = vor.u32 %v2158_v52, %v1889_v51  ;;  %v1761_v61 = vld [vmem:[%s3308_s1 + $0x260] sm:$0xf]  ;;  %v2156_v3 = vld [vmem:[%s3308_s1 + $0x354] sm:$0xf0] }
  0x1e   :  { %1037 = vmatpush.bf16.msra.mxu2 %v1594_v22  ;;  %v2126_v62 = vld [vmem:[%s3308_s1 + $0x264] sm:$0xf0]  ;;  %v1953_v63 = vld [vmem:[%s3308_s1 + $0x3e0] sm:$0xf]  ;;  %v1826_v0 = vor.u32 %v2142_v56, %v1825_v55  ;;  %v1817_v4 = vld [vmem:[%s3308_s1 + $0x2d0] sm:$0xf]  ;;  %v1882_v8 = vor.u32 %v2156_v3, %v1881_v2 }
  0x1f   :  { %1056 = vmatpush.bf16.msra.mxu3 %v1658_v26  ;;  %v2174_v1 = vld [vmem:[%s3308_s1 + $0x3e4] sm:$0xf0]  ;;  %v2140_v5 = vld [vmem:[%s3308_s1 + $0x2d4] sm:$0xf0]  ;;  %v1762_v6 = vor.u32 %v2126_v62, %v1761_v61  ;;  %v1753_v9 = vld [vmem:[%s3308_s1 + $0x250] sm:$0xf] }
  0x20   :  { %1000 = vmatpush.bf16.msra.mxu0 %v1458_v34  ;;  %v1954_v7 = vor.u32 %v2174_v1, %v1953_v63  ;;  %v2124_v10 = vld [vmem:[%s3308_s1 + $0x254] sm:$0xf0]  ;;  %v1945_v11 = vld [vmem:[%s3308_s1 + $0x3d0] sm:$0xf]  ;;  %v1818_v12 = vor.u32 %v2140_v5, %v1817_v4  ;;  %v1873_v14 = vld [vmem:[%s3308_s1 + $0x340] sm:$0xf] }
  0x21   :  { %1019 = vmatpush.bf16.msra.mxu1 %v1522_v38  ;;  %v2172_v13 = vld [vmem:[%s3308_s1 + $0x3d4] sm:$0xf0]  ;;  %v2154_v15 = vld [vmem:[%s3308_s1 + $0x344] sm:$0xf0]  ;;  %v1809_v16 = vld [vmem:[%s3308_s1 + $0x2c0] sm:$0xf]  ;;  %v1754_v18 = vor.u32 %v2124_v10, %v1753_v9 }
  0x22   :  { %1038 = vmatpush.bf16.msra.mxu2 %v1586_v39  ;;  %v2138_v17 = vld [vmem:[%s3308_s1 + $0x2c4] sm:$0xf0]  ;;  %v1745_v19 = vld [vmem:[%s3308_s1 + $0x240] sm:$0xf]  ;;  %v1946_v22 = vor.u32 %v2172_v13, %v1945_v11  ;;  %v1874_v23 = vor.u32 %v2154_v15, %v1873_v14  ;;  %v2044_v26 = vld [vmem:[%s3309_s0 + $0x68] sm:$0xf0] }
  0x23   :  { %1057 = vmatpush.bf16.msra.mxu3 %v1650_v43  ;;  %1001 = vmatmul.bf16.vlgmr.msra.gmra.mxu0 %v2471_v48  ;;  %v2122_v20 = vld [vmem:[%s3308_s1 + $0x244] sm:$0xf0]  ;;  %v1937_v21 = vld [vmem:[%s3308_s1 + $0x3c0] sm:$0xf]  ;;  %v1810_v27 = vor.u32 %v2138_v17, %v1809_v16  ;;  %v2040_v28 = vld [vmem:[%s3309_s0 + $0x4c] sm:$0xf] }
  0x24   :  { %1020 = vmatmul.bf16.vlgmr.msra.gmra.mxu1 %v2482_v53  ;;  %1069 = vmatpush.bf16.msrb.mxu0 %v1770_v58  ;;  %v2170_v24 = vld [vmem:[%s3308_s1 + $0x3c4] sm:$0xf0]  ;;  %v1423_v29 = vld [vmem:[%s3309_s0 + $0x6c] sm:$0xf0]  ;;  %v2152_v31 = vld [vmem:[%s3308_s1 + $0x334] sm:$0xf0]  ;;  %v1746_v35 = vor.u32 %v2122_v20, %v1745_v19 }
  0x25   :  { %1088 = vmatpush.bf16.msrb.mxu1 %v1834_v49  ;;  %1039 = vmatmul.bf16.vlgmr.msra.gmra.mxu2 %v2484_v54  ;;  %v1421_v25 = vld [vmem:[%s3309_s0 + $0x48] sm:$0xf]  ;;  %v1865_v30 = vld [vmem:[%s3308_s1 + $0x330] sm:$0xf]  ;;  %v2136_v34 = vld [vmem:[%s3308_s1 + $0x2b4] sm:$0xf0]  ;;  %v1938_v39 = vor.u32 %v2170_v24, %v1937_v21  ;;  %v2614_v50 = vor.u32 %v2040_v28, %v1423_v29 }
  0x26   :  { %1107 = vmatpush.bf16.msrb.mxu2 %v1898_v44  ;;  %1058 = vmatmul.bf16.vlgmr.msra.gmra.mxu3 %v2492_v57  ;;  %v1429_v32 = vld [vmem:[%s3309_s0 + $0x50] sm:$0xf]  ;;  %v2045_v36 = vld [vmem:[%s3309_s0 + $0x70] sm:$0xf0]  ;;  %v1431_v38 = vld [vmem:[%s3309_s0 + $0x74] sm:$0xf0]  ;;  %v1866_v40 = vor.u32 %v2152_v31, %v1865_v30  ;;  %v2603_v44 = vor.u32 %v2044_v26, %v1421_v25 }
  0x27   :  { %1126 = vmatpush.bf16.msrb.mxu3 %v1962_v59  ;;  %v1801_v33 = vld [vmem:[%s3308_s1 + $0x2b0] sm:$0xf]  ;;  %v2041_v37 = vld [vmem:[%s3309_s0 + $0x54] sm:$0xf]  ;;  %v2120_v42 = vld [vmem:[%s3308_s1 + $0x234] sm:$0xf0]  ;;  %v2616_v51 = vor.u32 %v2045_v36, %v1429_v32 }
  0x28   :  { %1070 = vmatpush.bf16.msrb.mxu0 %v1762_v6  ;;  %v1737_v41 = vld [vmem:[%s3308_s1 + $0x230] sm:$0xf]  ;;  %v1802_v45 = vor.u32 %v2136_v34, %v1801_v33  ;;  %v2168_v46 = vld [vmem:[%s3308_s1 + $0x3b4] sm:$0xf0]  ;;  %v1857_v47 = vld [vmem:[%s3308_s1 + $0x320] sm:$0xf]  ;;  %v2624_v56 = vor.u32 %v2041_v37, %v1431_v38 }
  0x29   :  { %1089 = vmatpush.bf16.msrb.mxu1 %v1826_v0  ;;  %v1929_v43 = vld [vmem:[%s3308_s1 + $0x3b0] sm:$0xf]  ;;  %v2150_v49 = vld [vmem:[%s3308_s1 + $0x324] sm:$0xf0]  ;;  %v1793_v52 = vld [vmem:[%s3308_s1 + $0x2a0] sm:$0xf]  ;;  %v1738_v58 = vor.u32 %v2120_v42, %v1737_v41 }
  0x2a   :  { %1108 = vmatpush.bf16.msrb.mxu2 %v1890_v60  ;;  %v2134_v55 = vld [vmem:[%s3308_s1 + $0x2a4] sm:$0xf0]  ;;  %v1930_v59 = vor.u32 %v2168_v46, %v1929_v43  ;;  %v1858_v60 = vor.u32 %v2150_v49, %v1857_v47  ;;  %v1729_v61 = vld [vmem:[%s3308_s1 + $0x220] sm:$0xf]  ;;  %v1849_v2 = vld [vmem:[%s3308_s1 + $0x310] sm:$0xf] }
  0x2b   :  { %1127 = vmatpush.bf16.msrb.mxu3 %v1954_v7  ;;  %v2118_v62 = vld [vmem:[%s3308_s1 + $0x224] sm:$0xf0]  ;;  %v1921_v63 = vld [vmem:[%s3308_s1 + $0x3a0] sm:$0xf]  ;;  %v1794_v0 = vor.u32 %v2134_v55, %v1793_v52  ;;  %v2148_v3 = vld [vmem:[%s3308_s1 + $0x314] sm:$0xf0] }
  0x2c   :  { %1071 = vmatpush.bf16.msrb.mxu0 %v1754_v18  ;;  %v2166_v1 = vld [vmem:[%s3308_s1 + $0x3a4] sm:$0xf0]  ;;  %v1785_v4 = vld [vmem:[%s3308_s1 + $0x290] sm:$0xf]  ;;  %v2132_v5 = vld [vmem:[%s3308_s1 + $0x294] sm:$0xf0]  ;;  %v1730_v6 = vor.u32 %v2118_v62, %v1729_v61  ;;  %v1850_v9 = vor.u32 %v2148_v3, %v1849_v2 }
  0x2d   :  { %1090 = vmatpush.bf16.msrb.mxu1 %v1818_v12  ;;  %v1721_v7 = vld [vmem:[%s3308_s1 + $0x210] sm:$0xf]  ;;  %v2116_v10 = vld [vmem:[%s3308_s1 + $0x214] sm:$0xf0]  ;;  %v1786_v13 = vor.u32 %v2132_v5, %v1785_v4  ;;  %v1841_v14 = vld [vmem:[%s3308_s1 + $0x300] sm:$0xf] }
  0x2e   :  { %1109 = vmatpush.bf16.msrb.mxu2 %v1882_v8  ;;  %v1922_v8 = vor.u32 %v2166_v1, %v1921_v63  ;;  %v1913_v11 = vld [vmem:[%s3308_s1 + $0x390] sm:$0xf]  ;;  %v2164_v12 = vld [vmem:[%s3308_s1 + $0x394] sm:$0xf0]  ;;  %v2146_v15 = vld [vmem:[%s3308_s1 + $0x304] sm:$0xf0]  ;;  %v1722_v20 = vor.u32 %v2116_v10, %v1721_v7 }
  0x2f   :  { %1128 = vmatpush.bf16.msrb.mxu3 %v1946_v22  ;;  %v1777_v16 = vld [vmem:[%s3308_s1 + $0x280] sm:$0xf]  ;;  %v2130_v17 = vld [vmem:[%s3308_s1 + $0x284] sm:$0xf0]  ;;  %v2079_v18 = vld [vmem:[%s3308_s1 + $0xf4] sm:$0xf]  ;;  %v1914_v24 = vor.u32 %v2164_v12, %v1913_v11  ;;  %v1842_v25 = vor.u32 %v2146_v15, %v1841_v14 }
  0x30   :  { %1072 = vmatpush.bf16.msrb.mxu0 %v1746_v35  ;;  %v1579_v19 = vld [vmem:[%s3308_s1 + $0xf8] sm:$0xf0]  ;;  %v1713_v21 = vld [vmem:[%s3308_s1 + $0x200] sm:$0xf]  ;;  %v2063_v22 = vld [vmem:[%s3308_s1 + $0x74] sm:$0xf]  ;;  %v1778_v29 = vor.u32 %v2130_v17, %v1777_v16 }
  0x31   :  { %1091 = vmatpush.bf16.msrb.mxu1 %v1810_v27  ;;  %v2114_v26 = vld [vmem:[%s3308_s1 + $0x204] sm:$0xf0]  ;;  %v1905_v27 = vld [vmem:[%s3308_s1 + $0x380] sm:$0xf]  ;;  %v1401_v30 = vld [vmem:[%s3309_s0 + $0x10] sm:$0xf]  ;;  %v1582_v34 = vor.u32 %v2079_v18, %v1579_v19 }
  0x32   :  { %1110 = vmatpush.bf16.msrb.mxu2 %v1874_v23  ;;  %v1515_v23 = vld [vmem:[%s3308_s1 + $0x78] sm:$0xf0]  ;;  %v2162_v28 = vld [vmem:[%s3308_s1 + $0x384] sm:$0xf0]  ;;  %v2037_v31 = vld [vmem:[%s3309_s0 + $0x30] sm:$0xf0]  ;;  %v1714_v42 = vor.u32 %v2114_v26, %v1713_v21 }
  0x33   :  { %1129 = vmatpush.bf16.msrb.mxu3 %v1938_v39  ;;  %1006 = vmatmul.bf16.gmra.mxu0 %v2603_v44  ;;  %v2033_v32 = vld [vmem:[%s3309_s0 + $0x14] sm:$0xf]  ;;  %v1403_v33 = vld [vmem:[%s3309_s0 + $0x34] sm:$0xf0]  ;;  %v2025_v35 = vld [vmem:[%s3308_s1 + $0x470] sm:$0xf]  ;;  %v1518_v38 = vor.u32 %v2063_v22, %v1515_v23  ;;  %v1906_v47 = vor.u32 %v2162_v28, %v1905_v27 }
  0x34   :  { %1025 = vmatmul.bf16.gmra.mxu1 %v2614_v50  ;;  %1073 = vmatpush.bf16.msrb.mxu0 %v1738_v58  ;;  %v2192_v36 = vld [vmem:[%s3308_s1 + $0x474] sm:$0xf0]  ;;  %v2095_v37 = vld [vmem:[%s3308_s1 + $0x174] sm:$0xf]  ;;  %v1643_v39 = vld [vmem:[%s3308_s1 + $0x178] sm:$0xf0]  ;;  %v2761_v1 = vor.u32 %v2033_v32, %v1403_v33 }
  0x35   :  { %1092 = vmatpush.bf16.msrb.mxu1 %v1802_v45  ;;  %1044 = vmatmul.bf16.gmra.mxu2 %v2616_v51  ;;  %v1571_v41 = vld [vmem:[%s3308_s1 + $0xe8] sm:$0xf0]  ;;  %v1409_v43 = vld [vmem:[%s3309_s0 + $0x18] sm:$0xf]  ;;  %v2038_v45 = vld [vmem:[%s3309_s0 + $0x38] sm:$0xf0]  ;;  %v2026_v52 = vor.u32 %v2192_v36, %v2025_v35 }
  0x36   :  { %1111 = vmatpush.bf16.msrb.mxu2 %v1866_v40  ;;  %1063 = vmatmul.bf16.gmra.mxu3 %v2624_v56  ;;  %v2077_v40 = vld [vmem:[%s3308_s1 + $0xe4] sm:$0xf]  ;;  %v2034_v46 = vld [vmem:[%s3309_s0 + $0x1c] sm:$0xf]  ;;  %v1411_v49 = vld [vmem:[%s3309_s0 + $0x3c] sm:$0xf0]  ;;  %v2772_v5 = vor.u32 %v2038_v45, %v1409_v43 }
  0x37   :  { %1130 = vmatpush.bf16.msrb.mxu3 %v1930_v59  ;;  %v2017_v55 = vld [vmem:[%s3308_s1 + $0x460] sm:$0xf]  ;;  %v2190_v58 = vld [vmem:[%s3308_s1 + $0x464] sm:$0xf0]  ;;  %v1646_v59 = vor.u32 %v2095_v37, %v1643_v39  ;;  %v2061_v61 = vld [vmem:[%s3308_s1 + $0x64] sm:$0xf] }
  0x38   :  { %1074 = vmatpush.bf16.msrb.mxu0 %v1730_v6  ;;  %v1507_v62 = vld [vmem:[%s3308_s1 + $0x68] sm:$0xf0]  ;;  %v2093_v63 = vld [vmem:[%s3308_s1 + $0x164] sm:$0xf]  ;;  %v2075_v3 = vld [vmem:[%s3308_s1 + $0xd4] sm:$0xf]  ;;  %v2774_v6 = vor.u32 %v2034_v46, %v1411_v49  ;;  %v2018_v7 = vor.u32 %v2190_v58, %v2017_v55 }
  0x39   :  { %1093 = vmatpush.bf16.msrb.mxu1 %v1794_v0  ;;  %v2759_v0 = vor.u32 %v2037_v31, %v1401_v30  ;;  %v1635_v2 = vld [vmem:[%s3308_s1 + $0x168] sm:$0xf0]  ;;  %v1563_v4 = vld [vmem:[%s3308_s1 + $0xd8] sm:$0xf0]  ;;  %v2188_v10 = vld [vmem:[%s3308_s1 + $0x454] sm:$0xf0] }
  0x3a   :  { %1112 = vmatpush.bf16.msrb.mxu2 %v1858_v60  ;;  %v1574_v60 = vor.u32 %v2077_v40, %v1571_v41  ;;  %v1638_v11 = vor.u32 %v2093_v63, %v1635_v2  ;;  %v1566_v12 = vor.u32 %v2075_v3, %v1563_v4  ;;  %v1499_v14 = vld [vmem:[%s3308_s1 + $0x58] sm:$0xf0]  ;;  %v2091_v15 = vld [vmem:[%s3308_s1 + $0x154] sm:$0xf]  ;;  %v2073_v17 = vld [vmem:[%s3308_s1 + $0xc4] sm:$0xf] }
  0x3b   :  { %1131 = vmatpush.bf16.msrb.mxu3 %v1922_v8  ;;  %v1510_v8 = vor.u32 %v2061_v61, %v1507_v62  ;;  %v1627_v16 = vld [vmem:[%s3308_s1 + $0x158] sm:$0xf0]  ;;  %v1555_v18 = vld [vmem:[%s3308_s1 + $0xc8] sm:$0xf0]  ;;  %v2001_v21 = vld [vmem:[%s3308_s1 + $0x440] sm:$0xf] }
  0x3c   :  { %1075 = vmatpush.bf16.msrb.mxu0 %v1722_v20  ;;  %v2186_v22 = vld [vmem:[%s3308_s1 + $0x444] sm:$0xf0]  ;;  %v1630_v23 = vor.u32 %v2091_v15, %v1627_v16  ;;  %v1491_v26 = vld [vmem:[%s3308_s1 + $0x48] sm:$0xf0]  ;;  %v2089_v27 = vld [vmem:[%s3308_s1 + $0x144] sm:$0xf] }
  0x3d   :  { %1094 = vmatpush.bf16.msrb.mxu1 %v1786_v13  ;;  %v2059_v13 = vld [vmem:[%s3308_s1 + $0x54] sm:$0xf]  ;;  %v1619_v28 = vld [vmem:[%s3308_s1 + $0x148] sm:$0xf0]  ;;  %v1547_v30 = vld [vmem:[%s3308_s1 + $0xb8] sm:$0xf0]  ;;  %v2002_v31 = vor.u32 %v2186_v22, %v2001_v21 }
  0x3e   :  { %1113 = vmatpush.bf16.msrb.mxu2 %v1850_v9  ;;  %v2009_v9 = vld [vmem:[%s3308_s1 + $0x450] sm:$0xf]  ;;  %v1502_v20 = vor.u32 %v2059_v13, %v1499_v14  ;;  %v1622_v35 = vor.u32 %v2089_v27, %v1619_v28  ;;  %v1437_v36 = vld [vmem:[%s3309_s0 + $0x58] sm:$0xf]  ;;  %v2046_v37 = vld [vmem:[%s3309_s0 + $0x78] sm:$0xf0] }
  0x3f   :  { %1132 = vmatpush.bf16.msrb.mxu3 %v1914_v24  ;;  %v2010_v19 = vor.u32 %v2188_v10, %v2009_v9  ;;  %v1558_v24 = vor.u32 %v2073_v17, %v1555_v18  ;;  %v1993_v33 = vld [vmem:[%s3308_s1 + $0x430] sm:$0xf]  ;;  %v1439_v39 = vld [vmem:[%s3309_s0 + $0x7c] sm:$0xf0]  ;;  %v2055_v41 = vld [vmem:[%s3308_s1 + $0x34] sm:$0xf] }
  0x40   :  { %1076 = vmatpush.bf16.msrb.mxu0 %v1714_v42  ;;  %v1483_v42 = vld [vmem:[%s3308_s1 + $0x38] sm:$0xf0]  ;;  %v2087_v43 = vld [vmem:[%s3308_s1 + $0x134] sm:$0xf]  ;;  %v2069_v46 = vld [vmem:[%s3308_s1 + $0xa4] sm:$0xf] }
  0x41   :  { %1095 = vmatpush.bf16.msrb.mxu1 %v1778_v29  ;;  %v2071_v29 = vld [vmem:[%s3308_s1 + $0xb4] sm:$0xf]  ;;  %v1611_v45 = vld [vmem:[%s3308_s1 + $0x138] sm:$0xf0]  ;;  %v1445_v49 = vld [vmem:[%s3309_s0 + $0x60] sm:$0xf] }
  0x42   :  { %1114 = vmatpush.bf16.msrb.mxu2 %v1842_v25  ;;  %v2057_v25 = vld [vmem:[%s3308_s1 + $0x44] sm:$0xf]  ;;  %v1550_v40 = vor.u32 %v2071_v29, %v1547_v30  ;;  %v1447_v58 = vld [vmem:[%s3309_s0 + $0x84] sm:$0xf0]  ;;  %v1985_v61 = vld [vmem:[%s3308_s1 + $0x420] sm:$0xf]  ;;  %v1614_v63 = vor.u32 %v2087_v43, %v1611_v45 }
  0x43   :  { %1133 = vmatpush.bf16.msrb.mxu3 %v1906_v47  ;;  %1077 = vmatmul.bf16.vlgmr.msrb.gmra.mxu0 %v2759_v0  ;;  %v1494_v32 = vor.u32 %v2057_v25, %v1491_v26  ;;  %v1539_v47 = vld [vmem:[%s3308_s1 + $0xa8] sm:$0xf0]  ;;  %v2043_v55 = vld [vmem:[%s3309_s0 + $0x64] sm:$0xf]  ;;  %v2182_v62 = vld [vmem:[%s3308_s1 + $0x424] sm:$0xf0] }
  0x44   :  { %1145 = vmatpush.bf16.msra.mxu0 %v2026_v52  ;;  %1096 = vmatmul.bf16.vlgmr.msrb.gmra.mxu1 %v2761_v1  ;;  %v2047_v52 = vld [vmem:[%s3309_s0 + $0x80] sm:$0xf0]  ;;  %v1542_v2 = vor.u32 %v2069_v46, %v1539_v47  ;;  %v1475_v4 = vld [vmem:[%s3308_s1 + $0x28] sm:$0xf0]  ;;  %v2906_v14 = vor.u32 %v2043_v55, %v1447_v58  ;;  %v1986_v15 = vor.u32 %v2182_v62, %v1985_v61  ;;  %v1977_v17 = vld [vmem:[%s3308_s1 + $0x410] sm:$0xf] }
  0x45   :  { %1164 = vmatpush.bf16.msra.mxu1 %v1518_v38  ;;  %1115 = vmatmul.bf16.vlgmr.msrb.gmra.mxu2 %v2772_v5  ;;  %v2042_v38 = vld [vmem:[%s3309_s0 + $0x5c] sm:$0xf]  ;;  %v2053_v3 = vld [vmem:[%s3308_s1 + $0x24] sm:$0xf]  ;;  %v1603_v10 = vld [vmem:[%s3308_s1 + $0x128] sm:$0xf0]  ;;  %v2904_v13 = vor.u32 %v2047_v52, %v1445_v49 }
  0x46   :  { %1183 = vmatpush.bf16.msra.mxu2 %v1582_v34  ;;  %1134 = vmatmul.bf16.vlgmr.msrb.gmra.mxu3 %v2774_v6  ;;  %v2184_v34 = vld [vmem:[%s3308_s1 + $0x434] sm:$0xf0]  ;;  %v2893_v9 = vor.u32 %v2042_v38, %v1439_v39  ;;  %v1478_v16 = vor.u32 %v2053_v3, %v1475_v4  ;;  %v2051_v21 = vld [vmem:[%s3308_s1 + $0x14] sm:$0xf]  ;;  %v1467_v22 = vld [vmem:[%s3308_s1 + $0x18] sm:$0xf0] }
  0x47   :  { %1202 = vmatpush.bf16.msra.mxu3 %v1646_v59  ;;  %v1994_v59 = vor.u32 %v2184_v34, %v1993_v33  ;;  %v2180_v18 = vld [vmem:[%s3308_s1 + $0x414] sm:$0xf0]  ;;  %v2065_v25 = vld [vmem:[%s3308_s1 + $0x84] sm:$0xf]  ;;  %v1523_v26 = vld [vmem:[%s3308_s1 + $0x88] sm:$0xf0]  ;;  %v1470_v30 = vor.u32 %v2051_v21, %v1467_v22 }
  0x48   :  { %1146 = vmatpush.bf16.msra.mxu0 %v2018_v7  ;;  %v2085_v7 = vld [vmem:[%s3308_s1 + $0x124] sm:$0xf]  ;;  %v2143_v27 = vld [vmem:[%s3308_s1 + $0x2f4] sm:$0xf]  ;;  %v1835_v28 = vld [vmem:[%s3308_s1 + $0x2f8] sm:$0xf0]  ;;  %v1978_v29 = vor.u32 %v2180_v18, %v1977_v17 }
  0x49   :  { %1165 = vmatpush.bf16.msra.mxu1 %v1510_v8  ;;  %v2891_v8 = vor.u32 %v2046_v37, %v1437_v36  ;;  %v2049_v33 = vld [vmem:[%s3308_s1 + $0x4] sm:$0xf]  ;;  %v1459_v36 = vld [vmem:[%s3308_s1 + $0x8] sm:$0xf0]  ;;  %v1838_v39 = vor.u32 %v2143_v27, %v1835_v28  ;;  %v1771_v43 = vld [vmem:[%s3308_s1 + $0x278] sm:$0xf0] }
  0x4a   :  { %1184 = vmatpush.bf16.msra.mxu2 %v1574_v60  ;;  %v1486_v60 = vor.u32 %v2055_v41, %v1483_v42  ;;  %v2081_v37 = vld [vmem:[%s3308_s1 + $0x104] sm:$0xf]  ;;  %v1587_v38 = vld [vmem:[%s3308_s1 + $0x108] sm:$0xf0]  ;;  %v1707_v41 = vld [vmem:[%s3308_s1 + $0x1f8] sm:$0xf0]  ;;  %v1462_v49 = vor.u32 %v2049_v33, %v1459_v36 }
  0x4b   :  { %1203 = vmatpush.bf16.msra.mxu3 %v1638_v11  ;;  %v2067_v11 = vld [vmem:[%s3308_s1 + $0x94] sm:$0xf]  ;;  %v1899_v46 = vld [vmem:[%s3308_s1 + $0x378] sm:$0xf0]  ;;  %v2141_v52 = vld [vmem:[%s3308_s1 + $0x2e4] sm:$0xf]  ;;  %v1590_v58 = vor.u32 %v2081_v37, %v1587_v38 }
  0x4c   :  { %1147 = vmatpush.bf16.msra.mxu0 %v2010_v19  ;;  %v1606_v19 = vor.u32 %v2085_v7, %v1603_v10  ;;  %v2127_v42 = vld [vmem:[%s3308_s1 + $0x274] sm:$0xf]  ;;  %v1827_v55 = vld [vmem:[%s3308_s1 + $0x2e8] sm:$0xf0]  ;;  %v2109_v62 = vld [vmem:[%s3308_s1 + $0x1e4] sm:$0xf] }
  0x4d   :  { %1166 = vmatpush.bf16.msra.mxu1 %v1502_v20  ;;  %v2159_v45 = vld [vmem:[%s3308_s1 + $0x374] sm:$0xf]  ;;  %v2039_v3 = vld [vmem:[%s3309_s0 + $0x40] sm:$0xf0]  ;;  %v1830_v4 = vor.u32 %v2141_v52, %v1827_v55  ;;  %v1763_v10 = vld [vmem:[%s3308_s1 + $0x268] sm:$0xf0] }
  0x4e   :  { %1185 = vmatpush.bf16.msra.mxu2 %v1566_v12  ;;  %v1531_v12 = vld [vmem:[%s3308_s1 + $0x98] sm:$0xf0]  ;;  %v1902_v61 = vor.u32 %v2159_v45, %v1899_v46  ;;  %v2125_v7 = vld [vmem:[%s3308_s1 + $0x264] sm:$0xf]  ;;  %v2155_v27 = vld [vmem:[%s3308_s1 + $0x354] sm:$0xf] }
  0x4f   :  { %1204 = vmatpush.bf16.msra.mxu3 %v1630_v23  ;;  %v1534_v20 = vor.u32 %v2067_v11, %v1531_v12  ;;  %v2083_v23 = vld [vmem:[%s3308_s1 + $0x114] sm:$0xf]  ;;  %v2157_v12 = vld [vmem:[%s3308_s1 + $0x364] sm:$0xf]  ;;  %v1819_v18 = vld [vmem:[%s3308_s1 + $0x2d8] sm:$0xf0]  ;;  %v1766_v21 = vor.u32 %v2125_v7, %v1763_v10 }
  0x50   :  { %1148 = vmatpush.bf16.msra.mxu0 %v2002_v31  ;;  %v1969_v31 = vld [vmem:[%s3308_s1 + $0x400] sm:$0xf]  ;;  %v1883_v28 = vld [vmem:[%s3308_s1 + $0x358] sm:$0xf0]  ;;  %v2135_v38 = vld [vmem:[%s3308_s1 + $0x2b4] sm:$0xf] }
  0x51   :  { %1167 = vmatpush.bf16.msra.mxu1 %v1494_v32  ;;  %v2178_v32 = vld [vmem:[%s3308_s1 + $0x404] sm:$0xf0]  ;;  %v2119_v45 = vld [vmem:[%s3308_s1 + $0x234] sm:$0xf]  ;;  %v1739_v46 = vld [vmem:[%s3308_s1 + $0x238] sm:$0xf0] }
  0x52   :  { %1186 = vmatpush.bf16.msra.mxu2 %v1558_v24  ;;  %v1595_v24 = vld [vmem:[%s3308_s1 + $0x118] sm:$0xf0]  ;;  %v1970_v47 = vor.u32 %v2178_v32, %v1969_v31  ;;  %v2105_v31 = vld [vmem:[%s3308_s1 + $0x1c4] sm:$0xf]  ;;  %v1683_v32 = vld [vmem:[%s3308_s1 + $0x1c8] sm:$0xf0] }
  0x53   :  { %1205 = vmatpush.bf16.msra.mxu3 %v1622_v35  ;;  %1082 = vmatmul.bf16.gmra.mxu0 %v2891_v8  ;;  %v1598_v34 = vor.u32 %v2083_v23, %v1595_v24  ;;  %v1526_v35 = vor.u32 %v2065_v25, %v1523_v26  ;;  %v2123_v23 = vld [vmem:[%s3308_s1 + $0x254] sm:$0xf]  ;;  %v1755_v24 = vld [vmem:[%s3308_s1 + $0x258] sm:$0xf0]  ;;  %v1686_v37 = vor.u32 %v2105_v31, %v1683_v32  ;;  %v1731_v7 = vld [vmem:[%s3308_s1 + $0x228] sm:$0xf0] }
  0x54   :  { %1149 = vmatpush.bf16.msra.mxu0 %v1994_v59  ;;  %1101 = vmatmul.bf16.gmra.mxu1 %v2893_v9  ;;  %v1758_v33 = vor.u32 %v2123_v23, %v1755_v24  ;;  %v2151_v52 = vld [vmem:[%s3308_s1 + $0x334] sm:$0xf]  ;;  %v1867_v55 = vld [vmem:[%s3308_s1 + $0x338] sm:$0xf0]  ;;  %v1779_v31 = vld [vmem:[%s3308_s1 + $0x288] sm:$0xf0] }
  0x55   :  { %1168 = vmatpush.bf16.msra.mxu1 %v1486_v60  ;;  %1120 = vmatmul.bf16.gmra.mxu2 %v2904_v13  ;;  %v1774_v60 = vor.u32 %v2127_v42, %v1771_v43  ;;  %v2115_v24 = vld [vmem:[%s3308_s1 + $0x214] sm:$0xf]  ;;  %v2097_v32 = vld [vmem:[%s3308_s1 + $0x184] sm:$0xf] }
  0x56   :  { %1187 = vmatpush.bf16.msra.mxu2 %v1550_v40  ;;  %1139 = vmatmul.bf16.gmra.mxu3 %v2906_v14  ;;  %v2111_v40 = vld [vmem:[%s3308_s1 + $0x1f4] sm:$0xf] }
  0x57   :  { %1206 = vmatpush.bf16.msra.mxu3 %v1614_v63  ;;  %v1710_v59 = vor.u32 %v2111_v40, %v1707_v41  ;;  %v1699_v63 = vld [vmem:[%s3308_s1 + $0x1e8] sm:$0xf0]  ;;  %v2103_v40 = vld [vmem:[%s3308_s1 + $0x1b4] sm:$0xf]  ;;  %v1675_v41 = vld [vmem:[%s3308_s1 + $0x1b8] sm:$0xf0] }
  0x58   :  { %1150 = vmatpush.bf16.msra.mxu0 %v1986_v15  ;;  %v1702_v11 = vor.u32 %v2109_v62, %v1699_v63  ;;  %v1891_v15 = vld [vmem:[%s3308_s1 + $0x368] sm:$0xf0]  ;;  %v1453_v62 = vld [vmem:[%s3309_s0 + $0x68] sm:$0xf] }
  0x59   :  { %1169 = vmatpush.bf16.msra.mxu1 %v1478_v16  ;;  %v2139_v16 = vld [vmem:[%s3308_s1 + $0x2d4] sm:$0xf]  ;;  %v1894_v22 = vor.u32 %v2157_v12, %v1891_v15  ;;  %v2048_v63 = vld [vmem:[%s3309_s0 + $0x88] sm:$0xf0]  ;;  %v2149_v12 = vld [vmem:[%s3308_s1 + $0x324] sm:$0xf] }
  0x5a   :  { %1188 = vmatpush.bf16.msra.mxu2 %v1542_v2  ;;  %v1417_v2 = vld [vmem:[%s3309_s0 + $0x20] sm:$0xf]  ;;  %v1822_v25 = vor.u32 %v2139_v16, %v1819_v18  ;;  %v1859_v15 = vld [vmem:[%s3308_s1 + $0x328] sm:$0xf0]  ;;  %v2131_v16 = vld [vmem:[%s3308_s1 + $0x294] sm:$0xf]  ;;  %v3119_v18 = vor.u32 %v2048_v63, %v1453_v62 }
  0x5b   :  { %1207 = vmatpush.bf16.msra.mxu3 %v1606_v19  ;;  %v3011_v17 = vor.u32 %v2039_v3, %v1417_v2  ;;  %v2107_v19 = vld [vmem:[%s3308_s1 + $0x1d4] sm:$0xf]  ;;  %v1742_v2 = vor.u32 %v2119_v45, %v1739_v46  ;;  %v1870_v3 = vor.u32 %v2151_v52, %v1867_v55  ;;  %v1862_v23 = vor.u32 %v2149_v12, %v1859_v15  ;;  %v2019_v52 = vld [vmem:[%s3308_s1 + $0x468] sm:$0xf0] }
  0x5c   :  { %1151 = vmatpush.bf16.msra.mxu0 %v1978_v29  ;;  %v2137_v29 = vld [vmem:[%s3308_s1 + $0x2c4] sm:$0xf] }
  0x5d   :  { %1170 = vmatpush.bf16.msra.mxu1 %v1470_v30  ;;  %v1811_v30 = vld [vmem:[%s3308_s1 + $0x2c8] sm:$0xf0] }
  0x5e   :  { %1189 = vmatpush.bf16.msra.mxu2 %v1534_v20  ;;  %v1691_v20 = vld [vmem:[%s3308_s1 + $0x1d8] sm:$0xf0]  ;;  %v1814_v36 = vor.u32 %v2137_v29, %v1811_v30  ;;  %v2129_v30 = vld [vmem:[%s3308_s1 + $0x284] sm:$0xf] }
  0x5f   :  { %1208 = vmatpush.bf16.msra.mxu3 %v1598_v34  ;;  %v1694_v26 = vor.u32 %v2107_v19, %v1691_v20  ;;  %v2121_v34 = vld [vmem:[%s3308_s1 + $0x244] sm:$0xf]  ;;  %v1787_v19 = vld [vmem:[%s3308_s1 + $0x298] sm:$0xf0]  ;;  %v2099_v20 = vld [vmem:[%s3308_s1 + $0x194] sm:$0xf] }
  0x60   :  { %1152 = vmatpush.bf16.msra.mxu0 %v1970_v47  ;;  %v1851_v29 = vld [vmem:[%s3308_s1 + $0x318] sm:$0xf0] }
  0x61   :  { %1171 = vmatpush.bf16.msra.mxu1 %v1462_v49  ;;  %v1678_v49 = vor.u32 %v2103_v40, %v1675_v41  ;;  %v2027_v40 = vld [vmem:[%s3308_s1 + $0x478] sm:$0xf0]  ;;  %v2173_v41 = vld [vmem:[%s3308_s1 + $0x3e4] sm:$0xf] }
  0x62   :  { %1190 = vmatpush.bf16.msra.mxu2 %v1526_v35  ;;  %v1747_v35 = vld [vmem:[%s3308_s1 + $0x248] sm:$0xf0] }
  0x63   :  { %1209 = vmatpush.bf16.msra.mxu3 %v1590_v58  ;;  %1153 = vmatmul.bf16.vlgmr.msra.gmra.mxu0 %v3011_v17  ;;  %v1750_v42 = vor.u32 %v2121_v34, %v1747_v35  ;;  %v2133_v58 = vld [vmem:[%s3308_s1 + $0x2a4] sm:$0xf] }
  0x64   :  { %1221 = vmatpush.bf16.msrb.mxu0 %v1710_v59  ;;  %1172 = vmatmul.bf16.vlgmr.msra.gmra.mxu1 %v2471_v48  ;;  %v1886_v48 = vor.u32 %v2155_v27, %v1883_v28  ;;  %v1795_v59 = vld [vmem:[%s3308_s1 + $0x2a8] sm:$0xf0]  ;;  %v2147_v28 = vld [vmem:[%s3308_s1 + $0x314] sm:$0xf] }
  0x65   :  { %1240 = vmatpush.bf16.msrb.mxu1 %v1774_v60  ;;  %1191 = vmatmul.bf16.vlgmr.msra.gmra.mxu2 %v2482_v53  ;;  %v2153_v53 = vld [vmem:[%s3308_s1 + $0x344] sm:$0xf]  ;;  %v1798_v10 = vor.u32 %v2133_v58, %v1795_v59  ;;  %v1854_v35 = vor.u32 %v2147_v28, %v1851_v29  ;;  %v2171_v58 = vld [vmem:[%s3308_s1 + $0x3d4] sm:$0xf]  ;;  %v1947_v59 = vld [vmem:[%s3308_s1 + $0x3d8] sm:$0xf0] }
  0x66   :  { %1259 = vmatpush.bf16.msrb.mxu2 %v1838_v39  ;;  %1210 = vmatmul.bf16.vlgmr.msra.gmra.mxu3 %v2484_v54  ;;  %v1875_v54 = vld [vmem:[%s3308_s1 + $0x348] sm:$0xf0]  ;;  %v1803_v39 = vld [vmem:[%s3308_s1 + $0x2b8] sm:$0xf0]  ;;  %v2101_v60 = vld [vmem:[%s3308_s1 + $0x1a4] sm:$0xf]  ;;  %v1950_v62 = vor.u32 %v2171_v58, %v1947_v59 }
  0x67   :  { %1278 = vmatpush.bf16.msrb.mxu3 %v1902_v61  ;;  %v1878_v43 = vor.u32 %v2153_v53, %v1875_v54  ;;  %v1806_v47 = vor.u32 %v2135_v38, %v1803_v39  ;;  %v1667_v61 = vld [vmem:[%s3308_s1 + $0x1a8] sm:$0xf0]  ;;  %v2145_v53 = vld [vmem:[%s3308_s1 + $0x304] sm:$0xf]  ;;  %v2191_v39 = vld [vmem:[%s3308_s1 + $0x474] sm:$0xf] }
  0x68   :  { %1222 = vmatpush.bf16.msrb.mxu0 %v1702_v11  ;;  %v1670_v11 = vor.u32 %v2101_v60, %v1667_v61  ;;  %v1843_v54 = vld [vmem:[%s3308_s1 + $0x308] sm:$0xf0]  ;;  %v2030_v46 = vor.u32 %v2191_v39, %v2027_v40  ;;  %v2187_v60 = vld [vmem:[%s3308_s1 + $0x454] sm:$0xf]  ;;  %v2011_v61 = vld [vmem:[%s3308_s1 + $0x458] sm:$0xf0] }
  0x69   :  { %1241 = vmatpush.bf16.msrb.mxu1 %v1766_v21  ;;  %v1659_v21 = vld [vmem:[%s3308_s1 + $0x198] sm:$0xf0]  ;;  %v1846_v45 = vor.u32 %v2145_v53, %v1843_v54  ;;  %v2014_v63 = vor.u32 %v2187_v60, %v2011_v61 }
  0x6a   :  { %1260 = vmatpush.bf16.msrb.mxu2 %v1830_v4  ;;  %v2117_v4 = vld [vmem:[%s3308_s1 + $0x224] sm:$0xf]  ;;  %v1662_v27 = vor.u32 %v2099_v20, %v1659_v21  ;;  %v1987_v21 = vld [vmem:[%s3308_s1 + $0x428] sm:$0xf0] }
  0x6b   :  { %1279 = vmatpush.bf16.msrb.mxu3 %v1894_v22  ;;  %v1734_v22 = vor.u32 %v2117_v4, %v1731_v7  ;;  %v2185_v4 = vld [vmem:[%s3308_s1 + $0x444] sm:$0xf]  ;;  %v2003_v7 = vld [vmem:[%s3308_s1 + $0x448] sm:$0xf0] }
  0x6c   :  { %1223 = vmatpush.bf16.msrb.mxu0 %v1694_v26  ;;  %v1790_v26 = vor.u32 %v2131_v16, %v1787_v19  ;;  %v2165_v16 = vld [vmem:[%s3308_s1 + $0x3a4] sm:$0xf]  ;;  %v1923_v19 = vld [vmem:[%s3308_s1 + $0x3a8] sm:$0xf0] }
  0x6d   :  { %1242 = vmatpush.bf16.msrb.mxu1 %v1758_v33  ;;  %v1651_v33 = vld [vmem:[%s3308_s1 + $0x188] sm:$0xf0]  ;;  %v2181_v20 = vld [vmem:[%s3308_s1 + $0x424] sm:$0xf] }
  0x6e   :  { %1261 = vmatpush.bf16.msrb.mxu2 %v1822_v25  ;;  %v1723_v25 = vld [vmem:[%s3308_s1 + $0x218] sm:$0xf0] }
  0x6f   :  { %1280 = vmatpush.bf16.msrb.mxu3 %v1886_v48  ;;  %v1963_v48 = vld [vmem:[%s3308_s1 + $0x3f8] sm:$0xf0]  ;;  %v1726_v34 = vor.u32 %v2115_v24, %v1723_v25  ;;  %v2163_v24 = vld [vmem:[%s3308_s1 + $0x394] sm:$0xf] }
  0x70   :  { %1224 = vmatpush.bf16.msrb.mxu0 %v1686_v37  ;;  %v1715_v37 = vld [vmem:[%s3308_s1 + $0x208] sm:$0xf0]  ;;  %v1915_v25 = vld [vmem:[%s3308_s1 + $0x398] sm:$0xf0] }
  0x71   :  { %1243 = vmatpush.bf16.msrb.mxu1 %v1750_v42  ;;  %v1955_v42 = vld [vmem:[%s3308_s1 + $0x3e8] sm:$0xf0]  ;;  %v1918_v28 = vor.u32 %v2163_v24, %v1915_v25 }
  0x72   :  { %1262 = vmatpush.bf16.msrb.mxu2 %v1814_v36  ;;  %v2113_v36 = vld [vmem:[%s3308_s1 + $0x204] sm:$0xf] }
  0x73   :  { %1281 = vmatpush.bf16.msrb.mxu3 %v1878_v43  ;;  %1158 = vmatmul.bf16.gmra.mxu0 %v3119_v18  ;;  %v1718_v43 = vor.u32 %v2113_v36, %v1715_v37 }
  0x74   :  { %1225 = vmatpush.bf16.msrb.mxu0 %v1678_v49  ;;  %1177 = vmatmul.bf16.gmra.mxu1 %v2603_v44  ;;  %v2175_v44 = vld [vmem:[%s3308_s1 + $0x3f4] sm:$0xf]  ;;  %v2189_v49 = vld [vmem:[%s3308_s1 + $0x464] sm:$0xf] }
  0x75   :  { %1244 = vmatpush.bf16.msrb.mxu1 %v1742_v2  ;;  %1196 = vmatmul.bf16.gmra.mxu2 %v2614_v50  ;;  %v1782_v50 = vor.u32 %v2129_v30, %v1779_v31  ;;  %v1966_v38 = vor.u32 %v2175_v44, %v1963_v48  ;;  %v2022_v55 = vor.u32 %v2189_v49, %v2019_v52  ;;  %v2169_v2 = vld [vmem:[%s3308_s1 + $0x3c4] sm:$0xf]  ;;  %v1907_v31 = vld [vmem:[%s3308_s1 + $0x388] sm:$0xf0] }
  0x76   :  { %1263 = vmatpush.bf16.msrb.mxu2 %v1806_v47  ;;  %1215 = vmatmul.bf16.gmra.mxu3 %v2616_v51  ;;  %v1654_v51 = vor.u32 %v2097_v32, %v1651_v33  ;;  %v1958_v47 = vor.u32 %v2173_v41, %v1955_v42  ;;  %v2161_v30 = vld [vmem:[%s3308_s1 + $0x384] sm:$0xf]  ;;  %v1971_v33 = vld [vmem:[%s3308_s1 + $0x408] sm:$0xf0] }
  0x77   :  { %1282 = vmatpush.bf16.msrb.mxu3 %v1870_v3  ;;  %v1939_v3 = vld [vmem:[%s3308_s1 + $0x3c8] sm:$0xf0]  ;;  %v2177_v32 = vld [vmem:[%s3308_s1 + $0x404] sm:$0xf]  ;;  %v1910_v44 = vor.u32 %v2161_v30, %v1907_v31 }
  0x78   :  { %1226 = vmatpush.bf16.msrb.mxu0 %v1670_v11  ;;  %v1931_v11 = vld [vmem:[%s3308_s1 + $0x3b8] sm:$0xf0] }
  0x79   :  { %1245 = vmatpush.bf16.msrb.mxu1 %v1734_v22  ;;  %v1926_v22 = vor.u32 %v2165_v16, %v1923_v19 }
  0x7a   :  { %1264 = vmatpush.bf16.msrb.mxu2 %v1798_v10  ;;  %v1942_v10 = vor.u32 %v2169_v2, %v1939_v3 }
  0x7b   :  { %1283 = vmatpush.bf16.msrb.mxu3 %v1862_v23  ;;  %v1990_v23 = vor.u32 %v2181_v20, %v1987_v21 }
  0x7c   :  { %1227 = vmatpush.bf16.msrb.mxu0 %v1662_v27  ;;  %v1979_v27 = vld [vmem:[%s3308_s1 + $0x418] sm:$0xf0] }
  0x7d   :  { %1246 = vmatpush.bf16.msrb.mxu1 %v1726_v34 }
  0x7e   :  { %1265 = vmatpush.bf16.msrb.mxu2 %v1790_v26  ;;  %v2179_v26 = vld [vmem:[%s3308_s1 + $0x414] sm:$0xf] }
  0x7f   :  { %1284 = vmatpush.bf16.msrb.mxu3 %v1854_v35  ;;  %v1982_v29 = vor.u32 %v2179_v26, %v1979_v27 }
  0x80   :  { %1228 = vmatpush.bf16.msrb.mxu0 %v1654_v51 }
  0x81   :  { %1247 = vmatpush.bf16.msrb.mxu1 %v1718_v43 }
  0x82   :  { %1266 = vmatpush.bf16.msrb.mxu2 %v1782_v50 }
  0x83   :  { %1285 = vmatpush.bf16.msrb.mxu3 %v1846_v45  ;;  %1229 = vmatmul.bf16.vlgmr.msrb.gmra.mxu0 %v2492_v57  ;;  %v2006_v57 = vor.u32 %v2185_v4, %v2003_v7 }
  0x84   :  { %1297 = vmatpush.bf16.msra.mxu0 %v1966_v38  ;;  %1248 = vmatmul.bf16.vlgmr.msrb.gmra.mxu1 %v2759_v0  ;;  %v2167_v0 = vld [vmem:[%s3308_s1 + $0x3b4] sm:$0xf] }
  0x85   :  { %1316 = vmatpush.bf16.msra.mxu1 %v2030_v46  ;;  %1267 = vmatmul.bf16.vlgmr.msrb.gmra.mxu2 %v2761_v1  ;;  %v2183_v1 = vld [vmem:[%s3308_s1 + $0x434] sm:$0xf]  ;;  %v1934_v12 = vor.u32 %v2167_v0, %v1931_v11 }
  0x86   :  { %2193 = vmatpush.bf16.msra.mxu2 %v1966_v38  ;;  %1286 = vmatmul.bf16.vlgmr.msrb.gmra.mxu3 %v2772_v5  ;;  %v1995_v5 = vld [vmem:[%s3308_s1 + $0x438] sm:$0xf0] }
  0x87   :  { %2201 = vmatpush.bf16.msra.mxu3 %v2030_v46  ;;  %v1998_v15 = vor.u32 %v2183_v1, %v1995_v5 }
  0x88   :  { %1298 = vmatpush.bf16.msra.mxu0 %v1958_v47 }
  0x89   :  { %1317 = vmatpush.bf16.msra.mxu1 %v2022_v55 }
  0x8a   :  { %2194 = vmatpush.bf16.msra.mxu2 %v1958_v47 }
  0x8b   :  { %2202 = vmatpush.bf16.msra.mxu3 %v2022_v55 }
  0x8c   :  { %1299 = vmatpush.bf16.msra.mxu0 %v1950_v62 }
  0x8d   :  { %1318 = vmatpush.bf16.msra.mxu1 %v2014_v63 }
  0x8e   :  { %2195 = vmatpush.bf16.msra.mxu2 %v1950_v62 }
  0x8f   :  { %2203 = vmatpush.bf16.msra.mxu3 %v2014_v63 }
  0x90   :  { %1300 = vmatpush.bf16.msra.mxu0 %v1942_v10 }
  0x91   :  { %1319 = vmatpush.bf16.msra.mxu1 %v2006_v57 }
  0x92   :  { %2196 = vmatpush.bf16.msra.mxu2 %v1942_v10 }
  0x93   :  { %2204 = vmatpush.bf16.msra.mxu3 %v2006_v57  ;;  %1234 = vmatmul.bf16.gmra.mxu0 %v2624_v56  ;;  %v1974_v56 = vor.u32 %v2177_v32, %v1971_v33 }
  0x94   :  { %1301 = vmatpush.bf16.msra.mxu0 %v1934_v12  ;;  %1253 = vmatmul.bf16.gmra.mxu1 %v2891_v8 }
  0x95   :  { %1320 = vmatpush.bf16.msra.mxu1 %v1998_v15  ;;  %1272 = vmatmul.bf16.gmra.mxu2 %v2893_v9 }
  0x96   :  { %2197 = vmatpush.bf16.msra.mxu2 %v1934_v12  ;;  %1291 = vmatmul.bf16.gmra.mxu3 %v2904_v13 }
  0x97   :  { %2205 = vmatpush.bf16.msra.mxu3 %v1998_v15 }
  0x98   :  { %1302 = vmatpush.bf16.msra.mxu0 %v1926_v22 }
  0x99   :  { %1321 = vmatpush.bf16.msra.mxu1 %v1990_v23 }
  0x9a   :  { %2198 = vmatpush.bf16.msra.mxu2 %v1926_v22 }
  0x9b   :  { %2206 = vmatpush.bf16.msra.mxu3 %v1990_v23 }
  0x9c   :  { %1303 = vmatpush.bf16.msra.mxu0 %v1918_v28 }
  0x9d   :  { %1322 = vmatpush.bf16.msra.mxu1 %v1982_v29 }
  0x9e   :  { %2199 = vmatpush.bf16.msra.mxu2 %v1918_v28 }
  0x9f   :  { %2207 = vmatpush.bf16.msra.mxu3 %v1982_v29 }
  0xa0   :  { %1304 = vmatpush.bf16.msra.mxu0 %v1910_v44  ;;  %v1002_v8 = vpop.f32.mrf.mxu0 }
  0xa1   :  { %1323 = vmatpush.bf16.msra.mxu1 %v1974_v56  ;;  %v1021_v48 = vpop.f32.mrf.mxu1 }
  0xa2   :  { %2200 = vmatpush.bf16.msra.mxu2 %v1910_v44  ;;  %v1022_v34 = vadd.f32 %v1021_v48, %v1002_v8 }
  0xa3   :  { %2208 = vmatpush.bf16.msra.mxu3 %v1974_v56  ;;  %1305 = vmatmul.bf16.vlgmr.msra.gmra.mxu0 %v2774_v6 }
  0xa4   :  { %1324 = vmatmul.bf16.vlgmr.msra.gmra.mxu1 %v3011_v17 }
  0xa5   :  { %1310 = vmatmul.bf16.vlgmr.msra.gmra.mxu2 %v2906_v14 }
  0xa6   :  { %1329 = vmatmul.bf16.vlgmr.msra.gmra.mxu3 %v3119_v18 }
  0xa8   :  { %v1040_v9 = vpop.f32.mrf.mxu2  ;;  %v1004_v36 = vpop.f32.mrf.mxu0 }
  0xa9   :  { %v1041_v13 = vadd.f32 %v1040_v9, %v1022_v34  ;;  %v1059_v35 = vpop.f32.mrf.mxu3  ;;  %v1023_v50 = vpop.f32.mrf.mxu1 }
  0xaa   :  { %v1024_v37 = vadd.f32 %v1023_v50, %v1004_v36 }
  0xab   :  { %v1060_v51 = vadd.f32 %v1059_v35, %v1041_v13 }
  0xb0   :  { %v1042_v53 = vpop.f32.mrf.mxu2  ;;  %v1007_v39 = vpop.f32.mrf.mxu0 }
  0xb1   :  { %v1043_v54 = vadd.f32 %v1042_v53, %v1024_v37  ;;  %v1061_v38 = vpop.f32.mrf.mxu3  ;;  %v1026_v40 = vpop.f32.mrf.mxu1 }
  0xb2   :  { %v1027_v6 = vadd.f32 %v1026_v40, %v1007_v39 }
  0xb3   :  { %v1062_v41 = vadd.f32 %v1061_v38, %v1043_v54 }
  0xb8   :  { %v1045_v42 = vpop.f32.mrf.mxu2  ;;  %v1009_v14 = vpop.f32.mrf.mxu0 }
  0xb9   :  { %v1046_v17 = vadd.f32 %v1045_v42, %v1027_v6  ;;  %v1064_v43 = vpop.f32.mrf.mxu3  ;;  %v1028_v45 = vpop.f32.mrf.mxu1 }
  0xba   :  { %v1029_v46 = vadd.f32 %v1028_v45, %v1009_v14 }
  0xbb   :  { %v1065_v18 = vadd.f32 %v1064_v43, %v1046_v17 }
  0xc0   :  { %v1047_v47 = vpop.f32.mrf.mxu2  ;;  %v1078_v55 = vpop.f32.mrf.mxu0 }
  0xc1   :  { %v1048_v49 = vadd.f32 %v1047_v47, %v1029_v46  ;;  %v1066_v52 = vpop.f32.mrf.mxu3  ;;  %v1097_v58 = vpop.f32.mrf.mxu1  ;;  %v1079_v60 = vadd.f32 %v1078_v55, %v1060_v51 }
  0xc3   :  { %v1067_v59 = vadd.f32 %v1066_v52, %v1048_v49  ;;  %v1098_v61 = vadd.f32 %v1097_v58, %v1079_v60 }
  0xc8   :  { %v1116_v62 = vpop.f32.mrf.mxu2  ;;  %v1080_v3 = vpop.f32.mrf.mxu0 }
  0xc9   :  { %v1135_v63 = vpop.f32.mrf.mxu3  ;;  %v1117_v2 = vadd.f32 %v1116_v62, %v1098_v61  ;;  %v1099_v4 = vpop.f32.mrf.mxu1  ;;  %v1081_v7 = vadd.f32 %v1080_v3, %v1062_v41 }
  0xcb   :  { %v1136_v10 = vadd.f32 %v1135_v63, %v1117_v2  ;;  %v1100_v57 = vadd.f32 %v1099_v4, %v1081_v7  ;;  %v1335_v2 = vld [vmem:[%s3310_s2] sm:$0x3] }
  0xd0   :  { %v1118_v0 = vpop.f32.mrf.mxu2  ;;  %v1083_v5 = vpop.f32.mrf.mxu0 }
  0xd1   :  { %v1137_v11 = vpop.f32.mrf.mxu3  ;;  %v1119_v1 = vadd.f32 %v1118_v0, %v1100_v57  ;;  %v1102_v12 = vpop.f32.mrf.mxu1  ;;  %v1084_v15 = vadd.f32 %v1083_v5, %v1065_v18  ;;  %v1337_v57 = vperm.slane %v1335_v2, 0  ;;  %v1349_v0 = vld [vmem:[%s3311_s3] sm:$0x3] }
  0xd3   :  { %v1138_v16 = vadd.f32 %v1137_v11, %v1119_v1  ;;  %v1103_v19 = vadd.f32 %v1102_v12, %v1084_v15 }
  0xd8   :  { %v1121_v20 = vpop.f32.mrf.mxu2  ;;  %v1085_v23 = vpop.f32.mrf.mxu0 }
  0xd9   :  { %v1140_v21 = vpop.f32.mrf.mxu3  ;;  %v1122_v22 = vadd.f32 %v1121_v20, %v1103_v19  ;;  %v1104_v24 = vpop.f32.mrf.mxu1  ;;  %v1086_v25 = vadd.f32 %v1085_v23, %v1067_v59 }
  0xdb   :  { %v3278_v26 = vadd.f32 %v1140_v21, %v1122_v22  ;;  %v1105_v27 = vadd.f32 %v1104_v24, %v1086_v25  ;;  %v1338_v25 = vperm.slane %v1335_v2, 1 }
  0xe0   :  { %v1123_v28 = vpop.f32.mrf.mxu2  ;;  %v1154_v31 = vpop.f32.mrf.mxu0 }
  0xe1   :  { %v1142_v29 = vpop.f32.mrf.mxu3  ;;  %v1124_v30 = vadd.f32 %v1123_v28, %v1105_v27  ;;  %v1173_v32 = vpop.f32.mrf.mxu1  ;;  %v1155_v33 = vadd.f32 %v1154_v31, %v1136_v10  ;;  %v1352_v31 = vperm.slane %v1349_v0, 1 }
  0xe3   :  { %v3280_v44 = vadd.f32 %v1142_v29, %v1124_v30  ;;  %v1341_v22 = vmul.f32 %v1337_v57, %v1155_v33 }
  0xe8   :  { %v1192_v56 = vpop.f32.mrf.mxu2  ;;  %v1156_v48 = vpop.f32.mrf.mxu0 }
  0xe9   :  { %v1211_v8 = vpop.f32.mrf.mxu3  ;;  %v1175_v34 = vpop.f32.mrf.mxu1  ;;  %v3282_v9 = vadd.f32 %v1156_v48, %v1138_v16  ;;  %v1193_v14 = vadd.f32 %v1192_v56, %v1173_v32  ;;  %v1351_v16 = vperm.slane %v1349_v0, 0 }
  0xeb   :  { %v1212_v49 = vadd.f32 %v1211_v8, %v1193_v14  ;;  %v1355_v8 = vadd.f32 %v1351_v16, %v1341_v22 }
  0xf0   :  { %v1194_v13 = vpop.f32.mrf.mxu2  ;;  %v1159_v36 = vpop.f32.mrf.mxu0 }
  0xf1   :  { %v1213_v35 = vpop.f32.mrf.mxu3  ;;  %v1178_v50 = vpop.f32.mrf.mxu1  ;;  %v1195_v58 = vadd.f32 %v1194_v13, %v1175_v34  ;;  %v1160_v32 = vadd.f32 %v1159_v36, %v3278_v26 }
  0xf3   :  { %v1214_v4 = vadd.f32 %v1213_v35, %v1195_v58 }
  0xf8   :  { %v1197_v51 = vpop.f32.mrf.mxu2  ;;  %v3284_v53 = vpop.f32.mrf.mxu0 }
  0xf9   :  { %v1216_v37 = vpop.f32.mrf.mxu3  ;;  %v1180_v54 = vpop.f32.mrf.mxu1  ;;  %v1198_v55 = vadd.f32 %v1197_v51, %v1178_v50 }
  0xfb   :  { %v1217_v3 = vadd.f32 %v1216_v37, %v1198_v55  ;;  %v1345_v37 = vmul.f32 %v1337_v57, %v1160_v32 }
  0xfd   :  { %v1359_v14 = vadd.f32 %v1351_v16, %v1345_v37 }
  0xff   :  { %v1367_v58 = vmax.f32 %v1359_v14, 0.0 }
 0x100   :  { %v1199_v38 = vpop.f32.mrf.mxu2  ;;  %v1230_v40 = vpop.f32.mrf.mxu0 }
 0x101   :  { %v1218_v39 = vpop.f32.mrf.mxu3  ;;  %v1249_v41 = vpop.f32.mrf.mxu1  ;;  %v1231_v52 = vadd.f32 %v1230_v40, %v1212_v49  ;;  %v1200_v1 = vadd.f32 %v1199_v38, %v1180_v54  ;;  %v1363_v40 = vmax.f32 %v1355_v8, 0.0 }
 0x103   :  { %v1250_v63 = vadd.f32 %v1249_v41, %v1231_v52  ;;  %v1219_v27 = vadd.f32 %v1218_v39, %v1200_v1  ;;  %v1343_v39 = vmul.f32 %v1337_v57, %v3282_v9 }
 0x108   :  { %v1268_v6 = vpop.f32.mrf.mxu2  ;;  %v1232_v17 = vpop.f32.mrf.mxu0 }
 0x109   :  { %v1287_v42 = vpop.f32.mrf.mxu3  ;;  %v1251_v43 = vpop.f32.mrf.mxu1  ;;  %v1269_v7 = vadd.f32 %v1268_v6, %v1250_v63  ;;  %v1233_v11 = vadd.f32 %v1232_v17, %v1214_v4 }
 0x10b   :  { %v1288_v5 = vadd.f32 %v1287_v42, %v1269_v7  ;;  %v1252_v23 = vadd.f32 %v1251_v43, %v1233_v11 }
 0x110   :  { %v1270_v45 = vpop.f32.mrf.mxu2  ;;  %v1235_v46 = vpop.f32.mrf.mxu0 }
 0x111   :  { %v1289_v18 = vpop.f32.mrf.mxu3  ;;  %v1254_v47 = vpop.f32.mrf.mxu1  ;;  %v1236_v10 = vadd.f32 %v1235_v46, %v1217_v3  ;;  %v1271_v29 = vadd.f32 %v1270_v45, %v1252_v23  ;;  %v1162_v45 = vadd.f32 %v3284_v53, %v3280_v44  ;;  %v1357_v46 = vadd.f32 %v1351_v16, %v1343_v39 }
 0x113   :  { %v1255_v19 = vadd.f32 %v1254_v47, %v1236_v10  ;;  %v1290_v13 = vadd.f32 %v1289_v18, %v1271_v29 }
 0x118   :  { %v1273_v59 = vpop.f32.mrf.mxu2  ;;  %v1237_v61 = vpop.f32.mrf.mxu0 }
 0x119   :  { %v1292_v60 = vpop.f32.mrf.mxu3  ;;  %v1256_v62 = vpop.f32.mrf.mxu1  ;;  %v1274_v28 = vadd.f32 %v1273_v59, %v1255_v19  ;;  %v1238_v56 = vadd.f32 %v1237_v61, %v1219_v27  ;;  %v1347_v59 = vmul.f32 %v1337_v57, %v1162_v45 }
 0x11b   :  { %v1293_v34 = vadd.f32 %v1292_v60, %v1274_v28  ;;  %v1257_v33 = vadd.f32 %v1256_v62, %v1238_v56  ;;  %v1365_v62 = vmax.f32 %v1357_v46, 0.0  ;;  %v1361_v4 = vadd.f32 %v1351_v16, %v1347_v59 }
 0x11d   :  { %v1369_v57 = vmax.f32 %v1361_v4, 0.0 }
 0x120   :  { %v1275_v12 = vpop.f32.mrf.mxu2  ;;  %v1306_v20 = vpop.f32.mrf.mxu0 }
 0x121   :  { %v1294_v15 = vpop.f32.mrf.mxu3  ;;  %v1325_v21 = vpop.f32.mrf.mxu1  ;;  %v1307_v24 = vadd.f32 %v1306_v20, %v1288_v5  ;;  %v1276_v42 = vadd.f32 %v1275_v12, %v1257_v33 }
 0x123   :  { %v1326_v30 = vadd.f32 %v1325_v21, %v1307_v24  ;;  %v1295_v49 = vadd.f32 %v1294_v15, %v1276_v42 }
 0x125   :  { %v1342_v48 = vmul.f32 %v1338_v25, %v1326_v30 }
 0x127   :  { %v1356_v35 = vadd.f32 %v1352_v31, %v1342_v48 }
 0x128   :  { %v1311_v50 = vpop.f32.mrf.mxu2  ;;  %v1308_v38 = vpop.f32.mrf.mxu0 }
 0x129   :  { %v1330_v51 = vpop.f32.mrf.mxu3  ;;  %v1312_v54 = vadd.f32 %v1311_v50, %v1293_v34  ;;  %v1364_v41 = vmax.f32 %v1356_v35, 0.0  ;;  %v1309_v6 = vadd.f32 %v1308_v38, %v1290_v13  ;;  %v1327_v26 = vpop.f32.mrf.mxu1 }
 0x12b   :  { %v1331_v17 = vadd.f32 %v1330_v51, %v1312_v54  ;;  %v1371_v36 = vpack.c.bf16 %v1364_v41, %v1363_v40  ;;  %v1328_v43 = vadd.f32 %v1327_v26, %v1309_v6 }
 0x12d   :  { %v1346_v18 = vmul.f32 %v1338_v25, %v1331_v17  ;;  %1375 = vst [vmem:[%s3312_s4] sm:$0xff] %v1371_v36  ;;  %v1344_v47 = vmul.f32 %v1338_v25, %v1328_v43 }
 0x12f   :  { %v1360_v9 = vadd.f32 %v1352_v31, %v1346_v18  ;;  %v1358_v52 = vadd.f32 %v1352_v31, %v1344_v47 }
 0x130   :  { %v1313_v55 = vpop.f32.mrf.mxu2 }
 0x131   :  { %v1368_v60 = vmax.f32 %v1360_v9, 0.0  ;;  %v1314_v61 = vadd.f32 %v1313_v55, %v1295_v49  ;;  %v1366_v63 = vmax.f32 %v1358_v52, 0.0  ;;  %v1332_v2 = vpop.f32.mrf.mxu3 }
 0x133   :  { %v1373_v3 = vpack.c.bf16 %v1368_v60, %v1367_v58  ;;  %v1333_v44 = vadd.f32 %v1332_v2, %v1314_v61  ;;  %v1372_v53 = vpack.c.bf16 %v1366_v63, %v1365_v62 }
 0x135   :  { %1377 = vst [vmem:[%s3312_s4 + $0x10] sm:$0xff] %v1373_v3  ;;  %v1348_v7 = vmul.f32 %v1338_v25, %v1333_v44 }
 0x136   :  { %1376 = vst [vmem:[%s3312_s4 + $0x8] sm:$0xff] %v1372_v53 }
 0x137   :  { %v1362_v10 = vadd.f32 %v1352_v31, %v1348_v7 }
 0x139   :  { %v1370_v0 = vmax.f32 %v1362_v10, 0.0 }
 0x13b   :  { %v1374_v11 = vpack.c.bf16 %v1370_v0, %v1369_v57 }
 0x13d   :  { %1378 = vst [vmem:[%s3312_s4 + $0x18] sm:$0xff] %v1374_v11 }

// kernel: branch_conv_forward.7
= control target key start
LH: loop header
LB: loop body
LE: loop exit
PB: predicated region body
PF: predicated region fallthrough
CT: control target
= control target key end

     0   :  { %s10265_s27 = smov 0   ;;  %s10267_s28 = smov 0   ;;  %s15207_s0 = inlined_call_operand.vmem [shape: f32[2,36,256], index: 0, kind: input, shape index: {}]   ;;  %s15208_s1 = inlined_call_operand.vmem [shape: bf16[9,256,256], index: 1, kind: input, shape index: {}]   ;;  %s15209_s2 = inlined_call_operand.vmem [shape: bf16[9,256,256], index: 2, kind: input, shape index: {}]   ;;  %s15210_s3 = inlined_call_operand.vmem [shape: f32[1,256], index: 3, kind: input, shape index: {}]   ;;  %s15211_s4 = inlined_call_operand.vmem [shape: f32[1,256], index: 4, kind: input, shape index: {}]   ;;  %s15212_s5 = inlined_call_operand.vmem [shape: f32[1,256], index: 5, kind: input, shape index: {}]   ;;  %s15213_s6 = inlined_call_operand.vmem [shape: f32[1,256], index: 6, kind: input, shape index: {}]   ;;  %s15214_s7 = inlined_call_operand.vmem [shape: f32[40,256], index: 7, kind: input, shape index: {}]   ;;  %s15215_s8 = inlined_call_operand.vmem [shape: f32[2,36,256], index: 8, kind: output, shape index: {}]  }
   0x1   :  { %s10269_s29 = smov 0   ;;  %s10271_s30 = smov 0  }
   0x2   :  { %s10273_s9 = smov 0  }
   0x3 LB: > { %s27_s10 = sadd.s32 1, %s10209_s29  ;;  %s30_s11 = sadd.s32 1, %s10213_s30  ;;  %s10217_s9 = sphi %s10273_s9, %s18_s9   ;;  %s10213_s30 = sphi %s10271_s30, %s15219_s30   ;;  %s10209_s29 = sphi %s10269_s29, %s15218_s29   ;;  %s10205_s28 = sphi %s10267_s28, %s15217_s28   ;;  %s10201_s27 = sphi %s10265_s27, %s15216_s27  }
   0x4   : > { %p28_p0 = scmp.ge.s32.totalorder %s27_s10, 10  ;;  %p6712_p1 = scmp.ge.s32.totalorder %s10217_s9, 1 }
   0x5   : > { %p274_p2 = scmp.lt.s32.totalorder %s10217_s9, 21 }
   0x6   : > { %s15221_s10 = smov (%p28_p0, %s27_s10), 0  ;;  %s15223_s11 = smov (!%p28_p0, %s30_s11), %s10213_s30 }
   0x7   : > { %p275_p3 = pnand %p6712_p1, %p274_p2  ;;  %p32_p4 = scmp.ge.s32.totalorder %s15223_s11, 2 }
   0x8   : > { %p308_p5 = scmp.lt.s32.totalorder (!%p275_p3), %s10205_s28, 1  ;;  %p6715_p6 = scmp.ne.s32.totalorder (!%p275_p3), %s10201_s27, 0 }
   0x9   : > { %s15225_s11 = smov (%p32_p4, %s15223_s11), 0  ;;  %278 = sbr.rel (%p275_p3) target bundleno = 1199 (0x4af), region = 52 }
   0xe   : > { %s15227_s28 = smov (!%p308_p5, %s10205_s28), 1  ;;  %321 = sbr.rel (%p6715_p6) target bundleno = 36 (0x24), region = 56 }
   0xf   : > { %s10111_s12 = smul.u32 80, %s15227_s28 }
  0x11   : > { %s312_s15 = scalar_lea.vmem %s15207_s0, %s10111_s12  ;;  %s10303_s18 = scalar_lea.vmem %s15215_s8, %s10111_s12 }
  0x13   : > { %v10219_v0 = vmov 0.0   ;;  %v336_v1 = vld [vmem:[%s312_s15] sm:$0xff]  ;;  %v337_v2 = vld [vmem:[%s312_s15 + $0x8] sm:$0xff]  ;;  %v338_v3 = vld [vmem:[%s312_s15 + $0x10] sm:$0xff] }
  0x14   : > { %322 = vst [vmem:[#allocation2 + $0x30] sm:$0xff] %v10219_v0  ;;  %v339_v4 = vld [vmem:[%s312_s15 + $0x18] sm:$0xff]  ;;  %v340_v5 = vld [vmem:[%s312_s15 + $0x20] sm:$0xff]  ;;  %v341_v6 = vld [vmem:[%s312_s15 + $0x28] sm:$0xff] }
  0x15   : > { %323 = vst [vmem:[#allocation2] sm:$0xff] %v10219_v0  ;;  %v342_v7 = vld [vmem:[%s312_s15 + $0x30] sm:$0xff]  ;;  %v343_v8 = vld [vmem:[%s312_s15 + $0x38] sm:$0xff]  ;;  %v344_v9 = vld [vmem:[%s312_s15 + $0x40] sm:$0xf] }
  0x16   : > { %332 = vst [vmem:[#allocation2 + $0x10] sm:$0xff] %v10219_v0  ;;  %v345_v10 = vld [vmem:[%s312_s15 + $0x48] sm:$0xf] }
  0x17   : > { %333 = vst [vmem:[#allocation2 + $0x38] sm:$0xff] %v10219_v0 }
  0x18   : > { %334 = vst [vmem:[#allocation2 + $0x60] sm:$0xff] %v10219_v0 }
  0x19   : > { %335 = vst [vmem:[#allocation2 + $0x28] sm:$0xff] %v10219_v0 }
  0x1a   : > { %346 = vst [vmem:[#allocation2 + $0x58] sm:$0xff] %v336_v1 }
  0x1b   : > { %347 = vst [vmem:[#allocation2 + $0x18] sm:$0xff] %v337_v2 }
  0x1c   : > { %348 = vst [vmem:[#allocation2 + $0x50] sm:$0xff] %v338_v3 }
  0x1d   : > { %349 = vst [vmem:[#allocation2 + $0x68] sm:$0xff] %v339_v4 }
  0x1e   : > { %350 = vst [vmem:[#allocation2 + $0x8] sm:$0xff] %v340_v5 }
  0x1f   : > { %351 = vst [vmem:[#allocation2 + $0x48] sm:$0xff] %v341_v6 }
  0x20   : > { %352 = vst [vmem:[#allocation2 + $0x40] sm:$0xff] %v342_v7 }
  0x21   : > { %353 = vst [vmem:[#allocation2 + $0x20] sm:$0xff] %v343_v8 }
  0x22   : > { %354 = vst [vmem:[#allocation2 + $0x10] sm:$0xf] %v344_v9 }
  0x23   : > { %355 = vst [vmem:[#allocation2 + $0x38] sm:$0xf] %v345_v10 }
  0x24 PF: > { %v6806_v11 = vld [vmem:[%s15208_s1 + $0x170] sm:$0xf]  ;;  %v9582_v12 = vld [vmem:[%s15208_s1 + $0x174] sm:$0xf0]  ;;  %v9581_v16 = vld [vmem:[%s15208_s1 + $0x174] sm:$0xf] }
  0x25   : > { %v6870_v13 = vld [vmem:[%s15208_s1 + $0x1f0] sm:$0xf]  ;;  %v6807_v14 = vor.u32 %v9582_v12, %v6806_v11  ;;  %v9598_v15 = vld [vmem:[%s15208_s1 + $0x1f4] sm:$0xf0]  ;;  %v6808_v17 = vld [vmem:[%s15208_s1 + $0x178] sm:$0xf0] }
  0x26   : > { %v6871_v18 = vor.u32 %v9598_v15, %v6870_v13  ;;  %v6811_v19 = vor.u32 %v9581_v16, %v6808_v17  ;;  %v9597_v20 = vld [vmem:[%s15208_s1 + $0x1f4] sm:$0xf]  ;;  %v6872_v21 = vld [vmem:[%s15208_s1 + $0x1f8] sm:$0xf0]  ;;  %v6798_v22 = vld [vmem:[%s15208_s1 + $0x160] sm:$0xf] }
  0x27   : > { %640 = vmatpush.bf16.msra.mxu0 %v6807_v14  ;;  %v6875_v23 = vor.u32 %v9597_v20, %v6872_v21  ;;  %v9580_v24 = vld [vmem:[%s15208_s1 + $0x164] sm:$0xf0]  ;;  %v6862_v25 = vld [vmem:[%s15208_s1 + $0x1e0] sm:$0xf]  ;;  %v9579_v29 = vld [vmem:[%s15208_s1 + $0x164] sm:$0xf] }
  0x28   : > { %v9596_v26 = vld [vmem:[%s15208_s1 + $0x1e4] sm:$0xf0]  ;;  %663 = vmatpush.bf16.msra.mxu1 %v6871_v18  ;;  %686 = vmatpush.bf16.msra.mxu2 %v6811_v19  ;;  %v6799_v27 = vor.u32 %v9580_v24, %v6798_v22  ;;  %v6800_v30 = vld [vmem:[%s15208_s1 + $0x168] sm:$0xf0]  ;;  %v9595_v31 = vld [vmem:[%s15208_s1 + $0x1e4] sm:$0xf] }
  0x29   : > { %v6863_v28 = vor.u32 %v9596_v26, %v6862_v25  ;;  %709 = vmatpush.bf16.msra.mxu3 %v6875_v23  ;;  %v6803_v32 = vor.u32 %v9579_v29, %v6800_v30  ;;  %v6864_v33 = vld [vmem:[%s15208_s1 + $0x1e8] sm:$0xf0]  ;;  %v6790_v34 = vld [vmem:[%s15208_s1 + $0x150] sm:$0xf]  ;;  %v9578_v35 = vld [vmem:[%s15208_s1 + $0x154] sm:$0xf0] }
  0x2a   : > { %v6867_v36 = vor.u32 %v9595_v31, %v6864_v33  ;;  %v6854_v37 = vld [vmem:[%s15208_s1 + $0x1d0] sm:$0xf]  ;;  %v9594_v38 = vld [vmem:[%s15208_s1 + $0x1d4] sm:$0xf0]  ;;  %v9577_v39 = vld [vmem:[%s15208_s1 + $0x154] sm:$0xf]  ;;  %v6791_v40 = vor.u32 %v9578_v35, %v6790_v34 }
  0x2b   : > { %641 = vmatpush.bf16.msra.mxu0 %v6799_v27  ;;  %v6792_v41 = vld [vmem:[%s15208_s1 + $0x158] sm:$0xf0]  ;;  %v9593_v42 = vld [vmem:[%s15208_s1 + $0x1d4] sm:$0xf]  ;;  %v6855_v44 = vor.u32 %v9594_v38, %v6854_v37  ;;  %v6782_v46 = vld [vmem:[%s15208_s1 + $0x140] sm:$0xf] }
  0x2c   : > { %v6856_v43 = vld [vmem:[%s15208_s1 + $0x1d8] sm:$0xf0]  ;;  %664 = vmatpush.bf16.msra.mxu1 %v6863_v28  ;;  %687 = vmatpush.bf16.msra.mxu2 %v6803_v32  ;;  %v6795_v45 = vor.u32 %v9577_v39, %v6792_v41  ;;  %v9576_v47 = vld [vmem:[%s15208_s1 + $0x144] sm:$0xf0]  ;;  %v6846_v48 = vld [vmem:[%s15208_s1 + $0x1c0] sm:$0xf] }
  0x2d   : > { %710 = vmatpush.bf16.msra.mxu3 %v6867_v36  ;;  %v6859_v49 = vor.u32 %v9593_v42, %v6856_v43  ;;  %v9592_v50 = vld [vmem:[%s15208_s1 + $0x1c4] sm:$0xf0]  ;;  %v9575_v51 = vld [vmem:[%s15208_s1 + $0x144] sm:$0xf]  ;;  %v6784_v52 = vld [vmem:[%s15208_s1 + $0x148] sm:$0xf0]  ;;  %v6783_v55 = vor.u32 %v9576_v47, %v6782_v46 }
  0x2e   : > { %v9591_v53 = vld [vmem:[%s15208_s1 + $0x1c4] sm:$0xf]  ;;  %v6848_v54 = vld [vmem:[%s15208_s1 + $0x1c8] sm:$0xf0]  ;;  %v6847_v56 = vor.u32 %v9592_v50, %v6846_v48  ;;  %v6787_v57 = vor.u32 %v9575_v51, %v6784_v52  ;;  %v6774_v58 = vld [vmem:[%s15208_s1 + $0x130] sm:$0xf] }
  0x2f   : > { %642 = vmatpush.bf16.msra.mxu0 %v6791_v40  ;;  %v9574_v59 = vld [vmem:[%s15208_s1 + $0x134] sm:$0xf0]  ;;  %v6838_v60 = vld [vmem:[%s15208_s1 + $0x1b0] sm:$0xf]  ;;  %v6851_v61 = vor.u32 %v9591_v53, %v6848_v54  ;;  %v9573_v63 = vld [vmem:[%s15208_s1 + $0x134] sm:$0xf] }
  0x30   : > { %665 = vmatpush.bf16.msra.mxu1 %v6855_v44  ;;  %688 = vmatpush.bf16.msra.mxu2 %v6795_v45  ;;  %v9590_v62 = vld [vmem:[%s15208_s1 + $0x1b4] sm:$0xf0]  ;;  %v6776_v0 = vld [vmem:[%s15208_s1 + $0x138] sm:$0xf0]  ;;  %v9589_v1 = vld [vmem:[%s15208_s1 + $0x1b4] sm:$0xf]  ;;  %v6775_v3 = vor.u32 %v9574_v59, %v6774_v58 }
  0x31   : > { %711 = vmatpush.bf16.msra.mxu3 %v6859_v49  ;;  %v6840_v2 = vld [vmem:[%s15208_s1 + $0x1b8] sm:$0xf0]  ;;  %v6839_v4 = vor.u32 %v9590_v62, %v6838_v60  ;;  %v6779_v5 = vor.u32 %v9573_v63, %v6776_v0  ;;  %v6766_v6 = vld [vmem:[%s15208_s1 + $0x120] sm:$0xf]  ;;  %v9572_v7 = vld [vmem:[%s15208_s1 + $0x124] sm:$0xf0] }
  0x32   : > { %v6830_v8 = vld [vmem:[%s15208_s1 + $0x1a0] sm:$0xf]  ;;  %v6843_v9 = vor.u32 %v9589_v1, %v6840_v2  ;;  %v9588_v10 = vld [vmem:[%s15208_s1 + $0x1a4] sm:$0xf0]  ;;  %v9571_v11 = vld [vmem:[%s15208_s1 + $0x124] sm:$0xf]  ;;  %v6767_v16 = vor.u32 %v9572_v7, %v6766_v6 }
  0x33   : > { %643 = vmatpush.bf16.msra.mxu0 %v6783_v55  ;;  %v6768_v12 = vld [vmem:[%s15208_s1 + $0x128] sm:$0xf0]  ;;  %v9587_v13 = vld [vmem:[%s15208_s1 + $0x1a4] sm:$0xf]  ;;  %v6758_v15 = vld [vmem:[%s15208_s1 + $0x110] sm:$0xf]  ;;  %v6831_v20 = vor.u32 %v9588_v10, %v6830_v8 }
  0x34   : > { %666 = vmatpush.bf16.msra.mxu1 %v6847_v56  ;;  %689 = vmatpush.bf16.msra.mxu2 %v6787_v57  ;;  %v6832_v14 = vld [vmem:[%s15208_s1 + $0x1a8] sm:$0xf0]  ;;  %v9570_v17 = vld [vmem:[%s15208_s1 + $0x114] sm:$0xf0]  ;;  %v6822_v18 = vld [vmem:[%s15208_s1 + $0x190] sm:$0xf]  ;;  %v6771_v21 = vor.u32 %v9571_v11, %v6768_v12 }
  0x35   : > { %712 = vmatpush.bf16.msra.mxu3 %v6851_v61  ;;  %v9586_v19 = vld [vmem:[%s15208_s1 + $0x194] sm:$0xf0]  ;;  %v9569_v22 = vld [vmem:[%s15208_s1 + $0x114] sm:$0xf]  ;;  %v6760_v23 = vld [vmem:[%s15208_s1 + $0x118] sm:$0xf0]  ;;  %v6835_v25 = vor.u32 %v9587_v13, %v6832_v14  ;;  %v6759_v33 = vor.u32 %v9570_v17, %v6758_v15 }
  0x36   : > { %v9585_v24 = vld [vmem:[%s15208_s1 + $0x194] sm:$0xf]  ;;  %v6824_v26 = vld [vmem:[%s15208_s1 + $0x198] sm:$0xf0]  ;;  %v6750_v29 = vld [vmem:[%s15208_s1 + $0x100] sm:$0xf]  ;;  %v6823_v34 = vor.u32 %v9586_v19, %v6822_v18  ;;  %v6763_v40 = vor.u32 %v9569_v22, %v6760_v23 }
  0x37   : > { %644 = vmatpush.bf16.msra.mxu0 %v6775_v3  ;;  %v10474_v27 = vld [vmem:[#allocation2 + $0x58] sm:$0xff]  ;;  %v370_v28 = vld [vmem:[#allocation2 + $0x50] sm:$0xff]  ;;  %v372_v30 = vld [vmem:[#allocation2 + $0x8] sm:$0xff]  ;;  %v6827_v46 = vor.u32 %v9585_v24, %v6824_v26  ;;  %vm463_vm0 = vcmask 1046528   ;;  %vm732_vm1 = vsmask.f32 7424 }
  0x38   : > { %667 = vmatpush.bf16.msra.mxu1 %v6839_v4  ;;  %690 = vmatpush.bf16.msra.mxu2 %v6779_v5  ;;  %v416_v31 = vld [vmem:[#allocation2 + $0x30] sm:$0xfc]  ;;  %v10479_v32 = vld [vmem:[#allocation2 + $0x18] sm:$0xff]  ;;  %v10481_v35 = vpack.c.bf16 %v372_v30, %v370_v28  ;;  %v371_v37 = vld [vmem:[#allocation2 + $0x68] sm:$0xff]  ;;  %vm1078_vm2 = vsmask.f32 6400 }
  0x39   : > { %713 = vmatpush.bf16.msra.mxu3 %v6843_v9  ;;  %v420_v36 = vpack.c.bf16 %v10474_v27, %v416_v31  ;;  %v373_v38 = vld [vmem:[#allocation2 + $0x48] sm:$0xff]  ;;  %v417_v39 = vld [vmem:[#allocation2] sm:$0xfc]  ;;  %v9549_v51 = vld [vmem:[%s15208_s1 + $0x74] sm:$0xf]  ;;  %vm2808_vm5 = vcmask 1044480  }
  0x3a   : > { %v9568_v41 = vld [vmem:[%s15208_s1 + $0x104] sm:$0xf0]  ;;  %v6814_v42 = vld [vmem:[%s15208_s1 + $0x180] sm:$0xf]  ;;  %v10493_v44 = vpack.c.bf16 %v373_v38, %v371_v37  ;;  %v421_v45 = vpack.c.bf16 %v10479_v32, %v417_v39  ;;  %v9567_v47 = vld [vmem:[%s15208_s1 + $0x104] sm:$0xf] }
  0x3b   : > { %645 = vmatpush.bf16.msra.mxu0 %v6767_v16  ;;  %v9584_v43 = vld [vmem:[%s15208_s1 + $0x184] sm:$0xf0]  ;;  %v6752_v48 = vld [vmem:[%s15208_s1 + $0x108] sm:$0xf0]  ;;  %v9583_v49 = vld [vmem:[%s15208_s1 + $0x184] sm:$0xf]  ;;  %v6751_v53 = vor.u32 %v9568_v41, %v6750_v29 }
  0x3c   : > { %668 = vmatpush.bf16.msra.mxu1 %v6831_v20  ;;  %691 = vmatpush.bf16.msra.mxu2 %v6771_v21  ;;  %v6816_v50 = vld [vmem:[%s15208_s1 + $0x188] sm:$0xf0]  ;;  %v6936_v52 = vld [vmem:[%s15208_s1 + $0x78] sm:$0xf0]  ;;  %v6815_v54 = vor.u32 %v9584_v43, %v6814_v42  ;;  %v464_v55 = vrot.slane %v420_v36, 1  ;;  %v465_v56 = vrot.slane %v10481_v35, 1  ;;  %v6755_v59 = vor.u32 %v9567_v47, %v6752_v48 }
  0x3d   : > { %714 = vmatpush.bf16.msra.mxu3 %v6835_v25  ;;  %v9565_v57 = vld [vmem:[%s15208_s1 + $0xf4] sm:$0xf]  ;;  %v7000_v58 = vld [vmem:[%s15208_s1 + $0xf8] sm:$0xf0]  ;;  %v467_v60 = vrot.slane %v421_v45, 1  ;;  %v468_v61 = vrot.slane %v10493_v44, 1  ;;  %v6819_v62 = vor.u32 %v9583_v49, %v6816_v50  ;;  %v6939_v63 = vor.u32 %v9549_v51, %v6936_v52 }
  0x3e   : > { %v6934_v0 = vld [vmem:[%s15208_s1 + $0x70] sm:$0xf]  ;;  %v9550_v1 = vld [vmem:[%s15208_s1 + $0x74] sm:$0xf0]  ;;  %v7003_v3 = vor.u32 %v9565_v57, %v7000_v58  ;;  %v9547_v5 = vld [vmem:[%s15208_s1 + $0x64] sm:$0xf]  ;;  %v466_v7 = vsel %vm463_vm0, %v464_v55, %v465_v56 }
  0x3f   : > { %646 = vmatpush.bf16.msra.mxu0 %v6759_v33  ;;  %v6998_v2 = vld [vmem:[%s15208_s1 + $0xf0] sm:$0xf]  ;;  %v9566_v4 = vld [vmem:[%s15208_s1 + $0xf4] sm:$0xf0]  ;;  %v6928_v6 = vld [vmem:[%s15208_s1 + $0x68] sm:$0xf0]  ;;  %v469_v10 = vsel %vm463_vm0, %v467_v60, %v468_v61  ;;  %v6935_v11 = vor.u32 %v9550_v1, %v6934_v0 }
  0x40   : > { %669 = vmatpush.bf16.msra.mxu1 %v6823_v34  ;;  %692 = vmatpush.bf16.msra.mxu2 %v6763_v40  ;;  %v9563_v8 = vld [vmem:[%s15208_s1 + $0xe4] sm:$0xf]  ;;  %v6992_v9 = vld [vmem:[%s15208_s1 + $0xe8] sm:$0xf0]  ;;  %v6999_v12 = vor.u32 %v9566_v4, %v6998_v2  ;;  %v6931_v13 = vor.u32 %v9547_v5, %v6928_v6  ;;  %v6926_v14 = vld [vmem:[%s15208_s1 + $0x60] sm:$0xf] }
  0x41   : > { %715 = vmatpush.bf16.msra.mxu3 %v6827_v46  ;;  %v9548_v15 = vld [vmem:[%s15208_s1 + $0x64] sm:$0xf0]  ;;  %v6990_v16 = vld [vmem:[%s15208_s1 + $0xe0] sm:$0xf]  ;;  %v6995_v17 = vor.u32 %v9563_v8, %v6992_v9  ;;  %v9545_v19 = vld [vmem:[%s15208_s1 + $0x54] sm:$0xf] }
  0x42   : > { %v9564_v18 = vld [vmem:[%s15208_s1 + $0xe4] sm:$0xf0]  ;;  %v6920_v20 = vld [vmem:[%s15208_s1 + $0x58] sm:$0xf0]  ;;  %v9561_v21 = vld [vmem:[%s15208_s1 + $0xd4] sm:$0xf]  ;;  %v6927_v24 = vor.u32 %v9548_v15, %v6926_v14 }
  0x43   : > { %647 = vmatpush.bf16.msra.mxu0 %v6751_v53  ;;  %v6984_v22 = vld [vmem:[%s15208_s1 + $0xd8] sm:$0xf0]  ;;  %v10576_v23 = vld [vmem:[#allocation2 + $0x40] sm:$0xff]  ;;  %v418_v25 = vld [vmem:[#allocation2 + $0x10] sm:$0x3]  ;;  %v6991_v29 = vor.u32 %v9564_v18, %v6990_v16  ;;  %v6923_v30 = vor.u32 %v9545_v19, %v6920_v20  ;;  %p9532_p7 = scmp.ne.s32.totalorder %s10201_s27, 9 }
  0x44   : > { %670 = vmatpush.bf16.msra.mxu1 %v6815_v54  ;;  %693 = vmatpush.bf16.msra.mxu2 %v6755_v59  ;;  %v10578_v26 = vld [vmem:[#allocation2 + $0x20] sm:$0xff]  ;;  %v419_v28 = vld [vmem:[#allocation2 + $0x38] sm:$0x3]  ;;  %v6918_v31 = vld [vmem:[%s15208_s1 + $0x50] sm:$0xf]  ;;  %v6987_v36 = vor.u32 %v9561_v21, %v6984_v22  ;;  %v422_v40 = vpack.c.bf16 %v418_v25, %v10576_v23 }
  0x45   : > { %716 = vmatpush.bf16.msra.mxu3 %v6819_v62  ;;  %v9546_v33 = vld [vmem:[%s15208_s1 + $0x54] sm:$0xf0]  ;;  %v6982_v34 = vld [vmem:[%s15208_s1 + $0xd0] sm:$0xf]  ;;  %v9543_v38 = vld [vmem:[%s15208_s1 + $0x44] sm:$0xf]  ;;  %v423_v43 = vpack.c.bf16 %v419_v28, %v10578_v26 }
  0x46   : > { %648 = vmatmul.bf16.vlgmr.msra.gmra.mxu0 %v466_v7  ;;  %v9562_v37 = vld [vmem:[%s15208_s1 + $0xd4] sm:$0xf0]  ;;  %v6912_v39 = vld [vmem:[%s15208_s1 + $0x48] sm:$0xf0]  ;;  %v9559_v41 = vld [vmem:[%s15208_s1 + $0xc4] sm:$0xf]  ;;  %v6919_v45 = vor.u32 %v9546_v33, %v6918_v31 }
  0x47   : > { %671 = vmatmul.bf16.vlgmr.msra.gmra.mxu1 %v469_v10  ;;  %694 = vmatmul.bf16.vlgmr.msra.gmra.mxu2 %v466_v7  ;;  %v6976_v42 = vld [vmem:[%s15208_s1 + $0xc8] sm:$0xf0]  ;;  %v6983_v46 = vor.u32 %v9562_v37, %v6982_v34  ;;  %v6915_v47 = vor.u32 %v9543_v38, %v6912_v39  ;;  %v6910_v48 = vld [vmem:[%s15208_s1 + $0x40] sm:$0xf]  ;;  %v9544_v49 = vld [vmem:[%s15208_s1 + $0x44] sm:$0xf0] }
  0x48   : > { %991 = vmatpush.bf16.msrb.mxu2 %v6939_v63  ;;  %717 = vmatmul.bf16.vlgmr.msra.gmra.mxu3 %v469_v10  ;;  %v6974_v50 = vld [vmem:[%s15208_s1 + $0xc0] sm:$0xf]  ;;  %v6979_v51 = vor.u32 %v9559_v41, %v6976_v42  ;;  %v9560_v52 = vld [vmem:[%s15208_s1 + $0xc4] sm:$0xf0]  ;;  %v9541_v53 = vld [vmem:[%s15208_s1 + $0x34] sm:$0xf]  ;;  %v6911_v60 = vor.u32 %v9544_v49, %v6910_v48 }
  0x49   : > { %1014 = vmatpush.bf16.msrb.mxu3 %v7003_v3  ;;  %945 = vmatpush.bf16.msrb.mxu0 %v6935_v11  ;;  %v6904_v54 = vld [vmem:[%s15208_s1 + $0x38] sm:$0xf0]  ;;  %v10624_v55 = vrot.slane %v422_v40, 1  ;;  %v9557_v57 = vld [vmem:[%s15208_s1 + $0xb4] sm:$0xf]  ;;  %v10632_v59 = vrot.slane %v423_v43, 1  ;;  %v6975_v62 = vor.u32 %v9560_v52, %v6974_v50 }
  0x4a   : > { %968 = vmatpush.bf16.msrb.mxu1 %v6999_v12  ;;  %v6968_v58 = vld [vmem:[%s15208_s1 + $0xb8] sm:$0xf0]  ;;  %v6907_v63 = vor.u32 %v9541_v53, %v6904_v54  ;;  %v6902_v0 = vld [vmem:[%s15208_s1 + $0x30] sm:$0xf]  ;;  %v9542_v1 = vld [vmem:[%s15208_s1 + $0x34] sm:$0xf0] }
  0x4b   : > { %v6966_v2 = vld [vmem:[%s15208_s1 + $0xb0] sm:$0xf]  ;;  %v6971_v3 = vor.u32 %v9557_v57, %v6968_v58  ;;  %v9558_v4 = vld [vmem:[%s15208_s1 + $0xb4] sm:$0xf0]  ;;  %v9539_v5 = vld [vmem:[%s15208_s1 + $0x24] sm:$0xf]  ;;  %v471_v7 = vsel %vm463_vm0, %v465_v56, %v10624_v55  ;;  %v473_v10 = vsel %vm463_vm0, %v468_v61, %v10632_v59  ;;  %v6903_v11 = vor.u32 %v9542_v1, %v6902_v0 }
  0x4c   : > { %992 = vmatpush.bf16.msrb.mxu2 %v6931_v13  ;;  %v6896_v6 = vld [vmem:[%s15208_s1 + $0x28] sm:$0xf0]  ;;  %v9555_v8 = vld [vmem:[%s15208_s1 + $0xa4] sm:$0xf]  ;;  %v6967_v12 = vor.u32 %v9558_v4, %v6966_v2  ;;  %v6894_v56 = vld [vmem:[%s15208_s1 + $0x20] sm:$0xf] }
  0x4d   : > { %1015 = vmatpush.bf16.msrb.mxu3 %v6995_v17  ;;  %946 = vmatpush.bf16.msrb.mxu0 %v6927_v24  ;;  %v6960_v9 = vld [vmem:[%s15208_s1 + $0xa8] sm:$0xf0]  ;;  %v6899_v13 = vor.u32 %v9539_v5, %v6896_v6  ;;  %v9540_v14 = vld [vmem:[%s15208_s1 + $0x24] sm:$0xf0]  ;;  %v6958_v15 = vld [vmem:[%s15208_s1 + $0xa0] sm:$0xf] }
  0x4e   : > { %969 = vmatpush.bf16.msrb.mxu1 %v6991_v29  ;;  %v6963_v61 = vor.u32 %v9555_v8, %v6960_v9  ;;  %v9556_v16 = vld [vmem:[%s15208_s1 + $0xa4] sm:$0xf0]  ;;  %v9537_v17 = vld [vmem:[%s15208_s1 + $0x14] sm:$0xf]  ;;  %v6888_v18 = vld [vmem:[%s15208_s1 + $0x18] sm:$0xf0]  ;;  %v6895_v21 = vor.u32 %v9540_v14, %v6894_v56 }
  0x4f   : > { %v9553_v19 = vld [vmem:[%s15208_s1 + $0x94] sm:$0xf]  ;;  %v6952_v20 = vld [vmem:[%s15208_s1 + $0x98] sm:$0xf0]  ;;  %v6886_v22 = vld [vmem:[%s15208_s1 + $0x10] sm:$0xf]  ;;  %v6959_v24 = vor.u32 %v9556_v16, %v6958_v15  ;;  %v6891_v25 = vor.u32 %v9537_v17, %v6888_v18 }
  0x50   : > { %993 = vmatpush.bf16.msrb.mxu2 %v6923_v30  ;;  %v9538_v28 = vld [vmem:[%s15208_s1 + $0x14] sm:$0xf0]  ;;  %v6950_v29 = vld [vmem:[%s15208_s1 + $0x90] sm:$0xf]  ;;  %v6955_v31 = vor.u32 %v9553_v19, %v6952_v20  ;;  %v9535_v33 = vld [vmem:[%s15208_s1 + $0x4] sm:$0xf] }
  0x51   : > { %1016 = vmatpush.bf16.msrb.mxu3 %v6987_v36  ;;  %947 = vmatpush.bf16.msrb.mxu0 %v6919_v45  ;;  %v9554_v30 = vld [vmem:[%s15208_s1 + $0x94] sm:$0xf0]  ;;  %v6880_v34 = vld [vmem:[%s15208_s1 + $0x8] sm:$0xf0]  ;;  %v9551_v36 = vld [vmem:[%s15208_s1 + $0x84] sm:$0xf]  ;;  %v6887_v40 = vor.u32 %v9538_v28, %v6886_v22 }
  0x52   : > { %970 = vmatpush.bf16.msrb.mxu1 %v6983_v46  ;;  %v6944_v37 = vld [vmem:[%s15208_s1 + $0x88] sm:$0xf0]  ;;  %v9613_v38 = vld [vmem:[%s15208_s1 + $0x274] sm:$0xf]  ;;  %v7096_v39 = vld [vmem:[%s15208_s1 + $0x278] sm:$0xf0]  ;;  %v6951_v45 = vor.u32 %v9554_v30, %v6950_v29  ;;  %v6883_v46 = vor.u32 %v9535_v33, %v6880_v34 }
  0x53   : > { %v366_v41 = vld [vmem:[#allocation2 + $0x30] sm:$0xfe]  ;;  %v7160_v43 = vld [vmem:[%s15208_s1 + $0x2f8] sm:$0xf0]  ;;  %v9536_v48 = vld [vmem:[%s15208_s1 + $0x4] sm:$0xf0]  ;;  %v6947_v50 = vor.u32 %v9551_v36, %v6944_v37  ;;  %v7099_v52 = vor.u32 %v9613_v38, %v7096_v39 }
  0x54   : > { %994 = vmatpush.bf16.msrb.mxu2 %v6915_v47  ;;  %v9629_v42 = vld [vmem:[%s15208_s1 + $0x2f4] sm:$0xf]  ;;  %v6878_v47 = vld [vmem:[%s15208_s1] sm:$0xf]  ;;  %v7094_v53 = vld [vmem:[%s15208_s1 + $0x270] sm:$0xf]  ;;  %v10745_v57 = vpack.c.bf16 %v10474_v27, %v366_v41 }
  0x55   : > { %1017 = vmatpush.bf16.msrb.mxu3 %v6979_v51  ;;  %948 = vmatpush.bf16.msrb.mxu0 %v6911_v60  ;;  %v6942_v49 = vld [vmem:[%s15208_s1 + $0x80] sm:$0xf]  ;;  %v9552_v51 = vld [vmem:[%s15208_s1 + $0x84] sm:$0xf0]  ;;  %v9614_v54 = vld [vmem:[%s15208_s1 + $0x274] sm:$0xf0]  ;;  %v7163_v58 = vor.u32 %v9629_v42, %v7160_v43 }
  0x56   : > { %971 = vmatpush.bf16.msrb.mxu1 %v6975_v62  ;;  %653 = vmatmul.bf16.gmra.mxu0 %v471_v7  ;;  %v7158_v60 = vld [vmem:[%s15208_s1 + $0x2f0] sm:$0xf]  ;;  %v9630_v62 = vld [vmem:[%s15208_s1 + $0x2f4] sm:$0xf0]  ;;  %v367_v0 = vld [vmem:[#allocation2] sm:$0xfe]  ;;  %v6943_v1 = vor.u32 %v9552_v51, %v6942_v49  ;;  %v7095_v2 = vor.u32 %v9614_v54, %v7094_v53 }
  0x57   : > { %676 = vmatmul.bf16.gmra.mxu1 %v473_v10  ;;  %699 = vmatmul.bf16.gmra.mxu2 %v471_v7  ;;  %v7088_v4 = vld [vmem:[%s15208_s1 + $0x268] sm:$0xf0]  ;;  %v9627_v5 = vld [vmem:[%s15208_s1 + $0x2e4] sm:$0xf]  ;;  %v7159_v6 = vor.u32 %v9630_v62, %v7158_v60  ;;  %v7086_v8 = vld [vmem:[%s15208_s1 + $0x260] sm:$0xf] }
  0x58   : > { %995 = vmatpush.bf16.msrb.mxu2 %v6907_v63  ;;  %722 = vmatmul.bf16.gmra.mxu3 %v473_v10  ;;  %v6879_v63 = vor.u32 %v9536_v48, %v6878_v47  ;;  %v7152_v7 = vld [vmem:[%s15208_s1 + $0x2e8] sm:$0xf0]  ;;  %v9612_v9 = vld [vmem:[%s15208_s1 + $0x264] sm:$0xf0]  ;;  %v736_v10 = vshll.u32 %v10745_v57, 16  ;;  %v734_v20 = vshrl.u32 %v10745_v57, 16 }
  0x59   : > { %1018 = vmatpush.bf16.msrb.mxu3 %v6971_v3  ;;  %949 = vmatpush.bf16.msrb.mxu0 %v6903_v11  ;;  %v9611_v3 = vld [vmem:[%s15208_s1 + $0x264] sm:$0xf]  ;;  %v10773_v11 = vpack.c.bf16 %v10479_v32, %v367_v0  ;;  %v7155_v14 = vor.u32 %v9627_v5, %v7152_v7  ;;  %v7087_v15 = vor.u32 %v9612_v9, %v7086_v8  ;;  %v7080_v16 = vld [vmem:[%s15208_s1 + $0x258] sm:$0xf0]  ;;  %v9625_v18 = vld [vmem:[%s15208_s1 + $0x2d4] sm:$0xf] }
  0x5a   : > { %972 = vmatpush.bf16.msrb.mxu1 %v6967_v12  ;;  %v7150_v12 = vld [vmem:[%s15208_s1 + $0x2e0] sm:$0xf]  ;;  %v7091_v56 = vor.u32 %v9611_v3, %v7088_v4  ;;  %v7144_v19 = vld [vmem:[%s15208_s1 + $0x2d8] sm:$0xf0]  ;;  %v10798_v22 = vshll.u32 %v10481_v35, 16 }
  0x5b   : > { %v7078_v28 = vld [vmem:[%s15208_s1 + $0x250] sm:$0xf]  ;;  %v7147_v30 = vor.u32 %v9625_v18, %v7144_v19  ;;  %v9607_v33 = vld [vmem:[%s15208_s1 + $0x244] sm:$0xf]  ;;  %v7072_v34 = vld [vmem:[%s15208_s1 + $0x248] sm:$0xf0] }
  0x5c   : > { %996 = vmatpush.bf16.msrb.mxu2 %v6899_v13  ;;  %v9628_v13 = vld [vmem:[%s15208_s1 + $0x2e4] sm:$0xf0]  ;;  %v7142_v29 = vld [vmem:[%s15208_s1 + $0x2d0] sm:$0xf]  ;;  %v9623_v37 = vld [vmem:[%s15208_s1 + $0x2c4] sm:$0xf]  ;;  %v7075_v47 = vor.u32 %v9607_v33, %v7072_v34 }
  0x5d   : > { %1019 = vmatpush.bf16.msrb.mxu3 %v6963_v61  ;;  %950 = vmatpush.bf16.msrb.mxu0 %v6895_v21  ;;  %v9609_v61 = vld [vmem:[%s15208_s1 + $0x254] sm:$0xf]  ;;  %v7151_v17 = vor.u32 %v9628_v13, %v7150_v12  ;;  %v738_v21 = vrot.slane %v736_v10, 1  ;;  %v7136_v38 = vld [vmem:[%s15208_s1 + $0x2c8] sm:$0xf0]  ;;  %v746_v43 = vshrl.u32 %v10773_v11, 16 }
  0x5e   : > { %973 = vmatpush.bf16.msrb.mxu1 %v6959_v24  ;;  %v748_v24 = vshll.u32 %v10773_v11, 16  ;;  %v7070_v39 = vld [vmem:[%s15208_s1 + $0x240] sm:$0xf]  ;;  %v9624_v42 = vld [vmem:[%s15208_s1 + $0x2c4] sm:$0xf0]  ;;  %v7139_v48 = vor.u32 %v9623_v37, %v7136_v38  ;;  %v743_v62 = vrot.slane %v10798_v22, 1 }
  0x5f   : > { %v7134_v41 = vld [vmem:[%s15208_s1 + $0x2c0] sm:$0xf]  ;;  %v7064_v51 = vld [vmem:[%s15208_s1 + $0x238] sm:$0xf0]  ;;  %v7062_v57 = vld [vmem:[%s15208_s1 + $0x230] sm:$0xf]  ;;  %v739_v60 = vor.u32 %v738_v21, %v734_v20 }
  0x60   : > { %997 = vmatpush.bf16.msrb.mxu2 %v6891_v25  ;;  %v7083_v25 = vor.u32 %v9609_v61, %v7080_v16  ;;  %v7135_v53 = vor.u32 %v9624_v42, %v7134_v41  ;;  %v7128_v54 = vld [vmem:[%s15208_s1 + $0x2b8] sm:$0xf0]  ;;  %v9622_v0 = vld [vmem:[%s15208_s1 + $0x2b4] sm:$0xf0]  ;;  %v376_v3 = vld [vmem:[#allocation2 + $0x10] sm:$0x1] }
  0x61   : > { %1020 = vmatpush.bf16.msrb.mxu3 %v6955_v31  ;;  %951 = vmatpush.bf16.msrb.mxu0 %v6887_v40  ;;  %v9608_v40 = vld [vmem:[%s15208_s1 + $0x244] sm:$0xf0]  ;;  %v377_v4 = vld [vmem:[#allocation2 + $0x38] sm:$0x1]  ;;  %v9603_v8 = vld [vmem:[%s15208_s1 + $0x224] sm:$0xf]  ;;  %v744_v13 = vsel %vm732_vm1, %v739_v60, %v743_v62 }
  0x62   : > { %974 = vmatpush.bf16.msrb.mxu1 %v6951_v45  ;;  %v750_v45 = vrot.slane %v748_v24, 1  ;;  %v7071_v49 = vor.u32 %v9608_v40, %v7070_v39  ;;  %v7056_v9 = vld [vmem:[%s15208_s1 + $0x228] sm:$0xf0]  ;;  %v9619_v11 = vld [vmem:[%s15208_s1 + $0x2a4] sm:$0xf]  ;;  %v10897_v19 = vshrl.u32 %v10493_v44, 16 }
  0x63   : > { %v7120_v12 = vld [vmem:[%s15208_s1 + $0x2a8] sm:$0xf0]  ;;  %v7059_v61 = vor.u32 %v9603_v8, %v7056_v9  ;;  %v7054_v21 = vld [vmem:[%s15208_s1 + $0x220] sm:$0xf]  ;;  %v9604_v24 = vld [vmem:[%s15208_s1 + $0x224] sm:$0xf0] }
  0x64   : > { %998 = vmatpush.bf16.msrb.mxu2 %v6883_v46  ;;  %v10840_v46 = vshll.u32 %v10493_v44, 16  ;;  %v7123_v16 = vor.u32 %v9619_v11, %v7120_v12  ;;  %v9620_v44 = vld [vmem:[%s15208_s1 + $0x2a4] sm:$0xf0]  ;;  %v7046_v33 = vld [vmem:[%s15208_s1 + $0x210] sm:$0xf] }
  0x65   : > { %1021 = vmatpush.bf16.msrb.mxu3 %v6947_v50  ;;  %952 = vmatpush.bf16.msrb.mxu0 %v6879_v63  ;;  %v9605_v50 = vld [vmem:[%s15208_s1 + $0x234] sm:$0xf]  ;;  %v7126_v63 = vld [vmem:[%s15208_s1 + $0x2b0] sm:$0xf]  ;;  %v9618_v38 = vld [vmem:[%s15208_s1 + $0x294] sm:$0xf0] }
  0x66   : > { %975 = vmatpush.bf16.msrb.mxu1 %v6943_v1  ;;  %658 = vmatmul.bf16.gmra.mxu0 %v10624_v55  ;;  %v751_v1 = vor.u32 %v750_v45, %v746_v43  ;;  %v7067_v5 = vor.u32 %v9605_v50, %v7064_v51  ;;  %v7127_v10 = vor.u32 %v9622_v0, %v7126_v63  ;;  %v7110_v37 = vld [vmem:[%s15208_s1 + $0x290] sm:$0xf]  ;;  %v9599_v41 = vld [vmem:[%s15208_s1 + $0x204] sm:$0xf]  ;;  %v7040_v42 = vld [vmem:[%s15208_s1 + $0x208] sm:$0xf0] }
  0x67   : > { %681 = vmatmul.bf16.gmra.mxu1 %v10632_v59  ;;  %704 = vmatmul.bf16.gmra.mxu2 %v10624_v55  ;;  %v9610_v55 = vld [vmem:[%s15208_s1 + $0x254] sm:$0xf0]  ;;  %v7111_v40 = vor.u32 %v9618_v38, %v7110_v37  ;;  %v9615_v43 = vld [vmem:[%s15208_s1 + $0x284] sm:$0xf]  ;;  %v7043_v45 = vor.u32 %v9599_v41, %v7040_v42  ;;  %v7102_v51 = vld [vmem:[%s15208_s1 + $0x280] sm:$0xf] }
  0x68   : > { %1333 = vmatpush.bf16.msra.mxu2 %v7099_v52  ;;  %727 = vmatmul.bf16.gmra.mxu3 %v10632_v59  ;;  %v7079_v31 = vor.u32 %v9610_v55, %v7078_v28  ;;  %v9626_v59 = vld [vmem:[%s15208_s1 + $0x2d4] sm:$0xf0]  ;;  %v9621_v52 = vld [vmem:[%s15208_s1 + $0x2b4] sm:$0xf]  ;;  %v7048_v55 = vld [vmem:[%s15208_s1 + $0x218] sm:$0xf0] }
  0x69   : > { %1356 = vmatpush.bf16.msra.mxu3 %v7163_v58  ;;  %1287 = vmatpush.bf16.msra.mxu0 %v7095_v2  ;;  %v7143_v36 = vor.u32 %v9626_v59, %v7142_v29  ;;  %v9606_v58 = vld [vmem:[%s15208_s1 + $0x234] sm:$0xf0]  ;;  %v755_v2 = vrot.slane %v10840_v46, 1  ;;  %v9601_v28 = vld [vmem:[%s15208_s1 + $0x214] sm:$0xf] }
  0x6a   : > { %1310 = vmatpush.bf16.msra.mxu1 %v7159_v6  ;;  %v7131_v6 = vor.u32 %v9621_v52, %v7128_v54  ;;  %v7063_v7 = vor.u32 %v9606_v58, %v7062_v57  ;;  %v7112_v59 = vld [vmem:[%s15208_s1 + $0x298] sm:$0xf0]  ;;  %v9616_v52 = vld [vmem:[%s15208_s1 + $0x284] sm:$0xf0]  ;;  %v9646_v8 = vld [vmem:[%s15208_s1 + $0x374] sm:$0xf0] }
  0x6b   : > { %v767_v58 = vor.u32 %v10897_v19, %v755_v2  ;;  %v7103_v63 = vor.u32 %v9616_v52, %v7102_v51  ;;  %v1038_v9 = vld [vmem:[#allocation2] sm:$0xf8]  ;;  %v7318_v12 = vld [vmem:[%s15208_s1 + $0x3f0] sm:$0xf]  ;;  %v1099_v51 = vrot.slane %v10897_v19, 1  ;;  %v1100_v52 = vrot.slane %v10840_v46, 2 }
  0x6c   : > { %1334 = vmatpush.bf16.msra.mxu2 %v7091_v56  ;;  %v10884_v56 = vpack.c.bf16 %v376_v3, %v10576_v23  ;;  %v9661_v3 = vld [vmem:[%s15208_s1 + $0x3f4] sm:$0xf]  ;;  %v1042_v38 = vpack.c.bf16 %v10479_v32, %v1038_v9  ;;  %v1088_v32 = vrot.slane %v10798_v22, 2  ;;  %vm1430_vm3 = vsmask.f32 4352 }
  0x6d   : > { %1357 = vmatpush.bf16.msra.mxu3 %v7155_v14  ;;  %1288 = vmatpush.bf16.msra.mxu0 %v7087_v15  ;;  %v10887_v14 = vpack.c.bf16 %v377_v4, %v10578_v26  ;;  %v756_v15 = vsel %vm732_vm1, %v751_v1, %v755_v2  ;;  %v7256_v2 = vld [vmem:[%s15208_s1 + $0x378] sm:$0xf0]  ;;  %v1037_v4 = vld [vmem:[#allocation2 + $0x30] sm:$0xf8]  ;;  %vm2450_vm4 = vsmask.f32 5376 }
  0x6e   : > { %1311 = vmatpush.bf16.msra.mxu1 %v7151_v17  ;;  %v10893_v17 = vshrl.u32 %v10481_v35, 16  ;;  %v761_v18 = vshll.u32 %v10884_v56, 16  ;;  %v7118_v35 = vld [vmem:[%s15208_s1 + $0x2a0] sm:$0xf] }
  0x6f   : > { %v769_v20 = vshll.u32 %v10887_v14, 16  ;;  %v7119_v29 = vor.u32 %v9620_v44, %v7118_v35  ;;  %v7246_v35 = vld [vmem:[%s15208_s1 + $0x360] sm:$0xf]  ;;  %v776_v37 = vshrl.u32 %v10887_v14, 16 }
  0x70   : > { %1335 = vmatpush.bf16.msra.mxu2 %v7083_v25  ;;  %v7055_v25 = vor.u32 %v9604_v24, %v7054_v21  ;;  %v763_v54 = vrot.slane %v761_v18, 1  ;;  %v9659_v18 = vld [vmem:[%s15208_s1 + $0x3e4] sm:$0xf]  ;;  %v7310_v44 = vld [vmem:[%s15208_s1 + $0x3e0] sm:$0xf]  ;;  %v1087_v14 = vrot.slane %v10893_v17, 1 }
  0x71   : > { %1358 = vmatpush.bf16.msra.mxu3 %v7147_v30  ;;  %1289 = vmatpush.bf16.msra.mxu0 %v7079_v31  ;;  %v7051_v30 = vor.u32 %v9601_v28, %v7048_v55  ;;  %v9617_v31 = vld [vmem:[%s15208_s1 + $0x294] sm:$0xf]  ;;  %v771_v60 = vrot.slane %v769_v20, 1  ;;  %v7312_v20 = vld [vmem:[%s15208_s1 + $0x3e8] sm:$0xf0] }
  0x72   : > { %1312 = vmatpush.bf16.msra.mxu1 %v7143_v36  ;;  %v7115_v34 = vor.u32 %v9617_v31, %v7112_v59  ;;  %v9602_v36 = vld [vmem:[%s15208_s1 + $0x214] sm:$0xf0]  ;;  %v7315_v24 = vor.u32 %v9659_v18, %v7312_v20  ;;  %v9660_v55 = vld [vmem:[%s15208_s1 + $0x3e4] sm:$0xf0]  ;;  %v773_v31 = vshrl.u32 %v10884_v56, 16  ;;  %v1041_v59 = vpack.c.bf16 %v10474_v27, %v1037_v4 }
  0x73   : > { %v7047_v39 = vor.u32 %v9602_v36, %v7046_v33  ;;  %v772_v1 = vsel %vm732_vm1, %v767_v58, %v771_v60  ;;  %v7311_v33 = vor.u32 %v9660_v55, %v7310_v44  ;;  %v7304_v36 = vld [vmem:[%s15208_s1 + $0x3d8] sm:$0xf0]  ;;  %v778_v42 = vor.u32 %v776_v37, %v771_v60  ;;  %v9658_v60 = vld [vmem:[%s15208_s1 + $0x3d4] sm:$0xf0]  ;;  %v7230_v4 = vld [vmem:[%s15208_s1 + $0x340] sm:$0xf] }
  0x74   : > { %1336 = vmatpush.bf16.msra.mxu2 %v7075_v47  ;;  %v7104_v47 = vld [vmem:[%s15208_s1 + $0x288] sm:$0xf0]  ;;  %v775_v27 = vor.u32 %v773_v31, %v763_v54  ;;  %v1083_v41 = vshll.u32 %v1041_v59, 16  ;;  %v1040_v44 = vld [vmem:[#allocation2 + $0x38] sm:$0x7] }
  0x75   : > { %1359 = vmatpush.bf16.msra.mxu3 %v7139_v48  ;;  %1290 = vmatpush.bf16.msra.mxu0 %v7071_v49  ;;  %v7038_v48 = vld [vmem:[%s15208_s1 + $0x200] sm:$0xf]  ;;  %v9600_v49 = vld [vmem:[%s15208_s1 + $0x204] sm:$0xf0]  ;;  %v7107_v50 = vor.u32 %v9615_v43, %v7104_v47  ;;  %v1092_v43 = vshrl.u32 %v1042_v38, 16  ;;  %v1044_v55 = vpack.c.bf16 %v1040_v44, %v10578_v26 }
  0x76   : > { %1313 = vmatpush.bf16.msra.mxu1 %v7135_v53  ;;  %953 = vmatmul.bf16.vlgmr.msrb.gmra.mxu0 %v744_v13  ;;  %v759_v53 = vor.u32 %v10893_v17, %v743_v62  ;;  %v7039_v57 = vor.u32 %v9600_v49, %v7038_v48  ;;  %v9645_v62 = vld [vmem:[%s15208_s1 + $0x374] sm:$0xf]  ;;  %v1085_v48 = vrot.slane %v1083_v41, 2  ;;  %v9654_v26 = vld [vmem:[%s15208_s1 + $0x3b4] sm:$0xf0] }
  0x77   : > { %976 = vmatmul.bf16.vlgmr.msrb.gmra.mxu1 %v756_v15  ;;  %999 = vmatmul.bf16.vlgmr.msrb.gmra.mxu2 %v744_v13  ;;  %v9662_v13 = vld [vmem:[%s15208_s1 + $0x3f4] sm:$0xf0]  ;;  %v1094_v49 = vrot.slane %v1092_v43, 1  ;;  %v7216_v37 = vld [vmem:[%s15208_s1 + $0x328] sm:$0xf0] }
  0x78   : > { %1337 = vmatpush.bf16.msra.mxu2 %v7067_v5  ;;  %1022 = vmatmul.bf16.vlgmr.msrb.gmra.mxu3 %v756_v15  ;;  %v764_v0 = vsel %vm732_vm1, %v759_v53, %v763_v54  ;;  %v7259_v5 = vor.u32 %v9645_v62, %v7256_v2  ;;  %v9643_v15 = vld [vmem:[%s15208_s1 + $0x364] sm:$0xf]  ;;  %v7238_v53 = vld [vmem:[%s15208_s1 + $0x350] sm:$0xf]  ;;  %v9642_v54 = vld [vmem:[%s15208_s1 + $0x354] sm:$0xf0] }
  0x79   : > { %1360 = vmatpush.bf16.msra.mxu3 %v7131_v6  ;;  %1291 = vmatpush.bf16.msra.mxu0 %v7063_v7  ;;  %v7320_v6 = vld [vmem:[%s15208_s1 + $0x3f8] sm:$0xf0]  ;;  %v7254_v7 = vld [vmem:[%s15208_s1 + $0x370] sm:$0xf]  ;;  %v7239_v58 = vor.u32 %v9642_v54, %v7238_v53  ;;  %v9655_v2 = vld [vmem:[%s15208_s1 + $0x3c4] sm:$0xf] }
  0x7a   : > { %1314 = vmatpush.bf16.msra.mxu1 %v7127_v10  ;;  %v7323_v10 = vor.u32 %v9661_v3, %v7320_v6  ;;  %v7255_v11 = vor.u32 %v9646_v8, %v7254_v7  ;;  %v7296_v3 = vld [vmem:[%s15208_s1 + $0x3c8] sm:$0xf0]  ;;  %v9640_v6 = vld [vmem:[%s15208_s1 + $0x344] sm:$0xf0]  ;;  %v7294_v7 = vld [vmem:[%s15208_s1 + $0x3c0] sm:$0xf] }
  0x7b   : > { %v9656_v8 = vld [vmem:[%s15208_s1 + $0x3c4] sm:$0xf0]  ;;  %v7231_v9 = vor.u32 %v9640_v6, %v7230_v4  ;;  %v7280_v41 = vld [vmem:[%s15208_s1 + $0x3a8] sm:$0xf0]  ;;  %v9633_v53 = vld [vmem:[%s15208_s1 + $0x314] sm:$0xf] }
  0x7c   : > { %1338 = vmatpush.bf16.msra.mxu2 %v7059_v61  ;;  %v7319_v61 = vor.u32 %v9662_v13, %v7318_v12  ;;  %v7224_v12 = vld [vmem:[%s15208_s1 + $0x338] sm:$0xf0]  ;;  %v9653_v13 = vld [vmem:[%s15208_s1 + $0x3b4] sm:$0xf]  ;;  %v9631_v4 = vld [vmem:[%s15208_s1 + $0x304] sm:$0xf] }
  0x7d   : > { %1361 = vmatpush.bf16.msra.mxu3 %v7123_v16  ;;  %1292 = vmatpush.bf16.msra.mxu0 %v7055_v25  ;;  %v7248_v16 = vld [vmem:[%s15208_s1 + $0x368] sm:$0xf0]  ;;  %v9644_v25 = vld [vmem:[%s15208_s1 + $0x364] sm:$0xf0]  ;;  %v7208_v54 = vld [vmem:[%s15208_s1 + $0x318] sm:$0xf0] }
  0x7e   : > { %1315 = vmatpush.bf16.msra.mxu1 %v7119_v29  ;;  %v7251_v21 = vor.u32 %v9643_v15, %v7248_v16  ;;  %v7247_v28 = vor.u32 %v9644_v25, %v7246_v35  ;;  %v9641_v29 = vld [vmem:[%s15208_s1 + $0x354] sm:$0xf]  ;;  %v1039_v15 = vld [vmem:[#allocation2 + $0x10] sm:$0x7]  ;;  %v7288_v16 = vld [vmem:[%s15208_s1 + $0x3b8] sm:$0xf0]  ;;  %v11086_v35 = vor.u32 %v1100_v52, %v1099_v51 }
  0x7f   : > { %v7291_v18 = vor.u32 %v9653_v13, %v7288_v16  ;;  %v1043_v25 = vpack.c.bf16 %v1039_v15, %v10576_v23  ;;  %v9638_v23 = vld [vmem:[%s15208_s1 + $0x334] sm:$0xf0]  ;;  %v9652_v51 = vld [vmem:[%s15208_s1 + $0x3a4] sm:$0xf0]  ;;  %v7198_v13 = vld [vmem:[%s15208_s1 + $0x300] sm:$0xf] }
  0x80   : > { %1339 = vmatpush.bf16.msra.mxu2 %v7051_v30  ;;  %v7240_v30 = vld [vmem:[%s15208_s1 + $0x358] sm:$0xf0]  ;;  %v9632_v15 = vld [vmem:[%s15208_s1 + $0x304] sm:$0xf0] }
  0x81   : > { %1362 = vmatpush.bf16.msra.mxu3 %v7115_v34  ;;  %1293 = vmatpush.bf16.msra.mxu0 %v7047_v39  ;;  %v9657_v34 = vld [vmem:[%s15208_s1 + $0x3d4] sm:$0xf]  ;;  %v7243_v39 = vor.u32 %v9641_v29, %v7240_v30  ;;  %v1104_v30 = vshrl.u32 %v1043_v25, 16  ;;  %v1107_v31 = vshll.u32 %v1043_v25, 16  ;;  %v7416_v44 = vld [vmem:[%s15208_s1 + $0x478] sm:$0xf0] }
  0x82   : > { %1316 = vmatpush.bf16.msra.mxu1 %v7111_v40  ;;  %v7307_v56 = vor.u32 %v9657_v34, %v7304_v36  ;;  %v1080_v40 = vshrl.u32 %v1041_v59, 16  ;;  %v7222_v59 = vld [vmem:[%s15208_s1 + $0x330] sm:$0xf]  ;;  %v9635_v36 = vld [vmem:[%s15208_s1 + $0x324] sm:$0xf] }
  0x83   : > { %v7223_v34 = vor.u32 %v9638_v23, %v7222_v59  ;;  %v1106_v43 = vrot.slane %v1104_v30, 1  ;;  %v1389_v30 = vld [vmem:[#allocation2 + $0x30] sm:$0x80]  ;;  %v9678_v59 = vld [vmem:[%s15208_s1 + $0x474] sm:$0xf0] }
  0x84   : > { %1340 = vmatpush.bf16.msra.mxu2 %v7043_v45  ;;  %v1095_v45 = vshll.u32 %v1042_v38, 16  ;;  %v1082_v47 = vrot.slane %v1080_v40, 1  ;;  %v1113_v38 = vshrl.u32 %v1044_v55, 16  ;;  %v9651_v40 = vld [vmem:[%s15208_s1 + $0x3a4] sm:$0xf] }
  0x85   : > { %1363 = vmatpush.bf16.msra.mxu3 %v7107_v50  ;;  %1294 = vmatpush.bf16.msra.mxu0 %v7039_v57  ;;  %v7302_v57 = vld [vmem:[%s15208_s1 + $0x3d0] sm:$0xf] }
  0x86   : > { %1317 = vmatpush.bf16.msra.mxu1 %v7103_v63  ;;  %958 = vmatmul.bf16.gmra.mxu0 %v764_v0  ;;  %v1097_v50 = vrot.slane %v1095_v45, 2  ;;  %v9639_v63 = vld [vmem:[%s15208_s1 + $0x344] sm:$0xf]  ;;  %v1086_v20 = vor.u32 %v1085_v48, %v1082_v47  ;;  %v7214_v45 = vld [vmem:[%s15208_s1 + $0x320] sm:$0xf] }
  0x87   : > { %981 = vmatmul.bf16.gmra.mxu1 %v772_v1  ;;  %1004 = vmatmul.bf16.gmra.mxu2 %v764_v0  ;;  %v7232_v0 = vld [vmem:[%s15208_s1 + $0x348] sm:$0xf0]  ;;  %v9636_v47 = vld [vmem:[%s15208_s1 + $0x324] sm:$0xf0]  ;;  %v7278_v48 = vld [vmem:[%s15208_s1 + $0x3a0] sm:$0xf] }
  0x88   : > { %1027 = vmatmul.bf16.gmra.mxu3 %v772_v1  ;;  %1685 = vmatpush.bf16.msrb.mxu2 %v7259_v5  ;;  %v7303_v1 = vor.u32 %v9658_v60, %v7302_v57  ;;  %v7235_v62 = vor.u32 %v9639_v63, %v7232_v0  ;;  %v7299_v5 = vor.u32 %v9655_v2, %v7296_v3  ;;  %v9649_v57 = vld [vmem:[%s15208_s1 + $0x394] sm:$0xf]  ;;  %v7272_v60 = vld [vmem:[%s15208_s1 + $0x398] sm:$0xf0]  ;;  %v7206_v63 = vld [vmem:[%s15208_s1 + $0x310] sm:$0xf] }
  0x89   : > { %1708 = vmatpush.bf16.msrb.mxu3 %v7323_v10  ;;  %1639 = vmatpush.bf16.msrb.mxu0 %v7255_v11  ;;  %v7295_v10 = vor.u32 %v9656_v8, %v7294_v7  ;;  %v9637_v11 = vld [vmem:[%s15208_s1 + $0x334] sm:$0xf]  ;;  %v7279_v52 = vor.u32 %v9652_v51, %v7278_v48  ;;  %v9634_v0 = vld [vmem:[%s15208_s1 + $0x314] sm:$0xf0]  ;;  %v7270_v2 = vld [vmem:[%s15208_s1 + $0x390] sm:$0xf] }
  0x8a   : > { %1662 = vmatpush.bf16.msrb.mxu1 %v7319_v61  ;;  %v7227_v61 = vor.u32 %v9637_v11, %v7224_v12  ;;  %v9650_v3 = vld [vmem:[%s15208_s1 + $0x394] sm:$0xf0]  ;;  %v7200_v7 = vld [vmem:[%s15208_s1 + $0x308] sm:$0xf0]  ;;  %v9647_v8 = vld [vmem:[%s15208_s1 + $0x384] sm:$0xf] }
  0x8b   : > { %v7271_v6 = vor.u32 %v9650_v3, %v7270_v2  ;;  %v7203_v11 = vor.u32 %v9631_v4, %v7200_v7  ;;  %v7478_v23 = vld [vmem:[%s15208_s1 + $0x4f0] sm:$0xf]  ;;  %v11227_v48 = vld [vmem:[#allocation2 + $0x18] sm:$0xff]  ;;  %v7470_v51 = vld [vmem:[%s15208_s1 + $0x4e0] sm:$0xf] }
  0x8c   : > { %1686 = vmatpush.bf16.msrb.mxu2 %v7251_v21  ;;  %v11084_v21 = vor.u32 %v1088_v32, %v1087_v14  ;;  %v1109_v14 = vrot.slane %v1107_v31, 2  ;;  %v1115_v32 = vrot.slane %v1113_v38, 1  ;;  %v7414_v31 = vld [vmem:[%s15208_s1 + $0x470] sm:$0xf]  ;;  %v7464_v2 = vld [vmem:[%s15208_s1 + $0x4d8] sm:$0xf0] }
  0x8d   : > { %1709 = vmatpush.bf16.msrb.mxu3 %v7315_v24  ;;  %1640 = vmatpush.bf16.msrb.mxu0 %v7247_v28  ;;  %v1098_v24 = vor.u32 %v1097_v50, %v1094_v49  ;;  %v7215_v50 = vor.u32 %v9636_v47, %v7214_v45  ;;  %v9674_v7 = vld [vmem:[%s15208_s1 + $0x454] sm:$0xf0] }
  0x8e   : > { %1663 = vmatpush.bf16.msrb.mxu1 %v7311_v33  ;;  %v1090_v28 = vsel %vm1078_vm2, %v1086_v20, %v11084_v21  ;;  %v7286_v33 = vld [vmem:[%s15208_s1 + $0x3b0] sm:$0xf]  ;;  %v9648_v20 = vld [vmem:[%s15208_s1 + $0x384] sm:$0xf0] }
  0x8f   : > { %v1102_v29 = vsel %vm1078_vm2, %v1098_v24, %v11086_v35 }
  0x90   : > { %1687 = vmatpush.bf16.msrb.mxu2 %v7243_v39  ;;  %v1116_v39 = vshll.u32 %v1044_v55, 16  ;;  %v7480_v55 = vld [vmem:[%s15208_s1 + $0x4f8] sm:$0xf0] }
  0x91   : > { %1710 = vmatpush.bf16.msrb.mxu3 %v7307_v56  ;;  %1641 = vmatpush.bf16.msrb.mxu0 %v7239_v58  ;;  %v7287_v56 = vor.u32 %v9654_v26, %v7286_v33  ;;  %v7211_v58 = vor.u32 %v9633_v53, %v7208_v54  ;;  %v7415_v33 = vor.u32 %v9678_v59, %v7414_v31  ;;  %v9675_v26 = vld [vmem:[%s15208_s1 + $0x464] sm:$0xf]  ;;  %v9692_v54 = vld [vmem:[%s15208_s1 + $0x4e4] sm:$0xf0]  ;;  %v7454_v31 = vld [vmem:[%s15208_s1 + $0x4c0] sm:$0xf] }
  0x92   : > { %1664 = vmatpush.bf16.msrb.mxu1 %v7303_v1  ;;  %v1118_v49 = vrot.slane %v1116_v39, 2  ;;  %v7275_v1 = vor.u32 %v9649_v57, %v7272_v60  ;;  %v9673_v57 = vld [vmem:[%s15208_s1 + $0x454] sm:$0xf]  ;;  %v1439_v60 = vrot.slane %v10893_v17, 3 }
  0x94   : > { %1688 = vmatpush.bf16.msrb.mxu2 %v7235_v62  ;;  %v7207_v62 = vor.u32 %v9634_v0, %v7206_v63  ;;  %v1440_v63 = vrot.slane %v10798_v22, 4  ;;  %v7471_v0 = vor.u32 %v9692_v54, %v7470_v51  ;;  %v7398_v22 = vld [vmem:[%s15208_s1 + $0x450] sm:$0xf] }
  0x95   : > { %1711 = vmatpush.bf16.msrb.mxu3 %v7299_v5  ;;  %1642 = vmatpush.bf16.msrb.mxu0 %v7231_v9  ;;  %v11157_v5 = vor.u32 %v1109_v14, %v1106_v43  ;;  %v7264_v9 = vld [vmem:[%s15208_s1 + $0x388] sm:$0xf0] }
  0x96   : > { %963 = vmatmul.bf16.gmra.mxu0 %v775_v27  ;;  %1665 = vmatpush.bf16.msrb.mxu1 %v7295_v10  ;;  %v11168_v10 = vor.u32 %v1118_v49, %v1115_v32  ;;  %v7267_v12 = vor.u32 %v9647_v8, %v7264_v9  ;;  %v7406_v49 = vld [vmem:[%s15208_s1 + $0x460] sm:$0xf]  ;;  %v7399_v8 = vor.u32 %v9674_v7, %v7398_v22  ;;  %v9690_v9 = vld [vmem:[%s15208_s1 + $0x4d4] sm:$0xf0]  ;;  %v7376_v22 = vld [vmem:[%s15208_s1 + $0x428] sm:$0xf0] }
  0x97   : > { %986 = vmatmul.bf16.gmra.mxu1 %v778_v42  ;;  %1009 = vmatmul.bf16.gmra.mxu2 %v775_v27  ;;  %v7219_v27 = vor.u32 %v9635_v36, %v7216_v37  ;;  %v1111_v16 = vsel %vm1078_vm2, %v11084_v21, %v11157_v5  ;;  %v9677_v21 = vld [vmem:[%s15208_s1 + $0x474] sm:$0xf]  ;;  %v7408_v36 = vld [vmem:[%s15208_s1 + $0x468] sm:$0xf0]  ;;  %v11218_v37 = vld [vmem:[#allocation2 + $0x58] sm:$0xff] }
  0x98   : > { %1032 = vmatmul.bf16.gmra.mxu3 %v778_v42  ;;  %1689 = vmatpush.bf16.msrb.mxu2 %v7227_v61  ;;  %v7283_v42 = vor.u32 %v9651_v40, %v7280_v41  ;;  %v7262_v61 = vld [vmem:[%s15208_s1 + $0x380] sm:$0xf]  ;;  %v1120_v24 = vsel %vm1078_vm2, %v11086_v35, %v11168_v10  ;;  %v9693_v35 = vld [vmem:[%s15208_s1 + $0x4f4] sm:$0xf]  ;;  %v1393_v38 = vpack.c.bf16 %v11218_v37, %v1389_v30  ;;  %v7472_v40 = vld [vmem:[%s15208_s1 + $0x4e8] sm:$0xf0] }
  0x99   : > { %1712 = vmatpush.bf16.msrb.mxu3 %v7291_v18  ;;  %1643 = vmatpush.bf16.msrb.mxu0 %v7223_v34  ;;  %v7199_v18 = vor.u32 %v9632_v15, %v7198_v13  ;;  %v7263_v25 = vor.u32 %v9648_v20, %v7262_v61  ;;  %v9694_v34 = vld [vmem:[%s15208_s1 + $0x4f4] sm:$0xf0]  ;;  %v1390_v41 = vld [vmem:[#allocation2] sm:$0x80]  ;;  %v1451_v15 = vrot.slane %v10897_v19, 3 }
  0x9a   : > { %1666 = vmatpush.bf16.msrb.mxu1 %v7287_v56  ;;  %v7479_v39 = vor.u32 %v9694_v34, %v7478_v23  ;;  %v7411_v56 = vor.u32 %v9675_v26, %v7408_v36  ;;  %v1432_v45 = vshrl.u32 %v1393_v38, 16  ;;  %v1435_v47 = vshll.u32 %v1393_v38, 16  ;;  %v7456_v20 = vld [vmem:[%s15208_s1 + $0x4c8] sm:$0xf0]  ;;  %v9672_v30 = vld [vmem:[%s15208_s1 + $0x444] sm:$0xf0] }
  0x9b   : > { %v1394_v14 = vpack.c.bf16 %v11227_v48, %v1390_v41  ;;  %v9688_v23 = vld [vmem:[%s15208_s1 + $0x4c4] sm:$0xf0]  ;;  %v7384_v34 = vld [vmem:[%s15208_s1 + $0x438] sm:$0xf0]  ;;  %v1391_v26 = vld [vmem:[#allocation2 + $0x10] sm:$0x7f] }
  0x9c   : > { %1690 = vmatpush.bf16.msrb.mxu2 %v7219_v27  ;;  %v9691_v27 = vld [vmem:[%s15208_s1 + $0x4e4] sm:$0xf]  ;;  %v11261_v3 = vrot.slane %v1432_v45, 3  ;;  %v1437_v13 = vrot.slane %v1435_v47, 4  ;;  %v7455_v36 = vor.u32 %v9688_v23, %v7454_v31  ;;  %v7368_v23 = vld [vmem:[%s15208_s1 + $0x418] sm:$0xf0] }
  0x9d   : > { %1713 = vmatpush.bf16.msrb.mxu3 %v7283_v42  ;;  %1644 = vmatpush.bf16.msrb.mxu0 %v7215_v50  ;;  %v7475_v42 = vor.u32 %v9691_v27, %v7472_v40  ;;  %v9676_v50 = vld [vmem:[%s15208_s1 + $0x464] sm:$0xf0]  ;;  %v1444_v4 = vshrl.u32 %v1394_v14, 16  ;;  %v1447_v17 = vshll.u32 %v1394_v14, 16  ;;  %v11319_v40 = vor.u32 %v1440_v63, %v1439_v60  ;;  %v11323_v45 = vld [vmem:[#allocation2 + $0x40] sm:$0xff] }
  0x9e   : > { %1667 = vmatpush.bf16.msrb.mxu1 %v7279_v52  ;;  %v7407_v53 = vor.u32 %v9676_v50, %v7406_v49  ;;  %v1438_v27 = vor.u32 %v1437_v13, %v11261_v3  ;;  %v1395_v47 = vpack.c.bf16 %v1391_v26, %v11323_v45  ;;  %v1392_v14 = vld [vmem:[#allocation2 + $0x38] sm:$0x7f]  ;;  %v7446_v3 = vld [vmem:[%s15208_s1 + $0x4b0] sm:$0xf] }
  0x9f   : > { %v7432_v26 = vld [vmem:[%s15208_s1 + $0x498] sm:$0xf0] }
  0xa0   : > { %1691 = vmatpush.bf16.msrb.mxu2 %v7211_v58  ;;  %v7400_v58 = vld [vmem:[%s15208_s1 + $0x458] sm:$0xf0]  ;;  %v1442_v51 = vsel %vm1430_vm3, %v1438_v27, %v11319_v40 }
  0xa1   : > { %1714 = vmatpush.bf16.msrb.mxu3 %v7275_v1  ;;  %1645 = vmatpush.bf16.msrb.mxu0 %v7207_v62  ;;  %v7403_v1 = vor.u32 %v9673_v57, %v7400_v58  ;;  %v9689_v62 = vld [vmem:[%s15208_s1 + $0x4d4] sm:$0xf]  ;;  %v11332_v58 = vld [vmem:[#allocation2 + $0x20] sm:$0xff] }
  0xa2   : > { %1668 = vmatpush.bf16.msrb.mxu1 %v7271_v6  ;;  %v7467_v6 = vor.u32 %v9689_v62, %v7464_v2  ;;  %v1396_v60 = vpack.c.bf16 %v1392_v14, %v11332_v58  ;;  %v7382_v62 = vld [vmem:[%s15208_s1 + $0x430] sm:$0xf]  ;;  %v9670_v2 = vld [vmem:[%s15208_s1 + $0x434] sm:$0xf0] }
  0xa4   : > { %1692 = vmatpush.bf16.msrb.mxu2 %v7203_v11  ;;  %v7392_v11 = vld [vmem:[%s15208_s1 + $0x448] sm:$0xf0]  ;;  %v1465_v7 = vshrl.u32 %v1396_v60, 16 }
  0xa5   : > { %1715 = vmatpush.bf16.msrb.mxu3 %v7267_v12  ;;  %1646 = vmatpush.bf16.msrb.mxu0 %v7199_v18  ;;  %v9687_v18 = vld [vmem:[%s15208_s1 + $0x4c4] sm:$0xf] }
  0xa6   : > { %1295 = vmatmul.bf16.vlgmr.msra.gmra.mxu0 %v1090_v28  ;;  %1669 = vmatpush.bf16.msrb.mxu1 %v7263_v25 }
  0xa7   : > { %1318 = vmatmul.bf16.vlgmr.msra.gmra.mxu1 %v1102_v29  ;;  %1341 = vmatmul.bf16.vlgmr.msra.gmra.mxu2 %v1090_v28  ;;  %v7419_v28 = vor.u32 %v9677_v21, %v7416_v44  ;;  %v1446_v21 = vrot.slane %v1444_v4, 3  ;;  %v1449_v44 = vrot.slane %v1447_v17, 4  ;;  %v7383_v4 = vor.u32 %v9670_v2, %v7382_v62  ;;  %v9686_v17 = vld [vmem:[%s15208_s1 + $0x4b4] sm:$0xf0]  ;;  %v7422_v62 = vld [vmem:[%s15208_s1 + $0x480] sm:$0xf] }
  0xa8   : > { %1364 = vmatmul.bf16.vlgmr.msra.gmra.mxu3 %v1102_v29  ;;  %v7483_v29 = vor.u32 %v9693_v35, %v7480_v55  ;;  %v1452_v35 = vrot.slane %v10840_v46, 4 }
  0xa9   : > { %1988 = vmatpush.bf16.msra.mxu2 %v7419_v28  ;;  %1942 = vmatpush.bf16.msra.mxu0 %v7415_v33  ;;  %v7459_v28 = vor.u32 %v9687_v18, %v7456_v20  ;;  %v9669_v33 = vld [vmem:[%s15208_s1 + $0x434] sm:$0xf] }
  0xaa   : > { %2011 = vmatpush.bf16.msra.mxu3 %v7483_v29  ;;  %1965 = vmatpush.bf16.msra.mxu1 %v7479_v39  ;;  %v7390_v29 = vld [vmem:[%s15208_s1 + $0x440] sm:$0xf]  ;;  %v7387_v38 = vor.u32 %v9669_v33, %v7384_v34  ;;  %v9685_v39 = vld [vmem:[%s15208_s1 + $0x4b4] sm:$0xf] }
  0xab   : > { %v7391_v46 = vor.u32 %v9672_v30, %v7390_v29  ;;  %v9681_v33 = vld [vmem:[%s15208_s1 + $0x494] sm:$0xf] }
  0xad   : > { %1989 = vmatpush.bf16.msra.mxu2 %v7411_v56  ;;  %1943 = vmatpush.bf16.msra.mxu0 %v7407_v53  ;;  %v7448_v56 = vld [vmem:[%s15208_s1 + $0x4b8] sm:$0xf0] }
  0xae   : > { %2012 = vmatpush.bf16.msra.mxu3 %v7475_v42  ;;  %1966 = vmatpush.bf16.msra.mxu1 %v7471_v0  ;;  %v7451_v41 = vor.u32 %v9685_v39, %v7448_v56  ;;  %v1450_v42 = vor.u32 %v1449_v44, %v1446_v21  ;;  %v1456_v0 = vshrl.u32 %v1395_v47, 16  ;;  %v9684_v44 = vld [vmem:[%s15208_s1 + $0x4a4] sm:$0xf0]  ;;  %v7435_v56 = vor.u32 %v9681_v33, %v7432_v26  ;;  %v7632_v33 = vld [vmem:[%s15208_s1 + $0x5e8] sm:$0xf0] }
  0xb1   : > { %1990 = vmatpush.bf16.msra.mxu2 %v7403_v1  ;;  %1944 = vmatpush.bf16.msra.mxu0 %v7399_v8  ;;  %v1459_v1 = vshll.u32 %v1395_v47, 16  ;;  %v7447_v8 = vor.u32 %v9686_v17, %v7446_v3  ;;  %v9663_v47 = vld [vmem:[%s15208_s1 + $0x404] sm:$0xf] }
  0xb2   : > { %2013 = vmatpush.bf16.msra.mxu3 %v7467_v6  ;;  %v9667_v6 = vld [vmem:[%s15208_s1 + $0x424] sm:$0xf] }
  0xb5   : > { %1945 = vmatpush.bf16.msra.mxu0 %v7391_v46  ;;  %v9665_v46 = vld [vmem:[%s15208_s1 + $0x414] sm:$0xf] }
  0xb6   : > { %1300 = vmatmul.bf16.gmra.mxu0 %v1111_v16  ;;  %2014 = vmatpush.bf16.msra.mxu3 %v7459_v28  ;;  %v7371_v34 = vor.u32 %v9665_v46, %v7368_v23  ;;  %v9723_v23 = vld [vmem:[%s15208_s1 + $0x5e4] sm:$0xf] }
  0xb7   : > { %1323 = vmatmul.bf16.gmra.mxu1 %v1120_v24  ;;  %1346 = vmatmul.bf16.gmra.mxu2 %v1111_v16 }
  0xb8   : > { %1369 = vmatmul.bf16.gmra.mxu3 %v1120_v24 }
  0xb9   : > { %1946 = vmatpush.bf16.msra.mxu0 %v7383_v4 }
  0xba   : > { %2015 = vmatpush.bf16.msra.mxu3 %v7451_v41  ;;  %v7430_v41 = vld [vmem:[%s15208_s1 + $0x490] sm:$0xf] }
  0xc3   : > { %v649_v43 = vpop.f32.mrf.mxu0 }
  0xc4   : > { %v672_v32 = vpop.f32.mrf.mxu1 }
  0xc5   : > { %v11239_v52 = vadd.f32 %v672_v32, %v649_v43  ;;  %v11321_v43 = vor.u32 %v1452_v35, %v1451_v15  ;;  %v7374_v15 = vld [vmem:[%s15208_s1 + $0x420] sm:$0xf] }
  0xc6   : > { %1305 = vmatmul.bf16.gmra.mxu0 %v11157_v5 }
  0xc7   : > { %1328 = vmatmul.bf16.gmra.mxu1 %v11168_v10  ;;  %1351 = vmatmul.bf16.gmra.mxu2 %v11157_v5  ;;  %v7462_v5 = vld [vmem:[%s15208_s1 + $0x4d0] sm:$0xf]  ;;  %v1454_v57 = vsel %vm1430_vm3, %v1450_v42, %v11321_v43  ;;  %v9682_v42 = vld [vmem:[%s15208_s1 + $0x494] sm:$0xf0] }
  0xc8   : > { %1374 = vmatmul.bf16.gmra.mxu3 %v11168_v10  ;;  %v9671_v10 = vld [vmem:[%s15208_s1 + $0x444] sm:$0xf]  ;;  %v7463_v61 = vor.u32 %v9690_v9, %v7462_v5  ;;  %v1468_v5 = vshll.u32 %v1396_v60, 16  ;;  %v7379_v9 = vor.u32 %v9667_v6, %v7376_v22  ;;  %v9680_v6 = vld [vmem:[%s15208_s1 + $0x484] sm:$0xf0] }
  0xc9   : > { %v7395_v16 = vor.u32 %v9671_v10, %v7392_v11  ;;  %v9683_v10 = vld [vmem:[%s15208_s1 + $0x4a4] sm:$0xf]  ;;  %v7440_v11 = vld [vmem:[%s15208_s1 + $0x4a8] sm:$0xf0] }
  0xca   : > { %v695_v12 = vpop.f32.mrf.mxu2  ;;  %1967 = vmatpush.bf16.msra.mxu1 %v7463_v61  ;;  %v9668_v61 = vld [vmem:[%s15208_s1 + $0x424] sm:$0xf0]  ;;  %v1470_v29 = vrot.slane %v1468_v5, 4 }
  0xcb   : > { %v718_v24 = vpop.f32.mrf.mxu3  ;;  %v651_v25 = vpop.f32.mrf.mxu0  ;;  %1991 = vmatpush.bf16.msra.mxu2 %v7395_v16  ;;  %v7438_v16 = vld [vmem:[%s15208_s1 + $0x4a0] sm:$0xf]  ;;  %v7375_v21 = vor.u32 %v9668_v61, %v7374_v15 }
  0xcc   : > { %v11290_v55 = vadd.f32 %v718_v24, %v695_v12  ;;  %v674_v19 = vpop.f32.mrf.mxu1  ;;  %v7443_v12 = vor.u32 %v9683_v10, %v7440_v11  ;;  %v1458_v24 = vrot.slane %v1456_v0, 3  ;;  %v7439_v30 = vor.u32 %v9684_v44, %v7438_v16  ;;  %v7358_v0 = vld [vmem:[%s15208_s1 + $0x400] sm:$0xf]  ;;  %v7576_v10 = vld [vmem:[%s15208_s1 + $0x578] sm:$0xf0] }
  0xcd   : > { %v11301_v59 = vadd.f32 %v674_v19, %v651_v25  ;;  %v1461_v25 = vrot.slane %v1459_v1, 4  ;;  %v1467_v19 = vrot.slane %v1465_v7, 3  ;;  %1947 = vmatpush.bf16.msra.mxu0 %v7375_v21  ;;  %v9664_v1 = vld [vmem:[%s15208_s1 + $0x404] sm:$0xf0]  ;;  %v7638_v21 = vld [vmem:[%s15208_s1 + $0x5f0] sm:$0xf] }
  0xce   : > { %1968 = vmatpush.bf16.msra.mxu1 %v7455_v36  ;;  %2016 = vmatpush.bf16.msra.mxu3 %v7443_v12  ;;  %v7366_v36 = vld [vmem:[%s15208_s1 + $0x410] sm:$0xf]  ;;  %v7359_v17 = vor.u32 %v9664_v1, %v7358_v0  ;;  %v7640_v12 = vld [vmem:[%s15208_s1 + $0x5f8] sm:$0xf0] }
  0xcf   : > { %1992 = vmatpush.bf16.msra.mxu2 %v7387_v38  ;;  %v9666_v38 = vld [vmem:[%s15208_s1 + $0x414] sm:$0xf0]  ;;  %v11395_v39 = vor.u32 %v1461_v25, %v1458_v24  ;;  %v11406_v14 = vor.u32 %v1470_v29, %v1467_v19  ;;  %v7574_v24 = vld [vmem:[%s15208_s1 + $0x570] sm:$0xf]  ;;  %v9707_v19 = vld [vmem:[%s15208_s1 + $0x564] sm:$0xf] }
  0xd0   : > { %v7367_v27 = vor.u32 %v9666_v38, %v7366_v36  ;;  %v9710_v25 = vld [vmem:[%s15208_s1 + $0x574] sm:$0xf0]  ;;  %v7568_v29 = vld [vmem:[%s15208_s1 + $0x568] sm:$0xf0]  ;;  %v7624_v0 = vld [vmem:[%s15208_s1 + $0x5d8] sm:$0xf0] }
  0xd1   : > { %v1463_v4 = vsel %vm1430_vm3, %v11319_v40, %v11395_v39  ;;  %v1472_v5 = vsel %vm1430_vm3, %v11321_v43, %v11406_v14  ;;  %v9709_v40 = vld [vmem:[%s15208_s1 + $0x574] sm:$0xf]  ;;  %v7575_v44 = vor.u32 %v9710_v25, %v7574_v24  ;;  %v7571_v46 = vor.u32 %v9707_v19, %v7568_v29  ;;  %v9720_v25 = vld [vmem:[%s15208_s1 + $0x5c4] sm:$0xf0] }
  0xd2   : > { %v697_v32 = vpop.f32.mrf.mxu2  ;;  %1969 = vmatpush.bf16.msra.mxu1 %v7447_v8  ;;  %2017 = vmatpush.bf16.msra.mxu3 %v7435_v56  ;;  %v7423_v8 = vor.u32 %v9680_v6, %v7422_v62  ;;  %v9725_v43 = vld [vmem:[%s15208_s1 + $0x5f4] sm:$0xf]  ;;  %v7579_v11 = vor.u32 %v9709_v40, %v7576_v10  ;;  %v7558_v62 = vld [vmem:[%s15208_s1 + $0x550] sm:$0xf]  ;;  %v7616_v40 = vld [vmem:[%s15208_s1 + $0x5c8] sm:$0xf0] }
  0xd3   : > { %v720_v49 = vpop.f32.mrf.mxu3  ;;  %v654_v50 = vpop.f32.mrf.mxu0  ;;  %1993 = vmatpush.bf16.msra.mxu2 %v7379_v9  ;;  %1948 = vmatpush.bf16.msra.mxu0 %v7367_v27  ;;  %v7643_v15 = vor.u32 %v9725_v43, %v7640_v12  ;;  %v9717_v29 = vld [vmem:[%s15208_s1 + $0x5b4] sm:$0xf] }
  0xd4   : > { %v11328_v53 = vadd.f32 %v720_v49, %v697_v32  ;;  %v677_v54 = vpop.f32.mrf.mxu1  ;;  %v7431_v32 = vor.u32 %v9682_v42, %v7430_v41  ;;  %v7360_v49 = vld [vmem:[%s15208_s1 + $0x408] sm:$0xf0]  ;;  %v7566_v41 = vld [vmem:[%s15208_s1 + $0x560] sm:$0xf]  ;;  %v9708_v42 = vld [vmem:[%s15208_s1 + $0x564] sm:$0xf0] }
  0xd5   : > { %v11335_v63 = vadd.f32 %v677_v54, %v654_v50  ;;  %v9679_v50 = vld [vmem:[%s15208_s1 + $0x484] sm:$0xf]  ;;  %v7363_v54 = vor.u32 %v9663_v47, %v7360_v49  ;;  %v7630_v47 = vld [vmem:[%s15208_s1 + $0x5e0] sm:$0xf]  ;;  %v7567_v49 = vor.u32 %v9708_v42, %v7566_v41 }
  0xd6   : > { %1647 = vmatmul.bf16.vlgmr.msrb.gmra.mxu0 %v1442_v51  ;;  %1970 = vmatpush.bf16.msra.mxu1 %v7439_v30 }
  0xd7   : > { %1670 = vmatmul.bf16.vlgmr.msrb.gmra.mxu1 %v1454_v57  ;;  %1693 = vmatmul.bf16.vlgmr.msrb.gmra.mxu2 %v1442_v51  ;;  %v7424_v51 = vld [vmem:[%s15208_s1 + $0x488] sm:$0xf0] }
  0xd8   : > { %1716 = vmatmul.bf16.vlgmr.msrb.gmra.mxu3 %v1454_v57  ;;  %1994 = vmatpush.bf16.msra.mxu2 %v7371_v34  ;;  %v7427_v57 = vor.u32 %v9679_v50, %v7424_v51  ;;  %v7635_v34 = vor.u32 %v9723_v23, %v7632_v33  ;;  %v9705_v50 = vld [vmem:[%s15208_s1 + $0x554] sm:$0xf]  ;;  %v7560_v51 = vld [vmem:[%s15208_s1 + $0x558] sm:$0xf0] }
  0xd9   : > { %1949 = vmatpush.bf16.msra.mxu0 %v7359_v17  ;;  %v7552_v17 = vld [vmem:[%s15208_s1 + $0x548] sm:$0xf0]  ;;  %v10157_v33 = vld [vmem:[#allocation2 + $0x50] sm:$0xff] }
  0xda   : > { %v700_v13 = vpop.f32.mrf.mxu2  ;;  %1971 = vmatpush.bf16.msra.mxu1 %v7431_v32  ;;  %2018 = vmatpush.bf16.msra.mxu3 %v7427_v57  ;;  %v7563_v57 = vor.u32 %v9705_v50, %v7560_v51  ;;  %v9699_v50 = vld [vmem:[%s15208_s1 + $0x524] sm:$0xf]  ;;  %v7536_v51 = vld [vmem:[%s15208_s1 + $0x528] sm:$0xf0] }
  0xdb   : > { %v723_v18 = vpop.f32.mrf.mxu3  ;;  %v656_v20 = vpop.f32.mrf.mxu0 }
  0xdc   : > { %v11373_v35 = vadd.f32 %v723_v18, %v700_v13  ;;  %v679_v28 = vpop.f32.mrf.mxu1  ;;  %1995 = vmatpush.bf16.msra.mxu2 %v7363_v54 }
  0xdd   : > { %v11375_v31 = vadd.f32 %v679_v28, %v656_v20  ;;  %v9726_v28 = vld [vmem:[%s15208_s1 + $0x5f4] sm:$0xf0]  ;;  %2307 = vmatpush.bf16.msrb.mxu0 %v7575_v44  ;;  %v7544_v44 = vld [vmem:[%s15208_s1 + $0x538] sm:$0xf0] }
  0xde   : > { %1972 = vmatpush.bf16.msra.mxu1 %v7423_v8  ;;  %2376 = vmatpush.bf16.msrb.mxu3 %v7643_v15  ;;  %v7639_v30 = vor.u32 %v9726_v28, %v7638_v21  ;;  %v9719_v8 = vld [vmem:[%s15208_s1 + $0x5c4] sm:$0xf]  ;;  %v9701_v21 = vld [vmem:[%s15208_s1 + $0x534] sm:$0xf] }
  0xdf   : > { %v7619_v12 = vor.u32 %v9719_v8, %v7616_v40  ;;  %v7547_v19 = vor.u32 %v9701_v21, %v7544_v44  ;;  %v9695_v21 = vld [vmem:[%s15208_s1 + $0x504] sm:$0xf] }
  0xe0   : > { %2353 = vmatpush.bf16.msrb.mxu2 %v7579_v11 }
  0xe1   : > { %2308 = vmatpush.bf16.msrb.mxu0 %v7567_v49 }
  0xe2   : > { %v702_v60 = vpop.f32.mrf.mxu2  ;;  %2330 = vmatpush.bf16.msrb.mxu1 %v7639_v30  ;;  %2377 = vmatpush.bf16.msrb.mxu3 %v7635_v34  ;;  %v7608_v30 = vld [vmem:[%s15208_s1 + $0x5b8] sm:$0xf0]  ;;  %v1743_v34 = vpack.c.bf16 %v10157_v33, %v11218_v37  ;;  %v7542_v37 = vld [vmem:[%s15208_s1 + $0x530] sm:$0xf] }
  0xe3   : > { %v725_v2 = vpop.f32.mrf.mxu3  ;;  %v659_v3 = vpop.f32.mrf.mxu0 }
  0xe4   : > { %v11432_v22 = vadd.f32 %v725_v2, %v702_v60  ;;  %v682_v7 = vpop.f32.mrf.mxu1  ;;  %2354 = vmatpush.bf16.msrb.mxu2 %v7571_v46  ;;  %v9721_v60 = vld [vmem:[%s15208_s1 + $0x5d4] sm:$0xf]  ;;  %v7622_v2 = vld [vmem:[%s15208_s1 + $0x5d0] sm:$0xf]  ;;  %v7611_v46 = vor.u32 %v9717_v29, %v7608_v30  ;;  %v7584_v29 = vld [vmem:[%s15208_s1 + $0x588] sm:$0xf0] }
  0xe5   : > { %v11437_v9 = vadd.f32 %v682_v7, %v659_v3  ;;  %v7627_v1 = vor.u32 %v9721_v60, %v7624_v0  ;;  %v9715_v60 = vld [vmem:[%s15208_s1 + $0x5a4] sm:$0xf]  ;;  %v7600_v0 = vld [vmem:[%s15208_s1 + $0x5a8] sm:$0xf0] }
  0xe6   : > { %1652 = vmatmul.bf16.gmra.mxu0 %v1463_v4 }
  0xe7   : > { %1675 = vmatmul.bf16.gmra.mxu1 %v1472_v5  ;;  %1698 = vmatmul.bf16.gmra.mxu2 %v1463_v4  ;;  %v9703_v4 = vld [vmem:[%s15208_s1 + $0x544] sm:$0xf] }
  0xe8   : > { %1721 = vmatmul.bf16.gmra.mxu3 %v1472_v5  ;;  %2355 = vmatpush.bf16.msrb.mxu2 %v7563_v57  ;;  %v7555_v5 = vor.u32 %v9703_v4, %v7552_v17  ;;  %v7539_v57 = vor.u32 %v9699_v50, %v7536_v51 }
  0xe9   : > { %2378 = vmatpush.bf16.msrb.mxu3 %v7627_v1  ;;  %v7603_v1 = vor.u32 %v9715_v60, %v7600_v0  ;;  %v7800_v60 = vld [vmem:[%s15208_s1 + $0x6f8] sm:$0xf0] }
  0xea   : > { %v705_v13 = vpop.f32.mrf.mxu2 }
  0xeb   : > { %v728_v61 = vpop.f32.mrf.mxu3  ;;  %v661_v16 = vpop.f32.mrf.mxu0 }
  0xec   : > { %v11451_v18 = vadd.f32 %v728_v61, %v705_v13  ;;  %v684_v20 = vpop.f32.mrf.mxu1  ;;  %2356 = vmatpush.bf16.msrb.mxu2 %v7555_v5  ;;  %v7550_v16 = vld [vmem:[%s15208_s1 + $0x540] sm:$0xf] }
  0xed   : > { %v9704_v20 = vld [vmem:[%s15208_s1 + $0x544] sm:$0xf0]  ;;  %2379 = vmatpush.bf16.msrb.mxu3 %v7619_v12 }
  0xf0   : > { %2357 = vmatpush.bf16.msrb.mxu2 %v7547_v19  ;;  %v9711_v19 = vld [vmem:[%s15208_s1 + $0x584] sm:$0xf] }
  0xf1   : > { %2380 = vmatpush.bf16.msrb.mxu3 %v7611_v46  ;;  %v10159_v46 = vld [vmem:[#allocation2 + $0x8] sm:$0xff] }
  0xf2   : > { %v707_v26 = vpop.f32.mrf.mxu2 }
  0xf3   : > { %v730_v36 = vpop.f32.mrf.mxu3  ;;  %v954_v38 = vpop.f32.mrf.mxu0 }
  0xf4   : > { %v955_v56 = vadd.f32 %v954_v38, %v11239_v52  ;;  %v977_v27 = vpop.f32.mrf.mxu1  ;;  %v9724_v52 = vld [vmem:[%s15208_s1 + $0x5e4] sm:$0xf0]  ;;  %2358 = vmatpush.bf16.msrb.mxu2 %v7539_v57 }
  0xf5   : > { %v7631_v54 = vor.u32 %v9724_v52, %v7630_v47  ;;  %v9718_v52 = vld [vmem:[%s15208_s1 + $0x5b4] sm:$0xf0]  ;;  %2381 = vmatpush.bf16.msrb.mxu3 %v7603_v1 }
  0xf6   : > { %v11487_v32 = vadd.f32 %v977_v27, %v955_v56  ;;  %1657 = vmatmul.bf16.gmra.mxu0 %v11395_v39  ;;  %v10158_v56 = vld [vmem:[#allocation2 + $0x68] sm:$0xff] }
  0xf7   : > { %1680 = vmatmul.bf16.gmra.mxu1 %v11406_v14  ;;  %1703 = vmatmul.bf16.gmra.mxu2 %v11395_v39  ;;  %v9706_v39 = vld [vmem:[%s15208_s1 + $0x554] sm:$0xf0]  ;;  %v1744_v27 = vpack.c.bf16 %v10158_v56, %v11227_v48  ;;  %v7606_v48 = vld [vmem:[%s15208_s1 + $0x5b0] sm:$0xf] }
  0xf8   : > { %1726 = vmatmul.bf16.gmra.mxu3 %v11406_v14  ;;  %2331 = vmatpush.bf16.msrb.mxu1 %v7631_v54  ;;  %v7559_v3 = vor.u32 %v9706_v39, %v7558_v62  ;;  %v9722_v14 = vld [vmem:[%s15208_s1 + $0x5d4] sm:$0xf0]  ;;  %v7607_v54 = vor.u32 %v9718_v52, %v7606_v48  ;;  %v7534_v39 = vld [vmem:[%s15208_s1 + $0x520] sm:$0xf] }
  0xf9   : > { %v7623_v7 = vor.u32 %v9722_v14, %v7622_v2  ;;  %v9700_v2 = vld [vmem:[%s15208_s1 + $0x524] sm:$0xf0] }
  0xfa   : > { %v1000_v6 = vpop.f32.mrf.mxu2  ;;  %2309 = vmatpush.bf16.msrb.mxu0 %v7559_v3  ;;  %v7598_v3 = vld [vmem:[%s15208_s1 + $0x5a0] sm:$0xf] }
  0xfb   : > { %v1001_v10 = vadd.f32 %v1000_v6, %v11290_v55  ;;  %v1023_v43 = vpop.f32.mrf.mxu3  ;;  %v956_v11 = vpop.f32.mrf.mxu0  ;;  %v7614_v55 = vld [vmem:[%s15208_s1 + $0x5c0] sm:$0xf]  ;;  %v7535_v6 = vor.u32 %v9700_v2, %v7534_v39 }
  0xfc   : > { %v957_v13 = vadd.f32 %v956_v11, %v11301_v59  ;;  %v979_v15 = vpop.f32.mrf.mxu1  ;;  %2332 = vmatpush.bf16.msrb.mxu1 %v7623_v7  ;;  %v7551_v59 = vor.u32 %v9704_v20, %v7550_v16  ;;  %v7615_v28 = vor.u32 %v9720_v25, %v7614_v55  ;;  %v9716_v7 = vld [vmem:[%s15208_s1 + $0x5a4] sm:$0xf0]  ;;  %v7528_v11 = vld [vmem:[%s15208_s1 + $0x518] sm:$0xf0]  ;;  %v9698_v16 = vld [vmem:[%s15208_s1 + $0x514] sm:$0xf0] }
  0xfd   : > { %v11534_v61 = vadd.f32 %v1023_v43, %v1001_v10  ;;  %v7599_v40 = vor.u32 %v9716_v7, %v7598_v3  ;;  %v9714_v25 = vld [vmem:[%s15208_s1 + $0x594] sm:$0xf0]  ;;  %v2048_v7 = vld [vmem:[#allocation2 + $0x8] sm:$0xff] }
  0xfe   : > { %v11545_v24 = vadd.f32 %v979_v15, %v957_v13  ;;  %2310 = vmatpush.bf16.msrb.mxu0 %v7551_v59  ;;  %v7592_v13 = vld [vmem:[%s15208_s1 + $0x598] sm:$0xf0]  ;;  %v7526_v15 = vld [vmem:[%s15208_s1 + $0x510] sm:$0xf] }
  0xff   : > { %v7527_v55 = vor.u32 %v9698_v16, %v7526_v15  ;;  %v7590_v59 = vld [vmem:[%s15208_s1 + $0x590] sm:$0xf] }
 0x100   : > { %2333 = vmatpush.bf16.msrb.mxu1 %v7615_v28  ;;  %v7591_v44 = vor.u32 %v9714_v25, %v7590_v59  ;;  %v7520_v28 = vld [vmem:[%s15208_s1 + $0x508] sm:$0xf0]  ;;  %v9755_v25 = vld [vmem:[%s15208_s1 + $0x6e4] sm:$0xf] }
 0x101   : > { %v7523_v33 = vor.u32 %v9695_v21, %v7520_v28  ;;  %v7792_v21 = vld [vmem:[%s15208_s1 + $0x6e8] sm:$0xf0] }
 0x102   : > { %v1002_v23 = vpop.f32.mrf.mxu2 }
 0x103   : > { %v1003_v26 = vadd.f32 %v1002_v23, %v11328_v53  ;;  %v1025_v36 = vpop.f32.mrf.mxu3  ;;  %v959_v38 = vpop.f32.mrf.mxu0  ;;  %v9702_v53 = vld [vmem:[%s15208_s1 + $0x534] sm:$0xf0]  ;;  %v1745_v23 = vpack.c.bf16 %v11323_v45, %v10159_v46 }
 0x104   : > { %v960_v41 = vadd.f32 %v959_v38, %v11335_v63  ;;  %v982_v42 = vpop.f32.mrf.mxu1  ;;  %v7543_v63 = vor.u32 %v9702_v53, %v7542_v37  ;;  %2334 = vmatpush.bf16.msrb.mxu1 %v7607_v54  ;;  %v7582_v38 = vld [vmem:[%s15208_s1 + $0x580] sm:$0xf]  ;;  %v9712_v37 = vld [vmem:[%s15208_s1 + $0x584] sm:$0xf0] }
 0x105   : > { %v11566_v47 = vadd.f32 %v1025_v36, %v1003_v26  ;;  %v7518_v26 = vld [vmem:[%s15208_s1 + $0x500] sm:$0xf]  ;;  %v9696_v36 = vld [vmem:[%s15208_s1 + $0x504] sm:$0xf0]  ;;  %v7583_v50 = vor.u32 %v9712_v37, %v7582_v38 }
 0x106   : > { %v11568_v49 = vadd.f32 %v982_v42, %v960_v41  ;;  %1950 = vmatmul.bf16.vlgmr.msra.gmra.mxu0 %v1743_v34  ;;  %v10160_v41 = vld [vmem:[#allocation2 + $0x48] sm:$0xff] }
 0x107   : > { %1973 = vmatmul.bf16.vlgmr.msra.gmra.mxu1 %v1744_v27  ;;  %1996 = vmatmul.bf16.vlgmr.msra.gmra.mxu2 %v1743_v34  ;;  %v7587_v34 = vor.u32 %v9711_v19, %v7584_v29  ;;  %v1746_v42 = vpack.c.bf16 %v11332_v58, %v10160_v41  ;;  %v9741_v58 = vld [vmem:[%s15208_s1 + $0x674] sm:$0xf]  ;;  %v7795_v19 = vor.u32 %v9755_v25, %v7792_v21  ;;  %v9740_v41 = vld [vmem:[%s15208_s1 + $0x664] sm:$0xf0] }
 0x108   : > { %2019 = vmatmul.bf16.vlgmr.msra.gmra.mxu3 %v1744_v27  ;;  %2311 = vmatpush.bf16.msrb.mxu0 %v7543_v63  ;;  %v7519_v63 = vor.u32 %v9696_v36, %v7518_v26 }
 0x109   : > { %2335 = vmatpush.bf16.msrb.mxu1 %v7599_v40  ;;  %v9742_v40 = vld [vmem:[%s15208_s1 + $0x674] sm:$0xf0] }
 0x10a   : > { %v1005_v62 = vpop.f32.mrf.mxu2 }
 0x10b   : > { %v1006_v14 = vadd.f32 %v1005_v62, %v11373_v35  ;;  %v1028_v4 = vpop.f32.mrf.mxu3  ;;  %v961_v17 = vpop.f32.mrf.mxu0  ;;  %v9697_v35 = vld [vmem:[%s15208_s1 + $0x514] sm:$0xf] }
 0x10c   : > { %v962_v5 = vadd.f32 %v961_v17, %v11375_v31  ;;  %v984_v8 = vpop.f32.mrf.mxu1  ;;  %2312 = vmatpush.bf16.msrb.mxu0 %v7535_v6  ;;  %v9713_v31 = vld [vmem:[%s15208_s1 + $0x594] sm:$0xf]  ;;  %v7531_v12 = vor.u32 %v9697_v35, %v7528_v11  ;;  %v11685_v17 = vld [vmem:[#allocation2 + $0x38] sm:$0xff]  ;;  %v7798_v35 = vld [vmem:[%s15208_s1 + $0x6f0] sm:$0xf] }
 0x10d   : > { %v11608_v10 = vadd.f32 %v1028_v4, %v1006_v14  ;;  %v7595_v20 = vor.u32 %v9713_v31, %v7592_v13  ;;  %2336 = vmatpush.bf16.msrb.mxu1 %v7591_v44  ;;  %v11683_v14 = vld [vmem:[#allocation2 + $0x10] sm:$0xff]  ;;  %v2044_v4 = vld [vmem:[#allocation2 + $0x58] sm:$0xfe]  ;;  %v7728_v13 = vld [vmem:[%s15208_s1 + $0x668] sm:$0xf0]  ;;  %v1748_v46 = vpack.c.bf16 %v11685_v17, %v11685_v17 }
 0x10e   : > { %v11610_v43 = vadd.f32 %v984_v8, %v962_v5  ;;  %2359 = vmatpush.bf16.msrb.mxu2 %v7531_v12  ;;  %v11687_v6 = vld [vmem:[#allocation2 + $0x50] sm:$0xff]  ;;  %v2050_v5 = vld [vmem:[#allocation2 + $0x40] sm:$0xff]  ;;  %v2045_v8 = vld [vmem:[#allocation2 + $0x18] sm:$0xfe]  ;;  %v1747_v28 = vpack.c.bf16 %v11683_v14, %v11683_v14 }
 0x10f   : > { %2382 = vmatpush.bf16.msrb.mxu3 %v7595_v20  ;;  %v9758_v31 = vld [vmem:[%s15208_s1 + $0x6f4] sm:$0xf0]  ;;  %v9739_v12 = vld [vmem:[%s15208_s1 + $0x664] sm:$0xf]  ;;  %v11708_v15 = vpack.c.bf16 %v11687_v6, %v2044_v4  ;;  %v11710_v16 = vpack.c.bf16 %v2050_v5, %v2048_v7  ;;  %v11712_v20 = vld [vmem:[#allocation2 + $0x68] sm:$0xff] }
 0x110   : > { %2313 = vmatpush.bf16.msrb.mxu0 %v7527_v55  ;;  %v7799_v55 = vor.u32 %v9758_v31, %v7798_v35  ;;  %v7731_v59 = vor.u32 %v9739_v12, %v7728_v13  ;;  %v9754_v4 = vld [vmem:[%s15208_s1 + $0x6d4] sm:$0xf0]  ;;  %v9735_v7 = vld [vmem:[%s15208_s1 + $0x644] sm:$0xf]  ;;  %v7712_v5 = vld [vmem:[%s15208_s1 + $0x648] sm:$0xf0] }
 0x111   : > { %2337 = vmatpush.bf16.msrb.mxu1 %v7583_v50  ;;  %v2096_v26 = vshrl.u32 %v11708_v15, 16  ;;  %v2098_v36 = vshll.u32 %v11708_v15, 16  ;;  %v11730_v38 = vshll.u32 %v11710_v16, 16  ;;  %v7720_v50 = vld [vmem:[%s15208_s1 + $0x658] sm:$0xf0]  ;;  %v7715_v31 = vor.u32 %v9735_v7, %v7712_v5 }
 0x112   : > { %v1007_v30 = vpop.f32.mrf.mxu2  ;;  %2360 = vmatpush.bf16.msrb.mxu2 %v7523_v33  ;;  %v11725_v33 = vpack.c.bf16 %v11712_v20, %v2045_v8  ;;  %v9751_v12 = vld [vmem:[%s15208_s1 + $0x6c4] sm:$0xf]  ;;  %v7776_v13 = vld [vmem:[%s15208_s1 + $0x6c8] sm:$0xf0]  ;;  %v7766_v7 = vld [vmem:[%s15208_s1 + $0x6b0] sm:$0xf] }
 0x113   : > { %v1008_v56 = vadd.f32 %v1007_v30, %v11432_v22  ;;  %v1030_v27 = vpop.f32.mrf.mxu3  ;;  %v964_v45 = vpop.f32.mrf.mxu0  ;;  %2383 = vmatpush.bf16.msrb.mxu3 %v7587_v34  ;;  %v7736_v22 = vld [vmem:[%s15208_s1 + $0x678] sm:$0xf0]  ;;  %v7779_v21 = vor.u32 %v9751_v12, %v7776_v13 }
 0x114   : > { %v965_v53 = vadd.f32 %v964_v45, %v11437_v9  ;;  %v987_v48 = vpop.f32.mrf.mxu1  ;;  %2314 = vmatpush.bf16.msrb.mxu0 %v7519_v63  ;;  %v9757_v9 = vld [vmem:[%s15208_s1 + $0x6f4] sm:$0xf]  ;;  %v7739_v57 = vor.u32 %v9741_v58, %v7736_v22  ;;  %v7726_v45 = vld [vmem:[%s15208_s1 + $0x660] sm:$0xf]  ;;  %v2108_v35 = vshrl.u32 %v11725_v33, 16 }
 0x115   : > { %v11664_v52 = vadd.f32 %v1030_v27, %v1008_v56  ;;  %v7803_v39 = vor.u32 %v9757_v9, %v7800_v60  ;;  %2682 = vmatpush.bf16.msra.mxu1 %v7799_v55  ;;  %v2049_v56 = vld [vmem:[#allocation2 + $0x48] sm:$0xff]  ;;  %v2051_v27 = vld [vmem:[#allocation2 + $0x20] sm:$0xff]  ;;  %v9737_v63 = vld [vmem:[%s15208_s1 + $0x654] sm:$0xf] }
 0x116   : > { %v11666_v51 = vadd.f32 %v987_v48, %v965_v53  ;;  %1955 = vmatmul.bf16.gmra.mxu0 %v1745_v23  ;;  %2705 = vmatpush.bf16.msra.mxu2 %v7739_v57  ;;  %v7727_v53 = vor.u32 %v9740_v41, %v7726_v45  ;;  %v9756_v48 = vld [vmem:[%s15208_s1 + $0x6e4] sm:$0xf0]  ;;  %v11753_v58 = vpack.c.bf16 %v2051_v27, %v2049_v56  ;;  %v7784_v57 = vld [vmem:[%s15208_s1 + $0x6d8] sm:$0xf0] }
 0x117   : > { %1978 = vmatmul.bf16.gmra.mxu1 %v1746_v42  ;;  %2001 = vmatmul.bf16.gmra.mxu2 %v1745_v23  ;;  %v7723_v9 = vor.u32 %v9737_v63, %v7720_v50  ;;  %v7704_v56 = vld [vmem:[%s15208_s1 + $0x638] sm:$0xf0]  ;;  %v2054_v63 = vld [vmem:[#allocation2 + $0x60] sm:$0x1]  ;;  %v2055_v50 = vld [vmem:[#allocation2 + $0x28] sm:$0x1] }
 0x118   : > { %2024 = vmatmul.bf16.gmra.mxu3 %v1746_v42  ;;  %v7790_v42 = vld [vmem:[%s15208_s1 + $0x6e0] sm:$0xf]  ;;  %v11788_v25 = vshll.u32 %v11753_v58, 16 }
 0x119   : > { %2728 = vmatpush.bf16.msra.mxu3 %v7803_v39  ;;  %v7791_v22 = vor.u32 %v9756_v48, %v7790_v42  ;;  %v7768_v42 = vld [vmem:[%s15208_s1 + $0x6b8] sm:$0xf0] }
 0x11a   : > { %v1010_v54 = vpop.f32.mrf.mxu2  ;;  %2706 = vmatpush.bf16.msra.mxu2 %v7731_v59  ;;  %v2117_v45 = vrot.slane %v11788_v25, 1 }
 0x11b   : > { %v1011_v0 = vadd.f32 %v1010_v54, %v11451_v18  ;;  %v1033_v1 = vpop.f32.mrf.mxu3  ;;  %v966_v62 = vpop.f32.mrf.mxu0  ;;  %v7734_v18 = vld [vmem:[%s15208_s1 + $0x670] sm:$0xf]  ;;  %v9753_v54 = vld [vmem:[%s15208_s1 + $0x6d4] sm:$0xf]  ;;  %2683 = vmatpush.bf16.msra.mxu1 %v7791_v22 }
 0x11c   : > { %v989_v2 = vpop.f32.mrf.mxu1  ;;  %v7735_v11 = vor.u32 %v9742_v40, %v7734_v18  ;;  %v7787_v60 = vor.u32 %v9753_v54, %v7784_v57  ;;  %v7782_v62 = vld [vmem:[%s15208_s1 + $0x6d0] sm:$0xf]  ;;  %v2100_v40 = vrot.slane %v2098_v36, 1  ;;  %v9733_v36 = vld [vmem:[%s15208_s1 + $0x634] sm:$0xf] }
 0x11d   : > { %v11681_v3 = vadd.f32 %v1033_v1, %v1011_v0  ;;  %2729 = vmatpush.bf16.msra.mxu3 %v7795_v19  ;;  %v7718_v0 = vld [vmem:[%s15208_s1 + $0x650] sm:$0xf]  ;;  %v9738_v1 = vld [vmem:[%s15208_s1 + $0x654] sm:$0xf0]  ;;  %v7707_v41 = vor.u32 %v9733_v36, %v7704_v56  ;;  %v11882_v56 = vshrl.u32 %v11753_v58, 16 }
 0x11e   : > { %2659 = vmatpush.bf16.msra.mxu0 %v7735_v11  ;;  %2707 = vmatpush.bf16.msra.mxu2 %v7723_v9  ;;  %v7719_v2 = vor.u32 %v9738_v1, %v7718_v0  ;;  %v7783_v11 = vor.u32 %v9754_v4, %v7782_v62  ;;  %v11829_v1 = vpack.c.bf16 %v2054_v63, %v11683_v14  ;;  %v9734_v4 = vld [vmem:[%s15208_s1 + $0x634] sm:$0xf0]  ;;  %v9745_v63 = vld [vmem:[%s15208_s1 + $0x694] sm:$0xf] }
 0x11f   : > { %v11832_v62 = vpack.c.bf16 %v2055_v50, %v11685_v17 }
 0x120   : > { %2684 = vmatpush.bf16.msra.mxu1 %v7783_v11  ;;  %v2123_v12 = vshll.u32 %v11829_v1, 16 }
 0x121   : > { %2730 = vmatpush.bf16.msra.mxu3 %v7787_v60  ;;  %v2131_v13 = vshll.u32 %v11832_v62, 16 }
 0x122   : > { %v1012_v44 = vpop.f32.mrf.mxu2  ;;  %2660 = vmatpush.bf16.msra.mxu0 %v7727_v53  ;;  %2708 = vmatpush.bf16.msra.mxu2 %v7715_v31  ;;  %v7760_v31 = vld [vmem:[%s15208_s1 + $0x6a8] sm:$0xf0] }
 0x123   : > { %v1035_v29 = vpop.f32.mrf.mxu3  ;;  %v1296_v30 = vpop.f32.mrf.mxu0 }
 0x124   : > { %v1319_v23 = vpop.f32.mrf.mxu1  ;;  %v7710_v29 = vld [vmem:[%s15208_s1 + $0x640] sm:$0xf] }
 0x125   : > { %v1320_v34 = vadd.f32 %v1319_v23, %v1296_v30  ;;  %v9736_v30 = vld [vmem:[%s15208_s1 + $0x644] sm:$0xf0]  ;;  %2731 = vmatpush.bf16.msra.mxu3 %v7779_v21 }
 0x126   : > { %1960 = vmatmul.bf16.gmra.mxu0 %v1747_v28  ;;  %2709 = vmatpush.bf16.msra.mxu2 %v7707_v41  ;;  %v9732_v21 = vld [vmem:[%s15208_s1 + $0x624] sm:$0xf0]  ;;  %v11884_v41 = vrot.slane %v2123_v12, 1 }
 0x127   : > { %v11742_v37 = vadd.f32 %v1320_v34, %v11487_v32  ;;  %1983 = vmatmul.bf16.gmra.mxu1 %v1748_v46  ;;  %2006 = vmatmul.bf16.gmra.mxu2 %v1747_v28  ;;  %v2110_v32 = vshll.u32 %v11725_v33, 16  ;;  %v2105_v28 = vrot.slane %v11730_v38, 1  ;;  %v2101_v33 = vor.u32 %v2100_v40, %v2096_v26  ;;  %v9752_v34 = vld [vmem:[%s15208_s1 + $0x6c4] sm:$0xf0]  ;;  %v9749_v26 = vld [vmem:[%s15208_s1 + $0x6b4] sm:$0xf] }
 0x128   : > { %2029 = vmatmul.bf16.gmra.mxu3 %v1748_v46  ;;  %2661 = vmatpush.bf16.msra.mxu0 %v7719_v2  ;;  %v7774_v46 = vld [vmem:[%s15208_s1 + $0x6c0] sm:$0xf]  ;;  %v7771_v53 = vor.u32 %v9749_v26, %v7768_v42  ;;  %v7702_v2 = vld [vmem:[%s15208_s1 + $0x630] sm:$0xf]  ;;  %v7696_v40 = vld [vmem:[%s15208_s1 + $0x628] sm:$0xf0] }
 0x129   : > { %v2112_v59 = vrot.slane %v2110_v32, 1  ;;  %v2106_v9 = vsel %vm732_vm1, %v2101_v33, %v2105_v28  ;;  %v11886_v26 = vrot.slane %v2131_v13, 1 }
 0x12a   : > { %v1342_v39 = vpop.f32.mrf.mxu2  ;;  %2732 = vmatpush.bf16.msra.mxu3 %v7771_v53  ;;  %v9729_v53 = vld [vmem:[%s15208_s1 + $0x614] sm:$0xf] }
 0x12b   : > { %v1365_v8 = vpop.f32.mrf.mxu3  ;;  %v1298_v18 = vpop.f32.mrf.mxu0  ;;  %v2113_v27 = vor.u32 %v2112_v59, %v2108_v35  ;;  %v7694_v59 = vld [vmem:[%s15208_s1 + $0x620] sm:$0xf] }
 0x12c   : > { %v1366_v15 = vadd.f32 %v1365_v8, %v1342_v39  ;;  %v1321_v55 = vpop.f32.mrf.mxu1  ;;  %v9750_v8 = vld [vmem:[%s15208_s1 + $0x6b4] sm:$0xf0]  ;;  %v7695_v33 = vor.u32 %v9732_v21, %v7694_v59 }
 0x12d   : > { %v1322_v44 = vadd.f32 %v1321_v55, %v1298_v18  ;;  %v2118_v60 = vsel %vm732_vm1, %v2113_v27, %v2117_v45  ;;  %v9731_v18 = vld [vmem:[%s15208_s1 + $0x624] sm:$0xf]  ;;  %v7767_v35 = vor.u32 %v9750_v8, %v7766_v7 }
 0x12e   : > { %v11792_v19 = vadd.f32 %v1366_v15, %v11534_v61  ;;  %v7711_v61 = vor.u32 %v9736_v30, %v7710_v29  ;;  %v7699_v11 = vor.u32 %v9731_v18, %v7696_v40  ;;  %v9743_v7 = vld [vmem:[%s15208_s1 + $0x684] sm:$0xf] }
 0x12f   : > { %v11804_v23 = vadd.f32 %v1322_v44, %v11545_v24  ;;  %v7775_v24 = vor.u32 %v9752_v34, %v7774_v46  ;;  %v7758_v44 = vld [vmem:[%s15208_s1 + $0x6a0] sm:$0xf]  ;;  %v11876_v46 = vshrl.u32 %v11710_v16, 16 }
 0x130   : > { %2662 = vmatpush.bf16.msra.mxu0 %v7711_v61  ;;  %2710 = vmatpush.bf16.msra.mxu2 %v7699_v11  ;;  %v9748_v61 = vld [vmem:[%s15208_s1 + $0x6a4] sm:$0xf0] }
 0x131   : > { %2685 = vmatpush.bf16.msra.mxu1 %v7775_v24  ;;  %v7759_v27 = vor.u32 %v9748_v61, %v7758_v44  ;;  %v9728_v11 = vld [vmem:[%s15208_s1 + $0x604] sm:$0xf0] }
 0x132   : > { %v1344_v48 = vpop.f32.mrf.mxu2 }
 0x133   : > { %v1367_v32 = vpop.f32.mrf.mxu3  ;;  %v1301_v22 = vpop.f32.mrf.mxu0 }
 0x134   : > { %v1368_v54 = vadd.f32 %v1367_v32, %v1344_v48  ;;  %v1324_v57 = vpop.f32.mrf.mxu1  ;;  %v7688_v48 = vld [vmem:[%s15208_s1 + $0x618] sm:$0xf0] }
 0x135   : > { %v1325_v0 = vadd.f32 %v1324_v57, %v1301_v22  ;;  %2686 = vmatpush.bf16.msra.mxu1 %v7767_v35  ;;  %v7691_v32 = vor.u32 %v9729_v53, %v7688_v48  ;;  %v7752_v22 = vld [vmem:[%s15208_s1 + $0x698] sm:$0xf0]  ;;  %v7678_v35 = vld [vmem:[%s15208_s1 + $0x600] sm:$0xf] }
 0x136   : > { %v11835_v39 = vadd.f32 %v1368_v54, %v11566_v47  ;;  %2315 = vmatmul.bf16.vlgmr.msrb.gmra.mxu0 %v2106_v9  ;;  %v7703_v47 = vor.u32 %v9734_v4, %v7702_v2  ;;  %v9730_v54 = vld [vmem:[%s15208_s1 + $0x614] sm:$0xf0]  ;;  %v7755_v57 = vor.u32 %v9745_v63, %v7752_v22  ;;  %v9727_v2 = vld [vmem:[%s15208_s1 + $0x604] sm:$0xf]  ;;  %v7679_v44 = vor.u32 %v9728_v11, %v7678_v35  ;;  %v2409_v22 = vld [vmem:[#allocation2 + $0x58] sm:$0xe0] }
 0x137   : > { %v11847_v5 = vadd.f32 %v1325_v0, %v11568_v49  ;;  %2338 = vmatmul.bf16.vlgmr.msrb.gmra.mxu1 %v2118_v60  ;;  %2361 = vmatmul.bf16.vlgmr.msrb.gmra.mxu2 %v2106_v9  ;;  %v9747_v49 = vld [vmem:[%s15208_s1 + $0x6a4] sm:$0xf]  ;;  %v7686_v9 = vld [vmem:[%s15208_s1 + $0x610] sm:$0xf]  ;;  %v9746_v0 = vld [vmem:[%s15208_s1 + $0x694] sm:$0xf0] }
 0x138   : > { %2384 = vmatmul.bf16.vlgmr.msrb.gmra.mxu3 %v2118_v60  ;;  %2663 = vmatpush.bf16.msra.mxu0 %v7703_v47  ;;  %v7763_v15 = vor.u32 %v9747_v49, %v7760_v31  ;;  %v7687_v60 = vor.u32 %v9730_v54, %v7686_v9  ;;  %v7744_v47 = vld [vmem:[%s15208_s1 + $0x688] sm:$0xf0]  ;;  %v7742_v49 = vld [vmem:[%s15208_s1 + $0x680] sm:$0xf]  ;;  %v2135_v54 = vshrl.u32 %v11829_v1, 16 }
 0x139   : > { %2687 = vmatpush.bf16.msra.mxu1 %v7759_v27  ;;  %2711 = vmatpush.bf16.msra.mxu2 %v7691_v32  ;;  %v7747_v40 = vor.u32 %v9743_v7, %v7744_v47  ;;  %v9789_v27 = vld [vmem:[%s15208_s1 + $0x7f4] sm:$0xf]  ;;  %v9790_v1 = vld [vmem:[%s15208_s1 + $0x7f4] sm:$0xf0] }
 0x13a   : > { %v1347_v55 = vpop.f32.mrf.mxu2  ;;  %2733 = vmatpush.bf16.msra.mxu3 %v7763_v15  ;;  %v9744_v15 = vld [vmem:[%s15208_s1 + $0x684] sm:$0xf0]  ;;  %v2137_v35 = vor.u32 %v2135_v54, %v11884_v41  ;;  %v9770_v54 = vld [vmem:[%s15208_s1 + $0x754] sm:$0xf0] }
 0x13b   : > { %v1370_v29 = vpop.f32.mrf.mxu3  ;;  %v1303_v30 = vpop.f32.mrf.mxu0 }
 0x13c   : > { %v1371_v34 = vadd.f32 %v1370_v29, %v1347_v55  ;;  %v1326_v36 = vpop.f32.mrf.mxu1  ;;  %2664 = vmatpush.bf16.msra.mxu0 %v7695_v33 }
 0x13d   : > { %v1327_v24 = vadd.f32 %v1326_v36, %v1303_v30  ;;  %v7743_v30 = vor.u32 %v9744_v15, %v7742_v49  ;;  %v7896_v36 = vld [vmem:[%s15208_s1 + $0x778] sm:$0xf0] }
 0x13e   : > { %v11889_v42 = vadd.f32 %v1371_v34, %v11608_v10  ;;  %v2121_v10 = vor.u32 %v11876_v46, %v2105_v28  ;;  %v7750_v28 = vld [vmem:[%s15208_s1 + $0x690] sm:$0xf]  ;;  %2734 = vmatpush.bf16.msra.mxu3 %v7755_v57  ;;  %v9773_v34 = vld [vmem:[%s15208_s1 + $0x774] sm:$0xf]  ;;  %v2410_v57 = vld [vmem:[#allocation2 + $0x18] sm:$0xe0] }
 0x13f   : > { %v11901_v50 = vadd.f32 %v1327_v24, %v11610_v43  ;;  %v2129_v43 = vor.u32 %v11882_v56, %v2117_v45  ;;  %v7751_v4 = vor.u32 %v9746_v0, %v7750_v28  ;;  %v7680_v45 = vld [vmem:[%s15208_s1 + $0x608] sm:$0xf0]  ;;  %v9774_v28 = vld [vmem:[%s15208_s1 + $0x774] sm:$0xf0]  ;;  %v7958_v0 = vld [vmem:[%s15208_s1 + $0x7f0] sm:$0xf] }
 0x140   : > { %2665 = vmatpush.bf16.msra.mxu0 %v7687_v60  ;;  %v7683_v18 = vor.u32 %v9727_v2, %v7680_v45  ;;  %v2126_v13 = vsel %vm732_vm1, %v2121_v10, %v11884_v41  ;;  %v7894_v60 = vld [vmem:[%s15208_s1 + $0x770] sm:$0xf]  ;;  %v11995_v45 = vpack.c.bf16 %v11712_v20, %v2410_v57  ;;  %v7959_v7 = vor.u32 %v9790_v1, %v7958_v0  ;;  %v9786_v57 = vld [vmem:[%s15208_s1 + $0x7d4] sm:$0xf0]  ;;  %v9783_v1 = vld [vmem:[%s15208_s1 + $0x7c4] sm:$0xf] }
 0x141   : > { %2688 = vmatpush.bf16.msra.mxu1 %v7751_v4  ;;  %v2134_v21 = vsel %vm732_vm1, %v2129_v43, %v11886_v26  ;;  %v2138_v43 = vshrl.u32 %v11832_v62, 16  ;;  %v7895_v2 = vor.u32 %v9774_v28, %v7894_v60  ;;  %v9771_v62 = vld [vmem:[%s15208_s1 + $0x764] sm:$0xf]  ;;  %v7888_v4 = vld [vmem:[%s15208_s1 + $0x768] sm:$0xf0] }
 0x142   : > { %v1349_v8 = vpop.f32.mrf.mxu2  ;;  %2712 = vmatpush.bf16.msra.mxu2 %v7683_v18  ;;  %2735 = vmatpush.bf16.msra.mxu3 %v7747_v40  ;;  %v7891_v47 = vor.u32 %v9771_v62, %v7888_v4  ;;  %v7952_v18 = vld [vmem:[%s15208_s1 + $0x7e8] sm:$0xf0]  ;;  %v2464_v41 = vshrl.u32 %v11995_v45, 16 }
 0x143   : > { %v1372_v31 = vpop.f32.mrf.mxu3  ;;  %v1306_v12 = vpop.f32.mrf.mxu0 }
 0x144   : > { %v1373_v55 = vadd.f32 %v1372_v31, %v1349_v8  ;;  %v1329_v59 = vpop.f32.mrf.mxu1  ;;  %2666 = vmatpush.bf16.msra.mxu0 %v7679_v44  ;;  %v9787_v8 = vld [vmem:[%s15208_s1 + $0x7e4] sm:$0xf] }
 0x145   : > { %v1330_v29 = vadd.f32 %v1329_v59, %v1306_v12  ;;  %2689 = vmatpush.bf16.msra.mxu1 %v7743_v30  ;;  %v7955_v11 = vor.u32 %v9787_v8, %v7952_v18  ;;  %v2140_v12 = vor.u32 %v2138_v43, %v11886_v26  ;;  %v2460_v59 = vrot.slane %v11730_v38, 3  ;;  %v7886_v26 = vld [vmem:[%s15208_s1 + $0x760] sm:$0xf]  ;;  %v7942_v43 = vld [vmem:[%s15208_s1 + $0x7d0] sm:$0xf] }
 0x146   : > { %v11953_v33 = vadd.f32 %v1373_v55, %v11664_v52  ;;  %2320 = vmatmul.bf16.gmra.mxu0 %v2126_v13  ;;  %v7899_v52 = vor.u32 %v9773_v34, %v7896_v36  ;;  %v2459_v55 = vrot.slane %v11876_v46, 2  ;;  %v2467_v30 = vshll.u32 %v11995_v45, 16  ;;  %v9772_v34 = vld [vmem:[%s15208_s1 + $0x764] sm:$0xf0]  ;;  %v7950_v36 = vld [vmem:[%s15208_s1 + $0x7e0] sm:$0xf] }
 0x147   : > { %v11956_v61 = vadd.f32 %v1330_v29, %v11666_v51  ;;  %2343 = vmatmul.bf16.gmra.mxu1 %v2134_v21  ;;  %2366 = vmatmul.bf16.gmra.mxu2 %v2126_v13  ;;  %v7960_v51 = vld [vmem:[%s15208_s1 + $0x7f8] sm:$0xf0]  ;;  %v7943_v0 = vor.u32 %v9786_v57, %v7942_v43  ;;  %v7936_v18 = vld [vmem:[%s15208_s1 + $0x7c8] sm:$0xf0] }
 0x148   : > { %2389 = vmatmul.bf16.gmra.mxu3 %v2134_v21  ;;  %v7963_v53 = vor.u32 %v9789_v27, %v7960_v51  ;;  %3031 = vmatpush.bf16.msrb.mxu2 %v7899_v52  ;;  %v2471_v21 = vrot.slane %v11882_v56, 2  ;;  %v7887_v27 = vor.u32 %v9772_v34, %v7886_v26  ;;  %v9788_v51 = vld [vmem:[%s15208_s1 + $0x7e4] sm:$0xf0] }
 0x149   : > { %2985 = vmatpush.bf16.msrb.mxu0 %v7895_v2  ;;  %3008 = vmatpush.bf16.msrb.mxu1 %v7959_v7  ;;  %v7872_v2 = vld [vmem:[%s15208_s1 + $0x748] sm:$0xf0] }
 0x14a   : > { %v1352_v24 = vpop.f32.mrf.mxu2  ;;  %3054 = vmatpush.bf16.msrb.mxu3 %v7963_v53  ;;  %v7880_v53 = vld [vmem:[%s15208_s1 + $0x758] sm:$0xf0] }
 0x14b   : > { %v1375_v48 = vpop.f32.mrf.mxu3  ;;  %v1308_v63 = vpop.f32.mrf.mxu0 }
 0x14c   : > { %v1376_v10 = vadd.f32 %v1375_v48, %v1352_v24  ;;  %v1331_v32 = vpop.f32.mrf.mxu1  ;;  %3032 = vmatpush.bf16.msrb.mxu2 %v7891_v47  ;;  %v9769_v24 = vld [vmem:[%s15208_s1 + $0x754] sm:$0xf]  ;;  %v7951_v48 = vor.u32 %v9788_v51, %v7950_v36  ;;  %v2472_v47 = vrot.slane %v11788_v25, 3  ;;  %v9784_v36 = vld [vmem:[%s15208_s1 + $0x7c4] sm:$0xf0] }
 0x14d   : > { %v7883_v63 = vor.u32 %v9769_v24, %v7880_v53  ;;  %v7878_v32 = vld [vmem:[%s15208_s1 + $0x750] sm:$0xf]  ;;  %2986 = vmatpush.bf16.msrb.mxu0 %v7887_v27  ;;  %v9765_v27 = vld [vmem:[%s15208_s1 + $0x734] sm:$0xf] }
 0x14e   : > { %v11971_v9 = vadd.f32 %v1376_v10, %v11681_v3  ;;  %v2413_v3 = vpack.c.bf16 %v11687_v6, %v2409_v22  ;;  %3055 = vmatpush.bf16.msrb.mxu3 %v7955_v11  ;;  %v7944_v10 = vld [vmem:[%s15208_s1 + $0x7d8] sm:$0xf0]  ;;  %3009 = vmatpush.bf16.msrb.mxu1 %v7951_v48  ;;  %v7879_v28 = vor.u32 %v9770_v54, %v7878_v32  ;;  %v2466_v11 = vrot.slane %v2464_v41, 2  ;;  %v7934_v41 = vld [vmem:[%s15208_s1 + $0x7c0] sm:$0xf] }
 0x14f   : > { %v12092_v24 = vor.u32 %v2472_v47, %v2471_v21  ;;  %v9781_v53 = vld [vmem:[%s15208_s1 + $0x7b4] sm:$0xf]  ;;  %v7928_v48 = vld [vmem:[%s15208_s1 + $0x7b8] sm:$0xf0]  ;;  %v7856_v47 = vld [vmem:[%s15208_s1 + $0x728] sm:$0xf0] }
 0x150   : > { %v2452_v15 = vshrl.u32 %v2413_v3, 16  ;;  %v2455_v29 = vshll.u32 %v2413_v3, 16  ;;  %3033 = vmatpush.bf16.msrb.mxu2 %v7883_v63  ;;  %v9767_v3 = vld [vmem:[%s15208_s1 + $0x744] sm:$0xf] }
 0x151   : > { %v7875_v8 = vor.u32 %v9767_v3, %v7872_v2  ;;  %2987 = vmatpush.bf16.msrb.mxu0 %v7879_v28 }
 0x152   : > { %v1354_v40 = vpop.f32.mrf.mxu2  ;;  %v2454_v45 = vrot.slane %v2452_v15, 2  ;;  %v2457_v7 = vrot.slane %v2455_v29, 3  ;;  %3010 = vmatpush.bf16.msrb.mxu1 %v7943_v0  ;;  %v9768_v29 = vld [vmem:[%s15208_s1 + $0x744] sm:$0xf0] }
 0x153   : > { %v1377_v49 = vpop.f32.mrf.mxu3  ;;  %v1648_v31 = vpop.f32.mrf.mxu0 }
 0x154   : > { %v1671_v13 = vpop.f32.mrf.mxu1  ;;  %v2469_v49 = vrot.slane %v2467_v30, 3  ;;  %3034 = vmatpush.bf16.msrb.mxu2 %v7875_v8  ;;  %v2458_v26 = vor.u32 %v2457_v7, %v2454_v45  ;;  %v9782_v45 = vld [vmem:[%s15208_s1 + $0x7b4] sm:$0xf0]  ;;  %v9763_v7 = vld [vmem:[%s15208_s1 + $0x724] sm:$0xf] }
 0x155   : > { %v1672_v44 = vadd.f32 %v1671_v13, %v1648_v31  ;;  %v7939_v31 = vor.u32 %v9783_v1, %v7936_v18  ;;  %v2411_v13 = vld [vmem:[#allocation2 + $0x60] sm:$0x1f]  ;;  %v7862_v1 = vld [vmem:[%s15208_s1 + $0x730] sm:$0xf] }
 0x156   : > { %2325 = vmatmul.bf16.gmra.mxu0 %v2137_v35  ;;  %v2470_v51 = vor.u32 %v2469_v49, %v2466_v11  ;;  %v2415_v63 = vpack.c.bf16 %v2411_v13, %v11683_v14  ;;  %v7920_v11 = vld [vmem:[%s15208_s1 + $0x7a8] sm:$0xf0]  ;;  %v9764_v13 = vld [vmem:[%s15208_s1 + $0x724] sm:$0xf0] }
 0x157   : > { %v12020_v52 = vadd.f32 %v1672_v44, %v11742_v37  ;;  %2348 = vmatmul.bf16.gmra.mxu1 %v2140_v12  ;;  %2371 = vmatmul.bf16.gmra.mxu2 %v2137_v35  ;;  %v9785_v37 = vld [vmem:[%s15208_s1 + $0x7d4] sm:$0xf]  ;;  %v7870_v44 = vld [vmem:[%s15208_s1 + $0x740] sm:$0xf] }
 0x158   : > { %2394 = vmatmul.bf16.gmra.mxu3 %v2140_v12  ;;  %v7947_v22 = vor.u32 %v9785_v37, %v7944_v10  ;;  %v7871_v34 = vor.u32 %v9768_v29, %v7870_v44  ;;  %v2412_v37 = vld [vmem:[#allocation2 + $0x28] sm:$0x1f]  ;;  %v7931_v10 = vor.u32 %v9781_v53, %v7928_v48  ;;  %v2476_v0 = vshrl.u32 %v2415_v63, 16  ;;  %v7918_v44 = vld [vmem:[%s15208_s1 + $0x7a0] sm:$0xf] }
 0x159   : > { %v2416_v28 = vpack.c.bf16 %v2412_v37, %v11685_v17  ;;  %v2479_v3 = vshll.u32 %v2415_v63, 16  ;;  %v9761_v37 = vld [vmem:[%s15208_s1 + $0x714] sm:$0xf] }
 0x15a   : > { %v1694_v60 = vpop.f32.mrf.mxu2  ;;  %3056 = vmatpush.bf16.msrb.mxu3 %v7947_v22  ;;  %2988 = vmatpush.bf16.msrb.mxu0 %v7871_v34 }
 0x15b   : > { %v1717_v62 = vpop.f32.mrf.mxu3  ;;  %v1650_v4 = vpop.f32.mrf.mxu0  ;;  %v2485_v8 = vshrl.u32 %v2416_v28, 16  ;;  %v2488_v18 = vshll.u32 %v2416_v28, 16  ;;  %v2481_v34 = vrot.slane %v2479_v3, 3  ;;  %v9759_v3 = vld [vmem:[%s15208_s1 + $0x704] sm:$0xf] }
 0x15c   : > { %v1718_v40 = vadd.f32 %v1717_v62, %v1694_v60  ;;  %v1673_v35 = vpop.f32.mrf.mxu1  ;;  %v2474_v60 = vsel %vm2450_vm4, %v2470_v51, %v12092_v24  ;;  %v9766_v62 = vld [vmem:[%s15208_s1 + $0x734] sm:$0xf0] }
 0x15d   : > { %v1674_v12 = vadd.f32 %v1673_v35, %v1650_v4  ;;  %v7926_v4 = vld [vmem:[%s15208_s1 + $0x7b0] sm:$0xf]  ;;  %v9779_v35 = vld [vmem:[%s15208_s1 + $0x7a4] sm:$0xf] }
 0x15e   : > { %v12063_v15 = vadd.f32 %v1718_v40, %v11792_v19  ;;  %v12079_v19 = vor.u32 %v2460_v59, %v2459_v55  ;;  %3057 = vmatpush.bf16.msrb.mxu3 %v7939_v31  ;;  %v7935_v55 = vor.u32 %v9784_v36, %v7934_v41  ;;  %v7859_v40 = vor.u32 %v9763_v7, %v7856_v47 }
 0x15f   : > { %v12075_v30 = vadd.f32 %v1674_v12, %v11804_v23  ;;  %v7864_v23 = vld [vmem:[%s15208_s1 + $0x738] sm:$0xf0]  ;;  %v7923_v49 = vor.u32 %v9779_v35, %v7920_v11  ;;  %v7854_v12 = vld [vmem:[%s15208_s1 + $0x720] sm:$0xf] }
 0x160   : > { %v7867_v59 = vor.u32 %v9765_v27, %v7864_v23  ;;  %3011 = vmatpush.bf16.msrb.mxu1 %v7935_v55  ;;  %v2462_v54 = vsel %vm2450_vm4, %v2458_v26, %v12079_v19  ;;  %v2478_v26 = vrot.slane %v2476_v0, 2  ;;  %v7855_v36 = vor.u32 %v9764_v13, %v7854_v12  ;;  %v9780_v27 = vld [vmem:[%s15208_s1 + $0x7a4] sm:$0xf0]  ;;  %v9778_v0 = vld [vmem:[%s15208_s1 + $0x794] sm:$0xf0] }
 0x161   : > { %v2487_v55 = vrot.slane %v2485_v8, 2  ;;  %v7919_v53 = vor.u32 %v9780_v27, %v7918_v44  ;;  %v7838_v8 = vld [vmem:[%s15208_s1 + $0x700] sm:$0xf] }
 0x162   : > { %v1696_v32 = vpop.f32.mrf.mxu2  ;;  %3035 = vmatpush.bf16.msrb.mxu2 %v7867_v59  ;;  %3058 = vmatpush.bf16.msrb.mxu3 %v7931_v10  ;;  %v2490_v59 = vrot.slane %v2488_v18, 3  ;;  %v7848_v10 = vld [vmem:[%s15208_s1 + $0x718] sm:$0xf0]  ;;  %v9760_v18 = vld [vmem:[%s15208_s1 + $0x704] sm:$0xf0] }
 0x163   : > { %v1719_v21 = vpop.f32.mrf.mxu3  ;;  %v1653_v22 = vpop.f32.mrf.mxu0  ;;  %v7839_v44 = vor.u32 %v9760_v18, %v7838_v8  ;;  %v8110_v8 = vld [vmem:[%s15208_s1 + $0x8e0] sm:$0xf] }
 0x164   : > { %v1720_v43 = vadd.f32 %v1719_v21, %v1696_v32  ;;  %v1676_v57 = vpop.f32.mrf.mxu1  ;;  %v9777_v32 = vld [vmem:[%s15208_s1 + $0x794] sm:$0xf] }
 0x165   : > { %v1677_v14 = vadd.f32 %v1676_v57, %v1653_v22  ;;  %v12163_v22 = vor.u32 %v2481_v34, %v2478_v26  ;;  %v9762_v57 = vld [vmem:[%s15208_s1 + $0x714] sm:$0xf0]  ;;  %v8056_v34 = vld [vmem:[%s15208_s1 + $0x878] sm:$0xf0] }
 0x166   : > { %v12107_v2 = vadd.f32 %v1720_v43, %v11835_v39  ;;  %2667 = vmatmul.bf16.vlgmr.msra.gmra.mxu0 %v2462_v54  ;;  %v7863_v39 = vor.u32 %v9766_v62, %v7862_v1  ;;  %3036 = vmatpush.bf16.msrb.mxu2 %v7859_v40  ;;  %v7846_v43 = vld [vmem:[%s15208_s1 + $0x710] sm:$0xf]  ;;  %v7840_v62 = vld [vmem:[%s15208_s1 + $0x708] sm:$0xf0] }
 0x167   : > { %v12119_v17 = vadd.f32 %v1677_v14, %v11847_v5  ;;  %2690 = vmatmul.bf16.vlgmr.msra.gmra.mxu1 %v2474_v60  ;;  %2713 = vmatmul.bf16.vlgmr.msra.gmra.mxu2 %v2462_v54  ;;  %v7927_v5 = vor.u32 %v9782_v45, %v7926_v4  ;;  %v7912_v54 = vld [vmem:[%s15208_s1 + $0x798] sm:$0xf0]  ;;  %v7910_v14 = vld [vmem:[%s15208_s1 + $0x790] sm:$0xf]  ;;  %v9775_v4 = vld [vmem:[%s15208_s1 + $0x784] sm:$0xf]  ;;  %v7843_v7 = vor.u32 %v9759_v3, %v7840_v62 }
 0x168   : > { %2736 = vmatmul.bf16.vlgmr.msra.gmra.mxu3 %v2474_v60  ;;  %2989 = vmatpush.bf16.msrb.mxu0 %v7863_v39  ;;  %v12174_v60 = vor.u32 %v2490_v59, %v2487_v55  ;;  %v7915_v28 = vor.u32 %v9777_v32, %v7912_v54  ;;  %v7911_v1 = vor.u32 %v9778_v0, %v7910_v14  ;;  %v7904_v39 = vld [vmem:[%s15208_s1 + $0x788] sm:$0xf0]  ;;  %v8118_v32 = vld [vmem:[%s15208_s1 + $0x8f0] sm:$0xf]  ;;  %v9822_v54 = vld [vmem:[%s15208_s1 + $0x8f4] sm:$0xf0] }
 0x169   : > { %3012 = vmatpush.bf16.msrb.mxu1 %v7927_v5  ;;  %3059 = vmatpush.bf16.msrb.mxu3 %v7923_v49  ;;  %v7907_v47 = vor.u32 %v9775_v4, %v7904_v39  ;;  %v7902_v5 = vld [vmem:[%s15208_s1 + $0x780] sm:$0xf]  ;;  %v2483_v11 = vsel %vm2450_vm4, %v12079_v19, %v12163_v22  ;;  %v9776_v49 = vld [vmem:[%s15208_s1 + $0x784] sm:$0xf0]  ;;  %v8112_v14 = vld [vmem:[%s15208_s1 + $0x8e8] sm:$0xf0] }
 0x16a   : > { %v1699_v31 = vpop.f32.mrf.mxu2  ;;  %v2492_v13 = vsel %vm2450_vm4, %v12092_v24, %v12174_v60  ;;  %v9805_v24 = vld [vmem:[%s15208_s1 + $0x874] sm:$0xf] }
 0x16b   : > { %v1722_v29 = vpop.f32.mrf.mxu3  ;;  %v1655_v41 = vpop.f32.mrf.mxu0 }
 0x16c   : > { %v1723_v23 = vadd.f32 %v1722_v29, %v1699_v31  ;;  %v1678_v51 = vpop.f32.mrf.mxu1  ;;  %2990 = vmatpush.bf16.msrb.mxu0 %v7855_v36  ;;  %v8059_v36 = vor.u32 %v9805_v24, %v8056_v34  ;;  %v9818_v24 = vld [vmem:[%s15208_s1 + $0x8d4] sm:$0xf0] }
 0x16d   : > { %v1679_v48 = vadd.f32 %v1678_v51, %v1655_v41  ;;  %3013 = vmatpush.bf16.msrb.mxu1 %v7919_v53  ;;  %3060 = vmatpush.bf16.msrb.mxu3 %v7915_v28  ;;  %v7903_v41 = vor.u32 %v9776_v49, %v7902_v5  ;;  %v2762_v5 = vld [vmem:[#allocation2 + $0x18] sm:$0xc0] }
 0x16e   : > { %v12149_v63 = vadd.f32 %v1723_v23, %v11889_v42  ;;  %v7851_v42 = vor.u32 %v9761_v37, %v7848_v10  ;;  %v8054_v37 = vld [vmem:[%s15208_s1 + $0x870] sm:$0xf]  ;;  %v9806_v10 = vld [vmem:[%s15208_s1 + $0x874] sm:$0xf0]  ;;  %v8040_v49 = vld [vmem:[%s15208_s1 + $0x858] sm:$0xf0] }
 0x16f   : > { %v12161_v21 = vadd.f32 %v1679_v48, %v11901_v50  ;;  %v7847_v50 = vor.u32 %v9762_v57, %v7846_v43  ;;  %v8048_v43 = vld [vmem:[%s15208_s1 + $0x868] sm:$0xf0]  ;;  %v8119_v57 = vor.u32 %v9822_v54, %v8118_v32 }
 0x170   : > { %3037 = vmatpush.bf16.msrb.mxu2 %v7851_v42  ;;  %v8055_v42 = vor.u32 %v9806_v10, %v8054_v37  ;;  %v2766_v10 = vpack.c.bf16 %v11712_v20, %v2762_v5  ;;  %v9800_v20 = vld [vmem:[%s15208_s1 + $0x844] sm:$0xf0] }
 0x171   : > { %2991 = vmatpush.bf16.msrb.mxu0 %v7847_v50  ;;  %3014 = vmatpush.bf16.msrb.mxu1 %v7911_v1  ;;  %v9819_v50 = vld [vmem:[%s15208_s1 + $0x8e4] sm:$0xf] }
 0x172   : > { %v1701_v45 = vpop.f32.mrf.mxu2  ;;  %3061 = vmatpush.bf16.msrb.mxu3 %v7907_v47  ;;  %v8115_v3 = vor.u32 %v9819_v50, %v8112_v14  ;;  %v9804_v47 = vld [vmem:[%s15208_s1 + $0x864] sm:$0xf0]  ;;  %v8094_v50 = vld [vmem:[%s15208_s1 + $0x8c0] sm:$0xf] }
 0x173   : > { %v1724_v40 = vpop.f32.mrf.mxu3  ;;  %v1658_v35 = vpop.f32.mrf.mxu0 }
 0x174   : > { %v1725_v31 = vadd.f32 %v1724_v40, %v1701_v45  ;;  %v1681_v12 = vpop.f32.mrf.mxu1  ;;  %3038 = vmatpush.bf16.msrb.mxu2 %v7843_v7  ;;  %v2761_v45 = vld [vmem:[#allocation2 + $0x58] sm:$0xc0]  ;;  %v8046_v7 = vld [vmem:[%s15208_s1 + $0x860] sm:$0xf] }
 0x175   : > { %v1682_v29 = vadd.f32 %v1681_v12, %v1658_v35  ;;  %2992 = vmatpush.bf16.msrb.mxu0 %v7839_v44  ;;  %3015 = vmatpush.bf16.msrb.mxu1 %v7903_v41  ;;  %v8047_v40 = vor.u32 %v9804_v47, %v8046_v7  ;;  %v9820_v35 = vld [vmem:[%s15208_s1 + $0x8e4] sm:$0xf0]  ;;  %v8104_v12 = vld [vmem:[%s15208_s1 + $0x8d8] sm:$0xf0]  ;;  %v2765_v44 = vpack.c.bf16 %v11687_v6, %v2761_v45  ;;  %v8102_v41 = vld [vmem:[%s15208_s1 + $0x8d0] sm:$0xf] }
 0x176   : > { %v12213_v26 = vadd.f32 %v1725_v31, %v11953_v33  ;;  %2672 = vmatmul.bf16.gmra.mxu0 %v2483_v11  ;;  %v9821_v33 = vld [vmem:[%s15208_s1 + $0x8f4] sm:$0xf]  ;;  %v9799_v6 = vld [vmem:[%s15208_s1 + $0x844] sm:$0xf]  ;;  %v8088_v45 = vld [vmem:[%s15208_s1 + $0x8b8] sm:$0xf0] }
 0x177   : > { %v12216_v19 = vadd.f32 %v1682_v29, %v11956_v61  ;;  %2695 = vmatmul.bf16.gmra.mxu1 %v2492_v13  ;;  %2718 = vmatmul.bf16.gmra.mxu2 %v2483_v11  ;;  %v8120_v61 = vld [vmem:[%s15208_s1 + $0x8f8] sm:$0xf0]  ;;  %v9801_v11 = vld [vmem:[%s15208_s1 + $0x854] sm:$0xf]  ;;  %v2809_v54 = vrot.slane %v2765_v44, 3 }
 0x178   : > { %2741 = vmatmul.bf16.gmra.mxu3 %v2492_v13  ;;  %v8123_v23 = vor.u32 %v9821_v33, %v8120_v61  ;;  %3382 = vmatpush.bf16.msra.mxu2 %v8059_v36  ;;  %v8043_v31 = vor.u32 %v9801_v11, %v8040_v49  ;;  %v8038_v13 = vld [vmem:[%s15208_s1 + $0x850] sm:$0xf]  ;;  %v8103_v36 = vor.u32 %v9818_v24, %v8102_v41  ;;  %v8032_v61 = vld [vmem:[%s15208_s1 + $0x848] sm:$0xf0]  ;;  %v9798_v44 = vld [vmem:[%s15208_s1 + $0x834] sm:$0xf0] }
 0x179   : > { %3336 = vmatpush.bf16.msra.mxu0 %v8055_v42  ;;  %3359 = vmatpush.bf16.msra.mxu1 %v8119_v57  ;;  %v9814_v41 = vld [vmem:[%s15208_s1 + $0x8b4] sm:$0xf0]  ;;  %v9795_v24 = vld [vmem:[%s15208_s1 + $0x824] sm:$0xf] }
 0x17a   : > { %v1704_v27 = vpop.f32.mrf.mxu2  ;;  %3405 = vmatpush.bf16.msra.mxu3 %v8123_v23 }
 0x17b   : > { %v1727_v51 = vpop.f32.mrf.mxu3  ;;  %v1660_v55 = vpop.f32.mrf.mxu0 }
 0x17c   : > { %v1728_v59 = vadd.f32 %v1727_v51, %v1704_v27  ;;  %v1683_v53 = vpop.f32.mrf.mxu1  ;;  %v9815_v27 = vld [vmem:[%s15208_s1 + $0x8c4] sm:$0xf]  ;;  %v8035_v55 = vor.u32 %v9799_v6, %v8032_v61  ;;  %v8080_v6 = vld [vmem:[%s15208_s1 + $0x8a8] sm:$0xf0]  ;;  %v12382_v61 = vld [vmem:[#allocation2 + $0x10] sm:$0xff] }
 0x17d   : > { %3337 = vmatpush.bf16.msra.mxu0 %v8047_v40 }
 0x17e   : > { %v12231_v48 = vadd.f32 %v1728_v59, %v11971_v9  ;;  %v9803_v9 = vld [vmem:[%s15208_s1 + $0x864] sm:$0xf]  ;;  %3406 = vmatpush.bf16.msra.mxu3 %v8115_v3  ;;  %v8096_v59 = vld [vmem:[%s15208_s1 + $0x8c8] sm:$0xf0]  ;;  %v9797_v3 = vld [vmem:[%s15208_s1 + $0x834] sm:$0xf] }
 0x17f   : > { %v8051_v28 = vor.u32 %v9803_v9, %v8048_v43  ;;  %v8099_v32 = vor.u32 %v9815_v27, %v8096_v59  ;;  %v2810_v9 = vrot.slane %v11710_v16, 3  ;;  %v2813_v43 = vrot.slane %v11753_v58, 3 }
 0x181   : > { %3383 = vmatpush.bf16.msra.mxu2 %v8051_v28  ;;  %v8030_v28 = vld [vmem:[%s15208_s1 + $0x840] sm:$0xf]  ;;  %v2811_v40 = vsel %vm2808_vm5, %v2809_v54, %v2810_v9 }
 0x182   : > { %v1706_v0 = vpop.f32.mrf.mxu2 }
 0x183   : > { %v1729_v1 = vpop.f32.mrf.mxu3  ;;  %v1951_v62 = vpop.f32.mrf.mxu0  ;;  %v9816_v0 = vld [vmem:[%s15208_s1 + $0x8c4] sm:$0xf0] }
 0x184   : > { %v1974_v4 = vpop.f32.mrf.mxu1  ;;  %v8024_v1 = vld [vmem:[%s15208_s1 + $0x838] sm:$0xf0] }
 0x185   : > { %v1975_v39 = vadd.f32 %v1974_v4, %v1951_v62  ;;  %3384 = vmatpush.bf16.msra.mxu2 %v8043_v31  ;;  %v2812_v62 = vrot.slane %v2766_v10, 3  ;;  %v8095_v4 = vor.u32 %v9816_v0, %v8094_v50  ;;  %v2763_v31 = vld [vmem:[#allocation2 + $0x60] sm:$0x3f] }
 0x186   : > { %2677 = vmatmul.bf16.gmra.mxu0 %v12163_v22  ;;  %v2767_v27 = vpack.c.bf16 %v2763_v31, %v12382_v61  ;;  %v8078_v10 = vld [vmem:[%s15208_s1 + $0x8a0] sm:$0xf]  ;;  %v9807_v31 = vld [vmem:[%s15208_s1 + $0x884] sm:$0xf] }
 0x187   : > { %v12268_v18 = vadd.f32 %v1975_v39, %v12020_v52  ;;  %2700 = vmatmul.bf16.gmra.mxu1 %v12174_v60  ;;  %2723 = vmatmul.bf16.gmra.mxu2 %v12163_v22  ;;  %v8111_v52 = vor.u32 %v9820_v35, %v8110_v8  ;;  %v9817_v22 = vld [vmem:[%s15208_s1 + $0x8d4] sm:$0xf]  ;;  %v8027_v39 = vor.u32 %v9797_v3, %v8024_v1 }
 0x188   : > { %2746 = vmatmul.bf16.gmra.mxu3 %v12174_v60  ;;  %v8107_v29 = vor.u32 %v9817_v22, %v8104_v12  ;;  %v9802_v60 = vld [vmem:[%s15208_s1 + $0x854] sm:$0xf0]  ;;  %v2814_v49 = vsel %vm2808_vm5, %v2812_v62, %v2813_v43  ;;  %v2764_v22 = vld [vmem:[#allocation2 + $0x28] sm:$0x3f]  ;;  %v12400_v3 = vrot.slane %v2767_v27, 3 }
 0x189   : > { %3360 = vmatpush.bf16.msra.mxu1 %v8111_v52  ;;  %v8039_v33 = vor.u32 %v9802_v60, %v8038_v13  ;;  %3385 = vmatpush.bf16.msra.mxu2 %v8035_v55  ;;  %v8022_v13 = vld [vmem:[%s15208_s1 + $0x830] sm:$0xf] }
 0x18a   : > { %v1997_v34 = vpop.f32.mrf.mxu2  ;;  %3407 = vmatpush.bf16.msra.mxu3 %v8107_v29  ;;  %v8086_v29 = vld [vmem:[%s15208_s1 + $0x8b0] sm:$0xf] }
 0x18b   : > { %v2020_v23 = vpop.f32.mrf.mxu3  ;;  %v1953_v51 = vpop.f32.mrf.mxu0  ;;  %3338 = vmatpush.bf16.msra.mxu0 %v8039_v33  ;;  %v8087_v33 = vor.u32 %v9814_v41, %v8086_v29  ;;  %v9792_v41 = vld [vmem:[%s15208_s1 + $0x804] sm:$0xf0] }
 0x18c   : > { %v2021_v53 = vadd.f32 %v2020_v23, %v1997_v34  ;;  %v1976_v37 = vpop.f32.mrf.mxu1  ;;  %v8016_v34 = vld [vmem:[%s15208_s1 + $0x828] sm:$0xf0]  ;;  %v12385_v23 = vld [vmem:[#allocation2 + $0x38] sm:$0xff] }
 0x18d   : > { %v1977_v42 = vadd.f32 %v1976_v37, %v1953_v51  ;;  %3361 = vmatpush.bf16.msra.mxu1 %v8103_v36  ;;  %3386 = vmatpush.bf16.msra.mxu2 %v8027_v39  ;;  %v8019_v36 = vor.u32 %v9795_v24, %v8016_v34  ;;  %v2768_v51 = vpack.c.bf16 %v2764_v22, %v12385_v23  ;;  %v9796_v37 = vld [vmem:[%s15208_s1 + $0x824] sm:$0xf0]  ;;  %v8008_v39 = vld [vmem:[%s15208_s1 + $0x818] sm:$0xf0]  ;;  %v8064_v22 = vld [vmem:[%s15208_s1 + $0x888] sm:$0xf0] }
 0x18e   : > { %v12317_v57 = vadd.f32 %v2021_v53, %v12063_v15  ;;  %3408 = vmatpush.bf16.msra.mxu3 %v8099_v32  ;;  %v8031_v15 = vor.u32 %v9800_v20, %v8030_v28  ;;  %v8014_v53 = vld [vmem:[%s15208_s1 + $0x820] sm:$0xf]  ;;  %v9812_v28 = vld [vmem:[%s15208_s1 + $0x8a4] sm:$0xf0]  ;;  %v8067_v29 = vor.u32 %v9807_v31, %v8064_v22 }
 0x18f   : > { %v12329_v14 = vadd.f32 %v1977_v42, %v12075_v30  ;;  %v9813_v30 = vld [vmem:[%s15208_s1 + $0x8b4] sm:$0xf]  ;;  %v8015_v54 = vor.u32 %v9796_v37, %v8014_v53  ;;  %v12402_v1 = vrot.slane %v2768_v51, 3  ;;  %v8062_v24 = vld [vmem:[%s15208_s1 + $0x880] sm:$0xf] }
 0x190   : > { %3339 = vmatpush.bf16.msra.mxu0 %v8031_v15  ;;  %v8091_v7 = vor.u32 %v9813_v30, %v8088_v45  ;;  %v8079_v15 = vor.u32 %v9812_v28, %v8078_v10  ;;  %v9809_v30 = vld [vmem:[%s15208_s1 + $0x894] sm:$0xf] }
 0x191   : > { %3362 = vmatpush.bf16.msra.mxu1 %v8095_v4  ;;  %3387 = vmatpush.bf16.msra.mxu2 %v8019_v36  ;;  %v9793_v4 = vld [vmem:[%s15208_s1 + $0x814] sm:$0xf]  ;;  %v2816_v36 = vsel %vm2808_vm5, %v2810_v9, %v12400_v3  ;;  %v2818_v51 = vsel %vm2808_vm5, %v2813_v43, %v12402_v1 }
 0x192   : > { %v1999_v47 = vpop.f32.mrf.mxu2  ;;  %3409 = vmatpush.bf16.msra.mxu3 %v8091_v7  ;;  %v8011_v7 = vor.u32 %v9793_v4, %v8008_v39  ;;  %v10164_v4 = vld [vmem:[#allocation2 + $0x68] sm:$0xff] }
 0x193   : > { %v2022_v8 = vpop.f32.mrf.mxu3  ;;  %v1956_v5 = vpop.f32.mrf.mxu0 }
 0x194   : > { %v2023_v35 = vadd.f32 %v2022_v8, %v1999_v47  ;;  %v1979_v11 = vpop.f32.mrf.mxu1  ;;  %v8006_v47 = vld [vmem:[%s15208_s1 + $0x810] sm:$0xf]  ;;  %v9794_v8 = vld [vmem:[%s15208_s1 + $0x814] sm:$0xf0] }
 0x195   : > { %v1980_v52 = vadd.f32 %v1979_v11, %v1956_v5  ;;  %3363 = vmatpush.bf16.msra.mxu1 %v8087_v33  ;;  %v9791_v11 = vld [vmem:[%s15208_s1 + $0x804] sm:$0xf]  ;;  %3388 = vmatpush.bf16.msra.mxu2 %v8011_v7 }
 0x196   : > { %v12353_v12 = vadd.f32 %v2023_v35, %v12107_v2  ;;  %2993 = vmatmul.bf16.vlgmr.msrb.gmra.mxu0 %v2811_v40  ;;  %v8023_v2 = vor.u32 %v9798_v44, %v8022_v13  ;;  %v9810_v35 = vld [vmem:[%s15208_s1 + $0x894] sm:$0xf0] }
 0x197   : > { %v12365_v60 = vadd.f32 %v1980_v52, %v12119_v17  ;;  %3016 = vmatmul.bf16.vlgmr.msrb.gmra.mxu1 %v2814_v49  ;;  %3039 = vmatmul.bf16.vlgmr.msrb.gmra.mxu2 %v2811_v40  ;;  %v9811_v17 = vld [vmem:[%s15208_s1 + $0x8a4] sm:$0xf]  ;;  %v8007_v40 = vor.u32 %v9794_v8, %v8006_v47  ;;  %v8000_v52 = vld [vmem:[%s15208_s1 + $0x808] sm:$0xf0] }
 0x198   : > { %3062 = vmatmul.bf16.vlgmr.msrb.gmra.mxu3 %v2814_v49  ;;  %3340 = vmatpush.bf16.msra.mxu0 %v8023_v2  ;;  %v8083_v55 = vor.u32 %v9811_v17, %v8080_v6  ;;  %v8003_v44 = vor.u32 %v9791_v11, %v8000_v52  ;;  %v7998_v2 = vld [vmem:[%s15208_s1 + $0x800] sm:$0xf]  ;;  %v9808_v17 = vld [vmem:[%s15208_s1 + $0x884] sm:$0xf0]  ;;  %v3148_v52 = vrot.slane %v11882_v56, 3 }
 0x199   : > { %3364 = vmatpush.bf16.msra.mxu1 %v8079_v15  ;;  %v8063_v53 = vor.u32 %v9808_v17, %v8062_v24  ;;  %v3089_v24 = vld [vmem:[#allocation2 + $0x60] sm:$0x7f] }
 0x19a   : > { %v2002_v59 = vpop.f32.mrf.mxu2  ;;  %3410 = vmatpush.bf16.msra.mxu3 %v8083_v55  ;;  %v7999_v55 = vor.u32 %v9792_v41, %v7998_v2  ;;  %3389 = vmatpush.bf16.msra.mxu2 %v8003_v44  ;;  %v3093_v17 = vpack.c.bf16 %v3089_v24, %v12382_v61 }
 0x19b   : > { %v2025_v32 = vpop.f32.mrf.mxu3  ;;  %v1958_v42 = vpop.f32.mrf.mxu0 }
 0x19c   : > { %v2026_v20 = vadd.f32 %v2025_v32, %v2002_v59  ;;  %v1981_v50 = vpop.f32.mrf.mxu1  ;;  %3341 = vmatpush.bf16.msra.mxu0 %v8015_v54  ;;  %v3088_v54 = vld [vmem:[#allocation2 + $0x18] sm:$0x80] }
 0x19d   : > { %v1982_v0 = vadd.f32 %v1981_v50, %v1958_v42  ;;  %v3092_v39 = vpack.c.bf16 %v10164_v4, %v3088_v54 }
 0x19e   : > { %v12405_v62 = vadd.f32 %v2026_v20, %v12149_v63  ;;  %v8072_v63 = vld [vmem:[%s15208_s1 + $0x898] sm:$0xf0] }
 0x19f   : > { %v12417_v45 = vadd.f32 %v1982_v0, %v12161_v21  ;;  %v8075_v5 = vor.u32 %v9809_v30, %v8072_v63  ;;  %v8070_v21 = vld [vmem:[%s15208_s1 + $0x890] sm:$0xf]  ;;  %v3141_v47 = vshrl.u32 %v3092_v39, 16  ;;  %v3144_v8 = vshll.u32 %v3092_v39, 16 }
 0x1a0   : > { %v8071_v49 = vor.u32 %v9810_v35, %v8070_v21  ;;  %3342 = vmatpush.bf16.msra.mxu0 %v8007_v40  ;;  %v3136_v40 = vrot.slane %v11876_v46, 3 }
 0x1a1   : > { %3411 = vmatpush.bf16.msra.mxu3 %v8075_v5  ;;  %v3143_v22 = vrot.slane %v3141_v47, 3 }
 0x1a2   : > { %v2004_v13 = vpop.f32.mrf.mxu2  ;;  %3365 = vmatpush.bf16.msra.mxu1 %v8071_v49 }
 0x1a3   : > { %v2027_v34 = vpop.f32.mrf.mxu3  ;;  %v1961_v33 = vpop.f32.mrf.mxu0 }
 0x1a4   : > { %v2028_v6 = vadd.f32 %v2027_v34, %v2004_v13  ;;  %v1984_v27 = vpop.f32.mrf.mxu1  ;;  %3343 = vmatpush.bf16.msra.mxu0 %v7999_v55  ;;  %v3146_v13 = vrot.slane %v3144_v8, 4  ;;  %v3090_v34 = vld [vmem:[#allocation2 + $0x28] sm:$0x7f]  ;;  %v3153_v55 = vshrl.u32 %v3093_v17, 16 }
 0x1a5   : > { %v1985_v59 = vadd.f32 %v1984_v27, %v1961_v33  ;;  %3412 = vmatpush.bf16.msra.mxu3 %v8067_v29 }
 0x1a6   : > { %v12467_v16 = vadd.f32 %v2028_v6, %v12213_v26  ;;  %2998 = vmatmul.bf16.gmra.mxu0 %v2816_v36  ;;  %3366 = vmatpush.bf16.msra.mxu1 %v8063_v53  ;;  %v3087_v26 = vld [vmem:[#allocation2 + $0x58] sm:$0x80]  ;;  %v3147_v2 = vor.u32 %v3146_v13, %v3143_v22  ;;  %v3155_v61 = vrot.slane %v3153_v55, 3 }
 0x1a7   : > { %v12470_v9 = vadd.f32 %v1985_v59, %v12216_v19  ;;  %3021 = vmatmul.bf16.gmra.mxu1 %v2818_v51  ;;  %3044 = vmatmul.bf16.gmra.mxu2 %v2816_v36  ;;  %v10163_v19 = vld [vmem:[#allocation2 + $0x50] sm:$0xff]  ;;  %v3156_v59 = vshll.u32 %v3093_v17, 16 }
 0x1a8   : > { %3067 = vmatmul.bf16.gmra.mxu3 %v2818_v51  ;;  %v3091_v15 = vpack.c.bf16 %v10163_v19, %v3087_v26 }
 0x1aa   : > { %v2007_v58 = vpop.f32.mrf.mxu2  ;;  %v3132_v63 = vshll.u32 %v3091_v15, 16 }
 0x1ab   : > { %v2030_v37 = vpop.f32.mrf.mxu3  ;;  %v1963_v43 = vpop.f32.mrf.mxu0 }
 0x1ac   : > { %v2031_v10 = vadd.f32 %v2030_v37, %v2007_v58  ;;  %v1986_v32 = vpop.f32.mrf.mxu1  ;;  %v3134_v49 = vrot.slane %v3132_v63, 4 }
 0x1ad   : > { %v3158_v32 = vrot.slane %v3156_v59, 4 }
 0x1ae   : > { %v12473_v42 = vadd.f32 %v2031_v10, %v12231_v48  ;;  %v3129_v48 = vshrl.u32 %v3091_v15, 16 }
 0x1b0   : > { %v3131_v11 = vrot.slane %v3129_v48, 3 }
 0x1b2   : > { %v2009_v28 = vpop.f32.mrf.mxu2  ;;  %v3135_v46 = vor.u32 %v3134_v49, %v3131_v11 }
 0x1b3   : > { %v2032_v20 = vpop.f32.mrf.mxu3  ;;  %v2316_v50 = vpop.f32.mrf.mxu0 }
 0x1b4   : > { %v2339_v0 = vpop.f32.mrf.mxu1  ;;  %v3159_v20 = vor.u32 %v3158_v32, %v3155_v61 }
 0x1b5   : > { %v2340_v30 = vadd.f32 %v2339_v0, %v2316_v50 }
 0x1b6   : > { %3003 = vmatmul.bf16.gmra.mxu0 %v12400_v3 }
 0x1b7   : > { %v12477_v7 = vadd.f32 %v2340_v30, %v12268_v18  ;;  %3026 = vmatmul.bf16.gmra.mxu1 %v12402_v1  ;;  %3049 = vmatmul.bf16.gmra.mxu2 %v12400_v3  ;;  %v3137_v18 = vrot.slane %v11730_v38, 4 }
 0x1b8   : > { %3072 = vmatmul.bf16.gmra.mxu3 %v12402_v1  ;;  %v3149_v1 = vrot.slane %v11788_v25, 4 }
 0x1b9   : > { %v3138_v29 = vor.u32 %v3137_v18, %v3136_v40 }
 0x1ba   : > { %v2362_v5 = vpop.f32.mrf.mxu2  ;;  %v3150_v41 = vor.u32 %v3149_v1, %v3148_v52 }
 0x1bb   : > { %v2385_v21 = vpop.f32.mrf.mxu3  ;;  %v12483_v35 = vpop.f32.mrf.mxu0  ;;  %v3139_v36 = vsel %vm1430_vm3, %v3135_v46, %v3138_v29  ;;  %v3160_v4 = vsel %vm1430_vm3, %v3138_v29, %v3159_v20 }
 0x1bc   : > { %v2386_v31 = vadd.f32 %v2385_v21, %v2362_v5  ;;  %v12487_v3 = vpop.f32.mrf.mxu1  ;;  %v3151_v25 = vsel %vm1430_vm3, %v3147_v2, %v3150_v41 }
 0x1be   : > { %v12491_v44 = vadd.f32 %v2386_v31, %v12317_v57  ;;  %v3094_v57 = vpack.c.bf16 %v3090_v34, %v12385_v23 }
 0x1c0   : > { %v3162_v53 = vshrl.u32 %v3094_v57, 16  ;;  %v3165_v58 = vshll.u32 %v3094_v57, 16 }
 0x1c2   : > { %v12493_v33 = vpop.f32.mrf.mxu2  ;;  %v3164_v23 = vrot.slane %v3162_v53, 3  ;;  %v3167_v28 = vrot.slane %v3165_v58, 4 }
 0x1c3   : > { %v12495_v38 = vpop.f32.mrf.mxu3  ;;  %v2321_v56 = vpop.f32.mrf.mxu0 }
 0x1c4   : > { %v2344_v6 = vpop.f32.mrf.mxu1  ;;  %v3168_v50 = vor.u32 %v3167_v28, %v3164_v23 }
 0x1c5   : > { %v2345_v27 = vadd.f32 %v2344_v6, %v2321_v56 }
 0x1c6   : > { %3344 = vmatmul.bf16.vlgmr.msra.gmra.mxu0 %v3139_v36  ;;  %v3169_v30 = vsel %vm1430_vm3, %v3150_v41, %v3168_v50 }
 0x1c7   : > { %v2403_v51 = vadd.f32 %v2345_v27, %v12365_v60  ;;  %3367 = vmatmul.bf16.vlgmr.msra.gmra.mxu1 %v3151_v25  ;;  %3390 = vmatmul.bf16.vlgmr.msra.gmra.mxu2 %v3139_v36 }
 0x1c8   : > { %3413 = vmatmul.bf16.vlgmr.msra.gmra.mxu3 %v3151_v25 }
 0x1ca   : > { %v2367_v37 = vpop.f32.mrf.mxu2 }
 0x1cb   : > { %v2390_v43 = vpop.f32.mrf.mxu3  ;;  %v12502_v10 = vpop.f32.mrf.mxu0 }
 0x1cc   : > { %v2391_v26 = vadd.f32 %v2390_v43, %v2367_v37  ;;  %v12504_v54 = vpop.f32.mrf.mxu1 }
 0x1ce   : > { %v2404_v60 = vadd.f32 %v2391_v26, %v12405_v62 }
 0x1d2   : > { %v12507_v19 = vpop.f32.mrf.mxu2 }
 0x1d3   : > { %v12509_v15 = vpop.f32.mrf.mxu3  ;;  %v2326_v0 = vpop.f32.mrf.mxu0 }
 0x1d4   : > { %v2349_v39 = vpop.f32.mrf.mxu1 }
 0x1d5   : > { %v2350_v48 = vadd.f32 %v2349_v39, %v2326_v0 }
 0x1d6   : > { %3349 = vmatmul.bf16.gmra.mxu0 %v3160_v4 }
 0x1d7   : > { %v2407_v63 = vadd.f32 %v2350_v48, %v12470_v9  ;;  %3372 = vmatmul.bf16.gmra.mxu1 %v3169_v30  ;;  %3395 = vmatmul.bf16.gmra.mxu2 %v3160_v4 }
 0x1d8   : > { %3418 = vmatmul.bf16.gmra.mxu3 %v3169_v30 }
 0x1da   : > { %v2372_v62 = vpop.f32.mrf.mxu2 }
 0x1db   : > { %v2395_v47 = vpop.f32.mrf.mxu3  ;;  %v2328_v8 = vpop.f32.mrf.mxu0 }
 0x1dc   : > { %v2396_v5 = vadd.f32 %v2395_v47, %v2372_v62  ;;  %v2351_v40 = vpop.f32.mrf.mxu1  ;;  %v9869_v8 = vld [vmem:[%s15209_s2 + $0x174] sm:$0xf] }
 0x1dd   : > { %v8214_v40 = vld [vmem:[%s15209_s2 + $0x170] sm:$0xf] }
 0x1de   : > { %v2408_v21 = vadd.f32 %v2396_v5, %v12473_v42  ;;  %v8216_v5 = vld [vmem:[%s15209_s2 + $0x178] sm:$0xf0] }
 0x1e2   : > { %v2374_v11 = vpop.f32.mrf.mxu2 }
 0x1e3   : > { %v2397_v49 = vpop.f32.mrf.mxu3  ;;  %v2668_v18 = vpop.f32.mrf.mxu0  ;;  %v9870_v11 = vld [vmem:[%s15209_s2 + $0x174] sm:$0xf0] }
 0x1e4   : > { %v2691_v52 = vpop.f32.mrf.mxu1  ;;  %v8215_v49 = vor.u32 %v9870_v11, %v8214_v40  ;;  %v9884_v11 = vld [vmem:[%s15209_s2 + $0x1e4] sm:$0xf0] }
 0x1e5   : > { %v2692_v31 = vadd.f32 %v2691_v52, %v2668_v18  ;;  %v9867_v18 = vld [vmem:[%s15209_s2 + $0x164] sm:$0xf]  ;;  %v8208_v52 = vld [vmem:[%s15209_s2 + $0x168] sm:$0xf0] }
 0x1e6   : > { %3354 = vmatmul.bf16.gmra.mxu0 %v3159_v20 }
 0x1e7   : > { %v12516_v22 = vadd.f32 %v2692_v31, %v12477_v7  ;;  %3377 = vmatmul.bf16.gmra.mxu1 %v3168_v50  ;;  %3400 = vmatmul.bf16.gmra.mxu2 %v3159_v20 }
 0x1e8   : > { %3423 = vmatmul.bf16.gmra.mxu3 %v3168_v50  ;;  %3773 = vmatpush.bf16.msrb.mxu0 %v8215_v49 }
 0x1ea   : > { %v2714_v9 = vpop.f32.mrf.mxu2 }
 0x1eb   : > { %v2737_v13 = vpop.f32.mrf.mxu3  ;;  %v12518_v1 = vpop.f32.mrf.mxu0 }
 0x1ec   : > { %v2738_v46 = vadd.f32 %v2737_v13, %v2714_v9  ;;  %v12520_v29 = vpop.f32.mrf.mxu1  ;;  %v8211_v9 = vor.u32 %v9867_v18, %v8208_v52  ;;  %v8206_v13 = vld [vmem:[%s15209_s2 + $0x160] sm:$0xf]  ;;  %v9863_v18 = vld [vmem:[%s15209_s2 + $0x144] sm:$0xf]  ;;  %v8192_v52 = vld [vmem:[%s15209_s2 + $0x148] sm:$0xf0] }
 0x1ee   : > { %v12523_v42 = vadd.f32 %v2738_v46, %v12491_v44  ;;  %v9868_v46 = vld [vmem:[%s15209_s2 + $0x164] sm:$0xf0] }
 0x1f2   : > { %v12525_v2 = vpop.f32.mrf.mxu2 }
 0x1f3   : > { %v12527_v41 = vpop.f32.mrf.mxu3  ;;  %v2673_v24 = vpop.f32.mrf.mxu0 }
 0x1f4   : > { %v2696_v7 = vpop.f32.mrf.mxu1 }
 0x1f5   : > { %v2697_v34 = vadd.f32 %v2696_v7, %v2673_v24 }
 0x1f7   : > { %v12529_v56 = vadd.f32 %v2697_v34, %v2403_v51  ;;  %v9885_v34 = vld [vmem:[%s15209_s2 + $0x1f4] sm:$0xf] }
 0x1fa   : > { %v2719_v36 = vpop.f32.mrf.mxu2 }
 0x1fb   : > { %v2742_v17 = vpop.f32.mrf.mxu3  ;;  %v12531_v6 = vpop.f32.mrf.mxu0 }
 0x1fc   : > { %v2743_v25 = vadd.f32 %v2742_v17, %v2719_v36  ;;  %v12533_v57 = vpop.f32.mrf.mxu1  ;;  %v8280_v36 = vld [vmem:[%s15209_s2 + $0x1f8] sm:$0xf0]  ;;  %v8278_v17 = vld [vmem:[%s15209_s2 + $0x1f0] sm:$0xf] }
 0x1fe   : > { %v12535_v27 = vadd.f32 %v2743_v25, %v2404_v60  ;;  %v8207_v25 = vor.u32 %v9868_v46, %v8206_v13  ;;  %v8195_v13 = vor.u32 %v9863_v18, %v8192_v52  ;;  %v8190_v46 = vld [vmem:[%s15209_s2 + $0x140] sm:$0xf] }
 0x1ff   : > { %v8254_v52 = vld [vmem:[%s15209_s2 + $0x1c0] sm:$0xf] }
 0x200   : > { %3774 = vmatpush.bf16.msrb.mxu0 %v8207_v25  ;;  %v9881_v25 = vld [vmem:[%s15209_s2 + $0x1d4] sm:$0xf] }
 0x202   : > { %v12537_v44 = vpop.f32.mrf.mxu2 }
 0x203   : > { %v12539_v55 = vpop.f32.mrf.mxu3  ;;  %v2678_v59 = vpop.f32.mrf.mxu0 }
 0x204   : > { %v2701_v53 = vpop.f32.mrf.mxu1 }
 0x205   : > { %v2702_v58 = vadd.f32 %v2701_v53, %v2678_v59  ;;  %v8283_v53 = vor.u32 %v9885_v34, %v8280_v36  ;;  %v9864_v34 = vld [vmem:[%s15209_s2 + $0x144] sm:$0xf0] }
 0x207   : > { %v12541_v37 = vadd.f32 %v2702_v58, %v2407_v63  ;;  %v9886_v58 = vld [vmem:[%s15209_s2 + $0x1f4] sm:$0xf0]  ;;  %3842 = vmatpush.bf16.msrb.mxu3 %v8283_v53  ;;  %v8264_v53 = vld [vmem:[%s15209_s2 + $0x1d8] sm:$0xf0] }
 0x20a   : > { %v2724_v51 = vpop.f32.mrf.mxu2 }
 0x20b   : > { %v2747_v43 = vpop.f32.mrf.mxu3  ;;  %v2680_v61 = vpop.f32.mrf.mxu0 }
 0x20c   : > { %v2748_v32 = vadd.f32 %v2747_v43, %v2724_v51  ;;  %v2703_v26 = vpop.f32.mrf.mxu1  ;;  %v8279_v51 = vor.u32 %v9886_v58, %v8278_v17  ;;  %v9865_v43 = vld [vmem:[%s15209_s2 + $0x154] sm:$0xf]  ;;  %v8200_v61 = vld [vmem:[%s15209_s2 + $0x158] sm:$0xf0]  ;;  %v8262_v58 = vld [vmem:[%s15209_s2 + $0x1d0] sm:$0xf] }
 0x20d   : > { %v8203_v26 = vor.u32 %v9865_v43, %v8200_v61  ;;  %v8267_v61 = vor.u32 %v9881_v25, %v8264_v53  ;;  %v8176_v25 = vld [vmem:[%s15209_s2 + $0x128] sm:$0xf0] }
 0x20e   : > { %v12543_v23 = vadd.f32 %v2748_v32, %v2408_v21  ;;  %v8219_v21 = vor.u32 %v9869_v8, %v8216_v5  ;;  %v8198_v32 = vld [vmem:[%s15209_s2 + $0x150] sm:$0xf]  ;;  %3796 = vmatpush.bf16.msrb.mxu1 %v8279_v51  ;;  %v8272_v8 = vld [vmem:[%s15209_s2 + $0x1e8] sm:$0xf0]  ;;  %v8270_v5 = vld [vmem:[%s15209_s2 + $0x1e0] sm:$0xf]  ;;  %v8191_v51 = vor.u32 %v9864_v34, %v8190_v46 }
 0x20f   : > { %v8271_v49 = vor.u32 %v9884_v11, %v8270_v5  ;;  %v8256_v11 = vld [vmem:[%s15209_s2 + $0x1c8] sm:$0xf0]  ;;  %v9859_v34 = vld [vmem:[%s15209_s2 + $0x124] sm:$0xf] }
 0x210   : > { %3819 = vmatpush.bf16.msrb.mxu2 %v8219_v21 }
 0x212   : > { %v2726_v28 = vpop.f32.mrf.mxu2  ;;  %3797 = vmatpush.bf16.msrb.mxu1 %v8271_v49 }
 0x213   : > { %v2749_v20 = vpop.f32.mrf.mxu3  ;;  %v12545_v60 = vpop.f32.mrf.mxu0  ;;  %v9866_v28 = vld [vmem:[%s15209_s2 + $0x154] sm:$0xf0] }
 0x214   : > { %v12547_v50 = vpop.f32.mrf.mxu1  ;;  %3820 = vmatpush.bf16.msrb.mxu2 %v8211_v9  ;;  %v9883_v20 = vld [vmem:[%s15209_s2 + $0x1e4] sm:$0xf]  ;;  %v8199_v40 = vor.u32 %v9866_v28, %v8198_v32  ;;  %v9882_v32 = vld [vmem:[%s15209_s2 + $0x1d4] sm:$0xf0]  ;;  %v9861_v28 = vld [vmem:[%s15209_s2 + $0x134] sm:$0xf] }
 0x215   : > { %v8275_v21 = vor.u32 %v9883_v20, %v8272_v8  ;;  %v8184_v20 = vld [vmem:[%s15209_s2 + $0x138] sm:$0xf0]  ;;  %v8182_v8 = vld [vmem:[%s15209_s2 + $0x130] sm:$0xf] }
 0x216   : > { %3775 = vmatpush.bf16.msrb.mxu0 %v8199_v40  ;;  %v8187_v5 = vor.u32 %v9861_v28, %v8184_v20  ;;  %v9862_v40 = vld [vmem:[%s15209_s2 + $0x134] sm:$0xf0]  ;;  %v9877_v28 = vld [vmem:[%s15209_s2 + $0x1b4] sm:$0xf]  ;;  %v8248_v20 = vld [vmem:[%s15209_s2 + $0x1b8] sm:$0xf0] }
 0x217   : > { %3843 = vmatpush.bf16.msrb.mxu3 %v8275_v21  ;;  %v9879_v21 = vld [vmem:[%s15209_s2 + $0x1c4] sm:$0xf]  ;;  %v8183_v49 = vor.u32 %v9862_v40, %v8182_v8  ;;  %v8246_v8 = vld [vmem:[%s15209_s2 + $0x1b0] sm:$0xf] }
 0x218   : > { %3821 = vmatpush.bf16.msrb.mxu2 %v8203_v26  ;;  %v8263_v26 = vor.u32 %v9882_v32, %v8262_v58  ;;  %v8259_v18 = vor.u32 %v9879_v21, %v8256_v11  ;;  %v8179_v58 = vor.u32 %v9859_v34, %v8176_v25  ;;  %v8251_v21 = vor.u32 %v9877_v28, %v8248_v20  ;;  %v9878_v11 = vld [vmem:[%s15209_s2 + $0x1b4] sm:$0xf0]  ;;  %v8168_v34 = vld [vmem:[%s15209_s2 + $0x118] sm:$0xf0]  ;;  %v9875_v25 = vld [vmem:[%s15209_s2 + $0x1a4] sm:$0xf] }
 0x219   : > { %v9876_v28 = vld [vmem:[%s15209_s2 + $0x1a4] sm:$0xf0]  ;;  %v3018_v20 = vadd.f32 %v12547_v50, %v12545_v60  ;;  %v9855_v60 = vld [vmem:[%s15209_s2 + $0x104] sm:$0xf]  ;;  %v8160_v50 = vld [vmem:[%s15209_s2 + $0x108] sm:$0xf0] }
 0x21a   : > { %v12549_v0 = vpop.f32.mrf.mxu2  ;;  %3776 = vmatpush.bf16.msrb.mxu0 %v8191_v51  ;;  %3798 = vmatpush.bf16.msrb.mxu1 %v8263_v26  ;;  %v8174_v51 = vld [vmem:[%s15209_s2 + $0x120] sm:$0xf] }
 0x21b   : > { %v12551_v4 = vpop.f32.mrf.mxu3  ;;  %v12553_v39 = vpop.f32.mrf.mxu0  ;;  %3844 = vmatpush.bf16.msrb.mxu3 %v8267_v61  ;;  %v9860_v61 = vld [vmem:[%s15209_s2 + $0x124] sm:$0xf0] }
 0x21c   : > { %v12555_v30 = vpop.f32.mrf.mxu1  ;;  %3822 = vmatpush.bf16.msrb.mxu2 %v8195_v13  ;;  %v9880_v13 = vld [vmem:[%s15209_s2 + $0x1c4] sm:$0xf0] }
 0x21d   : > { %v8255_v46 = vor.u32 %v9880_v13, %v8254_v52  ;;  %v9858_v52 = vld [vmem:[%s15209_s2 + $0x114] sm:$0xf0]  ;;  %v9857_v13 = vld [vmem:[%s15209_s2 + $0x114] sm:$0xf] }
 0x21e   : > { %3777 = vmatpush.bf16.msrb.mxu0 %v8183_v49  ;;  %v8247_v49 = vor.u32 %v9878_v11, %v8246_v8  ;;  %v3438_v11 = vld [vmem:[%s15210_s3] sm:$0x3] }
 0x21f   : > { %3845 = vmatpush.bf16.msrb.mxu3 %v8259_v18  ;;  %3799 = vmatpush.bf16.msrb.mxu1 %v8255_v46  ;;  %v8166_v18 = vld [vmem:[%s15209_s2 + $0x110] sm:$0xf] }
 0x220   : > { %3823 = vmatpush.bf16.msrb.mxu2 %v8187_v5  ;;  %v8175_v5 = vor.u32 %v9860_v61, %v8174_v51  ;;  %v8167_v46 = vor.u32 %v9858_v52, %v8166_v18  ;;  %v8171_v51 = vor.u32 %v9857_v13, %v8168_v34  ;;  %v9873_v13 = vld [vmem:[%s15209_s2 + $0x194] sm:$0xf]  ;;  %v8163_v34 = vor.u32 %v9855_v60, %v8160_v50 }
 0x221   : > { %v3064_v60 = vadd.f32 %v12551_v4, %v12549_v0  ;;  %v2740_v0 = vadd.f32 %v12527_v41, %v12525_v2  ;;  %v3020_v4 = vadd.f32 %v12555_v30, %v12553_v39 }
 0x222   : > { %v12557_v48 = vpop.f32.mrf.mxu2  ;;  %3778 = vmatpush.bf16.msrb.mxu0 %v8175_v5  ;;  %v8158_v5 = vld [vmem:[%s15209_s2 + $0x100] sm:$0xf] }
 0x223   : > { %v12559_v63 = vpop.f32.mrf.mxu3  ;;  %v12561_v62 = vpop.f32.mrf.mxu0  ;;  %3846 = vmatpush.bf16.msrb.mxu3 %v8251_v21  ;;  %3800 = vmatpush.bf16.msrb.mxu1 %v8247_v49  ;;  %v3078_v2 = vadd.f32 %v3064_v60, %v12523_v42  ;;  %v12826_v42 = vperm.slane %v3438_v11, 1 }
 0x224   : > { %v12563_v47 = vpop.f32.mrf.mxu1  ;;  %3824 = vmatpush.bf16.msrb.mxu2 %v8179_v58  ;;  %v8240_v58 = vld [vmem:[%s15209_s2 + $0x1a8] sm:$0xf0]  ;;  %v3066_v41 = vadd.f32 %v12559_v63, %v12557_v48 }
 0x225   : > { %v8243_v61 = vor.u32 %v9875_v25, %v8240_v58  ;;  %v8230_v25 = vld [vmem:[%s15209_s2 + $0x190] sm:$0xf]  ;;  %v2342_v58 = vadd.f32 %v12487_v3, %v12483_v35  ;;  %v2347_v3 = vadd.f32 %v12504_v54, %v12502_v10  ;;  %v8224_v10 = vld [vmem:[%s15209_s2 + $0x188] sm:$0xf0] }
 0x226   : > { %3779 = vmatpush.bf16.msrb.mxu0 %v8167_v46  ;;  %v8232_v46 = vld [vmem:[%s15209_s2 + $0x198] sm:$0xf0] }
 0x227   : > { %3847 = vmatpush.bf16.msrb.mxu3 %v8243_v61  ;;  %v2401_v54 = vadd.f32 %v2342_v58, %v12329_v14 }
 0x228   : > { %3825 = vmatpush.bf16.msrb.mxu2 %v8171_v51  ;;  %v2388_v51 = vadd.f32 %v12495_v38, %v12493_v33  ;;  %v2393_v33 = vadd.f32 %v12509_v15, %v12507_v19  ;;  %v2694_v38 = vadd.f32 %v12520_v29, %v12518_v1  ;;  %v8222_v1 = vld [vmem:[%s15209_s2 + $0x180] sm:$0xf]  ;;  %v9872_v29 = vld [vmem:[%s15209_s2 + $0x184] sm:$0xf0] }
 0x229   : > { %v8223_v14 = vor.u32 %v9872_v29, %v8222_v1 }
 0x22a   : > { %v12583_v31 = vpop.f32.mrf.mxu2  ;;  %v2402_v19 = vadd.f32 %v2388_v51, %v12353_v12  ;;  %v2405_v12 = vadd.f32 %v2347_v3, %v12417_v45 }
 0x22b   : > { %v12591_v24 = vpop.f32.mrf.mxu3  ;;  %v12593_v7 = vpop.f32.mrf.mxu0 }
 0x22c   : > { %v12604_v59 = vpop.f32.mrf.mxu1  ;;  %3826 = vmatpush.bf16.msrb.mxu2 %v8163_v34  ;;  %v2745_v34 = vadd.f32 %v12539_v55, %v12537_v44  ;;  %v2754_v48 = vadd.f32 %v2740_v0, %v2402_v19  ;;  %v358_v0 = vld [vmem:[%s15214_s7 + $0x10] sm:$0xff] }
 0x22e   : > { %v3080_v3 = vadd.f32 %v3066_v41, %v2754_v48  ;;  %v8344_v48 = vld [vmem:[%s15209_s2 + $0x78] sm:$0xf0] }
 0x232   : > { %v12639_v9 = vpop.f32.mrf.mxu2 }
 0x233   : > { %v12647_v36 = vpop.f32.mrf.mxu3  ;;  %v12649_v17 = vpop.f32.mrf.mxu0 }
 0x234   : > { %v12660_v43 = vpop.f32.mrf.mxu1 }
 0x23a   : > { %v12695_v53 = vpop.f32.mrf.mxu2 }
 0x23b   : > { %v12703_v32 = vpop.f32.mrf.mxu3  ;;  %v3006_v26 = vpop.f32.mrf.mxu0 }
 0x23c   : > { %v3029_v40 = vpop.f32.mrf.mxu1  ;;  %v8238_v26 = vld [vmem:[%s15209_s2 + $0x1a0] sm:$0xf] }
 0x23d   : > { %v8239_v8 = vor.u32 %v9876_v28, %v8238_v26  ;;  %v9856_v40 = vld [vmem:[%s15209_s2 + $0x104] sm:$0xf0]  ;;  %v3454_v26 = vld [vmem:[%s15211_s4] sm:$0x3]  ;;  %v8235_v28 = vor.u32 %v9873_v13, %v8232_v46  ;;  %v2699_v13 = vadd.f32 %v12533_v57, %v12531_v6  ;;  %v3069_v6 = vadd.f32 %v12591_v24, %v12583_v31  ;;  %v3500_v31 = vld [vmem:[#allocation2 + $0x30] sm:$0xfe] }
 0x23e   : > { %v8159_v49 = vor.u32 %v9856_v40, %v8158_v5  ;;  %v3077_v5 = vadd.f32 %v3018_v20, %v12516_v22  ;;  %v12788_v20 = vperm.slane %v3454_v26, 0  ;;  %v356_v57 = vld [vmem:[%s15214_s7] sm:$0xff]  ;;  %v4169_v24 = vld [vmem:[#allocation2 + $0x30] sm:$0xf8] }
 0x23f   : > { %3801 = vmatpush.bf16.msrb.mxu1 %v8239_v8  ;;  %v9874_v8 = vld [vmem:[%s15209_s2 + $0x194] sm:$0xf0]  ;;  %3848 = vmatpush.bf16.msrb.mxu3 %v8235_v28  ;;  %v2757_v51 = vadd.f32 %v2699_v13, %v2405_v12 }
 0x240   : > { %3780 = vmatpush.bf16.msrb.mxu0 %v8159_v49  ;;  %v8231_v35 = vor.u32 %v9874_v8, %v8230_v25  ;;  %v9871_v49 = vld [vmem:[%s15209_s2 + $0x184] sm:$0xf]  ;;  %v3071_v8 = vadd.f32 %v12647_v36, %v12639_v9 }
 0x241   : > { %v8227_v15 = vor.u32 %v9871_v49, %v8224_v10  ;;  %v357_v10 = vld [vmem:[%s15214_s7 + $0x8] sm:$0xff] }
 0x242   : > { %v3052_v21 = vpop.f32.mrf.mxu2 }
 0x243   : > { %v3075_v18 = vpop.f32.mrf.mxu3  ;;  %v3345_v52 = vpop.f32.mrf.mxu0  ;;  %v12778_v21 = vperm.slane %v3438_v11, 0  ;;  %3802 = vmatpush.bf16.msrb.mxu1 %v8231_v35  ;;  %3849 = vmatpush.bf16.msrb.mxu3 %v8227_v15  ;;  %v4520_v35 = vld [vmem:[#allocation2 + $0x30] sm:$0x80] }
 0x244   : > { %v3368_v61 = vpop.f32.mrf.mxu1  ;;  %v2406_v18 = vadd.f32 %v2393_v33, %v12467_v16  ;;  %v3023_v16 = vadd.f32 %v12563_v47, %v12561_v62  ;;  %v12830_v47 = vperm.slane %v3454_v26, 1 }
 0x245   : > { %v3369_v40 = vadd.f32 %v3368_v61, %v3345_v52  ;;  %v2753_v52 = vadd.f32 %v2694_v38, %v2401_v54  ;;  %v3025_v61 = vadd.f32 %v12604_v59, %v12593_v7  ;;  %v12838_v38 = vadd.f32 %v3069_v6, %v12535_v27 }
 0x246   : > { %v2758_v28 = vadd.f32 %v2745_v34, %v2406_v18  ;;  %v3081_v33 = vadd.f32 %v3023_v16, %v12529_v56  ;;  %v3028_v59 = vadd.f32 %v12660_v43, %v12649_v17  ;;  %v3074_v43 = vadd.f32 %v12703_v32, %v12695_v53  ;;  %v12879_v16 = vld [vmem:[#allocation2] sm:$0xfc] }
 0x247   : > { %v3428_v22 = vadd.f32 %v3369_v40, %v3077_v5  ;;  %3803 = vmatpush.bf16.msrb.mxu1 %v8223_v14  ;;  %v3079_v63 = vadd.f32 %v3020_v4, %v2753_v52  ;;  %v3550_v40 = vld [vmem:[#allocation2 + $0x30] sm:$0xfc]  ;;  %v12849_v60 = vadd.f32 %v3025_v61, %v2757_v51  ;;  %v3501_v52 = vld [vmem:[#allocation2] sm:$0xfe] }
 0x248   : > { %v12856_v17 = vadd.f32 %v3071_v8, %v2758_v28  ;;  %v12869_v53 = vadd.f32 %v3028_v59, %v12541_v37  ;;  %v9853_v61 = vld [vmem:[%s15209_s2 + $0xf4] sm:$0xf]  ;;  %v360_v8 = vld [vmem:[%s15214_s7 + $0x20] sm:$0xff] }
 0x249   : > { %v3444_v50 = vmul.f32 %v12778_v21, %v3428_v22 }
 0x24a   : > { %v3391_v46 = vpop.f32.mrf.mxu2 }
 0x24b   : > { %v3460_v39 = vadd.f32 %v12788_v20, %v3444_v50  ;;  %v3414_v30 = vpop.f32.mrf.mxu3  ;;  %v3347_v45 = vpop.f32.mrf.mxu0 }
 0x24c   : > { %v3415_v44 = vadd.f32 %v3414_v30, %v3391_v46  ;;  %v3370_v55 = vpop.f32.mrf.mxu1 }
 0x24d   : > { %v3470_v25 = vmax.f32 %v3460_v39, 0.0  ;;  %v3371_v58 = vadd.f32 %v3370_v55, %v3347_v45  ;;  %v4170_v39 = vld [vmem:[#allocation2] sm:$0xf8]  ;;  %v9837_v55 = vld [vmem:[%s15209_s2 + $0x74] sm:$0xf] }
 0x24e   : > { %v3429_v62 = vadd.f32 %v3415_v44, %v3078_v2  ;;  %v8347_v51 = vor.u32 %v9837_v55, %v8344_v48 }
 0x24f   : > { %v12834_v11 = vmul.f32 %v3470_v25, %v356_v57  ;;  %v3430_v5 = vadd.f32 %v3371_v58, %v3079_v63  ;;  %v12884_v57 = vadd.f32 %v3074_v43, %v12543_v23  ;;  %v359_v23 = vld [vmem:[%s15214_s7 + $0x18] sm:$0xff]  ;;  %v9835_v43 = vld [vmem:[%s15209_s2 + $0x64] sm:$0xf] }
 0x250   : > { %v3445_v7 = vmul.f32 %v12826_v42, %v3429_v62  ;;  %v8408_v62 = vld [vmem:[%s15209_s2 + $0xf8] sm:$0xf0]  ;;  %4123 = vmatpush.bf16.msra.mxu2 %v8347_v51 }
 0x251   : > { %3490 = vst [vmem:[#allocation2 + $0x58] sm:$0xff] %v12834_v11  ;;  %v3446_v9 = vmul.f32 %v12778_v21, %v3430_v5  ;;  %v12846_v36 = vpack.c.bf16 %v12834_v11, %v3500_v31  ;;  %v4173_v26 = vpack.c.bf16 %v12834_v11, %v4169_v24  ;;  %v3554_v22 = vpack.c.bf16 %v12834_v11, %v3550_v40 }
 0x252   : > { %v3461_v56 = vadd.f32 %v12830_v47, %v3445_v7  ;;  %v3393_v27 = vpop.f32.mrf.mxu2  ;;  %v12854_v49 = vpack.c.bf16 %v12834_v11, %v4520_v35  ;;  %v8411_v40 = vor.u32 %v9853_v61, %v8408_v62  ;;  %v8342_v35 = vld [vmem:[%s15209_s2 + $0x70] sm:$0xf]  ;;  %v9849_v61 = vld [vmem:[%s15209_s2 + $0xd4] sm:$0xf]  ;;  %v8392_v62 = vld [vmem:[%s15209_s2 + $0xd8] sm:$0xf0] }
 0x253   : > { %v3462_v54 = vadd.f32 %v12788_v20, %v3446_v9  ;;  %v3416_v19 = vpop.f32.mrf.mxu3  ;;  %v3350_v15 = vpop.f32.mrf.mxu0  ;;  %v3868_v1 = vshll.u32 %v12846_v36, 16  ;;  %v4211_v14 = vshrl.u32 %v4173_v26, 16  ;;  %v4214_v12 = vshll.u32 %v4173_v26, 16 }
 0x254   : > { %v3471_v29 = vmax.f32 %v3461_v56, 0.0  ;;  %v3417_v4 = vadd.f32 %v3416_v19, %v3393_v27  ;;  %v3373_v50 = vpop.f32.mrf.mxu1  ;;  %v4562_v13 = vshrl.u32 %v12854_v49, 16  ;;  %v12874_v2 = vrot.slane %v3554_v22, 1  ;;  %v8406_v27 = vld [vmem:[%s15209_s2 + $0xf0] sm:$0xf]  ;;  %4146 = vmatpush.bf16.msra.mxu3 %v8411_v40 }
 0x255   : > { %v3472_v32 = vmax.f32 %v3462_v54, 0.0  ;;  %v3374_v18 = vadd.f32 %v3373_v50, %v3350_v15  ;;  %v3866_v41 = vshrl.u32 %v12846_v36, 16  ;;  %v3870_v37 = vrot.slane %v3868_v1, 1  ;;  %v9854_v22 = vld [vmem:[%s15209_s2 + $0xf4] sm:$0xf0] }
 0x256   : > { %v12872_v46 = vmul.f32 %v3471_v29, %v357_v10  ;;  %v3431_v34 = vadd.f32 %v3417_v4, %v3080_v3  ;;  %v12881_v6 = vrot.slane %v4211_v14, 1  ;;  %v12897_v25 = vrot.slane %v4214_v12, 2  ;;  %v9838_v3 = vld [vmem:[%s15209_s2 + $0x74] sm:$0xf0]  ;;  %v8336_v29 = vld [vmem:[%s15209_s2 + $0x68] sm:$0xf0] }
 0x257   : > { %v12877_v30 = vmul.f32 %v3472_v32, %v358_v0  ;;  %v3432_v45 = vadd.f32 %v3374_v18, %v3081_v33  ;;  %v12913_v24 = vrot.slane %v4562_v13, 3  ;;  %v4565_v7 = vshll.u32 %v12854_v49, 16  ;;  %v9851_v0 = vld [vmem:[%s15209_s2 + $0xe4] sm:$0xf]  ;;  %v8400_v12 = vld [vmem:[%s15209_s2 + $0xe8] sm:$0xf0] }
 0x258   : > { %3491 = vst [vmem:[#allocation2 + $0x18] sm:$0xff] %v12872_v46  ;;  %v3447_v44 = vmul.f32 %v12826_v42, %v3431_v34  ;;  %v12895_v63 = vpack.c.bf16 %v12872_v46, %v3501_v52  ;;  %v12911_v31 = vpack.c.bf16 %v12872_v46, %v4170_v39  ;;  %v3555_v26 = vpack.c.bf16 %v12872_v46, %v12879_v16  ;;  %v4521_v18 = vld [vmem:[#allocation2] sm:$0x80]  ;;  %v8334_v39 = vld [vmem:[%s15209_s2 + $0x60] sm:$0xf] }
 0x259   : > { %3492 = vst [vmem:[#allocation2 + $0x50] sm:$0xff] %v12877_v30  ;;  %v3448_v58 = vmul.f32 %v12778_v21, %v3432_v45  ;;  %v8343_v56 = vor.u32 %v9838_v3, %v8342_v35  ;;  %v12941_v10 = vpack.c.bf16 %v12877_v30, %v12834_v11  ;;  %v8407_v1 = vor.u32 %v9854_v22, %v8406_v27  ;;  %v9836_v45 = vld [vmem:[%s15209_s2 + $0x64] sm:$0xf0]  ;;  %v8398_v16 = vld [vmem:[%s15209_s2 + $0xe0] sm:$0xf] }
 0x25a   : > { %v3463_v28 = vadd.f32 %v12830_v47, %v3447_v44  ;;  %v3396_v5 = vpop.f32.mrf.mxu2  ;;  %v3878_v33 = vshrl.u32 %v12895_v63, 16  ;;  %v3880_v4 = vshll.u32 %v12895_v63, 16  ;;  %v8339_v11 = vor.u32 %v9835_v43, %v8336_v29  ;;  %v9852_v63 = vld [vmem:[%s15209_s2 + $0xe4] sm:$0xf0] }
 0x25b   : > { %v3464_v59 = vadd.f32 %v12788_v20, %v3448_v58  ;;  %v3419_v9 = vpop.f32.mrf.mxu3  ;;  %v3352_v36 = vpop.f32.mrf.mxu0  ;;  %4077 = vmatpush.bf16.msra.mxu0 %v8343_v56  ;;  %v4223_v32 = vshrl.u32 %v12911_v31, 16  ;;  %4100 = vmatpush.bf16.msra.mxu1 %v8407_v1  ;;  %v8403_v34 = vor.u32 %v9851_v0, %v8400_v12  ;;  %v12966_v44 = vor.u32 %v3870_v37, %v3866_v41  ;;  %v8328_v58 = vld [vmem:[%s15209_s2 + $0x58] sm:$0xf0]  ;;  %v9834_v12 = vld [vmem:[%s15209_s2 + $0x54] sm:$0xf0] }
 0x25c   : > { %v3473_v54 = vmax.f32 %v3463_v28, 0.0  ;;  %v3420_v19 = vadd.f32 %v3419_v9, %v3396_v5  ;;  %v3375_v15 = vpop.f32.mrf.mxu1  ;;  %4124 = vmatpush.bf16.msra.mxu2 %v8339_v11  ;;  %v8335_v48 = vor.u32 %v9836_v45, %v8334_v39  ;;  %v4217_v41 = vor.u32 %v12897_v25, %v12881_v6  ;;  %v8326_v11 = vld [vmem:[%s15209_s2 + $0x50] sm:$0xf]  ;;  %v365_v6 = vld [vmem:[%s15214_s7 + $0x48] sm:$0xff] }
 0x25d   : > { %v3474_v50 = vmax.f32 %v3464_v59, 0.0  ;;  %v3376_v14 = vadd.f32 %v3375_v15, %v3352_v36  ;;  %4147 = vmatpush.bf16.msra.mxu3 %v8403_v34  ;;  %v8399_v37 = vor.u32 %v9852_v63, %v8398_v16  ;;  %v3882_v28 = vrot.slane %v3880_v4, 1  ;;  %v362_v15 = vld [vmem:[%s15214_s7 + $0x30] sm:$0xff]  ;;  %v9831_v34 = vld [vmem:[%s15209_s2 + $0x44] sm:$0xf] }
 0x25e   : > { %v12954_v52 = vmul.f32 %v3473_v54, %v359_v23  ;;  %v3433_v13 = vadd.f32 %v3420_v19, %v12838_v38  ;;  %v9833_v23 = vld [vmem:[%s15209_s2 + $0x54] sm:$0xf]  ;;  %v12996_v40 = vrot.slane %v3555_v26, 1  ;;  %v8395_v35 = vor.u32 %v9849_v61, %v8392_v62  ;;  %v8320_v16 = vld [vmem:[%s15209_s2 + $0x48] sm:$0xf0] }
 0x25f   : > { %v12968_v55 = vmul.f32 %v3474_v50, %v360_v8  ;;  %v3434_v38 = vadd.f32 %v3376_v14, %v12849_v60  ;;  %v8331_v51 = vor.u32 %v9833_v23, %v8328_v58  ;;  %4078 = vmatpush.bf16.msra.mxu0 %v8335_v48  ;;  %4101 = vmatpush.bf16.msra.mxu1 %v8399_v37  ;;  %v13001_v36 = vrot.slane %v4223_v32, 1  ;;  %v8384_v48 = vld [vmem:[%s15209_s2 + $0xc8] sm:$0xf0]  ;;  %v9832_v37 = vld [vmem:[%s15209_s2 + $0x44] sm:$0xf0] }
 0x260   : > { %3493 = vst [vmem:[#allocation2 + $0x68] sm:$0xff] %v12954_v52  ;;  %v3449_v60 = vmul.f32 %v12826_v42, %v3433_v13  ;;  %v12999_v9 = vor.u32 %v3882_v28, %v3878_v33  ;;  %v13004_v56 = vpack.c.bf16 %v12872_v46, %v4521_v18  ;;  %v4226_v33 = vshll.u32 %v12911_v31, 16  ;;  %v9850_v13 = vld [vmem:[%s15209_s2 + $0xd4] sm:$0xf0] }
 0x261   : > { %3494 = vst [vmem:[#allocation2 + $0x8] sm:$0xff] %v12968_v55  ;;  %v3450_v8 = vmul.f32 %v12778_v21, %v3434_v38  ;;  %v12994_v5 = vpack.c.bf16 %v12968_v55, %v12877_v30  ;;  %v361_v30 = vld [vmem:[%s15214_s7 + $0x28] sm:$0xff]  ;;  %4125 = vmatpush.bf16.msra.mxu2 %v8331_v51  ;;  %4148 = vmatpush.bf16.msra.mxu3 %v8395_v35  ;;  %v13023_v4 = vrot.slane %v4565_v7, 4  ;;  %v9847_v38 = vld [vmem:[%s15209_s2 + $0xc4] sm:$0xf]  ;;  %v363_v51 = vld [vmem:[%s15214_s7 + $0x38] sm:$0xff] }
 0x262   : > { %v3465_v3 = vadd.f32 %v12830_v47, %v3449_v60  ;;  %v3398_v59 = vpop.f32.mrf.mxu2  ;;  %v8327_v18 = vor.u32 %v9834_v12, %v8326_v11  ;;  %v8323_v58 = vor.u32 %v9831_v34, %v8320_v16  ;;  %v8318_v60 = vld [vmem:[%s15209_s2 + $0x40] sm:$0xf]  ;;  %v8387_v62 = vor.u32 %v9847_v38, %v8384_v48  ;;  %v9848_v35 = vld [vmem:[%s15209_s2 + $0xc4] sm:$0xf0] }
 0x263   : > { %v3466_v26 = vadd.f32 %v12788_v20, %v3450_v8  ;;  %v3421_v27 = vpop.f32.mrf.mxu3  ;;  %v3355_v22 = vpop.f32.mrf.mxu0  ;;  %v3598_v43 = vrot.slane %v12994_v5, 1  ;;  %v13012_v54 = vshll.u32 %v12994_v5, 16  ;;  %v13019_v0 = vshrl.u32 %v12994_v5, 16  ;;  %v8382_v8 = vld [vmem:[%s15209_s2 + $0xc0] sm:$0xf] }
 0x264   : > { %v3475_v19 = vmax.f32 %v3465_v3, 0.0  ;;  %v3422_v1 = vadd.f32 %v3421_v27, %v3398_v59  ;;  %v3378_v29 = vpop.f32.mrf.mxu1  ;;  %4079 = vmatpush.bf16.msra.mxu0 %v8327_v18  ;;  %v8319_v28 = vor.u32 %v9832_v37, %v8318_v60  ;;  %v9829_v27 = vld [vmem:[%s15209_s2 + $0x34] sm:$0xf]  ;;  %v13112_v12 = vrot.slane %v4226_v33, 2  ;;  %v8310_v33 = vld [vmem:[%s15209_s2 + $0x30] sm:$0xf] }
 0x265   : > { %v3476_v50 = vmax.f32 %v3466_v26, 0.0  ;;  %v3379_v14 = vadd.f32 %v3378_v29, %v3355_v22  ;;  %v3599_v31 = vsel %vm463_vm0, %v12874_v2, %v3598_v43  ;;  %v3875_v32 = vrot.slane %v13012_v54, 1  ;;  %v8390_v2 = vld [vmem:[%s15209_s2 + $0xd0] sm:$0xf]  ;;  %4126 = vmatpush.bf16.msra.mxu2 %v8323_v58  ;;  %v8312_v22 = vld [vmem:[%s15209_s2 + $0x38] sm:$0xf0]  ;;  %4149 = vmatpush.bf16.msra.mxu3 %v8387_v62 }
 0x266   : > { %v13036_v49 = vmul.f32 %v3475_v19, %v361_v30  ;;  %v3435_v7 = vadd.f32 %v3422_v1, %v12856_v17  ;;  %3781 = vmatmul.bf16.vlgmr.msrb.gmra.mxu0 %v3599_v31  ;;  %3827 = vmatmul.bf16.vlgmr.msrb.gmra.mxu2 %v3599_v31  ;;  %v8391_v17 = vor.u32 %v9850_v13, %v8390_v2  ;;  %v4219_v3 = vrot.slane %v13012_v54, 2  ;;  %v8376_v31 = vld [vmem:[%s15209_s2 + $0xb8] sm:$0xf0]  ;;  %v8374_v60 = vld [vmem:[%s15209_s2 + $0xb0] sm:$0xf] }
 0x267   : > { %v13048_v39 = vmul.f32 %v3476_v50, %v362_v15  ;;  %v3436_v45 = vadd.f32 %v3379_v14, %v12869_v53  ;;  %v13064_v63 = vsel %vm732_vm1, %v12966_v44, %v3875_v32  ;;  %v4218_v44 = vrot.slane %v13019_v0, 1  ;;  %v9845_v14 = vld [vmem:[%s15209_s2 + $0xb4] sm:$0xf]  ;;  %v9846_v37 = vld [vmem:[%s15209_s2 + $0xb4] sm:$0xf0] }
 0x268   : > { %3495 = vst [vmem:[#allocation2 + $0x48] sm:$0xff] %v13036_v49  ;;  %v3451_v53 = vmul.f32 %v12826_v42, %v3435_v7  ;;  %v13070_v23 = vpack.c.bf16 %v13036_v49, %v12954_v52  ;;  %4102 = vmatpush.bf16.msra.mxu1 %v8391_v17  ;;  %v8315_v50 = vor.u32 %v9829_v27, %v8312_v22  ;;  %v9830_v17 = vld [vmem:[%s15209_s2 + $0x34] sm:$0xf0]  ;;  %v4569_v27 = vrot.slane %v13019_v0, 3  ;;  %v8350_v5 = vld [vmem:[%s15209_s2 + $0x80] sm:$0xf] }
 0x269   : > { %3496 = vst [vmem:[#allocation2 + $0x40] sm:$0xff] %v13048_v39  ;;  %v3452_v61 = vmul.f32 %v12778_v21, %v3436_v45  ;;  %v8383_v21 = vor.u32 %v9848_v35, %v8382_v8  ;;  %4080 = vmatpush.bf16.msra.mxu0 %v8319_v28  ;;  %v8379_v34 = vor.u32 %v9845_v14, %v8376_v31 }
 0x26a   : > { %v3467_v59 = vadd.f32 %v12830_v47, %v3451_v53  ;;  %v3401_v30 = vpop.f32.mrf.mxu2  ;;  %v3601_v26 = vrot.slane %v13070_v23, 1  ;;  %v13100_v19 = vshll.u32 %v13070_v23, 16  ;;  %v13110_v11 = vshrl.u32 %v13070_v23, 16  ;;  %4127 = vmatpush.bf16.msra.mxu2 %v8315_v50  ;;  %v9917_v23 = vld [vmem:[%s15209_s2 + $0x2f4] sm:$0xf] }
 0x26b   : > { %v3468_v15 = vadd.f32 %v12788_v20, %v3452_v61  ;;  %v3424_v1 = vpop.f32.mrf.mxu3  ;;  %v3357_v29 = vpop.f32.mrf.mxu0  ;;  %v364_v20 = vld [vmem:[%s15214_s7 + $0x40] sm:$0xff]  ;;  %v13128_v38 = vor.u32 %v4219_v3, %v4218_v44  ;;  %v8311_v58 = vor.u32 %v9830_v17, %v8310_v33  ;;  %4150 = vmatpush.bf16.msra.mxu3 %v8379_v34  ;;  %v8368_v61 = vld [vmem:[%s15209_s2 + $0xa8] sm:$0xf0]  ;;  %v4229_v28 = vor.u32 %v13112_v12, %v13001_v36 }
 0x26c   : > { %v3477_v7 = vmax.f32 %v3467_v59, 0.0  ;;  %v3425_v18 = vadd.f32 %v3424_v1, %v3401_v30  ;;  %v3380_v2 = vpop.f32.mrf.mxu1  ;;  %v3602_v13 = vsel %vm463_vm0, %v12996_v40, %v3601_v26  ;;  %v3887_v16 = vrot.slane %v13100_v19, 1  ;;  %4103 = vmatpush.bf16.msra.mxu1 %v8383_v21  ;;  %v9827_v44 = vld [vmem:[%s15209_s2 + $0x24] sm:$0xf]  ;;  %v8302_v59 = vld [vmem:[%s15209_s2 + $0x20] sm:$0xf] }
 0x26d   : > { %v3478_v45 = vmax.f32 %v3468_v15, 0.0  ;;  %3804 = vmatmul.bf16.vlgmr.msrb.gmra.mxu1 %v3602_v13  ;;  %3850 = vmatmul.bf16.vlgmr.msrb.gmra.mxu3 %v3602_v13  ;;  %v4568_v40 = vor.u32 %v13023_v4, %v12913_v24  ;;  %v8375_v4 = vor.u32 %v9846_v37, %v8374_v60  ;;  %v9828_v30 = vld [vmem:[%s15209_s2 + $0x24] sm:$0xf0]  ;;  %v4231_v36 = vrot.slane %v13100_v19, 2  ;;  %v9826_v2 = vld [vmem:[%s15209_s2 + $0x14] sm:$0xf0] }
 0x26e   : > { %v13132_v48 = vmul.f32 %v3477_v7, %v363_v51  ;;  %v3437_v53 = vadd.f32 %v3425_v18, %v12884_v57  ;;  %v8304_v57 = vld [vmem:[%s15209_s2 + $0x28] sm:$0xf0]  ;;  %v9843_v51 = vld [vmem:[%s15209_s2 + $0xa4] sm:$0xf]  ;;  %v13157_v62 = vsel %vm732_vm1, %v12999_v9, %v3887_v16  ;;  %4081 = vmatpush.bf16.msra.mxu0 %v8311_v58  ;;  %v4230_v9 = vrot.slane %v13110_v11, 1 }
 0x26f   : > { %v3488_v24 = vmul.f32 %v3478_v45, %v364_v20  ;;  %v8307_v35 = vor.u32 %v9827_v44, %v8304_v57  ;;  %v8371_v3 = vor.u32 %v9843_v51, %v8368_v61  ;;  %v8303_v21 = vor.u32 %v9828_v30, %v8302_v59  ;;  %v8294_v18 = vld [vmem:[%s15209_s2 + $0x10] sm:$0xf]  ;;  %v9825_v13 = vld [vmem:[%s15209_s2 + $0x14] sm:$0xf]  ;;  %v8366_v58 = vld [vmem:[%s15209_s2 + $0xa0] sm:$0xf] }
 0x270   : > { %3497 = vst [vmem:[#allocation2 + $0x20] sm:$0xff] %v13132_v48  ;;  %v3453_v8 = vmul.f32 %v12826_v42, %v3437_v53  ;;  %v13175_v42 = vsel %vm1078_vm2, %v4217_v41, %v13128_v38  ;;  %4104 = vmatpush.bf16.msra.mxu1 %v8375_v4  ;;  %v4570_v1 = vrot.slane %v13012_v54, 4  ;;  %v4574_v29 = vshrl.u32 %v13004_v56, 16  ;;  %v8296_v53 = vld [vmem:[%s15209_s2 + $0x18] sm:$0xf0] }
 0x271   : > { %3498 = vst [vmem:[#allocation2 + $0x10] sm:$0xff] %v3488_v24  ;;  %4128 = vmatpush.bf16.msra.mxu2 %v8307_v35  ;;  %v4577_v50 = vshll.u32 %v13004_v56, 16  ;;  %4151 = vmatpush.bf16.msra.mxu3 %v8371_v3  ;;  %v13186_v41 = vor.u32 %v4231_v36, %v4230_v9  ;;  %v4581_v14 = vrot.slane %v13110_v11, 3  ;;  %v13192_v31 = vpack.c.bf16 %v12954_v52, %v12872_v46  ;;  %v9844_v60 = vld [vmem:[%s15209_s2 + $0xa4] sm:$0xf0] }
 0x272   : > { %v3469_v22 = vadd.f32 %v12830_v47, %v3453_v8  ;;  %v3403_v15 = vpop.f32.mrf.mxu2  ;;  %v4582_v47 = vrot.slane %v13100_v19, 4  ;;  %4082 = vmatpush.bf16.msra.mxu0 %v8303_v21  ;;  %v13194_v7 = vor.u32 %v4570_v1, %v4569_v27  ;;  %v4576_v56 = vrot.slane %v4574_v29, 3  ;;  %v9841_v24 = vld [vmem:[%s15209_s2 + $0x94] sm:$0xf]  ;;  %v8360_v4 = vld [vmem:[%s15209_s2 + $0x98] sm:$0xf0] }
 0x273   : > { %v3426_v25 = vpop.f32.mrf.mxu3  ;;  %v4579_v20 = vrot.slane %v4577_v50, 4  ;;  %v13207_v46 = vsel %vm1078_vm2, %v4229_v28, %v13186_v41  ;;  %v13213_v34 = vpack.c.bf16 %v13048_v39, %v12968_v55  ;;  %v13217_v45 = vpack.c.bf16 %v13132_v48, %v13036_v49  ;;  %v8286_v57 = vld [vmem:[%s15209_s2] sm:$0xf]  ;;  %v9824_v61 = vld [vmem:[%s15209_s2 + $0x4] sm:$0xf0] }
 0x274   : > { %v3479_v12 = vmax.f32 %v3469_v22, 0.0  ;;  %v13209_v52 = vor.u32 %v4582_v47, %v4581_v14  ;;  %v8295_v17 = vor.u32 %v9826_v2, %v8294_v18  ;;  %v13230_v55 = vsel %vm1430_vm3, %v4568_v40, %v13194_v7  ;;  %v9823_v3 = vld [vmem:[%s15209_s2 + $0x4] sm:$0xf]  ;;  %v8288_v59 = vld [vmem:[%s15209_s2 + $0x8] sm:$0xf0] }
 0x275   : > { %v4580_v49 = vor.u32 %v4579_v20, %v4576_v56  ;;  %v8299_v37 = vor.u32 %v9825_v13, %v8296_v53  ;;  %v8367_v44 = vor.u32 %v9844_v60, %v8366_v58  ;;  %v8363_v40 = vor.u32 %v9841_v24, %v8360_v4  ;;  %v8358_v30 = vld [vmem:[%s15209_s2 + $0x90] sm:$0xf]  ;;  %v9842_v21 = vld [vmem:[%s15209_s2 + $0x94] sm:$0xf0]  ;;  %v9840_v20 = vld [vmem:[%s15209_s2 + $0x84] sm:$0xf0] }
 0x276   : > { %v3489_v33 = vmul.f32 %v3479_v12, %v365_v6  ;;  %4083 = vmatpush.bf16.msra.mxu0 %v8295_v17  ;;  %v8287_v35 = vor.u32 %v9824_v61, %v8286_v57  ;;  %v8291_v9 = vor.u32 %v9823_v3, %v8288_v59  ;;  %v8359_v15 = vor.u32 %v9842_v21, %v8358_v30  ;;  %v9839_v12 = vld [vmem:[%s15209_s2 + $0x84] sm:$0xf]  ;;  %v9901_v59 = vld [vmem:[%s15209_s2 + $0x274] sm:$0xf]  ;;  %v8504_v30 = vld [vmem:[%s15209_s2 + $0x278] sm:$0xf0] }
 0x277   : > { %v13246_v28 = vsel %vm1430_vm3, %v4580_v49, %v13209_v52  ;;  %4129 = vmatpush.bf16.msra.mxu2 %v8299_v37  ;;  %4105 = vmatpush.bf16.msra.mxu1 %v8367_v44  ;;  %v3891_v18 = vor.u32 %v13019_v0, %v3875_v32  ;;  %v8351_v17 = vor.u32 %v9840_v20, %v8350_v5  ;;  %v8502_v21 = vld [vmem:[%s15209_s2 + $0x270] sm:$0xf] }
 0x278   : > { %3499 = vst [vmem:[#allocation2 + $0x38] sm:$0xff] %v3489_v33  ;;  %v3552_v51 = vld [vmem:[#allocation2 + $0x10] sm:$0x3]  ;;  %4152 = vmatpush.bf16.msra.mxu3 %v8363_v40  ;;  %v3899_v5 = vor.u32 %v13110_v11, %v3887_v16 }
 0x279   : > { %v3556_v8 = vpack.c.bf16 %v3552_v51, %v13048_v39  ;;  %v3510_v36 = vld [vmem:[#allocation2 + $0x10] sm:$0x1] }
 0x27a   : > { %v4171_v27 = vld [vmem:[#allocation2 + $0x10] sm:$0x7]  ;;  %v13264_v1 = vpack.c.bf16 %v3510_v36, %v13048_v39  ;;  %4084 = vmatpush.bf16.msra.mxu0 %v8287_v35  ;;  %v9902_v36 = vld [vmem:[%s15209_s2 + $0x274] sm:$0xf0] }
 0x27b   : > { %v13261_v22 = vrot.slane %v3556_v8, 1  ;;  %v4175_v29 = vpack.c.bf16 %v4171_v27, %v13048_v39  ;;  %v4522_v50 = vld [vmem:[#allocation2 + $0x10] sm:$0x7f]  ;;  %4130 = vmatpush.bf16.msra.mxu2 %v8291_v9  ;;  %4106 = vmatpush.bf16.msra.mxu1 %v8359_v15  ;;  %v8507_v9 = vor.u32 %v9901_v59, %v8504_v30  ;;  %v9898_v30 = vld [vmem:[%s15209_s2 + $0x254] sm:$0xf0] }
 0x27c   : > { %v4526_v6 = vpack.c.bf16 %v4522_v50, %v13048_v39  ;;  %v3893_v14 = vshll.u32 %v13264_v1, 16  ;;  %v8352_v39 = vld [vmem:[%s15209_s2 + $0x88] sm:$0xf0]  ;;  %v8486_v59 = vld [vmem:[%s15209_s2 + $0x250] sm:$0xf] }
 0x27d   : > { %v3604_v25 = vsel %vm463_vm0, %v3598_v43, %v13261_v22  ;;  %v4235_v47 = vshrl.u32 %v4175_v29, 16  ;;  %v8355_v56 = vor.u32 %v9839_v12, %v8352_v39  ;;  %v4238_v58 = vshll.u32 %v4175_v29, 16  ;;  %v9915_v12 = vld [vmem:[%s15209_s2 + $0x2e4] sm:$0xf]  ;;  %v8560_v39 = vld [vmem:[%s15209_s2 + $0x2e8] sm:$0xf0] }
 0x27e   : > { %3786 = vmatmul.bf16.gmra.mxu0 %v3604_v25  ;;  %3832 = vmatmul.bf16.gmra.mxu2 %v3604_v25  ;;  %v13288_v2 = vrot.slane %v3893_v14, 1  ;;  %v4586_v49 = vshrl.u32 %v4526_v6, 16  ;;  %v4589_v4 = vshll.u32 %v4526_v6, 16  ;;  %v8503_v6 = vor.u32 %v9902_v36, %v8502_v21  ;;  %v8566_v25 = vld [vmem:[%s15209_s2 + $0x2f0] sm:$0xf] }
 0x27f   : > { %v3553_v43 = vld [vmem:[#allocation2 + $0x38] sm:$0x3]  ;;  %v4237_v13 = vrot.slane %v4235_v47, 1  ;;  %4153 = vmatpush.bf16.msra.mxu3 %v8355_v56  ;;  %4107 = vmatpush.bf16.msra.mxu1 %v8351_v17  ;;  %v4240_v32 = vrot.slane %v4238_v58, 2  ;;  %v9899_v47 = vld [vmem:[%s15209_s2 + $0x264] sm:$0xf]  ;;  %v8563_v20 = vor.u32 %v9915_v12, %v8560_v39 }
 0x280   : > { %v3557_v33 = vpack.c.bf16 %v3553_v43, %v13132_v48  ;;  %v3511_v53 = vld [vmem:[#allocation2 + $0x38] sm:$0x1]  ;;  %v13293_v37 = vsel %vm732_vm1, %v3891_v18, %v13288_v2  ;;  %v4588_v24 = vrot.slane %v4586_v49, 3  ;;  %v4591_v3 = vrot.slane %v4589_v4, 4  ;;  %4464 = vmatpush.bf16.msrb.mxu2 %v8507_v9  ;;  %4418 = vmatpush.bf16.msrb.mxu0 %v8503_v6  ;;  %v8494_v58 = vld [vmem:[%s15209_s2 + $0x260] sm:$0xf] }
 0x281   : > { %v4172_v60 = vld [vmem:[#allocation2 + $0x38] sm:$0x7]  ;;  %v13296_v44 = vpack.c.bf16 %v3511_v53, %v13132_v48  ;;  %v13306_v8 = vor.u32 %v4240_v32, %v4237_v13  ;;  %v8558_v49 = vld [vmem:[%s15209_s2 + $0x2e0] sm:$0xf]  ;;  %v9897_v4 = vld [vmem:[%s15209_s2 + $0x254] sm:$0xf] }
 0x282   : > { %v4176_v54 = vpack.c.bf16 %v4172_v60, %v13132_v48  ;;  %v13299_v0 = vrot.slane %v3557_v33, 1  ;;  %v4523_v40 = vld [vmem:[#allocation2 + $0x38] sm:$0x7f]  ;;  %v13331_v15 = vor.u32 %v4591_v3, %v4588_v24  ;;  %v9900_v60 = vld [vmem:[%s15209_s2 + $0x264] sm:$0xf0] }
 0x283   : > { %v3901_v57 = vshll.u32 %v13296_v44, 16  ;;  %v13329_v27 = vsel %vm1078_vm2, %v13128_v38, %v13306_v8  ;;  %v4527_v29 = vpack.c.bf16 %v4523_v40, %v13132_v48  ;;  %v9918_v14 = vld [vmem:[%s15209_s2 + $0x2f4] sm:$0xf0]  ;;  %v8496_v48 = vld [vmem:[%s15209_s2 + $0x268] sm:$0xf0] }
 0x284   : > { %v4244_v51 = vshrl.u32 %v4176_v54, 16  ;;  %v3606_v61 = vsel %vm463_vm0, %v3601_v26, %v13299_v0  ;;  %v4247_v35 = vshll.u32 %v4176_v54, 16  ;;  %v8568_v26 = vld [vmem:[%s15209_s2 + $0x2f8] sm:$0xf0]  ;;  %v8567_v38 = vor.u32 %v9918_v14, %v8566_v25  ;;  %v9916_v24 = vld [vmem:[%s15209_s2 + $0x2e4] sm:$0xf0] }
 0x285   : > { %3809 = vmatmul.bf16.gmra.mxu1 %v3606_v61  ;;  %3855 = vmatmul.bf16.gmra.mxu3 %v3606_v61  ;;  %v8571_v50 = vor.u32 %v9917_v23, %v8568_v26  ;;  %v13358_v43 = vsel %vm1430_vm3, %v13194_v7, %v13331_v15  ;;  %v8499_v56 = vor.u32 %v9899_v47, %v8496_v48  ;;  %v13360_v18 = vrot.slane %v3901_v57, 1  ;;  %v8488_v57 = vld [vmem:[%s15209_s2 + $0x258] sm:$0xf0]  ;;  %v9914_v9 = vld [vmem:[%s15209_s2 + $0x2d4] sm:$0xf0] }
 0x286   : > { %v4246_v13 = vrot.slane %v4244_v51, 1  ;;  %4441 = vmatpush.bf16.msrb.mxu1 %v8567_v38  ;;  %v4249_v33 = vrot.slane %v4247_v35, 2  ;;  %v4595_v17 = vshrl.u32 %v4527_v29, 16  ;;  %v4598_v53 = vshll.u32 %v4527_v29, 16  ;;  %v8552_v61 = vld [vmem:[%s15209_s2 + $0x2d8] sm:$0xf0] }
 0x287   : > { %4487 = vmatpush.bf16.msrb.mxu3 %v8571_v50  ;;  %v13364_v19 = vsel %vm732_vm1, %v3899_v5, %v13360_v18  ;;  %4465 = vmatpush.bf16.msrb.mxu2 %v8499_v56  ;;  %v8559_v51 = vor.u32 %v9916_v24, %v8558_v49  ;;  %v8491_v40 = vor.u32 %v9897_v4, %v8488_v57  ;;  %v8480_v26 = vld [vmem:[%s15209_s2 + $0x248] sm:$0xf0]  ;;  %v9911_v29 = vld [vmem:[%s15209_s2 + $0x2c4] sm:$0xf]  ;;  %v8478_v6 = vld [vmem:[%s15209_s2 + $0x240] sm:$0xf] }
 0x288   : > { %v13366_v11 = vor.u32 %v4249_v33, %v4246_v13  ;;  %v4597_v16 = vrot.slane %v4595_v17, 3  ;;  %v4600_v7 = vrot.slane %v4598_v53, 4  ;;  %v8487_v23 = vor.u32 %v9898_v30, %v8486_v59  ;;  %v8544_v50 = vld [vmem:[%s15209_s2 + $0x2c8] sm:$0xf0]  ;;  %v9896_v14 = vld [vmem:[%s15209_s2 + $0x244] sm:$0xf0] }
 0x289   : > { %v8547_v25 = vor.u32 %v9911_v29, %v8544_v50  ;;  %v8542_v47 = vld [vmem:[%s15209_s2 + $0x2c0] sm:$0xf]  ;;  %v9912_v38 = vld [vmem:[%s15209_s2 + $0x2c4] sm:$0xf0]  ;;  %v8479_v48 = vor.u32 %v9896_v14, %v8478_v6  ;;  %v9893_v39 = vld [vmem:[%s15209_s2 + $0x234] sm:$0xf] }
 0x28a   : > { %v13382_v54 = vsel %vm1078_vm2, %v13186_v41, %v13366_v11  ;;  %v13384_v32 = vor.u32 %v4600_v7, %v4597_v16  ;;  %v9913_v41 = vld [vmem:[%s15209_s2 + $0x2d4] sm:$0xf]  ;;  %4442 = vmatpush.bf16.msrb.mxu1 %v8559_v51  ;;  %v8543_v12 = vor.u32 %v9912_v38, %v8542_v47  ;;  %v8472_v5 = vld [vmem:[%s15209_s2 + $0x238] sm:$0xf0]  ;;  %v5178_v17 = vld [vmem:[#allocation2 + $0x8] sm:$0xff] }
 0x28b   : > { %4488 = vmatpush.bf16.msrb.mxu3 %v8563_v20  ;;  %v8555_v3 = vor.u32 %v9913_v41, %v8552_v61  ;;  %4466 = vmatpush.bf16.msrb.mxu2 %v8491_v40  ;;  %v9909_v56 = vld [vmem:[%s15209_s2 + $0x2b4] sm:$0xf]  ;;  %v8475_v20 = vor.u32 %v9893_v39, %v8472_v5  ;;  %v8536_v13 = vld [vmem:[%s15209_s2 + $0x2b8] sm:$0xf0]  ;;  %v5180_v53 = vld [vmem:[#allocation2 + $0x40] sm:$0xff] }
 0x28c   : > { %v13404_v35 = vsel %vm1430_vm3, %v13209_v52, %v13384_v32  ;;  %v8550_v52 = vld [vmem:[%s15209_s2 + $0x2d0] sm:$0xf]  ;;  %v8539_v33 = vor.u32 %v9909_v56, %v8536_v13  ;;  %v5179_v16 = vld [vmem:[#allocation2 + $0x48] sm:$0xff]  ;;  %v5181_v7 = vld [vmem:[#allocation2 + $0x20] sm:$0xff] }
 0x28d   : > { %v8551_v21 = vor.u32 %v9914_v9, %v8550_v52  ;;  %v8534_v49 = vld [vmem:[%s15209_s2 + $0x2b0] sm:$0xf]  ;;  %v9910_v24 = vld [vmem:[%s15209_s2 + $0x2b4] sm:$0xf0]  ;;  %v8464_v4 = vld [vmem:[%s15209_s2 + $0x228] sm:$0xf0]  ;;  %v13487_v59 = vpack.c.bf16 %v5181_v7, %v5179_v16 }
 0x28e   : > { %3791 = vmatmul.bf16.gmra.mxu0 %v13261_v22  ;;  %3837 = vmatmul.bf16.gmra.mxu2 %v13261_v22  ;;  %v8495_v22 = vor.u32 %v9900_v60, %v8494_v58  ;;  %v8470_v58 = vld [vmem:[%s15209_s2 + $0x230] sm:$0xf]  ;;  %v9894_v60 = vld [vmem:[%s15209_s2 + $0x234] sm:$0xf0]  ;;  %v8535_v57 = vor.u32 %v9910_v24, %v8534_v49  ;;  %v9907_v40 = vld [vmem:[%s15209_s2 + $0x2a4] sm:$0xf] }
 0x28f   : > { %4489 = vmatpush.bf16.msrb.mxu3 %v8555_v3  ;;  %4443 = vmatpush.bf16.msrb.mxu1 %v8551_v21  ;;  %v8528_v41 = vld [vmem:[%s15209_s2 + $0x2a8] sm:$0xf0]  ;;  %v8462_v61 = vld [vmem:[%s15209_s2 + $0x220] sm:$0xf]  ;;  %v13485_v3 = vpack.c.bf16 %v5180_v53, %v5178_v17  ;;  %v9892_v52 = vld [vmem:[%s15209_s2 + $0x224] sm:$0xf0] }
 0x290   : > { %4419 = vmatpush.bf16.msrb.mxu0 %v8495_v22  ;;  %v8471_v22 = vor.u32 %v9894_v60, %v8470_v58  ;;  %v8531_v30 = vor.u32 %v9907_v40, %v8528_v41  ;;  %v13502_v21 = vshrl.u32 %v13487_v59, 16  ;;  %v9890_v29 = vld [vmem:[%s15209_s2 + $0x214] sm:$0xf0]  ;;  %v9889_v50 = vld [vmem:[%s15209_s2 + $0x214] sm:$0xf] }
 0x291   : > { %v13493_v9 = vshll.u32 %v13485_v3, 16  ;;  %v9908_v14 = vld [vmem:[%s15209_s2 + $0x2a4] sm:$0xf0]  ;;  %v8446_v39 = vld [vmem:[%s15209_s2 + $0x200] sm:$0xf] }
 0x292   : > { %v9888_v56 = vld [vmem:[%s15209_s2 + $0x204] sm:$0xf0]  ;;  %v8448_v13 = vld [vmem:[%s15209_s2 + $0x208] sm:$0xf0]  ;;  %v8518_v17 = vld [vmem:[%s15209_s2 + $0x290] sm:$0xf] }
 0x293   : > { %4490 = vmatpush.bf16.msrb.mxu3 %v8547_v25  ;;  %4444 = vmatpush.bf16.msrb.mxu1 %v8543_v12  ;;  %v8456_v25 = vld [vmem:[%s15209_s2 + $0x218] sm:$0xf0]  ;;  %v9906_v53 = vld [vmem:[%s15209_s2 + $0x294] sm:$0xf0]  ;;  %v6265_v58 = vrot.slane %v13493_v9, 4  ;;  %v8447_v60 = vor.u32 %v9888_v56, %v8446_v39  ;;  %v6276_v49 = vrot.slane %v13502_v21, 3 }
 0x294   : > { %4420 = vmatpush.bf16.msrb.mxu0 %v8487_v23  ;;  %v8463_v23 = vor.u32 %v9892_v52, %v8462_v61  ;;  %v8459_v47 = vor.u32 %v9889_v50, %v8456_v25  ;;  %v8520_v12 = vld [vmem:[%s15209_s2 + $0x298] sm:$0xf0]  ;;  %v8519_v16 = vor.u32 %v9906_v53, %v8518_v17  ;;  %v9904_v41 = vld [vmem:[%s15209_s2 + $0x284] sm:$0xf0]  ;;  %v9949_v52 = vld [vmem:[%s15209_s2 + $0x3f4] sm:$0xf] }
 0x295   : > { %3814 = vmatmul.bf16.gmra.mxu1 %v13299_v0  ;;  %3860 = vmatmul.bf16.gmra.mxu3 %v13299_v0  ;;  %v9895_v0 = vld [vmem:[%s15209_s2 + $0x244] sm:$0xf]  ;;  %v8726_v25 = vld [vmem:[%s15209_s2 + $0x3f0] sm:$0xf]  ;;  %v3905_v56 = vshrl.u32 %v13264_v1, 16 }
 0x296   : > { %v8483_v36 = vor.u32 %v9895_v0, %v8480_v26  ;;  %v13496_v0 = vshll.u32 %v13487_v59, 16  ;;  %v13499_v26 = vshrl.u32 %v13485_v3, 16  ;;  %v8718_v17 = vld [vmem:[%s15209_s2 + $0x3e0] sm:$0xf]  ;;  %v9929_v53 = vld [vmem:[%s15209_s2 + $0x354] sm:$0xf] }
 0x297   : > { %4491 = vmatpush.bf16.msrb.mxu3 %v8539_v33  ;;  %4445 = vmatpush.bf16.msrb.mxu1 %v8535_v57  ;;  %v8512_v57 = vld [vmem:[%s15209_s2 + $0x288] sm:$0xf0] }
 0x298   : > { %4467 = vmatpush.bf16.msrb.mxu2 %v8483_v36  ;;  %4421 = vmatpush.bf16.msrb.mxu0 %v8479_v48  ;;  %v8454_v36 = vld [vmem:[%s15209_s2 + $0x210] sm:$0xf]  ;;  %v9905_v48 = vld [vmem:[%s15209_s2 + $0x294] sm:$0xf]  ;;  %v6264_v7 = vrot.slane %v13499_v26, 3 }
 0x299   : > { %v8455_v6 = vor.u32 %v9890_v29, %v8454_v36  ;;  %v8523_v5 = vor.u32 %v9905_v48, %v8520_v12  ;;  %v8728_v36 = vld [vmem:[%s15209_s2 + $0x3f8] sm:$0xf0]  ;;  %v9934_v29 = vld [vmem:[%s15209_s2 + $0x374] sm:$0xf0]  ;;  %v9947_v48 = vld [vmem:[%s15209_s2 + $0x3e4] sm:$0xf] }
 0x29a   : > { %v13552_v24 = vor.u32 %v6265_v58, %v6264_v7  ;;  %v8731_v50 = vor.u32 %v9949_v52, %v8728_v36  ;;  %v8720_v12 = vld [vmem:[%s15209_s2 + $0x3e8] sm:$0xf0] }
 0x29b   : > { %4492 = vmatpush.bf16.msrb.mxu3 %v8531_v30  ;;  %v8664_v30 = vld [vmem:[%s15209_s2 + $0x378] sm:$0xf0]  ;;  %v8704_v36 = vld [vmem:[%s15209_s2 + $0x3c8] sm:$0xf0] }
 0x29c   : > { %4468 = vmatpush.bf16.msrb.mxu2 %v8475_v20  ;;  %4422 = vmatpush.bf16.msrb.mxu0 %v8471_v22  ;;  %v9887_v20 = vld [vmem:[%s15209_s2 + $0x204] sm:$0xf]  ;;  %v6277_v22 = vrot.slane %v13496_v0, 4 }
 0x29d   : > { %v8451_v33 = vor.u32 %v9887_v20, %v8448_v13  ;;  %v3907_v20 = vor.u32 %v3905_v56, %v13288_v2  ;;  %v8654_v13 = vld [vmem:[%s15209_s2 + $0x360] sm:$0xf]  ;;  %v9948_v2 = vld [vmem:[%s15209_s2 + $0x3e4] sm:$0xf0]  ;;  %v8630_v56 = vld [vmem:[%s15209_s2 + $0x330] sm:$0xf] }
 0x29e   : > { %4085 = vmatmul.bf16.vlgmr.msra.gmra.mxu0 %v13064_v63  ;;  %4131 = vmatmul.bf16.vlgmr.msra.gmra.mxu2 %v13064_v63  ;;  %v9891_v63 = vld [vmem:[%s15209_s2 + $0x224] sm:$0xf]  ;;  %v8719_v7 = vor.u32 %v9948_v2, %v8718_v17  ;;  %v9942_v17 = vld [vmem:[%s15209_s2 + $0x3b4] sm:$0xf0] }
 0x29f   : > { %v8467_v51 = vor.u32 %v9891_v63, %v8464_v4  ;;  %4493 = vmatpush.bf16.msrb.mxu3 %v8523_v5  ;;  %v13554_v63 = vor.u32 %v6277_v22, %v6276_v49  ;;  %v9903_v4 = vld [vmem:[%s15209_s2 + $0x284] sm:$0xf]  ;;  %v8723_v5 = vor.u32 %v9947_v48, %v8720_v12  ;;  %v8712_v49 = vld [vmem:[%s15209_s2 + $0x3d8] sm:$0xf0]  ;;  %v3908_v22 = vshrl.u32 %v13296_v44, 16 }
 0x2a0   : > { %4423 = vmatpush.bf16.msrb.mxu0 %v8463_v23  ;;  %v8515_v40 = vor.u32 %v9903_v4, %v8512_v57  ;;  %v8710_v44 = vld [vmem:[%s15209_s2 + $0x3d0] sm:$0xf]  ;;  %v9941_v48 = vld [vmem:[%s15209_s2 + $0x3b4] sm:$0xf] }
 0x2a1   : > { %4469 = vmatpush.bf16.msrb.mxu2 %v8467_v51  ;;  %v8510_v51 = vld [vmem:[%s15209_s2 + $0x280] sm:$0xf]  ;;  %v3910_v57 = vor.u32 %v3908_v22, %v13360_v18  ;;  %v9946_v18 = vld [vmem:[%s15209_s2 + $0x3d4] sm:$0xf0] }
 0x2a2   : > { %v8511_v61 = vor.u32 %v9904_v41, %v8510_v51  ;;  %v8646_v51 = vld [vmem:[%s15209_s2 + $0x350] sm:$0xf] }
 0x2a3   : > { %4494 = vmatpush.bf16.msrb.mxu3 %v8515_v40  ;;  %v9930_v40 = vld [vmem:[%s15209_s2 + $0x354] sm:$0xf0] }
 0x2a4   : > { %4424 = vmatpush.bf16.msrb.mxu0 %v8455_v6  ;;  %v8647_v41 = vor.u32 %v9930_v40, %v8646_v51  ;;  %v9921_v51 = vld [vmem:[%s15209_s2 + $0x314] sm:$0xf] }
 0x2a5   : > { %4108 = vmatmul.bf16.vlgmr.msra.gmra.mxu1 %v13157_v62  ;;  %4154 = vmatmul.bf16.vlgmr.msra.gmra.mxu3 %v13157_v62  ;;  %v8526_v62 = vld [vmem:[%s15209_s2 + $0x2a0] sm:$0xf] }
 0x2a6   : > { %v8527_v38 = vor.u32 %v9908_v14, %v8526_v62  ;;  %4470 = vmatpush.bf16.msrb.mxu2 %v8459_v47  ;;  %v9950_v62 = vld [vmem:[%s15209_s2 + $0x3f4] sm:$0xf0]  ;;  %v9931_v14 = vld [vmem:[%s15209_s2 + $0x364] sm:$0xf] }
 0x2a7   : > { %v8727_v47 = vor.u32 %v9950_v62, %v8726_v25  ;;  %4838 = vmatpush.bf16.msra.mxu3 %v8731_v50  ;;  %v9928_v50 = vld [vmem:[%s15209_s2 + $0x344] sm:$0xf0] }
 0x2a8   : > { %4446 = vmatpush.bf16.msrb.mxu1 %v8527_v38  ;;  %4425 = vmatpush.bf16.msrb.mxu0 %v8447_v60  ;;  %v8656_v38 = vld [vmem:[%s15209_s2 + $0x368] sm:$0xf0]  ;;  %v9945_v60 = vld [vmem:[%s15209_s2 + $0x3d4] sm:$0xf]  ;;  %v9944_v25 = vld [vmem:[%s15209_s2 + $0x3c4] sm:$0xf0] }
 0x2a9   : > { %v8659_v39 = vor.u32 %v9931_v14, %v8656_v38  ;;  %v8715_v4 = vor.u32 %v9945_v60, %v8712_v49  ;;  %v8632_v38 = vld [vmem:[%s15209_s2 + $0x338] sm:$0xf0]  ;;  %v9924_v49 = vld [vmem:[%s15209_s2 + $0x324] sm:$0xf0] }
 0x2aa   : > { %4471 = vmatpush.bf16.msrb.mxu2 %v8451_v33  ;;  %v9932_v33 = vld [vmem:[%s15209_s2 + $0x364] sm:$0xf0] }
 0x2ab   : > { %4839 = vmatpush.bf16.msra.mxu3 %v8723_v5  ;;  %v8655_v1 = vor.u32 %v9932_v33, %v8654_v13  ;;  %v8694_v13 = vld [vmem:[%s15209_s2 + $0x3b0] sm:$0xf] }
 0x2ac   : > { %4447 = vmatpush.bf16.msrb.mxu1 %v8519_v16  ;;  %v8648_v16 = vld [vmem:[%s15209_s2 + $0x358] sm:$0xf0]  ;;  %v8695_v2 = vor.u32 %v9942_v17, %v8694_v13 }
 0x2ad   : > { %v8651_v58 = vor.u32 %v9929_v53, %v8648_v16  ;;  %v9939_v16 = vld [vmem:[%s15209_s2 + $0x3a4] sm:$0xf] }
 0x2ae   : > { %4090 = vmatmul.bf16.gmra.mxu0 %v13293_v37  ;;  %4136 = vmatmul.bf16.gmra.mxu2 %v13293_v37  ;;  %v9933_v37 = vld [vmem:[%s15209_s2 + $0x374] sm:$0xf] }
 0x2af   : > { %v8667_v23 = vor.u32 %v9933_v37, %v8664_v30  ;;  %4840 = vmatpush.bf16.msra.mxu3 %v8715_v4  ;;  %v8640_v37 = vld [vmem:[%s15209_s2 + $0x348] sm:$0xf0]  ;;  %v8711_v30 = vor.u32 %v9946_v18, %v8710_v44  ;;  %v8614_v4 = vld [vmem:[%s15209_s2 + $0x310] sm:$0xf]  ;;  %v8616_v44 = vld [vmem:[%s15209_s2 + $0x318] sm:$0xf0] }
 0x2b0   : > { %4448 = vmatpush.bf16.msrb.mxu1 %v8511_v61  ;;  %v9927_v61 = vld [vmem:[%s15209_s2 + $0x344] sm:$0xf]  ;;  %v8619_v18 = vor.u32 %v9921_v51, %v8616_v44  ;;  %v8880_v51 = vld [vmem:[%s15209_s2 + $0x4e8] sm:$0xf0] }
 0x2b1   : > { %4815 = vmatpush.bf16.msra.mxu2 %v8667_v23  ;;  %v8643_v52 = vor.u32 %v9927_v61, %v8640_v37  ;;  %v9943_v23 = vld [vmem:[%s15209_s2 + $0x3c4] sm:$0xf]  ;;  %v9937_v37 = vld [vmem:[%s15209_s2 + $0x394] sm:$0xf] }
 0x2b4   : > { %4792 = vmatpush.bf16.msra.mxu1 %v8727_v47  ;;  %v9925_v47 = vld [vmem:[%s15209_s2 + $0x334] sm:$0xf] }
 0x2b5   : > { %4113 = vmatmul.bf16.gmra.mxu1 %v13364_v19  ;;  %4159 = vmatmul.bf16.gmra.mxu3 %v13364_v19  ;;  %v8662_v19 = vld [vmem:[%s15209_s2 + $0x370] sm:$0xf]  ;;  %v8635_v12 = vor.u32 %v9925_v47, %v8632_v38  ;;  %v9935_v47 = vld [vmem:[%s15209_s2 + $0x384] sm:$0xf]  ;;  %v8672_v38 = vld [vmem:[%s15209_s2 + $0x388] sm:$0xf0] }
 0x2b6   : > { %v8663_v6 = vor.u32 %v9934_v29, %v8662_v19  ;;  %4816 = vmatpush.bf16.msra.mxu2 %v8659_v39  ;;  %v8638_v19 = vld [vmem:[%s15209_s2 + $0x340] sm:$0xf]  ;;  %v8707_v29 = vor.u32 %v9943_v23, %v8704_v36  ;;  %v8696_v39 = vld [vmem:[%s15209_s2 + $0x3b8] sm:$0xf0]  ;;  %v9920_v36 = vld [vmem:[%s15209_s2 + $0x304] sm:$0xf0] }
 0x2b7   : > { %v8639_v62 = vor.u32 %v9928_v50, %v8638_v19  ;;  %v8699_v5 = vor.u32 %v9941_v48, %v8696_v39  ;;  %v8606_v23 = vld [vmem:[%s15209_s2 + $0x300] sm:$0xf]  ;;  %v9919_v19 = vld [vmem:[%s15209_s2 + $0x304] sm:$0xf]  ;;  %v8608_v50 = vld [vmem:[%s15209_s2 + $0x308] sm:$0xf0]  ;;  %v8675_v48 = vor.u32 %v9935_v47, %v8672_v38 }
 0x2b8   : > { %4769 = vmatpush.bf16.msra.mxu0 %v8663_v6  ;;  %4793 = vmatpush.bf16.msra.mxu1 %v8719_v7  ;;  %v8702_v6 = vld [vmem:[%s15209_s2 + $0x3c0] sm:$0xf]  ;;  %v8688_v7 = vld [vmem:[%s15209_s2 + $0x3a8] sm:$0xf0]  ;;  %v8870_v47 = vld [vmem:[%s15209_s2 + $0x4d0] sm:$0xf] }
 0x2b9   : > { %v8703_v14 = vor.u32 %v9944_v25, %v8702_v6  ;;  %4841 = vmatpush.bf16.msra.mxu3 %v8707_v29  ;;  %v8691_v60 = vor.u32 %v9939_v16, %v8688_v7  ;;  %v8607_v29 = vor.u32 %v9920_v36, %v8606_v23  ;;  %v8678_v6 = vld [vmem:[%s15209_s2 + $0x390] sm:$0xf]  ;;  %v9938_v25 = vld [vmem:[%s15209_s2 + $0x394] sm:$0xf0]  ;;  %v8808_v23 = vld [vmem:[%s15209_s2 + $0x458] sm:$0xf0] }
 0x2ba   : > { %4817 = vmatpush.bf16.msra.mxu2 %v8651_v58  ;;  %v8622_v58 = vld [vmem:[%s15209_s2 + $0x320] sm:$0xf]  ;;  %v8886_v16 = vld [vmem:[%s15209_s2 + $0x4f0] sm:$0xf] }
 0x2bb   : > { %v8623_v22 = vor.u32 %v9924_v49, %v8622_v58  ;;  %v9982_v58 = vld [vmem:[%s15209_s2 + $0x4f4] sm:$0xf0]  ;;  %v8816_v49 = vld [vmem:[%s15209_s2 + $0x468] sm:$0xf0] }
 0x2bc   : > { %4770 = vmatpush.bf16.msra.mxu0 %v8655_v1  ;;  %4794 = vmatpush.bf16.msra.mxu1 %v8711_v30  ;;  %v8624_v1 = vld [vmem:[%s15209_s2 + $0x328] sm:$0xf0]  ;;  %v8680_v30 = vld [vmem:[%s15209_s2 + $0x398] sm:$0xf0] }
 0x2bd   : > { %4842 = vmatpush.bf16.msra.mxu3 %v8699_v5  ;;  %v9965_v5 = vld [vmem:[%s15209_s2 + $0x474] sm:$0xf] }
 0x2be   : > { %4095 = vmatmul.bf16.gmra.mxu0 %v3907_v20  ;;  %4141 = vmatmul.bf16.gmra.mxu2 %v3907_v20  ;;  %v9926_v20 = vld [vmem:[%s15209_s2 + $0x334] sm:$0xf0] }
 0x2bf   : > { %4818 = vmatpush.bf16.msra.mxu2 %v8643_v52  ;;  %v8631_v33 = vor.u32 %v9926_v20, %v8630_v56  ;;  %v8683_v52 = vor.u32 %v9937_v37, %v8680_v30  ;;  %v8824_v56 = vld [vmem:[%s15209_s2 + $0x478] sm:$0xf0]  ;;  %v9981_v20 = vld [vmem:[%s15209_s2 + $0x4f4] sm:$0xf]  ;;  %v9980_v30 = vld [vmem:[%s15209_s2 + $0x4e4] sm:$0xf0] }
 0x2c0   : > { %4771 = vmatpush.bf16.msra.mxu0 %v8647_v41  ;;  %4795 = vmatpush.bf16.msra.mxu1 %v8703_v14  ;;  %v9940_v41 = vld [vmem:[%s15209_s2 + $0x3a4] sm:$0xf0]  ;;  %v8679_v14 = vor.u32 %v9938_v25, %v8678_v6  ;;  %v8827_v13 = vor.u32 %v9965_v5, %v8824_v56  ;;  %v8872_v6 = vld [vmem:[%s15209_s2 + $0x4d8] sm:$0xf0]  ;;  %v9975_v5 = vld [vmem:[%s15209_s2 + $0x4c4] sm:$0xf] }
 0x2c1   : > { %4843 = vmatpush.bf16.msra.mxu3 %v8691_v60  ;;  %v9963_v60 = vld [vmem:[%s15209_s2 + $0x464] sm:$0xf]  ;;  %v8864_v56 = vld [vmem:[%s15209_s2 + $0x4c8] sm:$0xf0] }
 0x2c3   : > { %4819 = vmatpush.bf16.msra.mxu2 %v8635_v12  ;;  %v8670_v12 = vld [vmem:[%s15209_s2 + $0x380] sm:$0xf] }
 0x2c4   : > { %4772 = vmatpush.bf16.msra.mxu0 %v8639_v62  ;;  %4796 = vmatpush.bf16.msra.mxu1 %v8695_v2  ;;  %v8611_v62 = vor.u32 %v9919_v19, %v8608_v50  ;;  %v8822_v2 = vld [vmem:[%s15209_s2 + $0x470] sm:$0xf]  ;;  %v9977_v50 = vld [vmem:[%s15209_s2 + $0x4d4] sm:$0xf] }
 0x2c5   : > { %4118 = vmatmul.bf16.gmra.mxu1 %v3910_v57  ;;  %4164 = vmatmul.bf16.gmra.mxu3 %v3910_v57  ;;  %v9922_v57 = vld [vmem:[%s15209_s2 + $0x314] sm:$0xf0]  ;;  %v8875_v25 = vor.u32 %v9977_v50, %v8872_v6  ;;  %v9971_v50 = vld [vmem:[%s15209_s2 + $0x4a4] sm:$0xf]  ;;  %v8848_v6 = vld [vmem:[%s15209_s2 + $0x4a8] sm:$0xf0] }
 0x2c6   : > { %v8615_v40 = vor.u32 %v9922_v57, %v8614_v4  ;;  %4844 = vmatpush.bf16.msra.mxu3 %v8683_v52  ;;  %v8819_v4 = vor.u32 %v9963_v60, %v8816_v49  ;;  %v9979_v57 = vld [vmem:[%s15209_s2 + $0x4e4] sm:$0xf]  ;;  %v9961_v52 = vld [vmem:[%s15209_s2 + $0x454] sm:$0xf]  ;;  %v8792_v49 = vld [vmem:[%s15209_s2 + $0x438] sm:$0xf0] }
 0x2c7   : > { %v8883_v44 = vor.u32 %v9979_v57, %v8880_v51  ;;  %v9957_v60 = vld [vmem:[%s15209_s2 + $0x434] sm:$0xf]  ;;  %v8856_v51 = vld [vmem:[%s15209_s2 + $0x4b8] sm:$0xf0] }
 0x2c8   : > { %4773 = vmatpush.bf16.msra.mxu0 %v8631_v33  ;;  %v8888_v33 = vld [vmem:[%s15209_s2 + $0x4f8] sm:$0xf0]  ;;  %v9973_v57 = vld [vmem:[%s15209_s2 + $0x4b4] sm:$0xf] }
 0x2c9   : > { %v8891_v17 = vor.u32 %v9981_v20, %v8888_v33  ;;  %v8867_v33 = vor.u32 %v9975_v5, %v8864_v56 }
 0x2ca   : > { %4845 = vmatpush.bf16.msra.mxu3 %v8675_v48  ;;  %v9978_v48 = vld [vmem:[%s15209_s2 + $0x4d4] sm:$0xf0] }
 0x2cc   : > { %4774 = vmatpush.bf16.msra.mxu0 %v8623_v22  ;;  %v8887_v22 = vor.u32 %v9982_v58, %v8886_v16  ;;  %v8862_v16 = vld [vmem:[%s15209_s2 + $0x4c0] sm:$0xf]  ;;  %v9976_v58 = vld [vmem:[%s15209_s2 + $0x4c4] sm:$0xf0] }
 0x2ce   : > { %4426 = vmatmul.bf16.vlgmr.msrb.gmra.mxu0 %v13175_v42  ;;  %4472 = vmatmul.bf16.vlgmr.msrb.gmra.mxu2 %v13175_v42  ;;  %v9923_v42 = vld [vmem:[%s15209_s2 + $0x324] sm:$0xf] }
 0x2cf   : > { %v8627_v53 = vor.u32 %v9923_v42, %v8624_v1 }
 0x2d0   : > { %4775 = vmatpush.bf16.msra.mxu0 %v8615_v40 }
 0x2d1   : > { %4820 = vmatpush.bf16.msra.mxu2 %v8627_v53  ;;  %v9966_v53 = vld [vmem:[%s15209_s2 + $0x474] sm:$0xf0] }
 0x2d2   : > { %v8823_v7 = vor.u32 %v9966_v53, %v8822_v2  ;;  %v8798_v2 = vld [vmem:[%s15209_s2 + $0x440] sm:$0xf]  ;;  %v9960_v53 = vld [vmem:[%s15209_s2 + $0x444] sm:$0xf0] }
 0x2d4   : > { %4776 = vmatpush.bf16.msra.mxu0 %v8607_v29  ;;  %v8811_v29 = vor.u32 %v9961_v52, %v8808_v23  ;;  %v9974_v52 = vld [vmem:[%s15209_s2 + $0x4b4] sm:$0xf0]  ;;  %v9955_v23 = vld [vmem:[%s15209_s2 + $0x424] sm:$0xf] }
 0x2d5   : > { %4449 = vmatmul.bf16.vlgmr.msrb.gmra.mxu1 %v13207_v46  ;;  %4495 = vmatmul.bf16.vlgmr.msrb.gmra.mxu3 %v13207_v46  ;;  %v8686_v46 = vld [vmem:[%s15209_s2 + $0x3a0] sm:$0xf] }
 0x2d6   : > { %v8687_v61 = vor.u32 %v9940_v41, %v8686_v46  ;;  %4821 = vmatpush.bf16.msra.mxu2 %v8619_v18  ;;  %5141 = vmatpush.bf16.msrb.mxu3 %v8891_v17  ;;  %v8814_v18 = vld [vmem:[%s15209_s2 + $0x460] sm:$0xf] }
 0x2d8   : > { %4797 = vmatpush.bf16.msra.mxu1 %v8687_v61  ;;  %5072 = vmatpush.bf16.msrb.mxu0 %v8823_v7  ;;  %v9964_v61 = vld [vmem:[%s15209_s2 + $0x464] sm:$0xf0]  ;;  %v8799_v7 = vor.u32 %v9960_v53, %v8798_v2 }
 0x2d9   : > { %v8815_v37 = vor.u32 %v9964_v61, %v8814_v18 }
 0x2da   : > { %4822 = vmatpush.bf16.msra.mxu2 %v8611_v62  ;;  %5142 = vmatpush.bf16.msrb.mxu3 %v8883_v44  ;;  %v8806_v62 = vld [vmem:[%s15209_s2 + $0x450] sm:$0xf] }
 0x2db   : > { %v8790_v44 = vld [vmem:[%s15209_s2 + $0x430] sm:$0xf] }
 0x2dc   : > { %4798 = vmatpush.bf16.msra.mxu1 %v8679_v14  ;;  %5073 = vmatpush.bf16.msrb.mxu0 %v8815_v37  ;;  %v9962_v14 = vld [vmem:[%s15209_s2 + $0x454] sm:$0xf0] }
 0x2dd   : > { %v8807_v38 = vor.u32 %v9962_v14, %v8806_v62  ;;  %v8851_v62 = vor.u32 %v9971_v50, %v8848_v6  ;;  %v8782_v14 = vld [vmem:[%s15209_s2 + $0x420] sm:$0xf]  ;;  %v9968_v6 = vld [vmem:[%s15209_s2 + $0x484] sm:$0xf0] }
 0x2de   : > { %4431 = vmatmul.bf16.gmra.mxu0 %v13329_v27  ;;  %4477 = vmatmul.bf16.gmra.mxu2 %v13329_v27  ;;  %v9936_v27 = vld [vmem:[%s15209_s2 + $0x384] sm:$0xf0]  ;;  %v8830_v50 = vld [vmem:[%s15209_s2 + $0x480] sm:$0xf] }
 0x2df   : > { %v8671_v39 = vor.u32 %v9936_v27, %v8670_v12  ;;  %5118 = vmatpush.bf16.msrb.mxu2 %v8827_v13  ;;  %v8800_v12 = vld [vmem:[%s15209_s2 + $0x448] sm:$0xf0]  ;;  %5143 = vmatpush.bf16.msrb.mxu3 %v8875_v25  ;;  %v8871_v27 = vor.u32 %v9978_v48, %v8870_v47  ;;  %v9956_v47 = vld [vmem:[%s15209_s2 + $0x424] sm:$0xf0] }
 0x2e0   : > { %5074 = vmatpush.bf16.msrb.mxu0 %v8807_v38  ;;  %v8783_v38 = vor.u32 %v9956_v47, %v8782_v14  ;;  %v8984_v14 = vld [vmem:[%s15209_s2 + $0x578] sm:$0xf0]  ;;  %v10013_v47 = vld [vmem:[%s15209_s2 + $0x5f4] sm:$0xf] }
 0x2e1   : > { %4799 = vmatpush.bf16.msra.mxu1 %v8671_v39 }
 0x2e3   : > { %5119 = vmatpush.bf16.msrb.mxu2 %v8819_v4  ;;  %5144 = vmatpush.bf16.msrb.mxu3 %v8867_v33  ;;  %v8795_v4 = vor.u32 %v9957_v60, %v8792_v49  ;;  %v9972_v33 = vld [vmem:[%s15209_s2 + $0x4a4] sm:$0xf0]  ;;  %v8766_v49 = vld [vmem:[%s15209_s2 + $0x400] sm:$0xf] }
 0x2e4   : > { %5075 = vmatpush.bf16.msrb.mxu0 %v8799_v7  ;;  %v9969_v7 = vld [vmem:[%s15209_s2 + $0x494] sm:$0xf] }
 0x2e5   : > { %4454 = vmatmul.bf16.gmra.mxu1 %v13382_v54  ;;  %4500 = vmatmul.bf16.gmra.mxu3 %v13382_v54  ;;  %v3782_v54 = vpop.f32.mrf.mxu0 }
 0x2e6   : > { %5095 = vmatpush.bf16.msrb.mxu1 %v8887_v22  ;;  %v8863_v22 = vor.u32 %v9976_v58, %v8862_v16  ;;  %v8840_v58 = vld [vmem:[%s15209_s2 + $0x498] sm:$0xf0] }
 0x2e7   : > { %5120 = vmatpush.bf16.msrb.mxu2 %v8811_v29  ;;  %v8784_v29 = vld [vmem:[%s15209_s2 + $0x428] sm:$0xf0]  ;;  %v8843_v60 = vor.u32 %v9969_v7, %v8840_v58 }
 0x2e8   : > { %v8787_v25 = vor.u32 %v9955_v23, %v8784_v29  ;;  %v8976_v7 = vld [vmem:[%s15209_s2 + $0x568] sm:$0xf0] }
 0x2e9   : > { %v3828_v40 = vpop.f32.mrf.mxu2 }
 0x2ea   : > { %v3805_v42 = vpop.f32.mrf.mxu1 }
 0x2eb   : > { %v13788_v1 = vadd.f32 %v3805_v42, %v3782_v54 }
 0x2ed   : > { %v13836_v36 = vpop.f32.mrf.mxu0 }
 0x2ee   : > { %4436 = vmatmul.bf16.gmra.mxu0 %v13306_v8  ;;  %4482 = vmatmul.bf16.gmra.mxu2 %v13306_v8  ;;  %v8878_v8 = vld [vmem:[%s15209_s2 + $0x4e0] sm:$0xf] }
 0x2ef   : > { %v8879_v19 = vor.u32 %v9980_v30, %v8878_v8  ;;  %v8854_v30 = vld [vmem:[%s15209_s2 + $0x4b0] sm:$0xf] }
 0x2f0   : > { %v3851_v46 = vpop.f32.mrf.mxu3 }
 0x2f1   : > { %v13816_v41 = vadd.f32 %v3851_v46, %v3828_v40  ;;  %5096 = vmatpush.bf16.msrb.mxu1 %v8879_v19  ;;  %v3830_v20 = vpop.f32.mrf.mxu2  ;;  %v8859_v40 = vor.u32 %v9973_v57, %v8856_v51  ;;  %v8855_v19 = vor.u32 %v9974_v52, %v8854_v30  ;;  %v8768_v51 = vld [vmem:[%s15209_s2 + $0x408] sm:$0xf0] }
 0x2f2   : > { %v13872_v54 = vpop.f32.mrf.mxu1 }
 0x2f3   : > { %5145 = vmatpush.bf16.msrb.mxu3 %v8859_v40  ;;  %v8838_v40 = vld [vmem:[%s15209_s2 + $0x490] sm:$0xf] }
 0x2f5   : > { %4459 = vmatmul.bf16.gmra.mxu1 %v13366_v11  ;;  %4505 = vmatmul.bf16.gmra.mxu3 %v13366_v11  ;;  %v9959_v11 = vld [vmem:[%s15209_s2 + $0x444] sm:$0xf] }
 0x2f6   : > { %v8803_v39 = vor.u32 %v9959_v11, %v8800_v12  ;;  %5097 = vmatpush.bf16.msrb.mxu1 %v8871_v27  ;;  %v9954_v27 = vld [vmem:[%s15209_s2 + $0x414] sm:$0xf0] }
 0x2f7   : > { %5146 = vmatpush.bf16.msrb.mxu3 %v8851_v62  ;;  %v9997_v62 = vld [vmem:[%s15209_s2 + $0x574] sm:$0xf] }
 0x2f8   : > { %v3853_v13 = vpop.f32.mrf.mxu3  ;;  %5121 = vmatpush.bf16.msrb.mxu2 %v8803_v39  ;;  %v9953_v39 = vld [vmem:[%s15209_s2 + $0x414] sm:$0xf] }
 0x2f9   : > { %v13870_v17 = vadd.f32 %v3853_v13, %v3830_v20  ;;  %v8776_v20 = vld [vmem:[%s15209_s2 + $0x418] sm:$0xf0]  ;;  %v8846_v13 = vld [vmem:[%s15209_s2 + $0x4a0] sm:$0xf] }
 0x2fa   : > { %5098 = vmatpush.bf16.msrb.mxu1 %v8863_v22  ;;  %v8779_v53 = vor.u32 %v9953_v39, %v8776_v20  ;;  %v8847_v16 = vor.u32 %v9972_v33, %v8846_v13  ;;  %v9952_v22 = vld [vmem:[%s15209_s2 + $0x404] sm:$0xf0]  ;;  %v9998_v20 = vld [vmem:[%s15209_s2 + $0x574] sm:$0xf0]  ;;  %v9046_v13 = vld [vmem:[%s15209_s2 + $0x5f0] sm:$0xf] }
 0x2fb   : > { %v3787_v42 = vpop.f32.mrf.mxu0  ;;  %v8767_v57 = vor.u32 %v9952_v22, %v8766_v49  ;;  %5147 = vmatpush.bf16.msrb.mxu3 %v8843_v60  ;;  %v10011_v49 = vld [vmem:[%s15209_s2 + $0x5e4] sm:$0xf] }
 0x2fc   : > { %5122 = vmatpush.bf16.msrb.mxu2 %v8795_v4  ;;  %v9951_v4 = vld [vmem:[%s15209_s2 + $0x404] sm:$0xf] }
 0x2fe   : > { %4777 = vmatmul.bf16.vlgmr.msra.gmra.mxu0 %v13230_v55  ;;  %4823 = vmatmul.bf16.vlgmr.msra.gmra.mxu2 %v13230_v55  ;;  %v9958_v55 = vld [vmem:[%s15209_s2 + $0x434] sm:$0xf0] }
 0x2ff   : > { %v8791_v18 = vor.u32 %v9958_v55, %v8790_v44  ;;  %5099 = vmatpush.bf16.msrb.mxu1 %v8855_v19  ;;  %v9970_v44 = vld [vmem:[%s15209_s2 + $0x494] sm:$0xf0]  ;;  %v8771_v55 = vor.u32 %v9951_v4, %v8768_v51  ;;  %v8974_v51 = vld [vmem:[%s15209_s2 + $0x560] sm:$0xf] }
 0x300   : > { %5123 = vmatpush.bf16.msrb.mxu2 %v8787_v25  ;;  %v8831_v25 = vor.u32 %v9968_v6, %v8830_v50 }
 0x301   : > { %v3833_v46 = vpop.f32.mrf.mxu2  ;;  %5076 = vmatpush.bf16.msrb.mxu0 %v8791_v18  ;;  %v9967_v18 = vld [vmem:[%s15209_s2 + $0x484] sm:$0xf] }
 0x302   : > { %v3810_v61 = vpop.f32.mrf.mxu1 }
 0x303   : > { %v13906_v8 = vadd.f32 %v3810_v61, %v3787_v42  ;;  %v3789_v37 = vpop.f32.mrf.mxu0  ;;  %5100 = vmatpush.bf16.msrb.mxu1 %v8847_v16  ;;  %v8832_v61 = vld [vmem:[%s15209_s2 + $0x488] sm:$0xf0]  ;;  %v9995_v16 = vld [vmem:[%s15209_s2 + $0x564] sm:$0xf] }
 0x304   : > { %5124 = vmatpush.bf16.msrb.mxu2 %v8779_v53  ;;  %v10014_v53 = vld [vmem:[%s15209_s2 + $0x5f4] sm:$0xf0]  ;;  %v8979_v60 = vor.u32 %v9995_v16, %v8976_v7  ;;  %v8958_v7 = vld [vmem:[%s15209_s2 + $0x540] sm:$0xf] }
 0x305   : > { %4800 = vmatmul.bf16.vlgmr.msra.gmra.mxu1 %v13246_v28  ;;  %4846 = vmatmul.bf16.vlgmr.msra.gmra.mxu3 %v13246_v28  ;;  %v8774_v28 = vld [vmem:[%s15209_s2 + $0x410] sm:$0xf]  ;;  %v9047_v58 = vor.u32 %v10014_v53, %v9046_v13 }
 0x306   : > { %5077 = vmatpush.bf16.msrb.mxu0 %v8783_v38  ;;  %v8775_v56 = vor.u32 %v9954_v27, %v8774_v28  ;;  %v8987_v38 = vor.u32 %v9997_v62, %v8984_v14  ;;  %v9994_v62 = vld [vmem:[%s15209_s2 + $0x554] sm:$0xf0]  ;;  %v9030_v14 = vld [vmem:[%s15209_s2 + $0x5d0] sm:$0xf] }
 0x308   : > { %v3856_v48 = vpop.f32.mrf.mxu3  ;;  %5125 = vmatpush.bf16.msrb.mxu2 %v8771_v55 }
 0x309   : > { %v13934_v11 = vadd.f32 %v3856_v48, %v3833_v46  ;;  %v3835_v12 = vpop.f32.mrf.mxu2  ;;  %v8839_v46 = vor.u32 %v9970_v44, %v8838_v40  ;;  %v9048_v48 = vld [vmem:[%s15209_s2 + $0x5f8] sm:$0xf0]  ;;  %v9996_v40 = vld [vmem:[%s15209_s2 + $0x564] sm:$0xf0]  ;;  %v9038_v44 = vld [vmem:[%s15209_s2 + $0x5e0] sm:$0xf] }
 0x30a   : > { %v3812_v5 = vpop.f32.mrf.mxu1  ;;  %5078 = vmatpush.bf16.msrb.mxu0 %v8775_v56  ;;  %v8982_v56 = vld [vmem:[%s15209_s2 + $0x570] sm:$0xf] }
 0x30b   : > { %v13954_v42 = vadd.f32 %v3812_v5, %v3789_v37  ;;  %v3792_v2 = vpop.f32.mrf.mxu0  ;;  %v8835_v37 = vor.u32 %v9967_v18, %v8832_v61  ;;  %5101 = vmatpush.bf16.msrb.mxu1 %v8839_v46  ;;  %v8975_v18 = vor.u32 %v9996_v40, %v8974_v51  ;;  %v10012_v61 = vld [vmem:[%s15209_s2 + $0x5e4] sm:$0xf0]  ;;  %v10005_v40 = vld [vmem:[%s15209_s2 + $0x5b4] sm:$0xf] }
 0x30c   : > { %5483 = vmatpush.bf16.msra.mxu2 %v8987_v38  ;;  %v10010_v38 = vld [vmem:[%s15209_s2 + $0x5d4] sm:$0xf0] }
 0x30d   : > { %5148 = vmatpush.bf16.msrb.mxu3 %v8835_v37  ;;  %v9993_v37 = vld [vmem:[%s15209_s2 + $0x554] sm:$0xf] }
 0x30e   : > { %4782 = vmatmul.bf16.gmra.mxu0 %v13358_v43  ;;  %4828 = vmatmul.bf16.gmra.mxu2 %v13358_v43 }
 0x30f   : > { %5079 = vmatpush.bf16.msrb.mxu0 %v8767_v57  ;;  %5102 = vmatpush.bf16.msrb.mxu1 %v8831_v25  ;;  %v8966_v25 = vld [vmem:[%s15209_s2 + $0x550] sm:$0xf] }
 0x310   : > { %v3858_v30 = vpop.f32.mrf.mxu3  ;;  %5484 = vmatpush.bf16.msra.mxu2 %v8979_v60  ;;  %v9022_v60 = vld [vmem:[%s15209_s2 + $0x5c0] sm:$0xf] }
 0x311   : > { %v13988_v52 = vadd.f32 %v3858_v30, %v3835_v12  ;;  %v3838_v23 = vpop.f32.mrf.mxu2  ;;  %v9051_v12 = vor.u32 %v10013_v47, %v9048_v48  ;;  %v8968_v30 = vld [vmem:[%s15209_s2 + $0x558] sm:$0xf0]  ;;  %v8967_v47 = vor.u32 %v9994_v62, %v8966_v25  ;;  %v8960_v48 = vld [vmem:[%s15209_s2 + $0x548] sm:$0xf0] }
 0x312   : > { %v3815_v43 = vpop.f32.mrf.mxu1 }
 0x313   : > { %v13990_v19 = vadd.f32 %v3815_v43, %v3792_v2  ;;  %v3794_v29 = vpop.f32.mrf.mxu0  ;;  %5506 = vmatpush.bf16.msra.mxu3 %v9051_v12  ;;  %v8983_v2 = vor.u32 %v9998_v20, %v8982_v56  ;;  %5460 = vmatpush.bf16.msra.mxu1 %v9047_v58  ;;  %v9031_v12 = vor.u32 %v10010_v38, %v9030_v14  ;;  %v9992_v58 = vld [vmem:[%s15209_s2 + $0x544] sm:$0xf0]  ;;  %v8942_v14 = vld [vmem:[%s15209_s2 + $0x520] sm:$0xf] }
 0x314   : > { %v9032_v29 = vld [vmem:[%s15209_s2 + $0x5d8] sm:$0xf0] }
 0x315   : > { %4805 = vmatmul.bf16.gmra.mxu1 %v13404_v35  ;;  %4851 = vmatmul.bf16.gmra.mxu3 %v13404_v35 }
 0x316   : > { %5437 = vmatpush.bf16.msra.mxu0 %v8983_v2 }
 0x318   : > { %v3861_v35 = vpop.f32.mrf.mxu3 }
 0x319   : > { %v14012_v28 = vadd.f32 %v3861_v35, %v3838_v23  ;;  %v3840_v27 = vpop.f32.mrf.mxu2 }
 0x31a   : > { %v3817_v39 = vpop.f32.mrf.mxu1  ;;  %5438 = vmatpush.bf16.msra.mxu0 %v8975_v18  ;;  %v10007_v27 = vld [vmem:[%s15209_s2 + $0x5c4] sm:$0xf] }
 0x31b   : > { %v4086_v5 = vpop.f32.mrf.mxu0  ;;  %v9024_v39 = vld [vmem:[%s15209_s2 + $0x5c8] sm:$0xf0] }
 0x31c   : > { %v4087_v33 = vadd.f32 %v4086_v5, %v13788_v1  ;;  %v9040_v1 = vld [vmem:[%s15209_s2 + $0x5e8] sm:$0xf0]  ;;  %v9027_v56 = vor.u32 %v10007_v27, %v9024_v39 }
 0x31d   : > { %v9043_v22 = vor.u32 %v10011_v49, %v9040_v1  ;;  %v8959_v49 = vor.u32 %v9992_v58, %v8958_v7  ;;  %v10008_v1 = vld [vmem:[%s15209_s2 + $0x5c4] sm:$0xf0]  ;;  %v9006_v7 = vld [vmem:[%s15209_s2 + $0x5a0] sm:$0xf] }
 0x31e   : > { %4787 = vmatmul.bf16.gmra.mxu0 %v13331_v15  ;;  %4833 = vmatmul.bf16.gmra.mxu2 %v13331_v15  ;;  %v3808_v15 = vadd.f32 %v13872_v54, %v13836_v36  ;;  %v9039_v36 = vor.u32 %v10012_v61, %v9038_v44  ;;  %v8971_v54 = vor.u32 %v9993_v37, %v8968_v30  ;;  %v10004_v58 = vld [vmem:[%s15209_s2 + $0x5a4] sm:$0xf0] }
 0x31f   : > { %5507 = vmatpush.bf16.msra.mxu3 %v9043_v22  ;;  %5439 = vmatpush.bf16.msra.mxu0 %v8967_v47  ;;  %v9989_v22 = vld [vmem:[%s15209_s2 + $0x534] sm:$0xf]  ;;  %v9988_v47 = vld [vmem:[%s15209_s2 + $0x524] sm:$0xf0] }
 0x320   : > { %v3863_v4 = vpop.f32.mrf.mxu3  ;;  %5461 = vmatpush.bf16.msra.mxu1 %v9039_v36  ;;  %5485 = vmatpush.bf16.msra.mxu2 %v8971_v54 }
 0x321   : > { %v4132_v57 = vpop.f32.mrf.mxu2  ;;  %v8952_v4 = vld [vmem:[%s15209_s2 + $0x538] sm:$0xf0] }
 0x322   : > { %v4109_v55 = vpop.f32.mrf.mxu1  ;;  %v4133_v46 = vadd.f32 %v4132_v57, %v13816_v41  ;;  %v10009_v41 = vld [vmem:[%s15209_s2 + $0x5d4] sm:$0xf]  ;;  %v9023_v57 = vor.u32 %v10008_v1, %v9022_v60  ;;  %v8955_v51 = vor.u32 %v9989_v22, %v8952_v4  ;;  %v8926_v1 = vld [vmem:[%s15209_s2 + $0x500] sm:$0xf]  ;;  %v9984_v4 = vld [vmem:[%s15209_s2 + $0x504] sm:$0xf0] }
 0x323   : > { %v14062_v23 = vadd.f32 %v4109_v55, %v4087_v33  ;;  %v4088_v43 = vpop.f32.mrf.mxu0  ;;  %v9035_v6 = vor.u32 %v10009_v41, %v9032_v29  ;;  %5440 = vmatpush.bf16.msra.mxu0 %v8959_v49  ;;  %v8950_v55 = vld [vmem:[%s15209_s2 + $0x530] sm:$0xf]  ;;  %v10006_v29 = vld [vmem:[%s15209_s2 + $0x5b4] sm:$0xf0]  ;;  %v10001_v49 = vld [vmem:[%s15209_s2 + $0x594] sm:$0xf] }
 0x324   : > { %v4089_v50 = vadd.f32 %v4088_v43, %v3808_v15  ;;  %5462 = vmatpush.bf16.msra.mxu1 %v9031_v12  ;;  %v9014_v41 = vld [vmem:[%s15209_s2 + $0x5b0] sm:$0xf] }
 0x325   : > { %4810 = vmatmul.bf16.gmra.mxu1 %v13384_v32  ;;  %4856 = vmatmul.bf16.gmra.mxu3 %v13384_v32  ;;  %v9991_v32 = vld [vmem:[%s15209_s2 + $0x544] sm:$0xf] }
 0x326   : > { %5508 = vmatpush.bf16.msra.mxu3 %v9035_v6  ;;  %v8963_v35 = vor.u32 %v9991_v32, %v8960_v48  ;;  %v9008_v6 = vld [vmem:[%s15209_s2 + $0x5a8] sm:$0xf0]  ;;  %v8943_v32 = vor.u32 %v9988_v47, %v8942_v14 }
 0x328   : > { %v4155_v5 = vpop.f32.mrf.mxu3  ;;  %5486 = vmatpush.bf16.msra.mxu2 %v8963_v35  ;;  %5463 = vmatpush.bf16.msra.mxu1 %v9023_v57  ;;  %v9983_v57 = vld [vmem:[%s15209_s2 + $0x504] sm:$0xf] }
 0x329   : > { %v14096_v20 = vadd.f32 %v4155_v5, %v4133_v46  ;;  %v4134_v13 = vpop.f32.mrf.mxu2  ;;  %v9990_v46 = vld [vmem:[%s15209_s2 + $0x534] sm:$0xf0] }
 0x32a   : > { %v4111_v33 = vpop.f32.mrf.mxu1  ;;  %v4135_v2 = vadd.f32 %v4134_v13, %v13870_v17  ;;  %5509 = vmatpush.bf16.msra.mxu3 %v9027_v56  ;;  %v8951_v37 = vor.u32 %v9990_v46, %v8950_v55  ;;  %v8934_v56 = vld [vmem:[%s15209_s2 + $0x510] sm:$0xf]  ;;  %v9986_v13 = vld [vmem:[%s15209_s2 + $0x514] sm:$0xf0] }
 0x32b   : > { %v14099_v53 = vadd.f32 %v4111_v33, %v4089_v50  ;;  %v4091_v16 = vpop.f32.mrf.mxu0  ;;  %v9015_v50 = vor.u32 %v10006_v29, %v9014_v41  ;;  %v9985_v33 = vld [vmem:[%s15209_s2 + $0x514] sm:$0xf] }
 0x32c   : > { %v4092_v17 = vadd.f32 %v4091_v16, %v13906_v8  ;;  %v9016_v8 = vld [vmem:[%s15209_s2 + $0x5b8] sm:$0xf0]  ;;  %5487 = vmatpush.bf16.msra.mxu2 %v8955_v51  ;;  %5441 = vmatpush.bf16.msra.mxu0 %v8951_v37  ;;  %v8935_v16 = vor.u32 %v9986_v13, %v8934_v56  ;;  %v8928_v51 = vld [vmem:[%s15209_s2 + $0x508] sm:$0xf0] }
 0x32d   : > { %v9019_v44 = vor.u32 %v10005_v40, %v9016_v8  ;;  %5464 = vmatpush.bf16.msra.mxu1 %v9015_v50  ;;  %v8927_v40 = vor.u32 %v9984_v4, %v8926_v1  ;;  %v8931_v8 = vor.u32 %v9983_v57, %v8928_v51  ;;  %v8990_v50 = vld [vmem:[%s15209_s2 + $0x580] sm:$0xf]  ;;  %v10043_v1 = vld [vmem:[%s15209_s2 + $0x6e4] sm:$0xf]  ;;  %v14283_v57 = vld [vmem:[#allocation2 + $0x38] sm:$0xff] }
 0x32e   : > { %5080 = vmatmul.bf16.vlgmr.msrb.gmra.mxu0 %v12941_v10  ;;  %5126 = vmatmul.bf16.vlgmr.msrb.gmra.mxu2 %v12941_v10 }
 0x32f   : > { %5510 = vmatpush.bf16.msra.mxu3 %v9019_v44  ;;  %v10002_v44 = vld [vmem:[%s15209_s2 + $0x594] sm:$0xf0] }
 0x330   : > { %v4157_v15 = vpop.f32.mrf.mxu3  ;;  %5442 = vmatpush.bf16.msra.mxu0 %v8943_v32 }
 0x331   : > { %v14134_v18 = vadd.f32 %v4157_v15, %v4135_v2  ;;  %v4137_v61 = vpop.f32.mrf.mxu2  ;;  %v9999_v15 = vld [vmem:[%s15209_s2 + $0x584] sm:$0xf] }
 0x332   : > { %v4114_v30 = vpop.f32.mrf.mxu1  ;;  %v4138_v10 = vadd.f32 %v4137_v61, %v13934_v11  ;;  %v9987_v11 = vld [vmem:[%s15209_s2 + $0x524] sm:$0xf]  ;;  %v8992_v61 = vld [vmem:[%s15209_s2 + $0x588] sm:$0xf0] }
 0x333   : > { %v14137_v43 = vadd.f32 %v4114_v30, %v4092_v17  ;;  %v4093_v36 = vpop.f32.mrf.mxu0  ;;  %v9007_v17 = vor.u32 %v10004_v58, %v9006_v7  ;;  %v10046_v58 = vld [vmem:[%s15209_s2 + $0x6f4] sm:$0xf0] }
 0x334   : > { %v4094_v54 = vadd.f32 %v4093_v36, %v13954_v42  ;;  %v8944_v42 = vld [vmem:[%s15209_s2 + $0x528] sm:$0xf0]  ;;  %5443 = vmatpush.bf16.msra.mxu0 %v8935_v16  ;;  %v10030_v16 = vld [vmem:[%s15209_s2 + $0x674] sm:$0xf0] }
 0x335   : > { %5103 = vmatmul.bf16.vlgmr.msrb.gmra.mxu1 %v13192_v31  ;;  %5149 = vmatmul.bf16.vlgmr.msrb.gmra.mxu3 %v13192_v31  ;;  %v10003_v31 = vld [vmem:[%s15209_s2 + $0x5a4] sm:$0xf]  ;;  %v8947_v25 = vor.u32 %v9987_v11, %v8944_v42  ;;  %v14227_v11 = vld [vmem:[#allocation2 + $0x50] sm:$0xff] }
 0x336   : > { %v9011_v62 = vor.u32 %v10003_v31, %v9008_v6  ;;  %5465 = vmatpush.bf16.msra.mxu1 %v9007_v17  ;;  %v10029_v42 = vld [vmem:[%s15209_s2 + $0x674] sm:$0xf]  ;;  %v9144_v6 = vld [vmem:[%s15209_s2 + $0x678] sm:$0xf0]  ;;  %v9136_v17 = vld [vmem:[%s15209_s2 + $0x668] sm:$0xf0] }
 0x337   : > { %5488 = vmatpush.bf16.msra.mxu2 %v8947_v25  ;;  %v9208_v25 = vld [vmem:[%s15209_s2 + $0x6f8] sm:$0xf0]  ;;  %v9147_v14 = vor.u32 %v10029_v42, %v9144_v6 }
 0x338   : > { %v4160_v38 = vpop.f32.mrf.mxu3  ;;  %5511 = vmatpush.bf16.msra.mxu3 %v9011_v62  ;;  %5444 = vmatpush.bf16.msra.mxu0 %v8927_v40  ;;  %v5174_v62 = vld [vmem:[#allocation2 + $0x58] sm:$0xfe] }
 0x339   : > { %v14166_v48 = vadd.f32 %v4160_v38, %v4138_v10  ;;  %v4139_v12 = vpop.f32.mrf.mxu2  ;;  %v8995_v10 = vor.u32 %v9999_v15, %v8992_v61  ;;  %v14250_v32 = vpack.c.bf16 %v14227_v11, %v5174_v62  ;;  %v5175_v61 = vld [vmem:[#allocation2 + $0x18] sm:$0xfe]  ;;  %v9126_v62 = vld [vmem:[%s15209_s2 + $0x650] sm:$0xf] }
 0x33a   : > { %v4116_v35 = vpop.f32.mrf.mxu1  ;;  %v4140_v27 = vadd.f32 %v4139_v12, %v13988_v52  ;;  %v8936_v52 = vld [vmem:[%s15209_s2 + $0x518] sm:$0xf0] }
 0x33b   : > { %v14169_v39 = vadd.f32 %v4116_v35, %v4094_v54  ;;  %v4096_v5 = vpop.f32.mrf.mxu0  ;;  %v8939_v60 = vor.u32 %v9985_v33, %v8936_v52  ;;  %v5228_v33 = vshll.u32 %v14250_v32, 16  ;;  %v9206_v52 = vld [vmem:[%s15209_s2 + $0x6f0] sm:$0xf] }
 0x33c   : > { %v4097_v2 = vadd.f32 %v4096_v5, %v13990_v19  ;;  %v9000_v19 = vld [vmem:[%s15209_s2 + $0x598] sm:$0xf0] }
 0x33d   : > { %v9003_v22 = vor.u32 %v10001_v49, %v9000_v19  ;;  %5489 = vmatpush.bf16.msra.mxu2 %v8939_v60  ;;  %v10027_v60 = vld [vmem:[%s15209_s2 + $0x664] sm:$0xf]  ;;  %v9207_v49 = vor.u32 %v10046_v58, %v9206_v52 }
 0x33e   : > { %5085 = vmatmul.bf16.gmra.mxu0 %v13213_v34  ;;  %5131 = vmatmul.bf16.gmra.mxu2 %v13213_v34  ;;  %v8998_v34 = vld [vmem:[%s15209_s2 + $0x590] sm:$0xf]  ;;  %v9139_v19 = vor.u32 %v10027_v60, %v9136_v17  ;;  %v5226_v17 = vshrl.u32 %v14250_v32, 16  ;;  %v10024_v32 = vld [vmem:[%s15209_s2 + $0x644] sm:$0xf0] }
 0x33f   : > { %5512 = vmatpush.bf16.msra.mxu3 %v9003_v22  ;;  %v8999_v46 = vor.u32 %v10002_v44, %v8998_v34  ;;  %v9200_v22 = vld [vmem:[%s15209_s2 + $0x6e8] sm:$0xf0]  ;;  %v5230_v34 = vrot.slane %v5228_v33, 1 }
 0x340   : > { %v4162_v55 = vpop.f32.mrf.mxu3  ;;  %v9203_v51 = vor.u32 %v10043_v1, %v9200_v22  ;;  %v14285_v44 = vld [vmem:[#allocation2 + $0x68] sm:$0xff] }
 0x341   : > { %v14222_v37 = vadd.f32 %v4162_v55, %v4140_v27  ;;  %v4142_v30 = vpop.f32.mrf.mxu2  ;;  %5490 = vmatpush.bf16.msra.mxu2 %v8931_v8  ;;  %5466 = vmatpush.bf16.msra.mxu1 %v8999_v46  ;;  %v14254_v27 = vld [vmem:[#allocation2 + $0x10] sm:$0xff]  ;;  %v4878_v46 = vpack.c.bf16 %v14283_v57, %v14283_v57  ;;  %v9120_v33 = vld [vmem:[%s15209_s2 + $0x648] sm:$0xf0] }
 0x342   : > { %v4119_v36 = vpop.f32.mrf.mxu1  ;;  %v4143_v54 = vadd.f32 %v4142_v30, %v14012_v28  ;;  %v10000_v28 = vld [vmem:[%s15209_s2 + $0x584] sm:$0xf0]  ;;  %v4877_v13 = vpack.c.bf16 %v14254_v27, %v14254_v27  ;;  %v9134_v30 = vld [vmem:[%s15209_s2 + $0x660] sm:$0xf] }
 0x343   : > { %v14225_v41 = vadd.f32 %v4119_v36, %v4097_v2  ;;  %v4098_v29 = vpop.f32.mrf.mxu0  ;;  %5513 = vmatpush.bf16.msra.mxu3 %v8995_v10  ;;  %v8991_v31 = vor.u32 %v10000_v28, %v8990_v50  ;;  %v9142_v2 = vld [vmem:[%s15209_s2 + $0x670] sm:$0xf]  ;;  %v10028_v10 = vld [vmem:[%s15209_s2 + $0x664] sm:$0xf0]  ;;  %v9198_v36 = vld [vmem:[%s15209_s2 + $0x6e0] sm:$0xf] }
 0x344   : > { %v9143_v7 = vor.u32 %v10030_v16, %v9142_v2  ;;  %v10044_v29 = vld [vmem:[%s15209_s2 + $0x6e4] sm:$0xf0]  ;;  %v10025_v50 = vld [vmem:[%s15209_s2 + $0x654] sm:$0xf]  ;;  %v9128_v28 = vld [vmem:[%s15209_s2 + $0x658] sm:$0xf0] }
 0x345   : > { %5108 = vmatmul.bf16.gmra.mxu1 %v13217_v45  ;;  %5154 = vmatmul.bf16.gmra.mxu3 %v13217_v45  ;;  %v10045_v45 = vld [vmem:[%s15209_s2 + $0x6f4] sm:$0xf]  ;;  %v9131_v6 = vor.u32 %v10025_v50, %v9128_v28  ;;  %v10039_v2 = vld [vmem:[%s15209_s2 + $0x6c4] sm:$0xf]  ;;  %v9176_v28 = vld [vmem:[%s15209_s2 + $0x6b8] sm:$0xf0] }
 0x346   : > { %v9211_v47 = vor.u32 %v10045_v45, %v9208_v25  ;;  %5467 = vmatpush.bf16.msra.mxu1 %v8991_v31  ;;  %5834 = vmatpush.bf16.msrb.mxu2 %v9147_v14  ;;  %v9199_v31 = vor.u32 %v10044_v29, %v9198_v36  ;;  %v10041_v45 = vld [vmem:[%s15209_s2 + $0x6d4] sm:$0xf]  ;;  %v9192_v25 = vld [vmem:[%s15209_s2 + $0x6d8] sm:$0xf0]  ;;  %v14320_v14 = vpack.c.bf16 %v14285_v44, %v5175_v61  ;;  %v5184_v36 = vld [vmem:[#allocation2 + $0x60] sm:$0x1] }
 0x347   : > { %5788 = vmatpush.bf16.msrb.mxu0 %v9143_v7  ;;  %v9184_v7 = vld [vmem:[%s15209_s2 + $0x6c8] sm:$0xf0]  ;;  %v9112_v61 = vld [vmem:[%s15209_s2 + $0x638] sm:$0xf0]  ;;  %v10037_v50 = vld [vmem:[%s15209_s2 + $0x6b4] sm:$0xf] }
 0x348   : > { %v4165_v38 = vpop.f32.mrf.mxu3  ;;  %5857 = vmatpush.bf16.msrb.mxu3 %v9211_v47  ;;  %v10026_v47 = vld [vmem:[%s15209_s2 + $0x654] sm:$0xf0]  ;;  %v5240_v22 = vshll.u32 %v14320_v14, 16 }
 0x349   : > { %v14252_v12 = vadd.f32 %v4165_v38, %v4143_v54  ;;  %v4144_v35 = vpop.f32.mrf.mxu2  ;;  %v9135_v54 = vor.u32 %v10028_v10, %v9134_v30  ;;  %v9190_v38 = vld [vmem:[%s15209_s2 + $0x6d0] sm:$0xf] }
 0x34a   : > { %v4121_v5 = vpop.f32.mrf.mxu1  ;;  %5811 = vmatpush.bf16.msrb.mxu1 %v9207_v49  ;;  %5835 = vmatpush.bf16.msrb.mxu2 %v9139_v19  ;;  %v10042_v35 = vld [vmem:[%s15209_s2 + $0x6d4] sm:$0xf0]  ;;  %v5235_v49 = vrot.slane %v13493_v9, 1  ;;  %v9187_v19 = vor.u32 %v10039_v2, %v9184_v7 }
 0x34b   : > { %v4427_v56 = vpop.f32.mrf.mxu0  ;;  %5789 = vmatpush.bf16.msrb.mxu0 %v9135_v54  ;;  %v9127_v5 = vor.u32 %v10026_v47, %v9126_v62  ;;  %v14382_v62 = vpack.c.bf16 %v5184_v36, %v14254_v27  ;;  %v10022_v47 = vld [vmem:[%s15209_s2 + $0x634] sm:$0xf0] }
 0x34c   : > { %5858 = vmatpush.bf16.msrb.mxu3 %v9203_v51 }
 0x34d   : > { %v5253_v7 = vshll.u32 %v14382_v62, 16 }
 0x34e   : > { %5090 = vmatmul.bf16.gmra.mxu0 %v4877_v13  ;;  %5136 = vmatmul.bf16.gmra.mxu2 %v4877_v13  ;;  %v10023_v13 = vld [vmem:[%s15209_s2 + $0x644] sm:$0xf] }
 0x34f   : > { %5812 = vmatpush.bf16.msrb.mxu1 %v9199_v31  ;;  %5836 = vmatpush.bf16.msrb.mxu2 %v9131_v6  ;;  %v9123_v52 = vor.u32 %v10023_v13, %v9120_v33  ;;  %v5242_v31 = vrot.slane %v5240_v22, 1  ;;  %v10035_v22 = vld [vmem:[%s15209_s2 + $0x6a4] sm:$0xf] }
 0x350   : > { %v4167_v4 = vpop.f32.mrf.mxu3  ;;  %5790 = vmatpush.bf16.msrb.mxu0 %v9127_v5 }
 0x351   : > { %v4473_v40 = vpop.f32.mrf.mxu2 }
 0x352   : > { %v4450_v8 = vpop.f32.mrf.mxu1 }
 0x353   : > { %v4451_v15 = vadd.f32 %v4450_v8, %v4427_v56  ;;  %v4429_v55 = vpop.f32.mrf.mxu0  ;;  %v9191_v56 = vor.u32 %v10042_v35, %v9190_v38  ;;  %5837 = vmatpush.bf16.msrb.mxu2 %v9123_v52 }
 0x355   : > { %v14308_v42 = vadd.f32 %v4451_v15, %v14062_v23  ;;  %5113 = vmatmul.bf16.gmra.mxu1 %v4878_v46  ;;  %5159 = vmatmul.bf16.gmra.mxu3 %v4878_v46  ;;  %v9195_v23 = vor.u32 %v10041_v45, %v9192_v25  ;;  %v5231_v15 = vor.u32 %v5230_v34, %v5226_v17  ;;  %v9182_v46 = vld [vmem:[%s15209_s2 + $0x6c0] sm:$0xf]  ;;  %v10040_v34 = vld [vmem:[%s15209_s2 + $0x6c4] sm:$0xf0]  ;;  %v5238_v45 = vshrl.u32 %v14320_v14, 16 }
 0x356   : > { %5813 = vmatpush.bf16.msrb.mxu1 %v9191_v56  ;;  %v9183_v54 = vor.u32 %v10040_v34, %v9182_v46  ;;  %v5247_v25 = vrot.slane %v13496_v0, 1  ;;  %v10019_v17 = vld [vmem:[%s15209_s2 + $0x624] sm:$0xf] }
 0x357   : > { %5859 = vmatpush.bf16.msrb.mxu3 %v9195_v23  ;;  %v5236_v10 = vsel %vm732_vm1, %v5231_v15, %v5235_v49  ;;  %v9110_v23 = vld [vmem:[%s15209_s2 + $0x630] sm:$0xf]  ;;  %v5243_v14 = vor.u32 %v5242_v31, %v5238_v45  ;;  %v9096_v45 = vld [vmem:[%s15209_s2 + $0x618] sm:$0xf0] }
 0x358   : > { %v4496_v16 = vpop.f32.mrf.mxu3  ;;  %v9111_v5 = vor.u32 %v10022_v47, %v9110_v23  ;;  %v9094_v31 = vld [vmem:[%s15209_s2 + $0x610] sm:$0xf]  ;;  %v10036_v23 = vld [vmem:[%s15209_s2 + $0x6a4] sm:$0xf0] }
 0x359   : > { %v4497_v58 = vadd.f32 %v4496_v16, %v4473_v40  ;;  %v4475_v60 = vpop.f32.mrf.mxu2  ;;  %v9118_v40 = vld [vmem:[%s15209_s2 + $0x640] sm:$0xf]  ;;  %v5185_v16 = vld [vmem:[#allocation2 + $0x28] sm:$0x1]  ;;  %v5248_v52 = vsel %vm732_vm1, %v5243_v14, %v5247_v25  ;;  %v9160_v14 = vld [vmem:[%s15209_s2 + $0x698] sm:$0xf0] }
 0x35a   : > { %v4452_v1 = vpop.f32.mrf.mxu1  ;;  %5814 = vmatpush.bf16.msrb.mxu1 %v9183_v54 }
 0x35b   : > { %v14347_v4 = vadd.f32 %v4497_v58, %v14096_v20  ;;  %v4453_v51 = vadd.f32 %v4452_v1, %v4429_v55  ;;  %v4432_v8 = vpop.f32.mrf.mxu0  ;;  %5860 = vmatpush.bf16.msrb.mxu3 %v9187_v19  ;;  %v9119_v20 = vor.u32 %v10024_v32, %v9118_v40  ;;  %v10021_v55 = vld [vmem:[%s15209_s2 + $0x634] sm:$0xf]  ;;  %v14410_v19 = vpack.c.bf16 %v5185_v16, %v14283_v57  ;;  %v9102_v40 = vld [vmem:[%s15209_s2 + $0x620] sm:$0xf]  ;;  %v10020_v32 = vld [vmem:[%s15209_s2 + $0x624] sm:$0xf0] }
 0x35c   : > { %v9115_v29 = vor.u32 %v10021_v55, %v9112_v61  ;;  %v14427_v61 = vrot.slane %v5253_v7, 1  ;;  %v10015_v16 = vld [vmem:[%s15209_s2 + $0x604] sm:$0xf] }
 0x35d   : > { %v14368_v30 = vadd.f32 %v4453_v51, %v14099_v53  ;;  %v9179_v53 = vor.u32 %v10037_v50, %v9176_v28  ;;  %5791 = vmatpush.bf16.msrb.mxu0 %v9119_v20  ;;  %v9168_v51 = vld [vmem:[%s15209_s2 + $0x6a8] sm:$0xf0]  ;;  %v9103_v20 = vor.u32 %v10020_v32, %v9102_v40  ;;  %v5261_v36 = vshll.u32 %v14410_v19, 16 }
 0x35e   : > { %5445 = vmatmul.bf16.vlgmr.msra.gmra.mxu0 %v5236_v10  ;;  %5491 = vmatmul.bf16.vlgmr.msra.gmra.mxu2 %v5236_v10  ;;  %v9171_v15 = vor.u32 %v10035_v22, %v9168_v51  ;;  %v5251_v28 = vor.u32 %v13499_v26, %v5235_v49  ;;  %v9166_v49 = vld [vmem:[%s15209_s2 + $0x6a0] sm:$0xf] }
 0x35f   : > { %5838 = vmatpush.bf16.msrb.mxu2 %v9115_v29  ;;  %5861 = vmatpush.bf16.msrb.mxu3 %v9179_v53  ;;  %v10018_v53 = vld [vmem:[%s15209_s2 + $0x614] sm:$0xf0]  ;;  %v14486_v22 = vrot.slane %v5261_v36, 1 }
 0x360   : > { %v4498_v6 = vpop.f32.mrf.mxu3 }
 0x361   : > { %v4499_v38 = vadd.f32 %v4498_v6, %v4475_v60  ;;  %v4478_v35 = vpop.f32.mrf.mxu2  ;;  %5792 = vmatpush.bf16.msrb.mxu0 %v9111_v5  ;;  %v10038_v60 = vld [vmem:[%s15209_s2 + $0x6b4] sm:$0xf0]  ;;  %v10017_v6 = vld [vmem:[%s15209_s2 + $0x614] sm:$0xf]  ;;  %v9167_v5 = vor.u32 %v10036_v23, %v9166_v49 }
 0x362   : > { %v4455_v56 = vpop.f32.mrf.mxu1 }
 0x363   : > { %v14391_v13 = vadd.f32 %v4499_v38, %v14134_v18  ;;  %v4456_v33 = vadd.f32 %v4455_v56, %v4432_v8  ;;  %v4434_v2 = vpop.f32.mrf.mxu0  ;;  %v9174_v18 = vld [vmem:[%s15209_s2 + $0x6b0] sm:$0xf]  ;;  %5862 = vmatpush.bf16.msrb.mxu3 %v9171_v15  ;;  %v5256_v38 = vsel %vm732_vm1, %v5251_v28, %v14427_v61  ;;  %v10033_v56 = vld [vmem:[%s15209_s2 + $0x694] sm:$0xf] }
 0x364   : > { %v9175_v1 = vor.u32 %v10038_v60, %v9174_v18  ;;  %v9158_v60 = vld [vmem:[%s15209_s2 + $0x690] sm:$0xf] }
 0x365   : > { %v14398_v58 = vadd.f32 %v4456_v33, %v14137_v43  ;;  %5468 = vmatmul.bf16.vlgmr.msra.gmra.mxu1 %v5248_v52  ;;  %5514 = vmatmul.bf16.vlgmr.msra.gmra.mxu3 %v5248_v52  ;;  %v9104_v43 = vld [vmem:[%s15209_s2 + $0x628] sm:$0xf0]  ;;  %v9086_v33 = vld [vmem:[%s15209_s2 + $0x600] sm:$0xf] }
 0x366   : > { %v9107_v8 = vor.u32 %v10019_v17, %v9104_v43  ;;  %5815 = vmatpush.bf16.msrb.mxu1 %v9175_v1  ;;  %5793 = vmatpush.bf16.msrb.mxu0 %v9103_v20  ;;  %v9088_v52 = vld [vmem:[%s15209_s2 + $0x608] sm:$0xf0]  ;;  %v10034_v17 = vld [vmem:[%s15209_s2 + $0x694] sm:$0xf0]  ;;  %v10031_v1 = vld [vmem:[%s15209_s2 + $0x684] sm:$0xf]  ;;  %v5259_v20 = vor.u32 %v13502_v21, %v5247_v25 }
 0x367   : > { %v9091_v18 = vor.u32 %v10015_v16, %v9088_v52  ;;  %v9159_v51 = vor.u32 %v10034_v17, %v9158_v60  ;;  %v9150_v25 = vld [vmem:[%s15209_s2 + $0x680] sm:$0xf]  ;;  %v9302_v52 = vld [vmem:[%s15209_s2 + $0x770] sm:$0xf]  ;;  %v9296_v60 = vld [vmem:[%s15209_s2 + $0x768] sm:$0xf0] }
 0x368   : > { %v4501_v46 = vpop.f32.mrf.mxu3  ;;  %5839 = vmatpush.bf16.msrb.mxu2 %v9107_v8  ;;  %v9152_v8 = vld [vmem:[%s15209_s2 + $0x688] sm:$0xf0] }
 0x369   : > { %v4502_v34 = vadd.f32 %v4501_v46, %v4478_v35  ;;  %v4480_v55 = vpop.f32.mrf.mxu2  ;;  %v9099_v35 = vor.u32 %v10017_v6, %v9096_v45  ;;  %v9155_v32 = vor.u32 %v10031_v1, %v9152_v8  ;;  %v5539_v6 = vld [vmem:[#allocation2 + $0x58] sm:$0xe0] }
 0x36a   : > { %v4457_v10 = vpop.f32.mrf.mxu1  ;;  %5816 = vmatpush.bf16.msrb.mxu1 %v9167_v5  ;;  %v5543_v23 = vpack.c.bf16 %v14227_v11, %v5539_v6 }
 0x36b   : > { %v14431_v54 = vadd.f32 %v4502_v34, %v14166_v48  ;;  %v4458_v29 = vadd.f32 %v4457_v10, %v4434_v2  ;;  %v4437_v50 = vpop.f32.mrf.mxu0  ;;  %v9095_v48 = vor.u32 %v10018_v53, %v9094_v31  ;;  %v10016_v2 = vld [vmem:[%s15209_s2 + $0x604] sm:$0xf0]  ;;  %v10077_v31 = vld [vmem:[%s15209_s2 + $0x7f4] sm:$0xf]  ;;  %v9368_v53 = vld [vmem:[%s15209_s2 + $0x7f8] sm:$0xf0] }
 0x36c   : > { %5840 = vmatpush.bf16.msrb.mxu2 %v9099_v35  ;;  %v9087_v7 = vor.u32 %v10016_v2, %v9086_v33  ;;  %v9371_v45 = vor.u32 %v10077_v31, %v9368_v53  ;;  %v5581_v2 = vshrl.u32 %v5543_v23, 16  ;;  %v5584_v16 = vshll.u32 %v5543_v23, 16  ;;  %v9288_v53 = vld [vmem:[%s15209_s2 + $0x758] sm:$0xf0] }
 0x36d   : > { %v14455_v47 = vadd.f32 %v4458_v29, %v14169_v39  ;;  %v9163_v39 = vor.u32 %v10033_v56, %v9160_v14  ;;  %5794 = vmatpush.bf16.msrb.mxu0 %v9095_v48  ;;  %v5264_v29 = vsel %vm732_vm1, %v5259_v20, %v14486_v22  ;;  %v5265_v56 = vshrl.u32 %v14382_v62, 16  ;;  %v9366_v62 = vld [vmem:[%s15209_s2 + $0x7f0] sm:$0xf]  ;;  %v9352_v23 = vld [vmem:[%s15209_s2 + $0x7d8] sm:$0xf0] }
 0x36e   : > { %5450 = vmatmul.bf16.gmra.mxu0 %v5256_v38  ;;  %5496 = vmatmul.bf16.gmra.mxu2 %v5256_v38  ;;  %v14551_v20 = vrot.slane %v5581_v2, 2 }
 0x36f   : > { %5863 = vmatpush.bf16.msrb.mxu3 %v9163_v39  ;;  %5817 = vmatpush.bf16.msrb.mxu1 %v9159_v51  ;;  %v5267_v39 = vor.u32 %v5265_v56, %v14427_v61  ;;  %v10078_v61 = vld [vmem:[%s15209_s2 + $0x7f4] sm:$0xf0]  ;;  %v9360_v51 = vld [vmem:[%s15209_s2 + $0x7e8] sm:$0xf0]  ;;  %v9350_v56 = vld [vmem:[%s15209_s2 + $0x7d0] sm:$0xf] }
 0x370   : > { %v4503_v43 = vpop.f32.mrf.mxu3  ;;  %5841 = vmatpush.bf16.msrb.mxu2 %v9091_v18  ;;  %v10059_v18 = vld [vmem:[%s15209_s2 + $0x764] sm:$0xf]  ;;  %v9367_v17 = vor.u32 %v10078_v61, %v9366_v62  ;;  %v9344_v61 = vld [vmem:[%s15209_s2 + $0x7c8] sm:$0xf0] }
 0x371   : > { %v4504_v15 = vadd.f32 %v4503_v43, %v4480_v55  ;;  %v4483_v40 = vpop.f32.mrf.mxu2  ;;  %5795 = vmatpush.bf16.msrb.mxu0 %v9087_v7  ;;  %v10062_v7 = vld [vmem:[%s15209_s2 + $0x774] sm:$0xf0]  ;;  %v9299_v1 = vor.u32 %v10059_v18, %v9296_v60  ;;  %v10075_v43 = vld [vmem:[%s15209_s2 + $0x7e4] sm:$0xf] }
 0x372   : > { %v4460_v46 = vpop.f32.mrf.mxu1 }
 0x373   : > { %v14495_v34 = vadd.f32 %v4504_v15, %v14222_v37  ;;  %v4461_v10 = vadd.f32 %v4460_v46, %v4437_v50  ;;  %v4439_v36 = vpop.f32.mrf.mxu0  ;;  %5864 = vmatpush.bf16.msrb.mxu3 %v9155_v32  ;;  %v10032_v37 = vld [vmem:[%s15209_s2 + $0x684] sm:$0xf0]  ;;  %v10061_v50 = vld [vmem:[%s15209_s2 + $0x774] sm:$0xf]  ;;  %v9363_v15 = vor.u32 %v10075_v43, %v9360_v51  ;;  %v5268_v32 = vshrl.u32 %v14410_v19, 16 }
 0x374   : > { %v9151_v28 = vor.u32 %v10032_v37, %v9150_v25  ;;  %v5588_v36 = vrot.slane %v13499_v26, 2  ;;  %v9294_v19 = vld [vmem:[%s15209_s2 + $0x760] sm:$0xf] }
 0x375   : > { %v14500_v55 = vadd.f32 %v4461_v10, %v14225_v41  ;;  %5473 = vmatmul.bf16.gmra.mxu1 %v5264_v29  ;;  %5519 = vmatmul.bf16.gmra.mxu3 %v5264_v29  ;;  %v9304_v41 = vld [vmem:[%s15209_s2 + $0x778] sm:$0xf0]  ;;  %v14553_v10 = vrot.slane %v5584_v16, 3  ;;  %v5589_v29 = vrot.slane %v13493_v9, 3  ;;  %v9358_v26 = vld [vmem:[%s15209_s2 + $0x7e0] sm:$0xf] }
 0x376   : > { %v9307_v48 = vor.u32 %v10061_v50, %v9304_v41  ;;  %5818 = vmatpush.bf16.msrb.mxu1 %v9151_v28  ;;  %v5270_v50 = vor.u32 %v5268_v32, %v14486_v22  ;;  %v5540_v28 = vld [vmem:[#allocation2 + $0x18] sm:$0xe0]  ;;  %v10060_v41 = vld [vmem:[%s15209_s2 + $0x764] sm:$0xf0]  ;;  %v10057_v22 = vld [vmem:[%s15209_s2 + $0x754] sm:$0xf] }
 0x377   : > { %6182 = vmatpush.bf16.msra.mxu3 %v9371_v45  ;;  %v9295_v31 = vor.u32 %v10060_v41, %v9294_v19  ;;  %v10076_v9 = vld [vmem:[%s15209_s2 + $0x7e4] sm:$0xf0]  ;;  %v9291_v45 = vor.u32 %v10057_v22, %v9288_v53  ;;  %v10055_v16 = vld [vmem:[%s15209_s2 + $0x744] sm:$0xf]  ;;  %v5600_v32 = vrot.slane %v13502_v21, 2 }
 0x378   : > { %v4506_v49 = vpop.f32.mrf.mxu3  ;;  %6159 = vmatpush.bf16.msra.mxu2 %v9307_v48  ;;  %v9359_v48 = vor.u32 %v10076_v9, %v9358_v26  ;;  %v9342_v21 = vld [vmem:[%s15209_s2 + $0x7c0] sm:$0xf]  ;;  %v10069_v9 = vld [vmem:[%s15209_s2 + $0x7b4] sm:$0xf]  ;;  %v9336_v22 = vld [vmem:[%s15209_s2 + $0x7b8] sm:$0xf0] }
 0x379   : > { %v4507_v38 = vadd.f32 %v4506_v49, %v4483_v40  ;;  %v4485_v35 = vpop.f32.mrf.mxu2  ;;  %v10073_v49 = vld [vmem:[%s15209_s2 + $0x7d4] sm:$0xf] }
 0x37a   : > { %v4462_v5 = vpop.f32.mrf.mxu1  ;;  %6136 = vmatpush.bf16.msra.mxu1 %v9367_v17  ;;  %v5544_v35 = vpack.c.bf16 %v14285_v44, %v5540_v28  ;;  %v14610_v17 = vor.u32 %v5589_v29, %v5588_v36  ;;  %v9278_v36 = vld [vmem:[%s15209_s2 + $0x740] sm:$0xf] }
 0x37b   : > { %v14523_v14 = vadd.f32 %v4507_v38, %v14252_v12  ;;  %v4778_v33 = vpop.f32.mrf.mxu0  ;;  %v9303_v12 = vor.u32 %v10062_v7, %v9302_v52  ;;  %6183 = vmatpush.bf16.msra.mxu3 %v9363_v15  ;;  %v9286_v38 = vld [vmem:[%s15209_s2 + $0x750] sm:$0xf]  ;;  %v10058_v5 = vld [vmem:[%s15209_s2 + $0x754] sm:$0xf0]  ;;  %v9280_v52 = vld [vmem:[%s15209_s2 + $0x748] sm:$0xf0] }
 0x37c   : > { %6160 = vmatpush.bf16.msra.mxu2 %v9299_v1  ;;  %v10071_v7 = vld [vmem:[%s15209_s2 + $0x7c4] sm:$0xf]  ;;  %v5596_v15 = vshll.u32 %v5544_v35, 16 }
 0x37d   : > { %6113 = vmatpush.bf16.msra.mxu0 %v9303_v12  ;;  %v9283_v12 = vor.u32 %v10055_v16, %v9280_v52  ;;  %v5541_v1 = vld [vmem:[#allocation2 + $0x60] sm:$0x1f]  ;;  %v9347_v43 = vor.u32 %v10071_v7, %v9344_v61 }
 0x37e   : > { %5455 = vmatmul.bf16.gmra.mxu0 %v5267_v39  ;;  %5501 = vmatmul.bf16.gmra.mxu2 %v5267_v39  ;;  %v9287_v39 = vor.u32 %v10058_v5, %v9286_v38  ;;  %v10054_v5 = vld [vmem:[%s15209_s2 + $0x734] sm:$0xf0] }
 0x37f   : > { %6137 = vmatpush.bf16.msra.mxu1 %v9359_v48  ;;  %v5598_v48 = vrot.slane %v5596_v15, 3  ;;  %v10067_v15 = vld [vmem:[%s15209_s2 + $0x7a4] sm:$0xf] }
 0x380   : > { %v4508_v8 = vpop.f32.mrf.mxu3  ;;  %6161 = vmatpush.bf16.msra.mxu2 %v9291_v45  ;;  %v9339_v45 = vor.u32 %v10069_v9, %v9336_v22  ;;  %v10050_v9 = vld [vmem:[%s15209_s2 + $0x714] sm:$0xf0]  ;;  %v10049_v22 = vld [vmem:[%s15209_s2 + $0x714] sm:$0xf] }
 0x381   : > { %v4824_v40 = vpop.f32.mrf.mxu2  ;;  %6114 = vmatpush.bf16.msra.mxu0 %v9295_v31  ;;  %v5593_v8 = vshrl.u32 %v5544_v35, 16 }
 0x382   : > { %v4801_v46 = vpop.f32.mrf.mxu1 }
 0x383   : > { %v4802_v25 = vadd.f32 %v4801_v46, %v4778_v33  ;;  %v4780_v37 = vpop.f32.mrf.mxu0  ;;  %v10074_v33 = vld [vmem:[%s15209_s2 + $0x7d4] sm:$0xf0]  ;;  %v5601_v46 = vrot.slane %v13496_v0, 3  ;;  %v10056_v0 = vld [vmem:[%s15209_s2 + $0x744] sm:$0xf0]  ;;  %v5595_v53 = vrot.slane %v5593_v8, 2 }
 0x384   : > { %v9351_v2 = vor.u32 %v10074_v33, %v9350_v56  ;;  %6162 = vmatpush.bf16.msra.mxu2 %v9283_v12  ;;  %v9279_v29 = vor.u32 %v10056_v0, %v9278_v36 }
 0x385   : > { %v14577_v6 = vadd.f32 %v4802_v25, %v14308_v42  ;;  %5478 = vmatmul.bf16.gmra.mxu1 %v5270_v50  ;;  %5524 = vmatmul.bf16.gmra.mxu3 %v5270_v50  ;;  %v9355_v42 = vor.u32 %v10073_v49, %v9352_v23  ;;  %v5542_v25 = vld [vmem:[#allocation2 + $0x28] sm:$0x1f]  ;;  %v14650_v23 = vor.u32 %v5601_v46, %v5600_v32 }
 0x386   : > { %6115 = vmatpush.bf16.msra.mxu0 %v9287_v39  ;;  %6138 = vmatpush.bf16.msra.mxu1 %v9351_v2  ;;  %v5599_v2 = vor.u32 %v5598_v48, %v5595_v53  ;;  %v9328_v32 = vld [vmem:[%s15209_s2 + $0x7a8] sm:$0xf0]  ;;  %v9326_v48 = vld [vmem:[%s15209_s2 + $0x7a0] sm:$0xf] }
 0x387   : > { %6184 = vmatpush.bf16.msra.mxu3 %v9355_v42  ;;  %v9270_v42 = vld [vmem:[%s15209_s2 + $0x730] sm:$0xf] }
 0x388   : > { %v4847_v62 = vpop.f32.mrf.mxu3  ;;  %v5603_v12 = vsel %vm2450_vm4, %v5599_v2, %v14650_v23 }
 0x389   : > { %v4848_v18 = vadd.f32 %v4847_v62, %v4824_v40  ;;  %v4826_v60 = vpop.f32.mrf.mxu2  ;;  %v5587_v40 = vor.u32 %v14553_v10, %v14551_v20  ;;  %v10072_v20 = vld [vmem:[%s15209_s2 + $0x7c4] sm:$0xf0]  ;;  %v10053_v10 = vld [vmem:[%s15209_s2 + $0x734] sm:$0xf] }
 0x38a   : > { %v4803_v51 = vpop.f32.mrf.mxu1  ;;  %v9343_v26 = vor.u32 %v10072_v20, %v9342_v21  ;;  %6116 = vmatpush.bf16.msra.mxu0 %v9279_v29 }
 0x38b   : > { %v14615_v50 = vadd.f32 %v4848_v18, %v14347_v4  ;;  %v4804_v28 = vadd.f32 %v4803_v51, %v4780_v37  ;;  %v4783_v19 = vpop.f32.mrf.mxu0  ;;  %v5545_v4 = vpack.c.bf16 %v5541_v1, %v14254_v27  ;;  %6185 = vmatpush.bf16.msra.mxu3 %v9347_v43  ;;  %v9272_v37 = vld [vmem:[%s15209_s2 + $0x738] sm:$0xf0]  ;;  %v5591_v27 = vsel %vm2450_vm4, %v5587_v40, %v14610_v17  ;;  %v10051_v51 = vld [vmem:[%s15209_s2 + $0x724] sm:$0xf] }
 0x38c   : > { %v9275_v31 = vor.u32 %v10053_v10, %v9272_v37  ;;  %6139 = vmatpush.bf16.msra.mxu1 %v9343_v26 }
 0x38d   : > { %v14639_v41 = vadd.f32 %v4804_v28, %v14368_v30  ;;  %v5546_v30 = vpack.c.bf16 %v5542_v25, %v14283_v57  ;;  %v5605_v38 = vshrl.u32 %v5545_v4, 16  ;;  %v5608_v35 = vshll.u32 %v5545_v4, 16  ;;  %v9262_v28 = vld [vmem:[%s15209_s2 + $0x720] sm:$0xf] }
 0x38e   : > { %5796 = vmatmul.bf16.vlgmr.msrb.gmra.mxu0 %v5591_v27  ;;  %5842 = vmatmul.bf16.vlgmr.msrb.gmra.mxu2 %v5591_v27  ;;  %v9271_v57 = vor.u32 %v10054_v5, %v9270_v42  ;;  %v9331_v25 = vor.u32 %v10067_v15, %v9328_v32  ;;  %v10065_v42 = vld [vmem:[%s15209_s2 + $0x794] sm:$0xf]  ;;  %v9320_v5 = vld [vmem:[%s15209_s2 + $0x798] sm:$0xf0] }
 0x38f   : > { %6163 = vmatpush.bf16.msra.mxu2 %v9275_v31  ;;  %6186 = vmatpush.bf16.msra.mxu3 %v9339_v45  ;;  %v5614_v62 = vshrl.u32 %v5546_v30, 16  ;;  %v5607_v61 = vrot.slane %v5605_v38, 2  ;;  %v5610_v18 = vrot.slane %v5608_v35, 3  ;;  %v5617_v1 = vshll.u32 %v5546_v30, 16  ;;  %v9254_v31 = vld [vmem:[%s15209_s2 + $0x710] sm:$0xf] }
 0x390   : > { %v4849_v49 = vpop.f32.mrf.mxu3  ;;  %6117 = vmatpush.bf16.msra.mxu0 %v9271_v57  ;;  %v9255_v53 = vor.u32 %v10050_v9, %v9254_v31  ;;  %v10068_v45 = vld [vmem:[%s15209_s2 + $0x7a4] sm:$0xf0]  ;;  %v9248_v57 = vld [vmem:[%s15209_s2 + $0x708] sm:$0xf0]  ;;  %v9462_v9 = vld [vmem:[%s15209_s2 + $0x870] sm:$0xf] }
 0x391   : > { %v4850_v56 = vadd.f32 %v4849_v49, %v4826_v60  ;;  %v4829_v33 = vpop.f32.mrf.mxu2  ;;  %v10070_v60 = vld [vmem:[%s15209_s2 + $0x7b4] sm:$0xf0]  ;;  %v14690_v4 = vor.u32 %v5610_v18, %v5607_v61  ;;  %v5616_v20 = vrot.slane %v5614_v62, 2  ;;  %v5619_v10 = vrot.slane %v5617_v1, 3  ;;  %v10063_v62 = vld [vmem:[%s15209_s2 + $0x784] sm:$0xf] }
 0x392   : > { %v4806_v39 = vpop.f32.mrf.mxu1  ;;  %v9327_v35 = vor.u32 %v10068_v45, %v9326_v48  ;;  %v9312_v1 = vld [vmem:[%s15209_s2 + $0x788] sm:$0xf0]  ;;  %v10091_v48 = vld [vmem:[%s15209_s2 + $0x864] sm:$0xf] }
 0x393   : > { %v14659_v16 = vadd.f32 %v4850_v56, %v14391_v13  ;;  %v4807_v52 = vadd.f32 %v4806_v39, %v4783_v19  ;;  %v4785_v7 = vpop.f32.mrf.mxu0  ;;  %v9334_v13 = vld [vmem:[%s15209_s2 + $0x7b0] sm:$0xf]  ;;  %v10052_v19 = vld [vmem:[%s15209_s2 + $0x724] sm:$0xf0]  ;;  %6187 = vmatpush.bf16.msra.mxu3 %v9331_v25  ;;  %v5612_v49 = vsel %vm2450_vm4, %v14610_v17, %v14690_v4  ;;  %v9246_v56 = vld [vmem:[%s15209_s2 + $0x700] sm:$0xf]  ;;  %v14746_v61 = vor.u32 %v5619_v10, %v5616_v20 }
 0x394   : > { %v9335_v8 = vor.u32 %v10070_v60, %v9334_v13  ;;  %v9263_v36 = vor.u32 %v10052_v19, %v9262_v28  ;;  %v10048_v17 = vld [vmem:[%s15209_s2 + $0x704] sm:$0xf0]  ;;  %v10093_v19 = vld [vmem:[%s15209_s2 + $0x874] sm:$0xf]  ;;  %v9456_v45 = vld [vmem:[%s15209_s2 + $0x868] sm:$0xf0] }
 0x395   : > { %v14664_v43 = vadd.f32 %v4807_v52, %v14398_v58  ;;  %5819 = vmatmul.bf16.vlgmr.msrb.gmra.mxu1 %v5603_v12  ;;  %5865 = vmatmul.bf16.vlgmr.msrb.gmra.mxu3 %v5603_v12  ;;  %v9264_v58 = vld [vmem:[%s15209_s2 + $0x728] sm:$0xf0]  ;;  %v9247_v39 = vor.u32 %v10048_v17, %v9246_v56  ;;  %v9318_v52 = vld [vmem:[%s15209_s2 + $0x790] sm:$0xf]  ;;  %v10064_v28 = vld [vmem:[%s15209_s2 + $0x784] sm:$0xf0] }
 0x396   : > { %v9267_v46 = vor.u32 %v10051_v51, %v9264_v58  ;;  %6140 = vmatpush.bf16.msra.mxu1 %v9335_v8  ;;  %6118 = vmatpush.bf16.msra.mxu0 %v9263_v36  ;;  %v9315_v51 = vor.u32 %v10063_v62, %v9312_v1  ;;  %v9528_v36 = vld [vmem:[%s15209_s2 + $0x8f8] sm:$0xf0]  ;;  %v10108_v62 = vld [vmem:[%s15209_s2 + $0x8e4] sm:$0xf0] }
 0x398   : > { %v4852_v40 = vpop.f32.mrf.mxu3  ;;  %6164 = vmatpush.bf16.msra.mxu2 %v9267_v46  ;;  %v5621_v46 = vsel %vm2450_vm4, %v14650_v23, %v14746_v61 }
 0x399   : > { %v4853_v0 = vadd.f32 %v4852_v40, %v4829_v33  ;;  %v4831_v21 = vpop.f32.mrf.mxu2  ;;  %v10047_v33 = vld [vmem:[%s15209_s2 + $0x704] sm:$0xf]  ;;  %v10109_v40 = vld [vmem:[%s15209_s2 + $0x8f4] sm:$0xf] }
 0x39a   : > { %v4808_v29 = vpop.f32.mrf.mxu1  ;;  %6119 = vmatpush.bf16.msra.mxu0 %v9255_v53  ;;  %v9251_v2 = vor.u32 %v10047_v33, %v9248_v57  ;;  %6141 = vmatpush.bf16.msra.mxu1 %v9327_v35  ;;  %v9526_v53 = vld [vmem:[%s15209_s2 + $0x8f0] sm:$0xf]  ;;  %v10107_v35 = vld [vmem:[%s15209_s2 + $0x8e4] sm:$0xf]  ;;  %v5890_v57 = vld [vmem:[#allocation2 + $0x58] sm:$0xc0] }
 0x39b   : > { %v14693_v37 = vadd.f32 %v4853_v0, %v14431_v54  ;;  %v4809_v27 = vadd.f32 %v4808_v29, %v4785_v7  ;;  %v4788_v26 = vpop.f32.mrf.mxu0  ;;  %v9256_v54 = vld [vmem:[%s15209_s2 + $0x718] sm:$0xf0]  ;;  %v10066_v7 = vld [vmem:[%s15209_s2 + $0x794] sm:$0xf0] }
 0x39c   : > { %v9259_v38 = vor.u32 %v10049_v22, %v9256_v54  ;;  %v9319_v18 = vor.u32 %v10066_v7, %v9318_v52  ;;  %v10094_v22 = vld [vmem:[%s15209_s2 + $0x874] sm:$0xf0]  ;;  %v9518_v52 = vld [vmem:[%s15209_s2 + $0x8e0] sm:$0xf] }
 0x39d   : > { %v14714_v30 = vadd.f32 %v4809_v27, %v14455_v47  ;;  %v9323_v47 = vor.u32 %v10065_v42, %v9320_v5  ;;  %v9463_v54 = vor.u32 %v10094_v22, %v9462_v9 }
 0x39e   : > { %5801 = vmatmul.bf16.gmra.mxu0 %v5612_v49  ;;  %5847 = vmatmul.bf16.gmra.mxu2 %v5612_v49 }
 0x39f   : > { %6165 = vmatpush.bf16.msra.mxu2 %v9259_v38  ;;  %6188 = vmatpush.bf16.msra.mxu3 %v9323_v47  ;;  %v9459_v38 = vor.u32 %v10091_v48, %v9456_v45  ;;  %v9502_v48 = vld [vmem:[%s15209_s2 + $0x8c0] sm:$0xf] }
 0x3a0   : > { %v4854_v12 = vpop.f32.mrf.mxu3  ;;  %6120 = vmatpush.bf16.msra.mxu0 %v9247_v39  ;;  %6142 = vmatpush.bf16.msra.mxu1 %v9319_v18  ;;  %v9454_v39 = vld [vmem:[%s15209_s2 + $0x860] sm:$0xf]  ;;  %v9448_v18 = vld [vmem:[%s15209_s2 + $0x858] sm:$0xf0] }
 0x3a1   : > { %v4855_v13 = vadd.f32 %v4854_v12, %v4831_v21  ;;  %v4834_v60 = vpop.f32.mrf.mxu2  ;;  %v9531_v21 = vor.u32 %v10109_v40, %v9528_v36  ;;  %v10089_v12 = vld [vmem:[%s15209_s2 + $0x854] sm:$0xf] }
 0x3a2   : > { %v4811_v8 = vpop.f32.mrf.mxu1 }
 0x3a3   : > { %v14752_v58 = vadd.f32 %v4855_v13, %v14495_v34  ;;  %v4812_v15 = vadd.f32 %v4811_v8, %v4788_v26  ;;  %v4790_v32 = vpop.f32.mrf.mxu0  ;;  %6166 = vmatpush.bf16.msra.mxu2 %v9251_v2  ;;  %6189 = vmatpush.bf16.msra.mxu3 %v9315_v51  ;;  %v9310_v34 = vld [vmem:[%s15209_s2 + $0x780] sm:$0xf]  ;;  %v10092_v2 = vld [vmem:[%s15209_s2 + $0x864] sm:$0xf0]  ;;  %v9519_v13 = vor.u32 %v10108_v62, %v9518_v52  ;;  %v10105_v51 = vld [vmem:[%s15209_s2 + $0x8d4] sm:$0xf] }
 0x3a4   : > { %v9311_v23 = vor.u32 %v10064_v28, %v9310_v34  ;;  %6464 = vmatpush.bf16.msrb.mxu0 %v9463_v54  ;;  %v9455_v7 = vor.u32 %v10092_v2, %v9454_v39  ;;  %v9512_v8 = vld [vmem:[%s15209_s2 + $0x8d8] sm:$0xf0]  ;;  %v10106_v34 = vld [vmem:[%s15209_s2 + $0x8d4] sm:$0xf0]  ;;  %v9438_v54 = vld [vmem:[%s15209_s2 + $0x840] sm:$0xf] }
 0x3a5   : > { %v14758_v25 = vadd.f32 %v4812_v15, %v14500_v55  ;;  %5824 = vmatmul.bf16.gmra.mxu1 %v5621_v46  ;;  %5870 = vmatmul.bf16.gmra.mxu3 %v5621_v46  ;;  %v9464_v55 = vld [vmem:[%s15209_s2 + $0x878] sm:$0xf0]  ;;  %v9446_v15 = vld [vmem:[%s15209_s2 + $0x850] sm:$0xf]  ;;  %v9515_v32 = vor.u32 %v10105_v51, %v9512_v8  ;;  %v5941_v39 = vrot.slane %v13487_v59, 3 }
 0x3a6   : > { %v9467_v0 = vor.u32 %v10093_v19, %v9464_v55  ;;  %6143 = vmatpush.bf16.msra.mxu1 %v9311_v23  ;;  %v9510_v46 = vld [vmem:[%s15209_s2 + $0x8d0] sm:$0xf]  ;;  %v9440_v23 = vld [vmem:[%s15209_s2 + $0x848] sm:$0xf0]  ;;  %v10103_v55 = vld [vmem:[%s15209_s2 + $0x8c4] sm:$0xf] }
 0x3a7   : > { %6533 = vmatpush.bf16.msrb.mxu3 %v9531_v21  ;;  %v9511_v19 = vor.u32 %v10106_v34, %v9510_v46  ;;  %v9430_v2 = vld [vmem:[%s15209_s2 + $0x830] sm:$0xf]  ;;  %v10086_v52 = vld [vmem:[%s15209_s2 + $0x834] sm:$0xf0]  ;;  %v10083_v34 = vld [vmem:[%s15209_s2 + $0x824] sm:$0xf] }
 0x3a8   : > { %v4857_v29 = vpop.f32.mrf.mxu3  ;;  %6510 = vmatpush.bf16.msrb.mxu2 %v9467_v0  ;;  %6465 = vmatpush.bf16.msrb.mxu0 %v9455_v7  ;;  %v9504_v0 = vld [vmem:[%s15209_s2 + $0x8c8] sm:$0xf0]  ;;  %v10102_v46 = vld [vmem:[%s15209_s2 + $0x8b4] sm:$0xf0] }
 0x3a9   : > { %v4858_v20 = vadd.f32 %v4857_v29, %v4834_v60  ;;  %v4836_v10 = vpop.f32.mrf.mxu2  ;;  %v9451_v60 = vor.u32 %v10089_v12, %v9448_v18  ;;  %v9431_v12 = vor.u32 %v10086_v52, %v9430_v2  ;;  %v9408_v52 = vld [vmem:[%s15209_s2 + $0x808] sm:$0xf0] }
 0x3aa   : > { %v4813_v27 = vpop.f32.mrf.mxu1  ;;  %v9507_v10 = vor.u32 %v10103_v55, %v9504_v0 }
 0x3ab   : > { %v14779_v26 = vadd.f32 %v4858_v20, %v14523_v14  ;;  %v5081_v31 = vpop.f32.mrf.mxu0  ;;  %v10110_v14 = vld [vmem:[%s15209_s2 + $0x8f4] sm:$0xf0]  ;;  %v5938_v20 = vrot.slane %v13485_v3, 3  ;;  %v10080_v3 = vld [vmem:[%s15209_s2 + $0x804] sm:$0xf0] }
 0x3ac   : > { %v9527_v49 = vor.u32 %v10110_v14, %v9526_v53  ;;  %6511 = vmatpush.bf16.msrb.mxu2 %v9459_v38  ;;  %v10088_v14 = vld [vmem:[%s15209_s2 + $0x844] sm:$0xf0]  ;;  %v9432_v38 = vld [vmem:[%s15209_s2 + $0x838] sm:$0xf0] }
 0x3ad   : > { %v9439_v45 = vor.u32 %v10088_v14, %v9438_v54 }
 0x3ae   : > { %5806 = vmatmul.bf16.gmra.mxu0 %v14690_v4  ;;  %5852 = vmatmul.bf16.gmra.mxu2 %v14690_v4  ;;  %v9520_v4 = vld [vmem:[%s15209_s2 + $0x8e8] sm:$0xf0] }
 0x3af   : > { %v9523_v5 = vor.u32 %v10107_v35, %v9520_v4  ;;  %6487 = vmatpush.bf16.msrb.mxu1 %v9527_v49  ;;  %v10085_v49 = vld [vmem:[%s15209_s2 + $0x834] sm:$0xf] }
 0x3b0   : > { %v4859_v42 = vpop.f32.mrf.mxu3  ;;  %6512 = vmatpush.bf16.msrb.mxu2 %v9451_v60 }
 0x3b1   : > { %v5127_v56 = vpop.f32.mrf.mxu2  ;;  %6534 = vmatpush.bf16.msrb.mxu3 %v9523_v5  ;;  %v5891_v42 = vld [vmem:[#allocation2 + $0x18] sm:$0xc0] }
 0x3b2   : > { %v5104_v47 = vpop.f32.mrf.mxu1 }
 0x3b3   : > { %v5105_v17 = vadd.f32 %v5104_v47, %v5081_v31  ;;  %v5083_v33 = vpop.f32.mrf.mxu0  ;;  %6488 = vmatpush.bf16.msrb.mxu1 %v9519_v13  ;;  %v10101_v47 = vld [vmem:[%s15209_s2 + $0x8b4] sm:$0xf]  ;;  %v5892_v13 = vld [vmem:[#allocation2 + $0x60] sm:$0x3f] }
 0x3b5   : > { %v14826_v1 = vadd.f32 %v5105_v17, %v14577_v6  ;;  %5829 = vmatmul.bf16.gmra.mxu1 %v14746_v61  ;;  %5875 = vmatmul.bf16.gmra.mxu3 %v14746_v61  ;;  %v5894_v6 = vpack.c.bf16 %v14227_v11, %v5890_v57  ;;  %v10090_v61 = vld [vmem:[%s15209_s2 + $0x854] sm:$0xf0]  ;;  %v10087_v11 = vld [vmem:[%s15209_s2 + $0x844] sm:$0xf]  ;;  %v9496_v17 = vld [vmem:[%s15209_s2 + $0x8b8] sm:$0xf0] }
 0x3b6   : > { %v9447_v28 = vor.u32 %v10090_v61, %v9446_v15  ;;  %6535 = vmatpush.bf16.msrb.mxu3 %v9515_v32  ;;  %v9443_v36 = vor.u32 %v10087_v11, %v9440_v23  ;;  %v14912_v32 = vld [vmem:[#allocation2 + $0x10] sm:$0xff]  ;;  %v9488_v11 = vld [vmem:[%s15209_s2 + $0x8a8] sm:$0xf0] }
 0x3b7   : > { %v5937_v31 = vrot.slane %v5894_v6, 3  ;;  %6489 = vmatpush.bf16.msrb.mxu1 %v9511_v19  ;;  %v5896_v61 = vpack.c.bf16 %v5892_v13, %v14912_v32  ;;  %v10099_v19 = vld [vmem:[%s15209_s2 + $0x8a4] sm:$0xf] }
 0x3b8   : > { %v5150_v40 = vpop.f32.mrf.mxu3  ;;  %6466 = vmatpush.bf16.msrb.mxu0 %v9447_v28  ;;  %6513 = vmatpush.bf16.msrb.mxu2 %v9443_v36  ;;  %v9424_v28 = vld [vmem:[%s15209_s2 + $0x828] sm:$0xf0]  ;;  %v9491_v55 = vor.u32 %v10099_v19, %v9488_v11  ;;  %v10084_v36 = vld [vmem:[%s15209_s2 + $0x824] sm:$0xf0] }
 0x3b9   : > { %v5151_v21 = vadd.f32 %v5150_v40, %v5127_v56  ;;  %v5129_v29 = vpop.f32.mrf.mxu2  ;;  %v5939_v4 = vsel %vm2808_vm5, %v5937_v31, %v5938_v20  ;;  %v9435_v56 = vor.u32 %v10085_v49, %v9432_v38  ;;  %v9427_v23 = vor.u32 %v10083_v34, %v9424_v28  ;;  %v9422_v40 = vld [vmem:[%s15209_s2 + $0x820] sm:$0xf]  ;;  %v5893_v31 = vld [vmem:[#allocation2 + $0x28] sm:$0x3f]  ;;  %v14953_v49 = vld [vmem:[#allocation2 + $0x38] sm:$0xff] }
 0x3ba   : > { %v5106_v27 = vpop.f32.mrf.mxu1  ;;  %6536 = vmatpush.bf16.msrb.mxu3 %v9507_v10  ;;  %v5897_v38 = vpack.c.bf16 %v5893_v31, %v14953_v49 }
 0x3bb   : > { %v14863_v9 = vadd.f32 %v5151_v21, %v14615_v50  ;;  %v5107_v22 = vadd.f32 %v5106_v27, %v5083_v33  ;;  %v5086_v53 = vpop.f32.mrf.mxu0  ;;  %v10104_v50 = vld [vmem:[%s15209_s2 + $0x8c4] sm:$0xf0]  ;;  %v9499_v33 = vor.u32 %v10101_v47, %v9496_v17  ;;  %v9423_v21 = vor.u32 %v10084_v36, %v9422_v40 }
 0x3bc   : > { %v9503_v5 = vor.u32 %v10104_v50, %v9502_v48  ;;  %6467 = vmatpush.bf16.msrb.mxu0 %v9439_v45  ;;  %6514 = vmatpush.bf16.msrb.mxu2 %v9435_v56  ;;  %v14939_v27 = vrot.slane %v5896_v61, 3  ;;  %v9414_v48 = vld [vmem:[%s15209_s2 + $0x810] sm:$0xf]  ;;  %v10082_v45 = vld [vmem:[%s15209_s2 + $0x814] sm:$0xf0] }
 0x3bd   : > { %v14884_v35 = vadd.f32 %v5107_v22, %v14639_v41  ;;  %v5895_v41 = vpack.c.bf16 %v14285_v44, %v5891_v42  ;;  %v10081_v50 = vld [vmem:[%s15209_s2 + $0x814] sm:$0xf]  ;;  %v9486_v42 = vld [vmem:[%s15209_s2 + $0x8a0] sm:$0xf] }
 0x3be   : > { %6121 = vmatmul.bf16.vlgmr.msra.gmra.mxu0 %v5939_v4  ;;  %6167 = vmatmul.bf16.vlgmr.msra.gmra.mxu2 %v5939_v4  ;;  %v9416_v4 = vld [vmem:[%s15209_s2 + $0x818] sm:$0xf0]  ;;  %v5944_v47 = vsel %vm2808_vm5, %v5938_v20, %v14939_v27  ;;  %v10079_v20 = vld [vmem:[%s15209_s2 + $0x804] sm:$0xf] }
 0x3bf   : > { %6490 = vmatpush.bf16.msrb.mxu1 %v9503_v5  ;;  %6537 = vmatpush.bf16.msrb.mxu3 %v9499_v33  ;;  %v5940_v18 = vrot.slane %v5895_v41, 3  ;;  %v10100_v5 = vld [vmem:[%s15209_s2 + $0x8a4] sm:$0xf0]  ;;  %v9419_v17 = vor.u32 %v10081_v50, %v9416_v4  ;;  %v10097_v33 = vld [vmem:[%s15209_s2 + $0x894] sm:$0xf] }
 0x3c0   : > { %v5152_v57 = vpop.f32.mrf.mxu3  ;;  %6468 = vmatpush.bf16.msrb.mxu0 %v9431_v12  ;;  %6515 = vmatpush.bf16.msrb.mxu2 %v9427_v23  ;;  %v9487_v41 = vor.u32 %v10100_v5, %v9486_v42  ;;  %v9478_v12 = vld [vmem:[%s15209_s2 + $0x890] sm:$0xf]  ;;  %v10168_v4 = vld [vmem:[#allocation2 + $0x68] sm:$0xff] }
 0x3c1   : > { %v5153_v7 = vadd.f32 %v5152_v57, %v5129_v29  ;;  %v5132_v62 = vpop.f32.mrf.mxu2  ;;  %v5942_v15 = vsel %vm2808_vm5, %v5940_v18, %v5941_v39  ;;  %v9480_v57 = vld [vmem:[%s15209_s2 + $0x898] sm:$0xf0]  ;;  %v10095_v18 = vld [vmem:[%s15209_s2 + $0x884] sm:$0xf] }
 0x3c2   : > { %v5109_v44 = vpop.f32.mrf.mxu1  ;;  %v9483_v2 = vor.u32 %v10097_v33, %v9480_v57 }
 0x3c3   : > { %v14904_v60 = vadd.f32 %v5153_v7, %v14659_v16  ;;  %v5110_v51 = vadd.f32 %v5109_v44, %v5086_v53  ;;  %v5088_v8 = vpop.f32.mrf.mxu0  ;;  %v9494_v16 = vld [vmem:[%s15209_s2 + $0x8b0] sm:$0xf]  ;;  %6538 = vmatpush.bf16.msrb.mxu3 %v9491_v55  ;;  %v10098_v44 = vld [vmem:[%s15209_s2 + $0x894] sm:$0xf0]  ;;  %v10096_v55 = vld [vmem:[%s15209_s2 + $0x884] sm:$0xf0] }
 0x3c4   : > { %6469 = vmatpush.bf16.msrb.mxu0 %v9423_v21  ;;  %6516 = vmatpush.bf16.msrb.mxu2 %v9419_v17 }
 0x3c5   : > { %v14910_v6 = vadd.f32 %v5110_v51, %v14664_v43  ;;  %6144 = vmatmul.bf16.vlgmr.msra.gmra.mxu1 %v5942_v15  ;;  %6190 = vmatmul.bf16.vlgmr.msra.gmra.mxu3 %v5942_v15  ;;  %v9495_v43 = vor.u32 %v10102_v46, %v9494_v16  ;;  %v5945_v51 = vrot.slane %v5897_v38, 3  ;;  %v9472_v15 = vld [vmem:[%s15209_s2 + $0x888] sm:$0xf0] }
 0x3c6   : > { %v9475_v46 = vor.u32 %v10095_v18, %v9472_v15 }
 0x3c7   : > { %6491 = vmatpush.bf16.msrb.mxu1 %v9495_v43  ;;  %6539 = vmatpush.bf16.msrb.mxu3 %v9483_v2  ;;  %v5946_v11 = vsel %vm2808_vm5, %v5941_v39, %v5945_v51  ;;  %v6217_v2 = vld [vmem:[#allocation2 + $0x60] sm:$0x7f] }
 0x3c8   : > { %v5155_v0 = vpop.f32.mrf.mxu3 }
 0x3c9   : > { %v5156_v29 = vadd.f32 %v5155_v0, %v5132_v62  ;;  %v5134_v10 = vpop.f32.mrf.mxu2  ;;  %v9411_v62 = vor.u32 %v10079_v20, %v9408_v52 }
 0x3ca   : > { %v5111_v22 = vpop.f32.mrf.mxu1 }
 0x3cb   : > { %v14942_v53 = vadd.f32 %v5156_v29, %v14693_v37  ;;  %v5112_v54 = vadd.f32 %v5111_v22, %v5088_v8  ;;  %v5091_v14 = vpop.f32.mrf.mxu0  ;;  %v9415_v37 = vor.u32 %v10082_v45, %v9414_v48  ;;  %6492 = vmatpush.bf16.msrb.mxu1 %v9487_v41  ;;  %v9479_v8 = vor.u32 %v10098_v44, %v9478_v12  ;;  %v6215_v29 = vld [vmem:[#allocation2 + $0x58] sm:$0x80] }
 0x3cc   : > { %6517 = vmatpush.bf16.msrb.mxu2 %v9411_v62  ;;  %6540 = vmatpush.bf16.msrb.mxu3 %v9475_v46  ;;  %v6221_v12 = vpack.c.bf16 %v6217_v2, %v14912_v32 }
 0x3cd   : > { %v14966_v56 = vadd.f32 %v5112_v54, %v14714_v30  ;;  %v9406_v30 = vld [vmem:[%s15209_s2 + $0x800] sm:$0xf]  ;;  %6470 = vmatpush.bf16.msrb.mxu0 %v9415_v37 }
 0x3ce   : > { %6126 = vmatmul.bf16.gmra.mxu0 %v5944_v47  ;;  %6172 = vmatmul.bf16.gmra.mxu2 %v5944_v47  ;;  %v9407_v7 = vor.u32 %v10080_v3, %v9406_v30  ;;  %v6284_v15 = vshll.u32 %v6221_v12, 16 }
 0x3cf   : > { %6493 = vmatpush.bf16.msrb.mxu1 %v9479_v8 }
 0x3d0   : > { %v5157_v13 = vpop.f32.mrf.mxu3 }
 0x3d1   : > { %v5158_v61 = vadd.f32 %v5157_v13, %v5134_v10  ;;  %v5137_v16 = vpop.f32.mrf.mxu2  ;;  %6471 = vmatpush.bf16.msrb.mxu0 %v9407_v7  ;;  %v10167_v10 = vld [vmem:[#allocation2 + $0x50] sm:$0xff] }
 0x3d2   : > { %v5114_v34 = vpop.f32.mrf.mxu1  ;;  %v6219_v31 = vpack.c.bf16 %v10167_v10, %v6215_v29 }
 0x3d3   : > { %v15003_v43 = vadd.f32 %v5158_v61, %v14752_v58  ;;  %v5115_v28 = vadd.f32 %v5114_v34, %v5091_v14  ;;  %v5093_v19 = vpop.f32.mrf.mxu0  ;;  %v9470_v58 = vld [vmem:[%s15209_s2 + $0x880] sm:$0xf]  ;;  %v6218_v61 = vld [vmem:[#allocation2 + $0x28] sm:$0x7f] }
 0x3d4   : > { %v9471_v40 = vor.u32 %v10096_v55, %v9470_v58  ;;  %v6257_v50 = vshrl.u32 %v6219_v31, 16  ;;  %v6260_v38 = vshll.u32 %v6219_v31, 16  ;;  %v6222_v19 = vpack.c.bf16 %v6218_v61, %v14953_v49 }
 0x3d5   : > { %v15009_v23 = vadd.f32 %v5115_v28, %v14758_v25  ;;  %6149 = vmatmul.bf16.gmra.mxu1 %v5946_v11  ;;  %6195 = vmatmul.bf16.gmra.mxu3 %v5946_v11  ;;  %v6286_v55 = vrot.slane %v6284_v15, 4 }
 0x3d6   : > { %6494 = vmatpush.bf16.msrb.mxu1 %v9471_v40  ;;  %v6259_v5 = vrot.slane %v6257_v50, 3 }
 0x3d8   : > { %v5160_v36 = vpop.f32.mrf.mxu3 }
 0x3d9   : > { %v5161_v59 = vadd.f32 %v5160_v36, %v5137_v16  ;;  %v5139_v39 = vpop.f32.mrf.mxu2  ;;  %v6290_v36 = vshrl.u32 %v6222_v19, 16 }
 0x3da   : > { %v5116_v0 = vpop.f32.mrf.mxu1 }
 0x3db   : > { %v15018_v21 = vadd.f32 %v5161_v59, %v14779_v26  ;;  %v5446_v25 = vpop.f32.mrf.mxu0  ;;  %v6216_v26 = vld [vmem:[#allocation2 + $0x18] sm:$0x80]  ;;  %v6293_v59 = vshll.u32 %v6222_v19, 16 }
 0x3dc   : > { %v6220_v42 = vpack.c.bf16 %v10168_v4, %v6216_v26 }
 0x3dd   : > { %v6295_v49 = vrot.slane %v6293_v59, 4 }
 0x3de   : > { %6131 = vmatmul.bf16.gmra.mxu0 %v14939_v27  ;;  %6177 = vmatmul.bf16.gmra.mxu2 %v14939_v27  ;;  %v6262_v27 = vrot.slane %v6260_v38, 4  ;;  %v6269_v57 = vshrl.u32 %v6220_v42, 16  ;;  %v6272_v30 = vshll.u32 %v6220_v42, 16 }
 0x3e0   : > { %v5162_v22 = vpop.f32.mrf.mxu3  ;;  %v6263_v52 = vor.u32 %v6262_v27, %v6259_v5  ;;  %v6271_v44 = vrot.slane %v6269_v57, 3  ;;  %v6274_v18 = vrot.slane %v6272_v30, 4 }
 0x3e1   : > { %v5492_v54 = vpop.f32.mrf.mxu2  ;;  %v6292_v22 = vrot.slane %v6290_v36, 3 }
 0x3e2   : > { %v5469_v14 = vpop.f32.mrf.mxu1  ;;  %v6267_v62 = vsel %vm1430_vm3, %v6263_v52, %v13552_v24  ;;  %v6275_v46 = vor.u32 %v6274_v18, %v6271_v44 }
 0x3e3   : > { %v5470_v48 = vadd.f32 %v5469_v14, %v5446_v25  ;;  %v5448_v45 = vpop.f32.mrf.mxu0 }
 0x3e4   : > { %v6279_v32 = vsel %vm1430_vm3, %v6275_v46, %v13554_v63 }
 0x3e5   : > { %v15023_v37 = vadd.f32 %v5470_v48, %v14826_v1  ;;  %6154 = vmatmul.bf16.gmra.mxu1 %v5945_v51  ;;  %6200 = vmatmul.bf16.gmra.mxu3 %v5945_v51  ;;  %v6296_v48 = vor.u32 %v6295_v49, %v6292_v22 }
 0x3e7   : > { %v6297_v42 = vsel %vm1430_vm3, %v13554_v63, %v6296_v48 }
 0x3e8   : > { %v5515_v47 = vpop.f32.mrf.mxu3 }
 0x3e9   : > { %v5516_v17 = vadd.f32 %v5515_v47, %v5492_v54  ;;  %v5494_v41 = vpop.f32.mrf.mxu2 }
 0x3ea   : > { %v5471_v33 = vpop.f32.mrf.mxu1 }
 0x3eb   : > { %v15026_v3 = vadd.f32 %v5516_v17, %v14863_v9  ;;  %v5472_v20 = vadd.f32 %v5471_v33, %v5448_v45  ;;  %v5451_v1 = vpop.f32.mrf.mxu0  ;;  %v6281_v9 = vshrl.u32 %v6221_v12, 16 }
 0x3ed   : > { %v15029_v7 = vadd.f32 %v5472_v20, %v14884_v35  ;;  %v6283_v58 = vrot.slane %v6281_v9, 3 }
 0x3ee   : > { %6472 = vmatmul.bf16.vlgmr.msrb.gmra.mxu0 %v6267_v62  ;;  %6518 = vmatmul.bf16.vlgmr.msrb.gmra.mxu2 %v6267_v62 }
 0x3ef   : > { %v6287_v0 = vor.u32 %v6286_v55, %v6283_v58 }
 0x3f0   : > { %v5517_v13 = vpop.f32.mrf.mxu3 }
 0x3f1   : > { %v5518_v51 = vadd.f32 %v5517_v13, %v5494_v41  ;;  %v5497_v8 = vpop.f32.mrf.mxu2  ;;  %v6288_v54 = vsel %vm1430_vm3, %v13552_v24, %v6287_v0 }
 0x3f2   : > { %v5474_v16 = vpop.f32.mrf.mxu1 }
 0x3f3   : > { %v15035_v35 = vadd.f32 %v5518_v51, %v14904_v60  ;;  %v5475_v34 = vadd.f32 %v5474_v16, %v5451_v1  ;;  %v5453_v28 = vpop.f32.mrf.mxu0 }
 0x3f5   : > { %v15041_v11 = vadd.f32 %v5475_v34, %v14910_v6  ;;  %6495 = vmatmul.bf16.vlgmr.msrb.gmra.mxu1 %v6279_v32  ;;  %6541 = vmatmul.bf16.vlgmr.msrb.gmra.mxu3 %v6279_v32 }
 0x3f8   : > { %v5520_v40 = vpop.f32.mrf.mxu3 }
 0x3f9   : > { %v5521_v39 = vadd.f32 %v5520_v40, %v5497_v8  ;;  %v5499_v60 = vpop.f32.mrf.mxu2 }
 0x3fa   : > { %v5476_v25 = vpop.f32.mrf.mxu1 }
 0x3fb   : > { %v5534_v29 = vadd.f32 %v5521_v39, %v14942_v53  ;;  %v5477_v10 = vadd.f32 %v5476_v25, %v5453_v28  ;;  %v5456_v31 = vpop.f32.mrf.mxu0 }
 0x3fd   : > { %v5535_v6 = vadd.f32 %v5477_v10, %v14966_v56 }
 0x3fe   : > { %6477 = vmatmul.bf16.gmra.mxu0 %v6288_v54  ;;  %6523 = vmatmul.bf16.gmra.mxu2 %v6288_v54 }
 0x400   : > { %v5522_v14 = vpop.f32.mrf.mxu3 }
 0x401   : > { %v5523_v45 = vadd.f32 %v5522_v14, %v5499_v60  ;;  %v5502_v50 = vpop.f32.mrf.mxu2 }
 0x402   : > { %v5479_v38 = vpop.f32.mrf.mxu1 }
 0x403   : > { %v5536_v26 = vadd.f32 %v5523_v45, %v15003_v43  ;;  %v5480_v4 = vadd.f32 %v5479_v38, %v5456_v31  ;;  %v5458_v53 = vpop.f32.mrf.mxu0 }
 0x405   : > { %v5537_v5 = vadd.f32 %v5480_v4, %v15009_v23  ;;  %6500 = vmatmul.bf16.gmra.mxu1 %v6297_v42  ;;  %6546 = vmatmul.bf16.gmra.mxu3 %v6297_v42 }
 0x408   : > { %v5525_v56 = vpop.f32.mrf.mxu3 }
 0x409   : > { %v5526_v24 = vadd.f32 %v5525_v56, %v5502_v50  ;;  %v5504_v27 = vpop.f32.mrf.mxu2 }
 0x40a   : > { %v5481_v47 = vpop.f32.mrf.mxu1 }
 0x40b   : > { %v5538_v17 = vadd.f32 %v5526_v24, %v15018_v21  ;;  %v5797_v41 = vpop.f32.mrf.mxu0 }
 0x40e   : > { %6482 = vmatmul.bf16.gmra.mxu0 %v6287_v0  ;;  %6528 = vmatmul.bf16.gmra.mxu2 %v6287_v0 }
 0x410   : > { %v5527_v33 = vpop.f32.mrf.mxu3 }
 0x411   : > { %v5843_v43 = vpop.f32.mrf.mxu2 }
 0x412   : > { %v5820_v57 = vpop.f32.mrf.mxu1 }
 0x413   : > { %v5821_v30 = vadd.f32 %v5820_v57, %v5797_v41  ;;  %v5799_v2 = vpop.f32.mrf.mxu0 }
 0x415   : > { %v15053_v63 = vadd.f32 %v5821_v30, %v15023_v37  ;;  %6505 = vmatmul.bf16.gmra.mxu1 %v6296_v48  ;;  %6551 = vmatmul.bf16.gmra.mxu3 %v6296_v48 }
 0x418   : > { %v5866_v23 = vpop.f32.mrf.mxu3 }
 0x419   : > { %v5867_v20 = vadd.f32 %v5866_v23, %v5843_v43  ;;  %v5845_v1 = vpop.f32.mrf.mxu2 }
 0x41a   : > { %v5822_v52 = vpop.f32.mrf.mxu1 }
 0x41b   : > { %v15056_v62 = vadd.f32 %v5867_v20, %v15026_v3  ;;  %v5823_v21 = vadd.f32 %v5822_v52, %v5799_v2  ;;  %v5802_v12 = vpop.f32.mrf.mxu0  ;;  %v6566_v20 = vld [vmem:[%s15212_s5] sm:$0x3] }
 0x41d   : > { %v15059_v44 = vadd.f32 %v5823_v21, %v15029_v7  ;;  %v6582_v21 = vld [vmem:[%s15213_s6] sm:$0x3] }
 0x420   : > { %v5868_v18 = vpop.f32.mrf.mxu3 }
 0x421   : > { %v5869_v13 = vadd.f32 %v5868_v18, %v5845_v1  ;;  %v5848_v51 = vpop.f32.mrf.mxu2 }
 0x422   : > { %v5825_v8 = vpop.f32.mrf.mxu1 }
 0x423   : > { %v15062_v37 = vadd.f32 %v5869_v13, %v15035_v35  ;;  %v5826_v9 = vadd.f32 %v5825_v8, %v5802_v12  ;;  %v5804_v15 = vpop.f32.mrf.mxu0  ;;  %v15104_v13 = vperm.slane %v6566_v20, 0 }
 0x425   : > { %v15065_v61 = vadd.f32 %v5826_v9, %v15041_v11 }
 0x428   : > { %v5871_v16 = vpop.f32.mrf.mxu3 }
 0x429   : > { %v5872_v3 = vadd.f32 %v5871_v16, %v5848_v51  ;;  %v5850_v46 = vpop.f32.mrf.mxu2 }
 0x42a   : > { %v5827_v34 = vpop.f32.mrf.mxu1 }
 0x42b   : > { %v15067_v28 = vadd.f32 %v5872_v3, %v5534_v29  ;;  %v5828_v7 = vadd.f32 %v5827_v34, %v5804_v15  ;;  %v5807_v32 = vpop.f32.mrf.mxu0  ;;  %v15106_v15 = vperm.slane %v6582_v21, 0 }
 0x42d   : > { %v15069_v19 = vadd.f32 %v5828_v7, %v5535_v6 }
 0x430   : > { %v5873_v58 = vpop.f32.mrf.mxu3 }
 0x431   : > { %v5874_v55 = vadd.f32 %v5873_v58, %v5850_v46  ;;  %v5853_v40 = vpop.f32.mrf.mxu2  ;;  %v15111_v58 = vperm.slane %v6566_v20, 1 }
 0x432   : > { %v5830_v35 = vpop.f32.mrf.mxu1 }
 0x433   : > { %v15071_v36 = vadd.f32 %v5874_v55, %v5536_v26  ;;  %v5831_v59 = vadd.f32 %v5830_v35, %v5807_v32  ;;  %v5809_v39 = vpop.f32.mrf.mxu0  ;;  %v10169_v35 = vld [vmem:[%s15214_s7] sm:$0xff] }
 0x435   : > { %v15073_v11 = vadd.f32 %v5831_v59, %v5537_v5 }
 0x438   : > { %v5876_v60 = vpop.f32.mrf.mxu3 }
 0x439   : > { %v5877_v0 = vadd.f32 %v5876_v60, %v5853_v40  ;;  %v5855_v25 = vpop.f32.mrf.mxu2  ;;  %v15117_v60 = vperm.slane %v6582_v21, 1 }
 0x43a   : > { %v5832_v10 = vpop.f32.mrf.mxu1 }
 0x43b   : > { %v15075_v29 = vadd.f32 %v5877_v0, %v5538_v17  ;;  %v6122_v31 = vpop.f32.mrf.mxu0 }
 0x440   : > { %v5878_v22 = vpop.f32.mrf.mxu3 }
 0x441   : > { %v6168_v49 = vpop.f32.mrf.mxu2 }
 0x442   : > { %v6145_v6 = vpop.f32.mrf.mxu1 }
 0x443   : > { %v6124_v54 = vpop.f32.mrf.mxu0  ;;  %v6146_v2 = vadd.f32 %v6145_v6, %v6122_v31 }
 0x445   : > { %v6205_v12 = vadd.f32 %v6146_v2, %v15053_v63 }
 0x448   : > { %v6191_v14 = vpop.f32.mrf.mxu3 }
 0x449   : > { %v6170_v48 = vpop.f32.mrf.mxu2  ;;  %v6192_v8 = vadd.f32 %v6191_v14, %v6168_v49  ;;  %v10170_v14 = vld [vmem:[%s15214_s7 + $0x8] sm:$0xff] }
 0x44a   : > { %v6147_v45 = vpop.f32.mrf.mxu1 }
 0x44b   : > { %v6127_v50 = vpop.f32.mrf.mxu0  ;;  %v6148_v16 = vadd.f32 %v6147_v45, %v6124_v54  ;;  %v6206_v34 = vadd.f32 %v6192_v8, %v15056_v62 }
 0x44d   : > { %v6207_v55 = vadd.f32 %v6148_v16, %v15059_v44 }
 0x450   : > { %v6193_v38 = vpop.f32.mrf.mxu3 }
 0x451   : > { %v15077_v26 = vpop.f32.mrf.mxu2  ;;  %v6194_v62 = vadd.f32 %v6193_v38, %v6170_v48 }
 0x452   : > { %v6150_v4 = vpop.f32.mrf.mxu1 }
 0x453   : > { %v15079_v53 = vpop.f32.mrf.mxu0  ;;  %v6151_v22 = vadd.f32 %v6150_v4, %v6127_v50  ;;  %v6208_v54 = vadd.f32 %v6194_v62, %v15062_v37  ;;  %v10171_v50 = vld [vmem:[%s15214_s7 + $0x10] sm:$0xff] }
 0x458   : > { %v15081_v42 = vpop.f32.mrf.mxu3 }
 0x459   : > { %v15083_v5 = vpop.f32.mrf.mxu2 }
 0x45a   : > { %v15085_v56 = vpop.f32.mrf.mxu1 }
 0x45b   : > { %v15087_v24 = vpop.f32.mrf.mxu0 }
 0x460   : > { %v15089_v27 = vpop.f32.mrf.mxu3 }
 0x461   : > { %v15091_v47 = vpop.f32.mrf.mxu2 }
 0x462   : > { %v15093_v17 = vpop.f32.mrf.mxu1 }
 0x463   : > { %v6134_v41 = vpop.f32.mrf.mxu0 }
 0x468   : > { %v15095_v33 = vpop.f32.mrf.mxu3 }
 0x469   : > { %v6180_v43 = vpop.f32.mrf.mxu2 }
 0x46a   : > { %v6157_v57 = vpop.f32.mrf.mxu1 }
 0x46b   : > { %v6473_v30 = vpop.f32.mrf.mxu0  ;;  %v6209_v57 = vadd.f32 %v6151_v22, %v15065_v61 }
 0x470   : > { %v6203_v23 = vpop.f32.mrf.mxu3 }
 0x471   : > { %v6519_v1 = vpop.f32.mrf.mxu2  ;;  %v6197_v23 = vadd.f32 %v15081_v42, %v15077_v26 }
 0x472   : > { %v6496_v52 = vpop.f32.mrf.mxu1 }
 0x473   : > { %v6497_v18 = vadd.f32 %v6496_v52, %v6473_v30  ;;  %v6475_v51 = vpop.f32.mrf.mxu0  ;;  %v6153_v52 = vadd.f32 %v15085_v56, %v15079_v53  ;;  %v10173_v53 = vld [vmem:[%s15214_s7 + $0x20] sm:$0xff] }
 0x475   : > { %v6556_v9 = vadd.f32 %v6497_v18, %v6205_v12  ;;  %v6210_v18 = vadd.f32 %v6197_v23, %v15067_v28 }
 0x477   : > { %v6572_v3 = vmul.f32 %v15104_v13, %v6556_v9 }
 0x478   : > { %v6542_v46 = vpop.f32.mrf.mxu3 }
 0x479   : > { %v6588_v7 = vadd.f32 %v15106_v15, %v6572_v3  ;;  %v6543_v32 = vadd.f32 %v6542_v46, %v6519_v1  ;;  %v6521_v63 = vpop.f32.mrf.mxu2  ;;  %v6211_v3 = vadd.f32 %v6153_v52, %v15069_v19 }
 0x47a   : > { %v6498_v40 = vpop.f32.mrf.mxu1 }
 0x47b   : > { %v6598_v59 = vmul.f32 %v10169_v35, %v6588_v7  ;;  %v6557_v39 = vadd.f32 %v6543_v32, %v6206_v34  ;;  %v6499_v0 = vadd.f32 %v6498_v40, %v6475_v51  ;;  %v6478_v25 = vpop.f32.mrf.mxu0  ;;  %v10172_v51 = vld [vmem:[%s15214_s7 + $0x18] sm:$0xff]  ;;  %v6199_v7 = vadd.f32 %v15089_v27, %v15083_v5 }
 0x47d   : > { %6608 = vst [vmem:[#allocation2 + $0x58] sm:$0xff] %v6598_v59  ;;  %v6573_v10 = vmul.f32 %v15111_v58, %v6557_v39  ;;  %v6558_v31 = vadd.f32 %v6499_v0, %v6207_v55  ;;  %v6156_v55 = vadd.f32 %v15093_v17, %v15087_v24  ;;  %v6212_v59 = vadd.f32 %v6199_v7, %v15071_v36  ;;  %v10174_v39 = vld [vmem:[%s15214_s7 + $0x28] sm:$0xff]  ;;  %v10175_v24 = vld [vmem:[%s15214_s7 + $0x30] sm:$0xff] }
 0x47f   : > { %v6589_v49 = vadd.f32 %v15117_v60, %v6573_v10  ;;  %v6574_v44 = vmul.f32 %v15104_v13, %v6558_v31  ;;  %v6213_v10 = vadd.f32 %v6156_v55, %v15073_v11 }
 0x480   : > { %v6544_v6 = vpop.f32.mrf.mxu3 }
 0x481   : > { %v6599_v45 = vmul.f32 %v10170_v14, %v6589_v49  ;;  %v6590_v41 = vadd.f32 %v15106_v15, %v6574_v44  ;;  %v6545_v48 = vadd.f32 %v6544_v6, %v6521_v63  ;;  %v6524_v38 = vpop.f32.mrf.mxu2  ;;  %v6202_v49 = vadd.f32 %v15095_v33, %v15091_v47 }
 0x482   : > { %v6501_v43 = vpop.f32.mrf.mxu1 }
 0x483   : > { %6609 = vst [vmem:[#allocation2 + $0x18] sm:$0xff] %v6599_v45  ;;  %v6600_v4 = vmul.f32 %v10171_v50, %v6590_v41  ;;  %v6559_v30 = vadd.f32 %v6545_v48, %v6208_v54  ;;  %v6502_v37 = vadd.f32 %v6501_v43, %v6478_v25  ;;  %v6480_v2 = vpop.f32.mrf.mxu0  ;;  %v6214_v45 = vadd.f32 %v6202_v49, %v15075_v29  ;;  %v10176_v41 = vld [vmem:[%s15214_s7 + $0x38] sm:$0xff] }
 0x485   : > { %6610 = vst [vmem:[#allocation2 + $0x50] sm:$0xff] %v6600_v4  ;;  %v6575_v20 = vmul.f32 %v15111_v58, %v6559_v30  ;;  %v6560_v1 = vadd.f32 %v6502_v37, %v6209_v57  ;;  %v10177_v57 = vld [vmem:[%s15214_s7 + $0x40] sm:$0xff] }
 0x487   : > { %v6591_v61 = vadd.f32 %v15117_v60, %v6575_v20  ;;  %v6576_v21 = vmul.f32 %v15104_v13, %v6560_v1 }
 0x488   : > { %v6547_v12 = vpop.f32.mrf.mxu3 }
 0x489   : > { %v6601_v8 = vmul.f32 %v10172_v51, %v6591_v61  ;;  %v6592_v26 = vadd.f32 %v15106_v15, %v6576_v21  ;;  %v6548_v42 = vadd.f32 %v6547_v12, %v6524_v38  ;;  %v6526_v9 = vpop.f32.mrf.mxu2 }
 0x48a   : > { %v6503_v16 = vpop.f32.mrf.mxu1 }
 0x48b   : > { %6611 = vst [vmem:[#allocation2 + $0x68] sm:$0xff] %v6601_v8  ;;  %v6602_v56 = vmul.f32 %v10173_v53, %v6592_v26  ;;  %v6561_v46 = vadd.f32 %v6548_v42, %v6210_v18  ;;  %v6504_v28 = vadd.f32 %v6503_v16, %v6480_v2  ;;  %v6483_v34 = vpop.f32.mrf.mxu0 }
 0x48d   : > { %6612 = vst [vmem:[#allocation2 + $0x8] sm:$0xff] %v6602_v56  ;;  %v6577_v32 = vmul.f32 %v15111_v58, %v6561_v46  ;;  %v6562_v63 = vadd.f32 %v6504_v28, %v6211_v3 }
 0x48f   : > { %v6593_v19 = vadd.f32 %v15117_v60, %v6577_v32  ;;  %v6578_v40 = vmul.f32 %v15104_v13, %v6562_v63 }
 0x490   : > { %v6549_v35 = vpop.f32.mrf.mxu3 }
 0x491   : > { %v6603_v0 = vmul.f32 %v10174_v39, %v6593_v19  ;;  %v6594_v5 = vadd.f32 %v15106_v15, %v6578_v40  ;;  %v6550_v27 = vadd.f32 %v6549_v35, %v6526_v9  ;;  %v6529_v25 = vpop.f32.mrf.mxu2 }
 0x492   : > { %v6506_v62 = vpop.f32.mrf.mxu1 }
 0x493   : > { %6613 = vst [vmem:[#allocation2 + $0x48] sm:$0xff] %v6603_v0  ;;  %v6604_v17 = vmul.f32 %v10175_v24, %v6594_v5  ;;  %v6563_v31 = vadd.f32 %v6550_v27, %v6212_v59  ;;  %v6507_v36 = vadd.f32 %v6506_v62, %v6483_v34  ;;  %v6485_v22 = vpop.f32.mrf.mxu0 }
 0x495   : > { %6614 = vst [vmem:[#allocation2 + $0x40] sm:$0xff] %v6604_v17  ;;  %v6579_v44 = vmul.f32 %v15111_v58, %v6563_v31  ;;  %v6564_v6 = vadd.f32 %v6507_v36, %v6213_v10 }
 0x497   : > { %v6595_v54 = vadd.f32 %v15117_v60, %v6579_v44  ;;  %v6580_v11 = vmul.f32 %v15104_v13, %v6564_v6 }
 0x498   : > { %v6552_v14 = vpop.f32.mrf.mxu3 }
 0x499   : > { %v6605_v48 = vmul.f32 %v10176_v41, %v6595_v54  ;;  %v6596_v38 = vadd.f32 %v15106_v15, %v6580_v11  ;;  %v6553_v43 = vadd.f32 %v6552_v14, %v6529_v25  ;;  %v6531_v47 = vpop.f32.mrf.mxu2  ;;  %v10178_v15 = vld [vmem:[%s15214_s7 + $0x48] sm:$0xff] }
 0x49a   : > { %v6508_v33 = vpop.f32.mrf.mxu1 }
 0x49b   : > { %6615 = vst [vmem:[#allocation2 + $0x20] sm:$0xff] %v6605_v48  ;;  %v6606_v50 = vmul.f32 %v10177_v57, %v6596_v38  ;;  %v6565_v13 = vadd.f32 %v6553_v43, %v6214_v45 }
 0x49d   : > { %6616 = vst [vmem:[#allocation2 + $0x10] sm:$0xff] %v6606_v50  ;;  %v6581_v29 = vmul.f32 %v15111_v58, %v6565_v13 }
 0x49f   : > { %v6597_v4 = vadd.f32 %v15117_v60, %v6581_v29  ;;  %6621 = sbr.rel (%p9532_p7) target bundleno = 1199 (0x4af), region = 60 }
 0x4a0   : > { %v6554_v30 = vpop.f32.mrf.mxu3 }
 0x4a1   : > { %v6607_v37 = vmul.f32 %v10178_v15, %v6597_v4 }
 0x4a3   : > { %6617 = vst [vmem:[#allocation2 + $0x38] sm:$0xff] %v6607_v37 }
 0x4a4   : > { %v6622_v2 = vld [vmem:[#allocation2 + $0x58] sm:$0xff]  ;;  %v6624_v60 = vld [vmem:[#allocation2 + $0x50] sm:$0xff]  ;;  %v6625_v23 = vld [vmem:[#allocation2 + $0x68] sm:$0xff] }
 0x4a5   : > { %v6623_v58 = vld [vmem:[#allocation2 + $0x18] sm:$0xff]  ;;  %6632 = vst [vmem:[%s10303_s18] sm:$0xff] %v6622_v2  ;;  %v6626_v20 = vld [vmem:[#allocation2 + $0x8] sm:$0xff]  ;;  %v6628_v52 = vld [vmem:[#allocation2 + $0x40] sm:$0xff] }
 0x4a6   : > { %6633 = vst [vmem:[%s10303_s18 + $0x8] sm:$0xff] %v6623_v58  ;;  %v6627_v1 = vld [vmem:[#allocation2 + $0x48] sm:$0xff]  ;;  %v6629_v61 = vld [vmem:[#allocation2 + $0x20] sm:$0xff]  ;;  %v6630_v21 = vld [vmem:[#allocation2 + $0x10] sm:$0xf] }
 0x4a7   : > { %6634 = vst [vmem:[%s10303_s18 + $0x10] sm:$0xff] %v6624_v60 }
 0x4a8   : > { %6635 = vst [vmem:[%s10303_s18 + $0x18] sm:$0xff] %v6625_v23 }
 0x4a9   : > { %6636 = vst [vmem:[%s10303_s18 + $0x20] sm:$0xff] %v6626_v20 }
 0x4aa   : > { %6637 = vst [vmem:[%s10303_s18 + $0x28] sm:$0xff] %v6627_v1  ;;  %v6631_v12 = vld [vmem:[#allocation2 + $0x38] sm:$0xf] }
 0x4ab   : > { %6638 = vst [vmem:[%s10303_s18 + $0x30] sm:$0xff] %v6628_v52 }
 0x4ac   : > { %6639 = vst [vmem:[%s10303_s18 + $0x38] sm:$0xff] %v6629_v61 }
 0x4ad   : > { %6640 = vst [vmem:[%s10303_s18 + $0x40] sm:$0xf] %v6630_v21 }
 0x4ae   : > { %6641 = vst [vmem:[%s10303_s18 + $0x48] sm:$0xf] %v6631_v12 }
 0x4af PF: > { %s18_s9 = sadd.s32 1, %s10217_s9   ;;  %s15216_s27 = smov %s10209_s29 }
 0x4b0   : > { %p15_p8 = scmp.ge.s32.totalorder %s18_s9, 22   ;;  %s15217_s28 = smov %s10213_s30 }
 0x4b1   : > { %s15218_s29 = smov %s15221_s10  ;;  %s15219_s30 = smov %s15225_s11 }
 0x4b2   :  { %17 = sbr.rel (!%p15_p8) target bundleno = 3 (0x3), region = 106 }

</bundles_post_ra>
